<compile_context>
chip_gen: v7x
topology: tpu7x:2x2x1
jax: 0.10.0
libtpu: 0.0.40
codegen_flags: <defaults>
</compile_context>

<pallas_src>
import functools
import math

import jax
import jax.numpy as jnp
from jax import lax
from jax.experimental import pallas as pl
from jax.experimental.pallas import tpu as pltpu


# ----------------------------------------------------------------------------
# Pallas kernels
# ----------------------------------------------------------------------------
def _mm(x, w):
    """bf16 MXU matmul with f32 accumulation."""
    return jnp.dot(x.astype(jnp.bfloat16), w, preferred_element_type=jnp.float32)


def _stn_conv_max_kernel(x_ref, w1, b1, w2, b2, w3, b3, gmax_ref):
    """STN3d conv1->conv2->conv3 (+folded BN + ReLU) fused with max over points."""
    pt = pl.program_id(1)
    x = x_ref[0]                                                     # (Tn, 3) f32
    h = jnp.maximum(_mm(x, w1[...]) + b1[...], 0.0)                  # (Tn, 64)
    h = jnp.maximum(_mm(h, w2[...]) + b2[...], 0.0)                  # (Tn, 128)
    h = jnp.maximum(_mm(h, w3[...]) + b3[...], 0.0)                  # (Tn, 1024)
    tile_max = jnp.max(h, axis=0, keepdims=True)                     # (1, 1024)

    @pl.when(pt == 0)
    def _():
        gmax_ref[0] = tile_max

    @pl.when(pt > 0)
    def _():
        gmax_ref[0] = jnp.maximum(gmax_ref[0], tile_max)


def _stn_fc_kernel(g_ref, w1, b1, w2, b2, w3, b3, iden_ref, out_ref):
    """STN3d fc1->fc2->fc3 (+folded BN + ReLU) + identity add, single call."""
    g = g_ref[...]                                                   # (B, 1024) f32
    h = jnp.maximum(_mm(g, w1[...]) + b1[...], 0.0)                  # (B, 512)
    h = jnp.maximum(_mm(h, w2[...]) + b2[...], 0.0)                  # (B, 256)
    out_ref[...] = _mm(h, w3[...]) + b3[...] + iden_ref[...]         # (B, 9)


def _feat_kernel(x_ref, trans_ref, w1, b1, w2, b2, w3, b3, pf_ref, gmax_ref):
    """PointNetfeat: apply 3x3 transform, conv1..conv3, pointfeat + global max."""
    pt = pl.program_id(1)
    x = x_ref[0]                                                     # (Tn, 3) f32
    t = trans_ref[0]                                                 # (3, 3)  f32
    xt = jnp.dot(x, t, preferred_element_type=jnp.float32)           # (Tn, 3)
    h1 = jnp.maximum(_mm(xt, w1[...]) + b1[...], 0.0)                # (Tn, 64)
    pf_ref[0] = h1.astype(pf_ref.dtype)                              # pointfeat (bf16)
    h2 = jnp.maximum(_mm(h1, w2[...]) + b2[...], 0.0)                # (Tn, 128)
    h3 = _mm(h2, w3[...]) + b3[...]                                  # (Tn, 1024), no ReLU
    tile_max = jnp.max(h3, axis=0, keepdims=True)                    # (1, 1024)

    @pl.when(pt == 0)
    def _():
        gmax_ref[0] = tile_max

    @pl.when(pt > 0)
    def _():
        gmax_ref[0] = jnp.maximum(gmax_ref[0], tile_max)


def _seg_head_kernel(pf_ref, g_ref, wg, wp, b1, w2, b2, w3, b3, w4, b4, out_ref):
    """Dense head: conv1(1088->512)..conv4(128->k) + log_softmax, fused.

    The 1088-wide concat [global, pointfeat] is never built: its matmul splits
    into (global @ Wg) + (pointfeat @ Wp).  The classifier is padded to a
    128-lane output; padded lanes carry a -1e30 bias so softmax ignores them.
    """
    pf = pf_ref[0]                                                   # (Tn, 64) bf16
    g = g_ref[0]                                                     # (1, 1024) f32
    g_contrib = _mm(g, wg[...])                                      # (1, 512)
    h1 = jnp.maximum(_mm(pf, wp[...]) + g_contrib + b1[...], 0.0)    # (Tn, 512)
    h2 = jnp.maximum(_mm(h1, w2[...]) + b2[...], 0.0)                # (Tn, 256)
    h3 = jnp.maximum(_mm(h2, w3[...]) + b3[...], 0.0)                # (Tn, 128)
    logits = _mm(h3, w4[...]) + b4[...]                              # (Tn, 128) padded
    m = jnp.max(logits, axis=-1, keepdims=True)
    z = logits - m
    lse = jnp.log(jnp.sum(jnp.exp(z), axis=-1, keepdims=True))
    out_ref[0] = z - lse                                             # log-probs (padded)


# ----------------------------------------------------------------------------
# pallas_call wrappers
# ----------------------------------------------------------------------------
def _const_spec(shape):
    """Whole-array block whose index never changes (weights/bias: DMA'd once)."""
    return pl.BlockSpec(shape, lambda *_args, _r=len(shape): (0,) * _r)


def stn_conv_max(x_pts, p, *, tile_n):
    B, N, _ = x_pts.shape
    return pl.pallas_call(
        _stn_conv_max_kernel,
        out_shape=jax.ShapeDtypeStruct((B, 1, 1024), jnp.float32),
        grid=(B, N // tile_n),
        in_specs=[
            pl.BlockSpec((1, tile_n, 3), lambda b, t: (b, t, 0)),
            _const_spec(p["w1"].shape), _const_spec(p["b1"].shape),
            _const_spec(p["w2"].shape), _const_spec(p["b2"].shape),
            _const_spec(p["w3"].shape), _const_spec(p["b3"].shape),
        ],
        out_specs=pl.BlockSpec((1, 1, 1024), lambda b, t: (b, 0, 0)),
        compiler_params=pltpu.CompilerParams(
            dimension_semantics=("parallel", "arbitrary")),
    )(x_pts, p["w1"], p["b1"], p["w2"], p["b2"], p["w3"], p["b3"])


def stn_fc(g, p):
    B = g.shape[0]
    iden = jnp.tile(
        jnp.array([1, 0, 0, 0, 1, 0, 0, 0, 1], jnp.float32).reshape(1, 9), (B, 1))
    out = pl.pallas_call(
        _stn_fc_kernel,
        out_shape=jax.ShapeDtypeStruct((B, 9), jnp.float32),
    )(g, p["w1"], p["b1"], p["w2"], p["b2"], p["w3"], p["b3"], iden)
    return out.reshape(B, 3, 3)


def feat_forward(x_pts, trans, p, *, tile_n):
    B, N, _ = x_pts.shape
    pf, gmax = pl.pallas_call(
        _feat_kernel,
        out_shape=(
            jax.ShapeDtypeStruct((B, N, 64), jnp.bfloat16),   # pointfeat
            jax.ShapeDtypeStruct((B, 1, 1024), jnp.float32),  # global max feature
        ),
        grid=(B, N // tile_n),
        in_specs=[
            pl.BlockSpec((1, tile_n, 3), lambda b, t: (b, t, 0)),
            pl.BlockSpec((1, 3, 3), lambda b, t: (b, 0, 0)),
            _const_spec(p["w1"].shape), _const_spec(p["b1"].shape),
            _const_spec(p["w2"].shape), _const_spec(p["b2"].shape),
            _const_spec(p["w3"].shape), _const_spec(p["b3"].shape),
        ],
        out_specs=(
            pl.BlockSpec((1, tile_n, 64), lambda b, t: (b, t, 0)),
            pl.BlockSpec((1, 1, 1024), lambda b, t: (b, 0, 0)),
        ),
        compiler_params=pltpu.CompilerParams(
            dimension_semantics=("parallel", "arbitrary")),
    )(x_pts, trans, p["w1"], p["b1"], p["w2"], p["b2"], p["w3"], p["b3"])
    return pf, gmax


def seg_head(pf, gmax, p, *, tile_n, k):
    B, N, _ = pf.shape
    out = pl.pallas_call(
        _seg_head_kernel,
        out_shape=jax.ShapeDtypeStruct((B, N, 128), jnp.float32),
        grid=(B, N // tile_n),
        in_specs=[
            pl.BlockSpec((1, tile_n, 64), lambda b, t: (b, t, 0)),
            pl.BlockSpec((1, 1, 1024), lambda b, t: (b, 0, 0)),
            _const_spec(p["wg"].shape), _const_spec(p["wp"].shape),
            _const_spec(p["b1"].shape),
            _const_spec(p["w2"].shape), _const_spec(p["b2"].shape),
            _const_spec(p["w3"].shape), _const_spec(p["b3"].shape),
            _const_spec(p["w4"].shape), _const_spec(p["b4"].shape),
        ],
        out_specs=pl.BlockSpec((1, tile_n, 128), lambda b, t: (b, t, 0)),
        compiler_params=pltpu.CompilerParams(
            dimension_semantics=("parallel", "parallel")),
    )(pf, gmax, p["wg"], p["wp"], p["b1"], p["w2"], p["b2"],
      p["w3"], p["b3"], p["w4"], p["b4"])
    return out[:, :, :k]   # drop lane-padding once, at the very end


# ----------------------------------------------------------------------------
# Parameters (deterministic synthetic init; BN folded in eval mode)
# ----------------------------------------------------------------------------
# TODO(synk): BatchNorm is folded with eval-mode running stats (mean=0, var=1);
# training-mode batch-statistics BN is not implemented.
def _fold_bn(w, b, gamma, beta, mean, var, eps=1e-5):
    scale = gamma / jnp.sqrt(var + eps)
    return w * scale[None, :], b * scale + (beta - mean * scale)


def _conv_bn_params(key, cin, cout):
    kw, kb, kg, kbt = jax.random.split(key, 4)
    w = jax.random.normal(kw, (cin, cout), jnp.float32) / math.sqrt(cin)
    b = jax.random.normal(kb, (cout,), jnp.float32) * 0.05
    gamma = 1.0 + 0.1 * jax.random.normal(kg, (cout,), jnp.float32)
    beta = 0.1 * jax.random.normal(kbt, (cout,), jnp.float32)
    w, b = _fold_bn(w, b, gamma, beta,
                    jnp.zeros((cout,), jnp.float32), jnp.ones((cout,), jnp.float32))
    return w.astype(jnp.bfloat16), b.reshape(1, cout).astype(jnp.float32)


def _linear_params(key, cin, cout):
    kw, kb = jax.random.split(key)
    w = jax.random.normal(kw, (cin, cout), jnp.float32) / math.sqrt(cin)
    b = jax.random.normal(kb, (cout,), jnp.float32) * 0.05
    return w.astype(jnp.bfloat16), b.reshape(1, cout).astype(jnp.float32)


def init_params(key, k):
    ks = jax.random.split(key, 13)
    stn_conv, stn_fc_p, feat, head = {}, {}, {}, {}

    # STN3d
    stn_conv["w1"], stn_conv["b1"] = _conv_bn_params(ks[0], 3, 64)
    stn_conv["w2"], stn_conv["b2"] = _conv_bn_params(ks[1], 64, 128)
    stn_conv["w3"], stn_conv["b3"] = _conv_bn_params(ks[2], 128, 1024)
    stn_fc_p["w1"], stn_fc_p["b1"] = _conv_bn_params(ks[3], 1024, 512)   # fc1 + bn4
    stn_fc_p["w2"], stn_fc_p["b2"] = _conv_bn_params(ks[4], 512, 256)    # fc2 + bn5
    stn_fc_p["w3"], stn_fc_p["b3"] = _linear_params(ks[5], 256, 9)       # fc3

    # PointNetfeat convs
    feat["w1"], feat["b1"] = _conv_bn_params(ks[6], 3, 64)
    feat["w2"], feat["b2"] = _conv_bn_params(ks[7], 64, 128)
    feat["w3"], feat["b3"] = _conv_bn_params(ks[8], 128, 1024)

    # Dense segmentation head (conv1 split: global rows 0..1023, pointfeat 1024..1087)
    w1, b1 = _conv_bn_params(ks[9], 1088, 512)
    head["wg"], head["wp"], head["b1"] = w1[:1024], w1[1024:], b1
    head["w2"], head["b2"] = _conv_bn_params(ks[10], 512, 256)
    head["w3"], head["b3"] = _conv_bn_params(ks[11], 256, 128)
    w4, b4 = _linear_params(ks[12], 128, k)
    # Lane-dense final classifier: pad to 128 output lanes; padded lanes get a
    # -1e30 bias so the in-kernel log_softmax ignores them.
    head["w4"] = jnp.zeros((128, 128), jnp.bfloat16).at[:, :k].set(w4)
    head["b4"] = jnp.full((1, 128), -1e30, jnp.float32).at[:, :k].set(b4)
    return {"stn_conv": stn_conv, "stn_fc": stn_fc_p, "feat": feat, "head": head}


# ----------------------------------------------------------------------------
# Forward pass (matches PointNetDenseCls.forward, eval mode)
# ----------------------------------------------------------------------------
def pointnet_densecls_forward(params, x, *, k, tile_n=256):
    """x: (B, 3, N) like the PyTorch module. Returns (log_probs (B,N,k), trans (B,3,3))."""
    B, _, N = x.shape
    tile_n = min(tile_n, N)
    assert N % tile_n == 0 and tile_n % 8 == 0, "num_points must tile cleanly"
    x_pts = jnp.transpose(x, (0, 2, 1))                              # (B, N, 3)

    # STN3d: fused conv chain + max-pool, then fused fc chain + identity.
    g_stn = stn_conv_max(x_pts, params["stn_conv"], tile_n=tile_n)   # (B, 1, 1024)
    trans = stn_fc(g_stn.reshape(B, 1024), params["stn_fc"])         # (B, 3, 3)

    # PointNetfeat: transform + conv chain + pointfeat + global max, one kernel.
    pf, gmax = feat_forward(x_pts, trans, params["feat"], tile_n=tile_n)

    # Dense head: conv1..conv4 + log_softmax, one kernel.
    logp = seg_head(pf, gmax, params["head"], tile_n=tile_n, k=k)    # (B, N, k)
    return logp, trans


# ----------------------------------------------------------------------------
if __name__ == "__main__":
    key = jax.random.PRNGKey(0)
    kp, kx = jax.random.split(key)

    B, N, k = 2, 512, 3
    x = jax.random.normal(kx, (B, 3, N), jnp.float32)
    params = init_params(kp, k)

    fwd = jax.jit(functools.partial(pointnet_densecls_forward, k=k, tile_n=256))
    logp, trans = fwd(params, x)
    logp, trans = jax.block_until_ready((logp, trans))

    assert logp.shape == (B, N, k), logp.shape
    assert trans.shape == (B, 3, 3), trans.shape
    assert bool(jnp.all(jnp.isfinite(logp)))
    assert bool(jnp.all(jnp.isfinite(trans)))
    # log_softmax sanity: per-point probabilities sum to ~1
    prob_sum = jnp.exp(logp).sum(-1)
    assert bool(jnp.all(jnp.abs(prob_sum - 1.0) < 1e-3)), prob_sum

    print("KERNEL_OK")
</pallas_src>

<mosaic_0001>
module attributes {stable_mosaic.version = 11 : i64} {
  func.func @_stn_conv_max_kernel(%arg0: i32, %arg1: i32, %arg2: memref<1x256x3xf32, #tpu.memory_space<vmem>>, %arg3: memref<3x64xbf16, #tpu.memory_space<vmem>>, %arg4: memref<1x64xf32, #tpu.memory_space<vmem>>, %arg5: memref<64x128xbf16, #tpu.memory_space<vmem>>, %arg6: memref<1x128xf32, #tpu.memory_space<vmem>>, %arg7: memref<128x1024xbf16, #tpu.memory_space<vmem>>, %arg8: memref<1x1024xf32, #tpu.memory_space<vmem>>, %arg9: memref<1x1x1024xf32, #tpu.memory_space<vmem>>) attributes {dimension_semantics = [#tpu.dimension_semantics<parallel>, #tpu.dimension_semantics<arbitrary>], iteration_bounds = array<i64: 2, 2>, scalar_prefetch = 0 : i64, scratch_operands = 0 : i64, tpu.core_type = #tpu.core_type<tc>, window_params = [{transform_indices = @transform_0, window_bounds = array<i64: 1, 256, 3>}, {pipeline_mode = #tpu.pipeline_mode<synchronous>, transform_indices = @transform_1, window_bounds = array<i64: 3, 64>}, {pipeline_mode = #tpu.pipeline_mode<synchronous>, transform_indices = @transform_2, window_bounds = array<i64: 1, 64>}, {pipeline_mode = #tpu.pipeline_mode<synchronous>, transform_indices = @transform_3, window_bounds = array<i64: 64, 128>}, {pipeline_mode = #tpu.pipeline_mode<synchronous>, transform_indices = @transform_4, window_bounds = array<i64: 1, 128>}, {pipeline_mode = #tpu.pipeline_mode<synchronous>, transform_indices = @transform_5, window_bounds = array<i64: 128, 1024>}, {pipeline_mode = #tpu.pipeline_mode<synchronous>, transform_indices = @transform_6, window_bounds = array<i64: 1, 1024>}, {transform_indices = @transform_7, window_bounds = array<i64: 1, 1, 1024>}]} {
    %c0 = arith.constant 0 : index
    %c0_0 = arith.constant 0 : index
    %c0_1 = arith.constant 0 : index
    %0 = vector.load %arg2[%c0, %c0_0, %c0_1] : memref<1x256x3xf32, #tpu.memory_space<vmem>>, vector<1x256x3xf32>
    %1 = vector.shape_cast %0 : vector<1x256x3xf32> to vector<256x3xf32>
    %c0_2 = arith.constant 0 : index
    %c0_3 = arith.constant 0 : index
    %2 = vector.load %arg3[%c0_2, %c0_3] : memref<3x64xbf16, #tpu.memory_space<vmem>>, vector<3x64xbf16>
    %3 = arith.truncf %1 : vector<256x3xf32> to vector<256x3xbf16>
    %cst = arith.constant dense<0.000000e+00> : vector<256x64xf32>
    %4 = tpu.matmul %3, %2, %cst {dimension_numbers = #tpu.dot_dimension_numbers<[1], [0], [0], [1], [0, 0, 1, 1], [], []>} : vector<256x3xbf16>, vector<3x64xbf16>, vector<256x64xf32> -> vector<256x64xf32>
    %c0_4 = arith.constant 0 : index
    %c0_5 = arith.constant 0 : index
    %5 = vector.load %arg4[%c0_4, %c0_5] : memref<1x64xf32, #tpu.memory_space<vmem>>, vector<1x64xf32>
    %6 = vector.broadcast %5 : vector<1x64xf32> to vector<256x64xf32>
    %7 = arith.addf %4, %6 : vector<256x64xf32>
    %cst_6 = arith.constant 0.000000e+00 : f32
    %8 = vector.broadcast %cst_6 : f32 to vector<256x64xf32>
    %9 = arith.maximumf %7, %8 : vector<256x64xf32>
    %c0_7 = arith.constant 0 : index
    %c0_8 = arith.constant 0 : index
    %10 = vector.load %arg5[%c0_7, %c0_8] : memref<64x128xbf16, #tpu.memory_space<vmem>>, vector<64x128xbf16>
    %11 = arith.truncf %9 : vector<256x64xf32> to vector<256x64xbf16>
    %cst_9 = arith.constant dense<0.000000e+00> : vector<256x128xf32>
    %12 = tpu.matmul %11, %10, %cst_9 {dimension_numbers = #tpu.dot_dimension_numbers<[1], [0], [0], [1], [0, 0, 1, 1], [], []>} : vector<256x64xbf16>, vector<64x128xbf16>, vector<256x128xf32> -> vector<256x128xf32>
    %c0_10 = arith.constant 0 : index
    %c0_11 = arith.constant 0 : index
    %13 = vector.load %arg6[%c0_10, %c0_11] : memref<1x128xf32, #tpu.memory_space<vmem>>, vector<1x128xf32>
    %14 = vector.broadcast %13 : vector<1x128xf32> to vector<256x128xf32>
    %15 = arith.addf %12, %14 : vector<256x128xf32>
    %cst_12 = arith.constant 0.000000e+00 : f32
    %16 = vector.broadcast %cst_12 : f32 to vector<256x128xf32>
    %17 = arith.maximumf %15, %16 : vector<256x128xf32>
    %c0_13 = arith.constant 0 : index
    %c0_14 = arith.constant 0 : index
    %18 = vector.load %arg7[%c0_13, %c0_14] : memref<128x1024xbf16, #tpu.memory_space<vmem>>, vector<128x1024xbf16>
    %19 = arith.truncf %17 : vector<256x128xf32> to vector<256x128xbf16>
    %cst_15 = arith.constant dense<0.000000e+00> : vector<256x1024xf32>
    %20 = tpu.matmul %19, %18, %cst_15 {dimension_numbers = #tpu.dot_dimension_numbers<[1], [0], [0], [1], [0, 0, 1, 1], [], []>} : vector<256x128xbf16>, vector<128x1024xbf16>, vector<256x1024xf32> -> vector<256x1024xf32>
    %c0_16 = arith.constant 0 : index
    %c0_17 = arith.constant 0 : index
    %21 = vector.load %arg8[%c0_16, %c0_17] : memref<1x1024xf32, #tpu.memory_space<vmem>>, vector<1x1024xf32>
    %22 = vector.broadcast %21 : vector<1x1024xf32> to vector<256x1024xf32>
    %23 = arith.addf %20, %22 : vector<256x1024xf32>
    %cst_18 = arith.constant 0.000000e+00 : f32
    %24 = vector.broadcast %cst_18 : f32 to vector<256x1024xf32>
    %25 = arith.maximumf %23, %24 : vector<256x1024xf32>
    %cst_19 = arith.constant dense<0xFF800000> : vector<1024xf32>
    %26 = vector.multi_reduction <maximumf>, %25, %cst_19 [0] : vector<256x1024xf32> to vector<1024xf32>
    %27 = vector.shape_cast %26 : vector<1024xf32> to vector<1x1024xf32>
    %c0_i32 = arith.constant 0 : i32
    %28 = arith.cmpi eq, %arg1, %c0_i32 : i32
    %29 = arith.extui %28 : i1 to i32
    %c0_i32_20 = arith.constant 0 : i32
    %30 = arith.cmpi ne, %29, %c0_i32_20 : i32
    scf.if %30 {
      %c0_23 = arith.constant 0 : index
      %c0_24 = arith.constant 0 : index
      %c0_25 = arith.constant 0 : index
      %34 = vector.load %arg9[%c0_23, %c0_24, %c0_25] : memref<1x1x1024xf32, #tpu.memory_space<vmem>>, vector<1x1x1024xf32>
      %35 = vector.shape_cast %34 : vector<1x1x1024xf32> to vector<1x1024xf32>
      %36 = vector.shape_cast %27 : vector<1x1024xf32> to vector<1x1x1024xf32>
      tpu.vector_store %arg9[%c0_23, %c0_24, %c0_25], %36 {strides = array<i32>} : memref<1x1x1024xf32, #tpu.memory_space<vmem>>, vector<1x1x1024xf32>,
    } else {
    }
    %c0_i32_21 = arith.constant 0 : i32
    %31 = arith.cmpi sgt, %arg1, %c0_i32_21 : i32
    %32 = arith.extui %31 : i1 to i32
    %c0_i32_22 = arith.constant 0 : i32
    %33 = arith.cmpi ne, %32, %c0_i32_22 : i32
    scf.if %33 {
      %c0_23 = arith.constant 0 : index
      %c0_24 = arith.constant 0 : index
      %c0_25 = arith.constant 0 : index
      %34 = vector.load %arg9[%c0_23, %c0_24, %c0_25] : memref<1x1x1024xf32, #tpu.memory_space<vmem>>, vector<1x1x1024xf32>
      %35 = vector.shape_cast %34 : vector<1x1x1024xf32> to vector<1x1024xf32>
      %36 = arith.maximumf %35, %27 : vector<1x1024xf32>
      %c0_26 = arith.constant 0 : index
      %c0_27 = arith.constant 0 : index
      %c0_28 = arith.constant 0 : index
      %37 = vector.load %arg9[%c0_26, %c0_27, %c0_28] : memref<1x1x1024xf32, #tpu.memory_space<vmem>>, vector<1x1x1024xf32>
      %38 = vector.shape_cast %37 : vector<1x1x1024xf32> to vector<1x1024xf32>
      %39 = vector.shape_cast %36 : vector<1x1024xf32> to vector<1x1x1024xf32>
      tpu.vector_store %arg9[%c0_26, %c0_27, %c0_28], %39 {strides = array<i32>} : memref<1x1x1024xf32, #tpu.memory_space<vmem>>, vector<1x1x1024xf32>,
    } else {
    }
    return
  }
  func.func @transform_0(%arg0: i32, %arg1: i32) -> (i32, i32, i32) {
    %c0_i32 = arith.constant 0 : i32
    %c0_i32_0 = arith.constant 0 : i32
    return %arg0, %arg1, %c0_i32 : i32, i32, i32
  }
  func.func @transform_1(%arg0: i32, %arg1: i32) -> (i32, i32) {
    %c0_i32 = arith.constant 0 : i32
    %c0_i32_0 = arith.constant 0 : i32
    %c0_i32_1 = arith.constant 0 : i32
    return %c0_i32, %c0_i32_0 : i32, i32
  }
  func.func @transform_2(%arg0: i32, %arg1: i32) -> (i32, i32) {
    %c0_i32 = arith.constant 0 : i32
    %c0_i32_0 = arith.constant 0 : i32
    %c0_i32_1 = arith.constant 0 : i32
    return %c0_i32, %c0_i32_0 : i32, i32
  }
  func.func @transform_3(%arg0: i32, %arg1: i32) -> (i32, i32) {
    %c0_i32 = arith.constant 0 : i32
    %c0_i32_0 = arith.constant 0 : i32
    %c0_i32_1 = arith.constant 0 : i32
    return %c0_i32, %c0_i32_0 : i32, i32
  }
  func.func @transform_4(%arg0: i32, %arg1: i32) -> (i32, i32) {
    %c0_i32 = arith.constant 0 : i32
    %c0_i32_0 = arith.constant 0 : i32
    %c0_i32_1 = arith.constant 0 : i32
    return %c0_i32, %c0_i32_0 : i32, i32
  }
  func.func @transform_5(%arg0: i32, %arg1: i32) -> (i32, i32) {
    %c0_i32 = arith.constant 0 : i32
    %c0_i32_0 = arith.constant 0 : i32
    %c0_i32_1 = arith.constant 0 : i32
    return %c0_i32, %c0_i32_0 : i32, i32
  }
  func.func @transform_6(%arg0: i32, %arg1: i32) -> (i32, i32) {
    %c0_i32 = arith.constant 0 : i32
    %c0_i32_0 = arith.constant 0 : i32
    %c0_i32_1 = arith.constant 0 : i32
    return %c0_i32, %c0_i32_0 : i32, i32
  }
  func.func @transform_7(%arg0: i32, %arg1: i32) -> (i32, i32, i32) {
    %c0_i32 = arith.constant 0 : i32
    %c0_i32_0 = arith.constant 0 : i32
    %c0_i32_1 = arith.constant 0 : i32
    return %arg0, %c0_i32, %c0_i32_0 : i32, i32, i32
  }
}

module attributes {stable_mosaic.version = 11 : i64} {
  func.func @_stn_fc_kernel(%arg0: memref<2x1024xf32, #tpu.memory_space<vmem>>, %arg1: memref<1024x512xbf16, #tpu.memory_space<vmem>>, %arg2: memref<1x512xf32, #tpu.memory_space<vmem>>, %arg3: memref<512x256xbf16, #tpu.memory_space<vmem>>, %arg4: memref<1x256xf32, #tpu.memory_space<vmem>>, %arg5: memref<256x9xbf16, #tpu.memory_space<vmem>>, %arg6: memref<1x9xf32, #tpu.memory_space<vmem>>, %arg7: memref<2x9xf32, #tpu.memory_space<vmem>>, %arg8: memref<2x9xf32, #tpu.memory_space<vmem>>) attributes {dimension_semantics = [], scalar_prefetch = 0 : i64, scratch_operands = 0 : i64, tpu.core_type = #tpu.core_type<tc>} {
    %c0 = arith.constant 0 : index
    %c0_0 = arith.constant 0 : index
    %0 = vector.load %arg0[%c0, %c0_0] : memref<2x1024xf32, #tpu.memory_space<vmem>>, vector<2x1024xf32>
    %c0_1 = arith.constant 0 : index
    %c0_2 = arith.constant 0 : index
    %1 = vector.load %arg1[%c0_1, %c0_2] : memref<1024x512xbf16, #tpu.memory_space<vmem>>, vector<1024x512xbf16>
    %2 = arith.truncf %0 : vector<2x1024xf32> to vector<2x1024xbf16>
    %cst = arith.constant dense<0.000000e+00> : vector<2x512xf32>
    %3 = tpu.matmul %2, %1, %cst {dimension_numbers = #tpu.dot_dimension_numbers<[1], [0], [0], [1], [0, 0, 1, 1], [], []>} : vector<2x1024xbf16>, vector<1024x512xbf16>, vector<2x512xf32> -> vector<2x512xf32>
    %c0_3 = arith.constant 0 : index
    %c0_4 = arith.constant 0 : index
    %4 = vector.load %arg2[%c0_3, %c0_4] : memref<1x512xf32, #tpu.memory_space<vmem>>, vector<1x512xf32>
    %5 = vector.broadcast %4 : vector<1x512xf32> to vector<2x512xf32>
    %6 = arith.addf %3, %5 : vector<2x512xf32>
    %cst_5 = arith.constant 0.000000e+00 : f32
    %7 = vector.broadcast %cst_5 : f32 to vector<2x512xf32>
    %8 = arith.maximumf %6, %7 : vector<2x512xf32>
    %c0_6 = arith.constant 0 : index
    %c0_7 = arith.constant 0 : index
    %9 = vector.load %arg3[%c0_6, %c0_7] : memref<512x256xbf16, #tpu.memory_space<vmem>>, vector<512x256xbf16>
    %10 = arith.truncf %8 : vector<2x512xf32> to vector<2x512xbf16>
    %cst_8 = arith.constant dense<0.000000e+00> : vector<2x256xf32>
    %11 = tpu.matmul %10, %9, %cst_8 {dimension_numbers = #tpu.dot_dimension_numbers<[1], [0], [0], [1], [0, 0, 1, 1], [], []>} : vector<2x512xbf16>, vector<512x256xbf16>, vector<2x256xf32> -> vector<2x256xf32>
    %c0_9 = arith.constant 0 : index
    %c0_10 = arith.constant 0 : index
    %12 = vector.load %arg4[%c0_9, %c0_10] : memref<1x256xf32, #tpu.memory_space<vmem>>, vector<1x256xf32>
    %13 = vector.broadcast %12 : vector<1x256xf32> to vector<2x256xf32>
    %14 = arith.addf %11, %13 : vector<2x256xf32>
    %cst_11 = arith.constant 0.000000e+00 : f32
    %15 = vector.broadcast %cst_11 : f32 to vector<2x256xf32>
    %16 = arith.maximumf %14, %15 : vector<2x256xf32>
    %c0_12 = arith.constant 0 : index
    %c0_13 = arith.constant 0 : index
    %17 = vector.load %arg5[%c0_12, %c0_13] : memref<256x9xbf16, #tpu.memory_space<vmem>>, vector<256x9xbf16>
    %18 = arith.truncf %16 : vector<2x256xf32> to vector<2x256xbf16>
    %cst_14 = arith.constant dense<0.000000e+00> : vector<2x9xf32>
    %19 = tpu.matmul %18, %17, %cst_14 {dimension_numbers = #tpu.dot_dimension_numbers<[1], [0], [0], [1], [0, 0, 1, 1], [], []>} : vector<2x256xbf16>, vector<256x9xbf16>, vector<2x9xf32> -> vector<2x9xf32>
    %c0_15 = arith.constant 0 : index
    %c0_16 = arith.constant 0 : index
    %20 = vector.load %arg6[%c0_15, %c0_16] : memref<1x9xf32, #tpu.memory_space<vmem>>, vector<1x9xf32>
    %21 = vector.broadcast %20 : vector<1x9xf32> to vector<2x9xf32>
    %22 = arith.addf %19, %21 : vector<2x9xf32>
    %c0_17 = arith.constant 0 : index
    %c0_18 = arith.constant 0 : index
    %23 = vector.load %arg7[%c0_17, %c0_18] : memref<2x9xf32, #tpu.memory_space<vmem>>, vector<2x9xf32>
    %24 = arith.addf %22, %23 : vector<2x9xf32>
    %c0_19 = arith.constant 0 : index
    %c0_20 = arith.constant 0 : index
    %25 = vector.load %arg8[%c0_19, %c0_20] : memref<2x9xf32, #tpu.memory_space<vmem>>, vector<2x9xf32>
    tpu.vector_store %arg8[%c0_19, %c0_20], %24 {strides = array<i32>} : memref<2x9xf32, #tpu.memory_space<vmem>>, vector<2x9xf32>,
    return
  }
}

module attributes {stable_mosaic.version = 11 : i64} {
  func.func @_feat_kernel(%arg0: i32, %arg1: i32, %arg2: memref<1x256x3xf32, #tpu.memory_space<vmem>>, %arg3: memref<1x3x3xf32, #tpu.memory_space<vmem>>, %arg4: memref<3x64xbf16, #tpu.memory_space<vmem>>, %arg5: memref<1x64xf32, #tpu.memory_space<vmem>>, %arg6: memref<64x128xbf16, #tpu.memory_space<vmem>>, %arg7: memref<1x128xf32, #tpu.memory_space<vmem>>, %arg8: memref<128x1024xbf16, #tpu.memory_space<vmem>>, %arg9: memref<1x1024xf32, #tpu.memory_space<vmem>>, %arg10: memref<1x256x64xbf16, #tpu.memory_space<vmem>>, %arg11: memref<1x1x1024xf32, #tpu.memory_space<vmem>>) attributes {dimension_semantics = [#tpu.dimension_semantics<parallel>, #tpu.dimension_semantics<arbitrary>], iteration_bounds = array<i64: 2, 2>, scalar_prefetch = 0 : i64, scratch_operands = 0 : i64, tpu.core_type = #tpu.core_type<tc>, window_params = [{transform_indices = @transform_0, window_bounds = array<i64: 1, 256, 3>}, {transform_indices = @transform_1, window_bounds = array<i64: 1, 3, 3>}, {pipeline_mode = #tpu.pipeline_mode<synchronous>, transform_indices = @transform_2, window_bounds = array<i64: 3, 64>}, {pipeline_mode = #tpu.pipeline_mode<synchronous>, transform_indices = @transform_3, window_bounds = array<i64: 1, 64>}, {pipeline_mode = #tpu.pipeline_mode<synchronous>, transform_indices = @transform_4, window_bounds = array<i64: 64, 128>}, {pipeline_mode = #tpu.pipeline_mode<synchronous>, transform_indices = @transform_5, window_bounds = array<i64: 1, 128>}, {pipeline_mode = #tpu.pipeline_mode<synchronous>, transform_indices = @transform_6, window_bounds = array<i64: 128, 1024>}, {pipeline_mode = #tpu.pipeline_mode<synchronous>, transform_indices = @transform_7, window_bounds = array<i64: 1, 1024>}, {transform_indices = @transform_8, window_bounds = array<i64: 1, 256, 64>}, {transform_indices = @transform_9, window_bounds = array<i64: 1, 1, 1024>}]} {
    %c0 = arith.constant 0 : index
    %c0_0 = arith.constant 0 : index
    %c0_1 = arith.constant 0 : index
    %0 = vector.load %arg2[%c0, %c0_0, %c0_1] : memref<1x256x3xf32, #tpu.memory_space<vmem>>, vector<1x256x3xf32>
    %1 = vector.shape_cast %0 : vector<1x256x3xf32> to vector<256x3xf32>
    %c0_2 = arith.constant 0 : index
    %c0_3 = arith.constant 0 : index
    %c0_4 = arith.constant 0 : index
    %2 = vector.load %arg3[%c0_2, %c0_3, %c0_4] : memref<1x3x3xf32, #tpu.memory_space<vmem>>, vector<1x3x3xf32>
    %3 = vector.shape_cast %2 : vector<1x3x3xf32> to vector<3x3xf32>
    %cst = arith.constant dense<0.000000e+00> : vector<256x3xf32>
    %4 = tpu.matmul %1, %3, %cst {dimension_numbers = #tpu.dot_dimension_numbers<[1], [0], [0], [1], [0, 0, 1, 1], [], []>} : vector<256x3xf32>, vector<3x3xf32>, vector<256x3xf32> -> vector<256x3xf32>
    %c0_5 = arith.constant 0 : index
    %c0_6 = arith.constant 0 : index
    %5 = vector.load %arg4[%c0_5, %c0_6] : memref<3x64xbf16, #tpu.memory_space<vmem>>, vector<3x64xbf16>
    %6 = arith.truncf %4 : vector<256x3xf32> to vector<256x3xbf16>
    %cst_7 = arith.constant dense<0.000000e+00> : vector<256x64xf32>
    %7 = tpu.matmul %6, %5, %cst_7 {dimension_numbers = #tpu.dot_dimension_numbers<[1], [0], [0], [1], [0, 0, 1, 1], [], []>} : vector<256x3xbf16>, vector<3x64xbf16>, vector<256x64xf32> -> vector<256x64xf32>
    %c0_8 = arith.constant 0 : index
    %c0_9 = arith.constant 0 : index
    %8 = vector.load %arg5[%c0_8, %c0_9] : memref<1x64xf32, #tpu.memory_space<vmem>>, vector<1x64xf32>
    %9 = vector.broadcast %8 : vector<1x64xf32> to vector<256x64xf32>
    %10 = arith.addf %7, %9 : vector<256x64xf32>
    %cst_10 = arith.constant 0.000000e+00 : f32
    %11 = vector.broadcast %cst_10 : f32 to vector<256x64xf32>
    %12 = arith.maximumf %10, %11 : vector<256x64xf32>
    %13 = arith.truncf %12 : vector<256x64xf32> to vector<256x64xbf16>
    %c0_11 = arith.constant 0 : index
    %c0_12 = arith.constant 0 : index
    %c0_13 = arith.constant 0 : index
    %14 = vector.load %arg10[%c0_11, %c0_12, %c0_13] : memref<1x256x64xbf16, #tpu.memory_space<vmem>>, vector<1x256x64xbf16>
    %15 = vector.shape_cast %14 : vector<1x256x64xbf16> to vector<256x64xbf16>
    %16 = vector.shape_cast %13 : vector<256x64xbf16> to vector<1x256x64xbf16>
    tpu.vector_store %arg10[%c0_11, %c0_12, %c0_13], %16 {strides = array<i32>} : memref<1x256x64xbf16, #tpu.memory_space<vmem>>, vector<1x256x64xbf16>,
    %c0_14 = arith.constant 0 : index
    %c0_15 = arith.constant 0 : index
    %17 = vector.load %arg6[%c0_14, %c0_15] : memref<64x128xbf16, #tpu.memory_space<vmem>>, vector<64x128xbf16>
    %18 = arith.truncf %12 : vector<256x64xf32> to vector<256x64xbf16>
    %cst_16 = arith.constant dense<0.000000e+00> : vector<256x128xf32>
    %19 = tpu.matmul %18, %17, %cst_16 {dimension_numbers = #tpu.dot_dimension_numbers<[1], [0], [0], [1], [0, 0, 1, 1], [], []>} : vector<256x64xbf16>, vector<64x128xbf16>, vector<256x128xf32> -> vector<256x128xf32>
    %c0_17 = arith.constant 0 : index
    %c0_18 = arith.constant 0 : index
    %20 = vector.load %arg7[%c0_17, %c0_18] : memref<1x128xf32, #tpu.memory_space<vmem>>, vector<1x128xf32>
    %21 = vector.broadcast %20 : vector<1x128xf32> to vector<256x128xf32>
    %22 = arith.addf %19, %21 : vector<256x128xf32>
    %cst_19 = arith.constant 0.000000e+00 : f32
    %23 = vector.broadcast %cst_19 : f32 to vector<256x128xf32>
    %24 = arith.maximumf %22, %23 : vector<256x128xf32>
    %c0_20 = arith.constant 0 : index
    %c0_21 = arith.constant 0 : index
    %25 = vector.load %arg8[%c0_20, %c0_21] : memref<128x1024xbf16, #tpu.memory_space<vmem>>, vector<128x1024xbf16>
    %26 = arith.truncf %24 : vector<256x128xf32> to vector<256x128xbf16>
    %cst_22 = arith.constant dense<0.000000e+00> : vector<256x1024xf32>
    %27 = tpu.matmul %26, %25, %cst_22 {dimension_numbers = #tpu.dot_dimension_numbers<[1], [0], [0], [1], [0, 0, 1, 1], [], []>} : vector<256x128xbf16>, vector<128x1024xbf16>, vector<256x1024xf32> -> vector<256x1024xf32>
    %c0_23 = arith.constant 0 : index
    %c0_24 = arith.constant 0 : index
    %28 = vector.load %arg9[%c0_23, %c0_24] : memref<1x1024xf32, #tpu.memory_space<vmem>>, vector<1x1024xf32>
    %29 = vector.broadcast %28 : vector<1x1024xf32> to vector<256x1024xf32>
    %30 = arith.addf %27, %29 : vector<256x1024xf32>
    %cst_25 = arith.constant dense<0xFF800000> : vector<1024xf32>
    %31 = vector.multi_reduction <maximumf>, %30, %cst_25 [0] : vector<256x1024xf32> to vector<1024xf32>
    %32 = vector.shape_cast %31 : vector<1024xf32> to vector<1x1024xf32>
    %c0_i32 = arith.constant 0 : i32
    %33 = arith.cmpi eq, %arg1, %c0_i32 : i32
    %34 = arith.extui %33 : i1 to i32
    %c0_i32_26 = arith.constant 0 : i32
    %35 = arith.cmpi ne, %34, %c0_i32_26 : i32
    scf.if %35 {
      %c0_29 = arith.constant 0 : index
      %c0_30 = arith.constant 0 : index
      %c0_31 = arith.constant 0 : index
      %39 = vector.load %arg11[%c0_29, %c0_30, %c0_31] : memref<1x1x1024xf32, #tpu.memory_space<vmem>>, vector<1x1x1024xf32>
      %40 = vector.shape_cast %39 : vector<1x1x1024xf32> to vector<1x1024xf32>
      %41 = vector.shape_cast %32 : vector<1x1024xf32> to vector<1x1x1024xf32>
      tpu.vector_store %arg11[%c0_29, %c0_30, %c0_31], %41 {strides = array<i32>} : memref<1x1x1024xf32, #tpu.memory_space<vmem>>, vector<1x1x1024xf32>,
    } else {
    }
    %c0_i32_27 = arith.constant 0 : i32
    %36 = arith.cmpi sgt, %arg1, %c0_i32_27 : i32
    %37 = arith.extui %36 : i1 to i32
    %c0_i32_28 = arith.constant 0 : i32
    %38 = arith.cmpi ne, %37, %c0_i32_28 : i32
    scf.if %38 {
      %c0_29 = arith.constant 0 : index
      %c0_30 = arith.constant 0 : index
      %c0_31 = arith.constant 0 : index
      %39 = vector.load %arg11[%c0_29, %c0_30, %c0_31] : memref<1x1x1024xf32, #tpu.memory_space<vmem>>, vector<1x1x1024xf32>
      %40 = vector.shape_cast %39 : vector<1x1x1024xf32> to vector<1x1024xf32>
      %41 = arith.maximumf %40, %32 : vector<1x1024xf32>
      %c0_32 = arith.constant 0 : index
      %c0_33 = arith.constant 0 : index
      %c0_34 = arith.constant 0 : index
      %42 = vector.load %arg11[%c0_32, %c0_33, %c0_34] : memref<1x1x1024xf32, #tpu.memory_space<vmem>>, vector<1x1x1024xf32>
      %43 = vector.shape_cast %42 : vector<1x1x1024xf32> to vector<1x1024xf32>
      %44 = vector.shape_cast %41 : vector<1x1024xf32> to vector<1x1x1024xf32>
      tpu.vector_store %arg11[%c0_32, %c0_33, %c0_34], %44 {strides = array<i32>} : memref<1x1x1024xf32, #tpu.memory_space<vmem>>, vector<1x1x1024xf32>,
    } else {
    }
    return
  }
  func.func @transform_0(%arg0: i32, %arg1: i32) -> (i32, i32, i32) {
    %c0_i32 = arith.constant 0 : i32
    %c0_i32_0 = arith.constant 0 : i32
    return %arg0, %arg1, %c0_i32 : i32, i32, i32
  }
  func.func @transform_1(%arg0: i32, %arg1: i32) -> (i32, i32, i32) {
    %c0_i32 = arith.constant 0 : i32
    %c0_i32_0 = arith.constant 0 : i32
    %c0_i32_1 = arith.constant 0 : i32
    return %arg0, %c0_i32, %c0_i32_0 : i32, i32, i32
  }
  func.func @transform_2(%arg0: i32, %arg1: i32) -> (i32, i32) {
    %c0_i32 = arith.constant 0 : i32
    %c0_i32_0 = arith.constant 0 : i32
    %c0_i32_1 = arith.constant 0 : i32
    return %c0_i32, %c0_i32_0 : i32, i32
  }
  func.func @transform_3(%arg0: i32, %arg1: i32) -> (i32, i32) {
    %c0_i32 = arith.constant 0 : i32
    %c0_i32_0 = arith.constant 0 : i32
    %c0_i32_1 = arith.constant 0 : i32
    return %c0_i32, %c0_i32_0 : i32, i32
  }
  func.func @transform_4(%arg0: i32, %arg1: i32) -> (i32, i32) {
    %c0_i32 = arith.constant 0 : i32
    %c0_i32_0 = arith.constant 0 : i32
    %c0_i32_1 = arith.constant 0 : i32
    return %c0_i32, %c0_i32_0 : i32, i32
  }
  func.func @transform_5(%arg0: i32, %arg1: i32) -> (i32, i32) {
    %c0_i32 = arith.constant 0 : i32
    %c0_i32_0 = arith.constant 0 : i32
    %c0_i32_1 = arith.constant 0 : i32
    return %c0_i32, %c0_i32_0 : i32, i32
  }
  func.func @transform_6(%arg0: i32, %arg1: i32) -> (i32, i32) {
    %c0_i32 = arith.constant 0 : i32
    %c0_i32_0 = arith.constant 0 : i32
    %c0_i32_1 = arith.constant 0 : i32
    return %c0_i32, %c0_i32_0 : i32, i32
  }
  func.func @transform_7(%arg0: i32, %arg1: i32) -> (i32, i32) {
    %c0_i32 = arith.constant 0 : i32
    %c0_i32_0 = arith.constant 0 : i32
    %c0_i32_1 = arith.constant 0 : i32
    return %c0_i32, %c0_i32_0 : i32, i32
  }
  func.func @transform_8(%arg0: i32, %arg1: i32) -> (i32, i32, i32) {
    %c0_i32 = arith.constant 0 : i32
    %c0_i32_0 = arith.constant 0 : i32
    return %arg0, %arg1, %c0_i32 : i32, i32, i32
  }
  func.func @transform_9(%arg0: i32, %arg1: i32) -> (i32, i32, i32) {
    %c0_i32 = arith.constant 0 : i32
    %c0_i32_0 = arith.constant 0 : i32
    %c0_i32_1 = arith.constant 0 : i32
    return %arg0, %c0_i32, %c0_i32_0 : i32, i32, i32
  }
}

module attributes {stable_mosaic.version = 11 : i64} {
  func.func @_seg_head_kernel(%arg0: i32, %arg1: i32, %arg2: memref<1x256x64xbf16, #tpu.memory_space<vmem>>, %arg3: memref<1x1x1024xf32, #tpu.memory_space<vmem>>, %arg4: memref<1024x512xbf16, #tpu.memory_space<vmem>>, %arg5: memref<64x512xbf16, #tpu.memory_space<vmem>>, %arg6: memref<1x512xf32, #tpu.memory_space<vmem>>, %arg7: memref<512x256xbf16, #tpu.memory_space<vmem>>, %arg8: memref<1x256xf32, #tpu.memory_space<vmem>>, %arg9: memref<256x128xbf16, #tpu.memory_space<vmem>>, %arg10: memref<1x128xf32, #tpu.memory_space<vmem>>, %arg11: memref<128x128xbf16, #tpu.memory_space<vmem>>, %arg12: memref<1x128xf32, #tpu.memory_space<vmem>>, %arg13: memref<1x256x128xf32, #tpu.memory_space<vmem>>) attributes {dimension_semantics = [#tpu.dimension_semantics<parallel>, #tpu.dimension_semantics<parallel>], iteration_bounds = array<i64: 2, 2>, scalar_prefetch = 0 : i64, scratch_operands = 0 : i64, tpu.core_type = #tpu.core_type<tc>, window_params = [{transform_indices = @transform_0, window_bounds = array<i64: 1, 256, 64>}, {transform_indices = @transform_1, window_bounds = array<i64: 1, 1, 1024>}, {pipeline_mode = #tpu.pipeline_mode<synchronous>, transform_indices = @transform_2, window_bounds = array<i64: 1024, 512>}, {pipeline_mode = #tpu.pipeline_mode<synchronous>, transform_indices = @transform_3, window_bounds = array<i64: 64, 512>}, {pipeline_mode = #tpu.pipeline_mode<synchronous>, transform_indices = @transform_4, window_bounds = array<i64: 1, 512>}, {pipeline_mode = #tpu.pipeline_mode<synchronous>, transform_indices = @transform_5, window_bounds = array<i64: 512, 256>}, {pipeline_mode = #tpu.pipeline_mode<synchronous>, transform_indices = @transform_6, window_bounds = array<i64: 1, 256>}, {pipeline_mode = #tpu.pipeline_mode<synchronous>, transform_indices = @transform_7, window_bounds = array<i64: 256, 128>}, {pipeline_mode = #tpu.pipeline_mode<synchronous>, transform_indices = @transform_8, window_bounds = array<i64: 1, 128>}, {pipeline_mode = #tpu.pipeline_mode<synchronous>, transform_indices = @transform_9, window_bounds = array<i64: 128, 128>}, {pipeline_mode = #tpu.pipeline_mode<synchronous>, transform_indices = @transform_10, window_bounds = array<i64: 1, 128>}, {transform_indices = @transform_11, window_bounds = array<i64: 1, 256, 128>}]} {
    %c0 = arith.constant 0 : index
    %c0_0 = arith.constant 0 : index
    %c0_1 = arith.constant 0 : index
    %0 = vector.load %arg2[%c0, %c0_0, %c0_1] : memref<1x256x64xbf16, #tpu.memory_space<vmem>>, vector<1x256x64xbf16>
    %1 = vector.shape_cast %0 : vector<1x256x64xbf16> to vector<256x64xbf16>
    %c0_2 = arith.constant 0 : index
    %c0_3 = arith.constant 0 : index
    %c0_4 = arith.constant 0 : index
    %2 = vector.load %arg3[%c0_2, %c0_3, %c0_4] : memref<1x1x1024xf32, #tpu.memory_space<vmem>>, vector<1x1x1024xf32>
    %3 = vector.shape_cast %2 : vector<1x1x1024xf32> to vector<1x1024xf32>
    %c0_5 = arith.constant 0 : index
    %c0_6 = arith.constant 0 : index
    %4 = vector.load %arg4[%c0_5, %c0_6] : memref<1024x512xbf16, #tpu.memory_space<vmem>>, vector<1024x512xbf16>
    %5 = arith.truncf %3 : vector<1x1024xf32> to vector<1x1024xbf16>
    %cst = arith.constant dense<0.000000e+00> : vector<1x512xf32>
    %6 = tpu.matmul %5, %4, %cst {dimension_numbers = #tpu.dot_dimension_numbers<[1], [0], [0], [1], [0, 0, 1, 1], [], []>} : vector<1x1024xbf16>, vector<1024x512xbf16>, vector<1x512xf32> -> vector<1x512xf32>
    %c0_7 = arith.constant 0 : index
    %c0_8 = arith.constant 0 : index
    %7 = vector.load %arg5[%c0_7, %c0_8] : memref<64x512xbf16, #tpu.memory_space<vmem>>, vector<64x512xbf16>
    %cst_9 = arith.constant dense<0.000000e+00> : vector<256x512xf32>
    %8 = tpu.matmul %1, %7, %cst_9 {dimension_numbers = #tpu.dot_dimension_numbers<[1], [0], [0], [1], [0, 0, 1, 1], [], []>} : vector<256x64xbf16>, vector<64x512xbf16>, vector<256x512xf32> -> vector<256x512xf32>
    %9 = vector.broadcast %6 : vector<1x512xf32> to vector<256x512xf32>
    %10 = arith.addf %8, %9 : vector<256x512xf32>
    %c0_10 = arith.constant 0 : index
    %c0_11 = arith.constant 0 : index
    %11 = vector.load %arg6[%c0_10, %c0_11] : memref<1x512xf32, #tpu.memory_space<vmem>>, vector<1x512xf32>
    %12 = vector.broadcast %11 : vector<1x512xf32> to vector<256x512xf32>
    %13 = arith.addf %10, %12 : vector<256x512xf32>
    %cst_12 = arith.constant 0.000000e+00 : f32
    %14 = vector.broadcast %cst_12 : f32 to vector<256x512xf32>
    %15 = arith.maximumf %13, %14 : vector<256x512xf32>
    %c0_13 = arith.constant 0 : index
    %c0_14 = arith.constant 0 : index
    %16 = vector.load %arg7[%c0_13, %c0_14] : memref<512x256xbf16, #tpu.memory_space<vmem>>, vector<512x256xbf16>
    %17 = arith.truncf %15 : vector<256x512xf32> to vector<256x512xbf16>
    %cst_15 = arith.constant dense<0.000000e+00> : vector<256x256xf32>
    %18 = tpu.matmul %17, %16, %cst_15 {dimension_numbers = #tpu.dot_dimension_numbers<[1], [0], [0], [1], [0, 0, 1, 1], [], []>} : vector<256x512xbf16>, vector<512x256xbf16>, vector<256x256xf32> -> vector<256x256xf32>
    %c0_16 = arith.constant 0 : index
    %c0_17 = arith.constant 0 : index
    %19 = vector.load %arg8[%c0_16, %c0_17] : memref<1x256xf32, #tpu.memory_space<vmem>>, vector<1x256xf32>
    %20 = vector.broadcast %19 : vector<1x256xf32> to vector<256x256xf32>
    %21 = arith.addf %18, %20 : vector<256x256xf32>
    %cst_18 = arith.constant 0.000000e+00 : f32
    %22 = vector.broadcast %cst_18 : f32 to vector<256x256xf32>
    %23 = arith.maximumf %21, %22 : vector<256x256xf32>
    %c0_19 = arith.constant 0 : index
    %c0_20 = arith.constant 0 : index
    %24 = vector.load %arg9[%c0_19, %c0_20] : memref<256x128xbf16, #tpu.memory_space<vmem>>, vector<256x128xbf16>
    %25 = arith.truncf %23 : vector<256x256xf32> to vector<256x256xbf16>
    %cst_21 = arith.constant dense<0.000000e+00> : vector<256x128xf32>
    %26 = tpu.matmul %25, %24, %cst_21 {dimension_numbers = #tpu.dot_dimension_numbers<[1], [0], [0], [1], [0, 0, 1, 1], [], []>} : vector<256x256xbf16>, vector<256x128xbf16>, vector<256x128xf32> -> vector<256x128xf32>
    %c0_22 = arith.constant 0 : index
    %c0_23 = arith.constant 0 : index
    %27 = vector.load %arg10[%c0_22, %c0_23] : memref<1x128xf32, #tpu.memory_space<vmem>>, vector<1x128xf32>
    %28 = vector.broadcast %27 : vector<1x128xf32> to vector<256x128xf32>
    %29 = arith.addf %26, %28 : vector<256x128xf32>
    %cst_24 = arith.constant 0.000000e+00 : f32
    %30 = vector.broadcast %cst_24 : f32 to vector<256x128xf32>
    %31 = arith.maximumf %29, %30 : vector<256x128xf32>
    %c0_25 = arith.constant 0 : index
    %c0_26 = arith.constant 0 : index
    %32 = vector.load %arg11[%c0_25, %c0_26] : memref<128x128xbf16, #tpu.memory_space<vmem>>, vector<128x128xbf16>
    %33 = arith.truncf %31 : vector<256x128xf32> to vector<256x128xbf16>
    %cst_27 = arith.constant dense<0.000000e+00> : vector<256x128xf32>
    %34 = tpu.matmul %33, %32, %cst_27 {dimension_numbers = #tpu.dot_dimension_numbers<[1], [0], [0], [1], [0, 0, 1, 1], [], []>} : vector<256x128xbf16>, vector<128x128xbf16>, vector<256x128xf32> -> vector<256x128xf32>
    %c0_28 = arith.constant 0 : index
    %c0_29 = arith.constant 0 : index
    %35 = vector.load %arg12[%c0_28, %c0_29] : memref<1x128xf32, #tpu.memory_space<vmem>>, vector<1x128xf32>
    %36 = vector.broadcast %35 : vector<1x128xf32> to vector<256x128xf32>
    %37 = arith.addf %34, %36 : vector<256x128xf32>
    %cst_30 = arith.constant dense<0xFF800000> : vector<256xf32>
    %38 = vector.multi_reduction <maximumf>, %37, %cst_30 [1] : vector<256x128xf32> to vector<256xf32>
    %39 = vector.shape_cast %38 : vector<256xf32> to vector<256x1xf32>
    %40 = vector.broadcast %39 : vector<256x1xf32> to vector<256x128xf32>
    %41 = arith.subf %37, %40 : vector<256x128xf32>
    %42 = math.exp %41 : vector<256x128xf32>
    %cst_31 = arith.constant dense<0.000000e+00> : vector<256xf32>
    %43 = vector.multi_reduction <add>, %42, %cst_31 [1] : vector<256x128xf32> to vector<256xf32>
    %44 = vector.shape_cast %43 : vector<256xf32> to vector<256x1xf32>
    %45 = math.log %44 : vector<256x1xf32>
    %46 = vector.broadcast %45 : vector<256x1xf32> to vector<256x128xf32>
    %47 = arith.subf %41, %46 : vector<256x128xf32>
    %c0_32 = arith.constant 0 : index
    %c0_33 = arith.constant 0 : index
    %c0_34 = arith.constant 0 : index
    %48 = vector.load %arg13[%c0_32, %c0_33, %c0_34] : memref<1x256x128xf32, #tpu.memory_space<vmem>>, vector<1x256x128xf32>
    %49 = vector.shape_cast %48 : vector<1x256x128xf32> to vector<256x128xf32>
    %50 = vector.shape_cast %47 : vector<256x128xf32> to vector<1x256x128xf32>
    tpu.vector_store %arg13[%c0_32, %c0_33, %c0_34], %50 {strides = array<i32>} : memref<1x256x128xf32, #tpu.memory_space<vmem>>, vector<1x256x128xf32>,
    return
  }
  func.func @transform_0(%arg0: i32, %arg1: i32) -> (i32, i32, i32) {
    %c0_i32 = arith.constant 0 : i32
    %c0_i32_0 = arith.constant 0 : i32
    return %arg0, %arg1, %c0_i32 : i32, i32, i32
  }
  func.func @transform_1(%arg0: i32, %arg1: i32) -> (i32, i32, i32) {
    %c0_i32 = arith.constant 0 : i32
    %c0_i32_0 = arith.constant 0 : i32
    %c0_i32_1 = arith.constant 0 : i32
    return %arg0, %c0_i32, %c0_i32_0 : i32, i32, i32
  }
  func.func @transform_2(%arg0: i32, %arg1: i32) -> (i32, i32) {
    %c0_i32 = arith.constant 0 : i32
    %c0_i32_0 = arith.constant 0 : i32
    %c0_i32_1 = arith.constant 0 : i32
    return %c0_i32, %c0_i32_0 : i32, i32
  }
  func.func @transform_3(%arg0: i32, %arg1: i32) -> (i32, i32) {
    %c0_i32 = arith.constant 0 : i32
    %c0_i32_0 = arith.constant 0 : i32
    %c0_i32_1 = arith.constant 0 : i32
    return %c0_i32, %c0_i32_0 : i32, i32
  }
  func.func @transform_4(%arg0: i32, %arg1: i32) -> (i32, i32) {
    %c0_i32 = arith.constant 0 : i32
    %c0_i32_0 = arith.constant 0 : i32
    %c0_i32_1 = arith.constant 0 : i32
    return %c0_i32, %c0_i32_0 : i32, i32
  }
  func.func @transform_5(%arg0: i32, %arg1: i32) -> (i32, i32) {
    %c0_i32 = arith.constant 0 : i32
    %c0_i32_0 = arith.constant 0 : i32
    %c0_i32_1 = arith.constant 0 : i32
    return %c0_i32, %c0_i32_0 : i32, i32
  }
  func.func @transform_6(%arg0: i32, %arg1: i32) -> (i32, i32) {
    %c0_i32 = arith.constant 0 : i32
    %c0_i32_0 = arith.constant 0 : i32
    %c0_i32_1 = arith.constant 0 : i32
    return %c0_i32, %c0_i32_0 : i32, i32
  }
  func.func @transform_7(%arg0: i32, %arg1: i32) -> (i32, i32) {
    %c0_i32 = arith.constant 0 : i32
    %c0_i32_0 = arith.constant 0 : i32
    %c0_i32_1 = arith.constant 0 : i32
    return %c0_i32, %c0_i32_0 : i32, i32
  }
  func.func @transform_8(%arg0: i32, %arg1: i32) -> (i32, i32) {
    %c0_i32 = arith.constant 0 : i32
    %c0_i32_0 = arith.constant 0 : i32
    %c0_i32_1 = arith.constant 0 : i32
    return %c0_i32, %c0_i32_0 : i32, i32
  }
  func.func @transform_9(%arg0: i32, %arg1: i32) -> (i32, i32) {
    %c0_i32 = arith.constant 0 : i32
    %c0_i32_0 = arith.constant 0 : i32
    %c0_i32_1 = arith.constant 0 : i32
    return %c0_i32, %c0_i32_0 : i32, i32
  }
  func.func @transform_10(%arg0: i32, %arg1: i32) -> (i32, i32) {
    %c0_i32 = arith.constant 0 : i32
    %c0_i32_0 = arith.constant 0 : i32
    %c0_i32_1 = arith.constant 0 : i32
    return %c0_i32, %c0_i32_0 : i32, i32
  }
  func.func @transform_11(%arg0: i32, %arg1: i32) -> (i32, i32, i32) {
    %c0_i32 = arith.constant 0 : i32
    %c0_i32_0 = arith.constant 0 : i32
    return %arg0, %arg1, %c0_i32 : i32, i32, i32
  }
}

</mosaic_0001>

<bundles_post_ra>
// kernel: pointnet_densecls_forward.4
= control target key start
LH: loop header
LB: loop body
LE: loop exit
PB: predicated region body
PF: predicated region fallthrough
CT: control target
= control target key end

     0   :  { %s4471_s0 = inlined_call_operand.vmem [shape: f32[2,512,3], index: 0, kind: input, shape index: {}]   ;;  %s4472_s1 = inlined_call_operand.hbm [shape: bf16[3,64], index: 1, kind: input, shape index: {}]   ;;  %s4473_s2 = inlined_call_operand.hbm [shape: f32[1,64], index: 2, kind: input, shape index: {}]   ;;  %s4474_s3 = inlined_call_operand.hbm [shape: bf16[64,128], index: 3, kind: input, shape index: {}]   ;;  %s4475_s4 = inlined_call_operand.hbm [shape: f32[1,128], index: 4, kind: input, shape index: {}]   ;;  %s4476_s5 = inlined_call_operand.hbm [shape: bf16[128,1024], index: 5, kind: input, shape index: {}]   ;;  %s4477_s6 = inlined_call_operand.hbm [shape: f32[1,1024], index: 6, kind: input, shape index: {}]   ;;  %s4478_s7 = inlined_call_operand.vmem [shape: f32[2,1,1024], index: 7, kind: output, shape index: {}]  }
   0x1   :  { %4482 = sst [smem:[#allocation16_spill]] %s4472_s1 }
   0x2   :  { %4483 = sst [smem:[#allocation17_spill]] %s4473_s2 }
   0x3   :  { %12 = vsyncpa [#allocation3], 0 }
   0x4   :  { %13 = vsyncpa [#allocation5], 0 }
   0x5   :  { %14 = vsyncpa [#allocation8], 0 }
   0x6   :  { %15 = vsyncpa [#allocation11], 0  ;;  %s3643_s24 = smov 0   ;;  %s3645_s25 = smov 0  }
   0x7   :  { %s3647_s26 = smov 0   ;;  %s3649_s27 = smov 0  }
   0x8   :  { %s3651_s28 = smov 0  }
   0x9 LB: > { %s3589_s29 = smov [#allocation4]   ;;  %s3013_s8 = sadd.s32 4294967295, %s3587_s28   ;;  %s3587_s28 = sphi %s3651_s28, %s21_s28   ;;  %s3583_s27 = sphi %s3649_s27, %s4496_s27   ;;  %s3579_s26 = sphi %s3647_s26, %s4495_s26   ;;  %s3575_s25 = sphi %s3645_s25, %s4494_s25   ;;  %s3571_s24 = sphi %s3643_s24, %s4493_s24  }
   0xa   : > { %s242_s30 = sshll.u32 %s3589_s29, 4  ;;  %p3015_p0 = scmp.ge.s32.totalorder %s3587_s28, 1  ;;  %s243_s30 = int_to_ptr.vmem [resolvable:$true] %s242_s30 }
   0xb   : > { %p218_p1 = scmp.lt.s32.totalorder %s3587_s28, 5  ;;  %p3671_p2 = scmp.eq.s32.totalorder %s3013_s8, 0 }
   0xc   : > { %s3590_s11 = smov [#allocation7]   ;;  %s4487_s2 = sld [smem:[#allocation17_spill]] }
   0xd   : > { %s4484_s9 = scalar_select %p3671_p2, 1, 0 }
   0xe   : > { %p3675_p3 = pnand %p3015_p0, %p218_p1  ;;  %s266_s12 = sshll.u32 %s3590_s11, 4  ;;  %s3681_s12 = int_to_ptr.vmem [resolvable:$true] %s266_s12 }
  0x10   : > { %s4485_s10 = scalar_select %p3675_p3, 1, 0 }
  0x11   : > { %p3275_p4 = pneg %p3675_p3 }
  0x12   : > { %s3365_s16 = scalar_lea.hbm %s4487_s2, 16 }
  0x13   : > { %p3685_p5 = pnand %p3671_p2, %p3275_p4  ;;  %p3366_p6 = scmp.ne.s32.totalorder %s4487_s2, %s3365_s16 }
  0x14   : > { %p3372_p10 = scmp.lt.u32.totalorder %s3365_s16, %s4487_s2 }
  0x15   : > { %p3697_p7 = pneg %p3685_p5 }
  0x17   : > { %p3368_p8 = pnand %p3697_p7, %p3366_p6 }
  0x19   : > { %p3369_p9 = pneg %p3368_p8 }
  0x1b   : > { %p3374_p11 = pnand %p3372_p10, %p3369_p9 }
  0x1d   : > { %3377 = shalt.err (!%p3374_p11)
}
  0x1e   : > { %s3378_s22 = scalar_lea.vmem %s243_s30, 16  ;;  %s3385_s23 = scalar_lea.vmem %s243_s30, 32 }
  0x1f   : > { %p3379_p12 = scmp.ne.s32.totalorder %s243_s30, %s3378_s22  ;;  %p3386_p1 = scmp.lt.s32.totalorder %s243_s30, %s243_s30 }
  0x20   : > { %p3387_p4 = scmp.lt.s32.totalorder %s3385_s23, %s3378_s22 }
  0x21   : > { %p3381_p13 = pnand %p3379_p12, %p3697_p7 }
  0x22   : > { %p3388_p2 = por %p3387_p4, %p3386_p1 }
  0x23   : > { %p3382_p0 = pneg %p3381_p13 }
  0x25   : > { %p3389_p3 = pnand %p3388_p2, %p3382_p0 }
  0x27   : > { %3392 = shalt.err (!%p3389_p3)
}
  0x28   : > { %3281 = dma.hbm_to_vmem [thread:$0]  (!%p3685_p5), %s4487_s2, 16, %s243_s30, [#allocation5]  }
  0x29   : > { %s3393_s15 = scalar_lea.hbm %s4475_s4, 16 }
  0x2a   : > { %p3394_p6 = scmp.ne.s32.totalorder %s4475_s4, %s3393_s15  ;;  %p3400_p2 = scmp.lt.u32.totalorder %s3393_s15, %s4475_s4 }
  0x2c   : > { %p3396_p8 = pnand %p3394_p6, %p3697_p7 }
  0x2e   : > { %p3397_p9 = pneg %p3396_p8 }
  0x30   : > { %p3402_p3 = pnand %p3400_p2, %p3397_p9 }
  0x32   : > { %3405 = shalt.err (!%p3402_p3)
}
  0x33   : > { %s3406_s30 = scalar_lea.vmem %s3681_s12, 16  ;;  %s3413_s21 = scalar_lea.vmem %s3681_s12, 32 }
  0x34   : > { %p3407_p10 = scmp.ne.s32.totalorder %s3681_s12, %s3406_s30  ;;  %p3414_p13 = scmp.lt.s32.totalorder %s3681_s12, %s3681_s12 }
  0x35   : > { %p3415_p0 = scmp.lt.s32.totalorder %s3413_s21, %s3406_s30 }
  0x36   : > { %p3409_p11 = pnand %p3407_p10, %p3697_p7 }
  0x37   : > { %p3416_p1 = por %p3415_p0, %p3414_p13 }
  0x38   : > { %p3410_p12 = pneg %p3409_p11 }
  0x3a   : > { %p3417_p4 = pnand %p3416_p1, %p3410_p12 }
  0x3c   : > { %3420 = shalt.err (!%p3417_p4)
}
  0x3d   : > { %3287 = dma.hbm_to_vmem [thread:$0]  (!%p3685_p5), %s4475_s4, 16, %s3681_s12, [#allocation8]  }
  0x3e   : > { %s30_s29 = sadd.s32 1, %s3579_s26  ;;  %s33_s8 = sadd.s32 1, %s3583_s27 }
  0x3f   : > { %p31_p6 = scmp.ge.s32.totalorder %s30_s29, 2  ;;  %s3591_s11 = smov [#allocation2]  }
  0x40   : > { %s231_s14 = sshll.u32 %s3591_s11, 4  ;;  %s3592_s15 = smov [#allocation6]   ;;  %s232_s14 = int_to_ptr.vmem [resolvable:$true] %s231_s14 }
  0x41   : > { %s4498_s29 = smov (%p31_p6, %s30_s29), 0  ;;  %s4500_s8 = smov (!%p31_p6, %s33_s8), %s3583_s27 }
  0x42   : > { %s252_s16 = sshll.u32 %s3592_s15, 4  ;;  %s4489_s1 = sld [smem:[#allocation16_spill]]  ;;  %s253_s16 = int_to_ptr.vmem [resolvable:$true] %s252_s16 }
  0x48   : > { %s3421_s20 = scalar_lea.hbm %s4489_s1, 32 }
  0x49   : > { %p3422_p9 = scmp.ne.s32.totalorder %s4489_s1, %s3421_s20  ;;  %p3428_p10 = scmp.lt.u32.totalorder %s3421_s20, %s4489_s1 }
  0x4b   : > { %p3424_p2 = pnand %p3422_p9, %p3697_p7 }
  0x4d   : > { %p3425_p3 = pneg %p3424_p2 }
  0x4f   : > { %p3430_p11 = pnand %p3428_p10, %p3425_p3 }
  0x51   : > { %3433 = shalt.err (!%p3430_p11)
}
  0x52   : > { %s3434_s23 = scalar_lea.vmem %s232_s14, 32  ;;  %p3442_p1 = scmp.lt.s32.totalorder %s232_s14, %s232_s14 }
  0x53   : > { %p3435_p12 = scmp.ne.s32.totalorder %s232_s14, %s3434_s23  ;;  %p3443_p4 = scmp.lt.s32.totalorder %s3434_s23, %s3434_s23 }
  0x55   : > { %p3437_p13 = pnand %p3435_p12, %p3697_p7  ;;  %p3444_p6 = por %p3443_p4, %p3442_p1 }
  0x57   : > { %p3438_p0 = pneg %p3437_p13 }
  0x59   : > { %p3445_p8 = pnand %p3444_p6, %p3438_p0 }
  0x5b   : > { %3448 = shalt.err (!%p3445_p8)
}
  0x5c   : > { %3278 = dma.hbm_to_vmem [thread:$0]  (!%p3685_p5), %s4489_s1, 32, %s232_s14, [#allocation3]  }
  0x5d   : > { %p4490_p9 = scmp.ge.s32.totalorder %s4500_s8, 2  ;;  %s3449_s20 = scalar_lea.hbm %s4474_s3, 512 }
  0x5e   : > { %p3450_p2 = scmp.ne.s32.totalorder %s4474_s3, %s3449_s20  ;;  %p3456_p10 = scmp.lt.u32.totalorder %s3449_s20, %s4474_s3 }
  0x5f   : > { %s4502_s8 = smov (%p4490_p9, %s4500_s8), 0 }
  0x60   : > { %p3452_p8 = pnand %p3450_p2, %p3697_p7 }
  0x62   : > { %p3453_p3 = pneg %p3452_p8 }
  0x64   : > { %p3458_p11 = pnand %p3456_p10, %p3453_p3 }
  0x66   : > { %3461 = shalt.err (!%p3458_p11)
}
  0x67   : > { %s3462_s14 = scalar_lea.vmem %s253_s16, 512  ;;  %p3470_p1 = scmp.lt.s32.totalorder %s253_s16, %s253_s16 }
  0x68   : > { %p3463_p12 = scmp.ne.s32.totalorder %s253_s16, %s3462_s14  ;;  %p3471_p4 = scmp.lt.s32.totalorder %s3462_s14, %s3462_s14 }
  0x6a   : > { %p3465_p13 = pnand %p3463_p12, %p3697_p7  ;;  %p3472_p6 = por %p3471_p4, %p3470_p1 }
  0x6c   : > { %p3466_p0 = pneg %p3465_p13 }
  0x6e   : > { %p3473_p9 = pnand %p3472_p6, %p3466_p0 }
  0x70   : > { %3476 = shalt.err (!%p3473_p9)
}
  0x71   : > { %s3593_s23 = smov 64   ;;  %s3594_s11 = smov 4  }
  0x72   : > { %3284 = dma.hbm_to_vmem [thread:$0]  (!%p3685_p5), %s4474_s3, 512, %s253_s16, [#allocation5], %s3593_s23, %s3593_s23, %s3594_s11  }
  0x73   : > { %s3595_s18 = smov [#allocation9]   ;;  %s3477_s12 = scalar_lea.hbm %s4476_s5, 8192 }
  0x74   : > { %s276_s20 = sshll.u32 %s3595_s18, 4  ;;  %p3478_p2 = scmp.ne.s32.totalorder %s4476_s5, %s3477_s12  ;;  %s277_s20 = int_to_ptr.vmem [resolvable:$true] %s276_s20 }
  0x75   : > { %p3484_p10 = scmp.lt.u32.totalorder %s3477_s12, %s4476_s5 }
  0x76   : > { %p3480_p8 = pnand %p3478_p2, %p3697_p7 }
  0x78   : > { %p3481_p3 = pneg %p3480_p8 }
  0x7a   : > { %p3486_p11 = pnand %p3484_p10, %p3481_p3 }
  0x7c   : > { %3489 = shalt.err (!%p3486_p11)
}
  0x7d   : > { %s3490_s16 = scalar_lea.vmem %s277_s20, 8192  ;;  %p3498_p1 = scmp.lt.s32.totalorder %s277_s20, %s277_s20 }
  0x7e   : > { %p3491_p12 = scmp.ne.s32.totalorder %s277_s20, %s3490_s16  ;;  %p3499_p4 = scmp.lt.s32.totalorder %s3490_s16, %s3490_s16 }
  0x80   : > { %p3493_p13 = pnand %p3491_p12, %p3697_p7  ;;  %p3500_p6 = por %p3499_p4, %p3498_p1 }
  0x82   : > { %p3494_p0 = pneg %p3493_p13 }
  0x84   : > { %p3501_p9 = pnand %p3500_p6, %p3494_p0 }
  0x86   : > { %3504 = shalt.err (!%p3501_p9)
}
  0x87   : > { %s3596_s23 = smov 512   ;;  %s3597_s11 = smov 32  }
  0x88   : > { %3290 = dma.hbm_to_vmem [thread:$0]  (!%p3685_p5), %s4476_s5, 8192, %s277_s20, [#allocation8], %s3596_s23, %s3596_s23, %s3597_s11  }
  0x89   : > { %s3598_s15 = smov [#allocation10]   ;;  %s3505_s21 = scalar_lea.hbm %s4477_s6, 128 }
  0x8a   : > { %s290_s17 = sshll.u32 %s3598_s15, 4  ;;  %p3506_p2 = scmp.ne.s32.totalorder %s4477_s6, %s3505_s21  ;;  %s291_s17 = int_to_ptr.vmem [resolvable:$true] %s290_s17 }
  0x8b   : > { %p3512_p10 = scmp.lt.u32.totalorder %s3505_s21, %s4477_s6 }
  0x8c   : > { %p3508_p8 = pnand %p3506_p2, %p3697_p7 }
  0x8e   : > { %p3509_p3 = pneg %p3508_p8 }
  0x90   : > { %p3514_p11 = pnand %p3512_p10, %p3509_p3 }
  0x92   : > { %3517 = shalt.err (!%p3514_p11)
}
  0x93   : > { %s3518_s20 = scalar_lea.vmem %s291_s17, 128  ;;  %p3526_p1 = scmp.lt.s32.totalorder %s291_s17, %s291_s17 }
  0x94   : > { %p3519_p12 = scmp.ne.s32.totalorder %s291_s17, %s3518_s20  ;;  %p3527_p4 = scmp.lt.s32.totalorder %s3518_s20, %s3518_s20 }
  0x96   : > { %p3521_p13 = pnand %p3519_p12, %p3697_p7  ;;  %p3528_p6 = por %p3527_p4, %p3526_p1 }
  0x98   : > { %p3522_p0 = pneg %p3521_p13 }
  0x9a   : > { %p3529_p9 = pnand %p3528_p6, %p3522_p0 }
  0x9c   : > { %3532 = shalt.err (!%p3529_p9)
}
  0x9d   : > { %3293 = dma.hbm_to_vmem [thread:$0]  (!%p3685_p5), %s4477_s6, 128, %s291_s17, [#allocation11]  }
  0x9e   : > { %p4491_p2 = scmp.ne.s32.totalorder %s4485_s10, 0 }
  0x9f   : > { %p4492_p8 = scmp.ne.s32.totalorder (!%p4491_p2), %s4484_s9, 0 }
  0xa0   : > { %316 = sbr.rel (%p4491_p2) target bundleno = 1139 (0x473), region = 48 }
  0xa7   : > { %3554 = dma.done.wait (%p4492_p8), [#allocation3], 32  }
  0xa8   : > { %3556 = vsyncadd (%p4492_p8), [#allocation3], 4294967264 }
  0xa9   : > { %3558 = dma.done.wait (%p4492_p8), [#allocation5], 528  }
  0xaa   : > { %3560 = vsyncadd (%p4492_p8), [#allocation5], 4294966768 }
  0xab   : > { %3562 = dma.done.wait (%p4492_p8), [#allocation8], 8208  }
  0xac   : > { %3564 = vsyncadd (%p4492_p8), [#allocation8], 4294959088 }
  0xad   : > { %3566 = dma.done.wait (%p4492_p8), [#allocation11], 128  }
  0xae   : > { %3568 = vsyncadd (%p4492_p8), [#allocation11], 4294967168  ;;  %vm491_vm0 = vcmask 1040384   ;;  %s3030_s10 = sshll.u32 %s3571_s24, 5  ;;  %p372_p5 = scmp.lt.s32.totalorder %s3575_s25, 1  ;;  %vm492_vm1 = vcmask 1041408  }
  0xaf   : > { %p374_p7 = scmp.lt.s32.totalorder %s3030_s10, 63  ;;  %v3599_v0 = vmov 65535   ;;  %v418_v3 = vld [vmem:[#allocation2] sm:$0x3]  ;;  %v3360_v4 = vld [vmem:[#allocation6] sm:$0xff]   ;;  %vm442_vm2 = vcmask 23552  }
  0xb0   : > { %v493_v1 = vsel %vm491_vm0, 4294967295, %v3599_v0  ;;  %s4504_s25 = smov (!%p372_p5, %s3575_s25), 1  ;;  %3211 = vmatprep.subr.bf16.mxu1 %v3360_v4  ;;  %v3361_v21 = vld [vmem:[#allocation6 + $0x8] sm:$0xff]   ;;  %v3362_v55 = vld [vmem:[#allocation6 + $0x10] sm:$0xff]   ;;  %v3363_v56 = vld [vmem:[#allocation6 + $0x18] sm:$0xff]   ;;  %vm746_vm3 = vcmask 523264  }
  0xb1   : > { %s4506_s10 = smov (!%p374_p7, %s3030_s10), 63  ;;  %v494_v2 = vsel %vm492_vm1, %v493_v1, 0  ;;  %s3031_s13 = sshll.u32 %s4504_s25, 6  ;;  %3212 = vmatpush3.bf16.msra.mxu1 %v3360_v4  ;;  %v988_v57 = vld [vmem:[#allocation9] sm:$0xff]  ;;  %v3896_v59 = vld [vmem:[#allocation9 + $0x8] sm:$0xff] }
  0xb2   : > { %s3033_s19 = sshll.u32 %s4504_s25, 3  ;;  %s377_s1 = sadd.s32 %s3031_s13, %s4506_s10  ;;  %v496_v5 = vand.u32 %v494_v2, %v418_v3  ;;  %3213 = vmatprep.subr.bf16.mxu1 %v3361_v21  ;;  %v992_v58 = vld [vmem:[#allocation9 + $0x20] sm:$0xff]  ;;  %v3898_v62 = vld [vmem:[#allocation9 + $0x28] sm:$0xff] }
  0xb3   : > { %s3841_s9 = scalar_lea.vmem %s4478_s7, %s3033_s19  ;;  %s3032_s17 = sshll.u32 %s377_s1, 3  ;;  %v3072_v60 = vcombine.low %v988_v57, %v992_v58  ;;  %v3073_v61 = vcombine.high %v988_v57, %v992_v58  ;;  %v996_v63 = vld [vmem:[#allocation9 + $0x40] sm:$0xff]  ;;  %v3074_v1 = vcombine.low %v3896_v59, %v3898_v62  ;;  %v3075_v2 = vcombine.high %v3896_v59, %v3898_v62 }
  0xb4   : > { %s3846_s21 = scalar_lea.vmem %s4471_s0, %s3032_s17  ;;  %3177 = vmatprep.subr.bf16.mxu0 %v496_v5  ;;  %v1000_v0 = vld [vmem:[#allocation9 + $0x60] sm:$0xff]  ;;  %p3136_p3 = scmp.ne.s32.totalorder %s3571_s24, 0 }
  0xb5   : > { %v386_v6 = vld [vmem:[%s3846_s21] sm:$0xff]  ;;  %v387_v7 = vld [vmem:[%s3846_s21 + $0x8] sm:$0xff]  ;;  %v388_v8 = vld [vmem:[%s3846_s21 + $0x10] sm:$0xff]  ;;  %3178 = vmatpush3.bf16.msra.mxu0 %v496_v5  ;;  %3214 = vmatpush3.bf16.msra.mxu1 %v3361_v21  ;;  %v3081_v3 = vcombine.high %v996_v63, %v1000_v0 }
  0xb6   : > { %v419_v9 = vpack.c.bf16 %v387_v7, %v386_v6  ;;  %v389_v10 = vld [vmem:[%s3846_s21 + $0x18] sm:$0xff]  ;;  %v390_v11 = vld [vmem:[%s3846_s21 + $0x20] sm:$0xff]  ;;  %v391_v12 = vld [vmem:[%s3846_s21 + $0x28] sm:$0xff]  ;;  %3215 = vmatprep.subr.bf16.mxu1 %v3362_v55  ;;  %1430 = vmatprep.subr.bf16.mxu0 %v3073_v61  ;;  %v3080_v6 = vcombine.low %v996_v63, %v1000_v0 }
  0xb7   : > { %v420_v13 = vpack.c.bf16 %v389_v10, %v388_v8  ;;  %v421_v14 = vpack.c.bf16 %v391_v12, %v390_v11  ;;  %v392_v15 = vld [vmem:[%s3846_s21 + $0x30] sm:$0xff]  ;;  %v393_v16 = vld [vmem:[%s3846_s21 + $0x38] sm:$0xff]  ;;  %v394_v17 = vld [vmem:[%s3846_s21 + $0x40] sm:$0xff] }
  0xb8   : > { %3179 = vmatprep.mubr.msk.bf16.mxu0 %vm442_vm2, %v419_v9  ;;  %v395_v18 = vld [vmem:[%s3846_s21 + $0x48] sm:$0xff]  ;;  %v422_v19 = vpack.c.bf16 %v393_v16, %v392_v15  ;;  %v396_v22 = vld [vmem:[%s3846_s21 + $0x50] sm:$0xff]  ;;  %v397_v23 = vld [vmem:[%s3846_s21 + $0x58] sm:$0xff] }
  0xb9   : > { %3180 = vmatmul.mubr.msk.bf16.vlgmr.msra.gmra.mrb[0].mxu0 %vm442_vm2, %v420_v13  ;;  %v423_v20 = vpack.c.bf16 %v395_v18, %v394_v17  ;;  %v398_v24 = vld [vmem:[%s3846_s21 + $0x60] sm:$0xff]  ;;  %v399_v25 = vld [vmem:[%s3846_s21 + $0x68] sm:$0xff]  ;;  %v424_v26 = vpack.c.bf16 %v397_v23, %v396_v22  ;;  %v400_v28 = vld [vmem:[%s3846_s21 + $0x70] sm:$0xff]  ;;  %3216 = vmatpush3.bf16.msra.mxu1 %v3362_v55 }
  0xba   : > { %3183 = vmatprep.mubr.msk.bf16.mxu0 %vm442_vm2, %v421_v14  ;;  %v425_v27 = vpack.c.bf16 %v399_v25, %v398_v24  ;;  %v401_v29 = vld [vmem:[%s3846_s21 + $0x78] sm:$0xff]  ;;  %v402_v30 = vld [vmem:[%s3846_s21 + $0x80] sm:$0xff]  ;;  %v403_v31 = vld [vmem:[%s3846_s21 + $0x88] sm:$0xff]  ;;  %3217 = vmatprep.subr.bf16.mxu1 %v3363_v56 }
  0xbb   : > { %v426_v32 = vpack.c.bf16 %v401_v29, %v400_v28  ;;  %v427_v33 = vpack.c.bf16 %v403_v31, %v402_v30  ;;  %v404_v34 = vld [vmem:[%s3846_s21 + $0x90] sm:$0xff]  ;;  %v405_v35 = vld [vmem:[%s3846_s21 + $0x98] sm:$0xff]  ;;  %v406_v36 = vld [vmem:[%s3846_s21 + $0xa0] sm:$0xff]  ;;  %1431 = vmatpush1.bf16.msra.mxu0 %v3072_v60 }
  0xbc   : > { %v407_v37 = vld [vmem:[%s3846_s21 + $0xa8] sm:$0xff]  ;;  %v428_v38 = vpack.c.bf16 %v405_v35, %v404_v34  ;;  %v408_v40 = vld [vmem:[%s3846_s21 + $0xb0] sm:$0xff]  ;;  %v409_v41 = vld [vmem:[%s3846_s21 + $0xb8] sm:$0xff]  ;;  %1432 = vmatprep.subr.bf16.mxu0 %v3081_v3 }
  0xbd   : > { %v429_v39 = vpack.c.bf16 %v407_v37, %v406_v36  ;;  %v410_v42 = vld [vmem:[%s3846_s21 + $0xc0] sm:$0xff]  ;;  %v411_v43 = vld [vmem:[%s3846_s21 + $0xc8] sm:$0xff]  ;;  %v430_v44 = vpack.c.bf16 %v409_v41, %v408_v40  ;;  %v412_v46 = vld [vmem:[%s3846_s21 + $0xd0] sm:$0xff]  ;;  %3218 = vmatpush3.bf16.msra.mxu1 %v3363_v56 }
  0xbe   : > { %v431_v45 = vpack.c.bf16 %v411_v43, %v410_v42  ;;  %v413_v47 = vld [vmem:[%s3846_s21 + $0xd8] sm:$0xff]  ;;  %v414_v48 = vld [vmem:[%s3846_s21 + $0xe0] sm:$0xff]  ;;  %v415_v49 = vld [vmem:[%s3846_s21 + $0xe8] sm:$0xff]  ;;  %1623 = vmatprep.subr.bf16.mxu1 %v3075_v2 }
  0xbf   : > { %v432_v50 = vpack.c.bf16 %v413_v47, %v412_v46  ;;  %v433_v51 = vpack.c.bf16 %v415_v49, %v414_v48  ;;  %v416_v52 = vld [vmem:[%s3846_s21 + $0xf0] sm:$0xff]  ;;  %v417_v53 = vld [vmem:[%s3846_s21 + $0xf8] sm:$0xff]  ;;  %v1004_v4 = vld [vmem:[#allocation9 + $0x80] sm:$0xff]  ;;  %1433 = vmatpush1.bf16.msra.mxu0 %v3080_v6 }
  0xc0   : > { %v434_v54 = vpack.c.bf16 %v417_v53, %v416_v52  ;;  %v1008_v5 = vld [vmem:[#allocation9 + $0xa0] sm:$0xff]  ;;  %v3904_v25 = vld [vmem:[#allocation4] ss:$0 sm:$0xff]  ;;  %v1005_v48 = vld [vmem:[#allocation9 + $0x88] sm:$0xff] }
  0xc1   : > { %3184 = vmatmul.mubr.msk.bf16.gmra.mrb[4].mxu0 %vm442_vm2, %v422_v19  ;;  %v3089_v7 = vcombine.high %v1004_v4, %v1008_v5  ;;  %v1012_v8 = vld [vmem:[#allocation9 + $0xc0] sm:$0xff]  ;;  %v3088_v10 = vcombine.low %v1004_v4, %v1008_v5  ;;  %v1009_v49 = vld [vmem:[#allocation9 + $0xa8] sm:$0xff] }
  0xc2   : > { %3187 = vmatprep.mubr.msk.bf16.mxu0 %vm442_vm2, %v423_v20  ;;  %v1016_v9 = vld [vmem:[#allocation9 + $0xe0] sm:$0xff]  ;;  %v3091_v57 = vcombine.high %v1005_v48, %v1009_v49  ;;  %v1013_v60 = vld [vmem:[#allocation9 + $0xc8] sm:$0xff]  ;;  %v3090_v3 = vcombine.low %v1005_v48, %v1009_v49 }
  0xc3   : > { %1434 = vmatprep.subr.bf16.mxu0 %v3089_v7  ;;  %v3097_v11 = vcombine.high %v1012_v8, %v1016_v9  ;;  %v1020_v12 = vld [vmem:[#allocation9 + $0x100] sm:$0xff]  ;;  %v3096_v14 = vcombine.low %v1012_v8, %v1016_v9  ;;  %v1017_v61 = vld [vmem:[#allocation9 + $0xe8] sm:$0xff] }
  0xc4   : > { %v1024_v13 = vld [vmem:[#allocation9 + $0x120] sm:$0xff]  ;;  %1435 = vmatpush1.bf16.msra.mxu0 %v3088_v10  ;;  %v3099_v6 = vcombine.high %v1013_v60, %v1017_v61  ;;  %v1025_v7 = vld [vmem:[#allocation9 + $0x128] sm:$0xff] }
  0xc5   : > { %1436 = vmatprep.subr.bf16.mxu0 %v3097_v11  ;;  %v3105_v15 = vcombine.high %v1020_v12, %v1024_v13  ;;  %v1028_v16 = vld [vmem:[#allocation9 + $0x140] sm:$0xff]  ;;  %v3104_v18 = vcombine.low %v1020_v12, %v1024_v13  ;;  %v3098_v13 = vcombine.low %v1013_v60, %v1017_v61 }
  0xc6   : > { %v1032_v17 = vld [vmem:[#allocation9 + $0x160] sm:$0xff] }
  0xc7   : > { %v3113_v19 = vcombine.high %v1028_v16, %v1032_v17  ;;  %v1036_v20 = vld [vmem:[#allocation9 + $0x180] sm:$0xff]  ;;  %v3112_v22 = vcombine.low %v1028_v16, %v1032_v17  ;;  %v1029_v17 = vld [vmem:[#allocation9 + $0x148] sm:$0xff] }
  0xc8   : > { %1437 = vmatpush1.bf16.msra.mxu0 %v3096_v14  ;;  %v1040_v21 = vld [vmem:[#allocation9 + $0x1a0] sm:$0xff] }
  0xc9   : > { %3188 = vmatmul.mubr.msk.bf16.gmra.mrb[8].mxu0 %vm442_vm2, %v424_v26  ;;  %1438 = vmatprep.subr.bf16.mxu0 %v3105_v15  ;;  %v3121_v23 = vcombine.high %v1036_v20, %v1040_v21  ;;  %v3120_v24 = vcombine.low %v1036_v20, %v1040_v21 }
  0xca   : > { %3191 = vmatprep.mubr.msk.bf16.mxu0 %vm442_vm2, %v425_v27 }
  0xcc   : > { %1439 = vmatpush1.bf16.msra.mxu0 %v3104_v18  ;;  %v1033_v18 = vld [vmem:[#allocation9 + $0x168] sm:$0xff] }
  0xcd   : > { %1440 = vmatprep.subr.bf16.mxu0 %v3113_v19 }
  0xd0   : > { %1441 = vmatpush1.bf16.msra.mxu0 %v3112_v22 }
  0xd1   : > { %3192 = vmatmul.mubr.msk.bf16.gmra.mrb[12].mxu0 %vm442_vm2, %v426_v32  ;;  %1442 = vmatprep.subr.bf16.mxu0 %v3121_v23 }
  0xd2   : > { %3195 = vmatprep.mubr.msk.bf16.mxu0 %vm442_vm2, %v427_v33 }
  0xd4   : > { %1443 = vmatpush1.bf16.msra.mxu0 %v3120_v24 }
  0xd9   : > { %3196 = vmatmul.mubr.msk.bf16.gmra.mrb[16].mxu0 %vm442_vm2, %v428_v38  ;;  %v997_v38 = vld [vmem:[#allocation9 + $0x48] sm:$0xff] }
  0xda   : > { %3199 = vmatprep.mubr.msk.bf16.mxu0 %vm442_vm2, %v429_v39  ;;  %v1001_v39 = vld [vmem:[#allocation9 + $0x68] sm:$0xff] }
  0xdb   : > { %v3082_v55 = vcombine.low %v997_v38, %v1001_v39 }
  0xe1   : > { %3200 = vmatmul.mubr.msk.bf16.gmra.mrb[20].mxu0 %vm442_vm2, %v430_v44 }
  0xe2   : > { %3203 = vmatprep.mubr.msk.bf16.mxu0 %vm442_vm2, %v431_v45  ;;  %v3083_v45 = vcombine.high %v997_v38, %v1001_v39 }
  0xe9   : > { %3204 = vmatmul.mubr.msk.bf16.gmra.mrb[24].mxu0 %vm442_vm2, %v432_v50 }
  0xea   : > { %3207 = vmatprep.mubr.msk.bf16.mxu0 %vm442_vm2, %v433_v51 }
  0xf1   : > { %3208 = vmatmul.mubr.msk.bf16.gmra.mrb[28].mxu0 %vm442_vm2, %v434_v54 }
 0x18c   : > { %v3181_v26 = vpop.f32.mrb[0].mxu0 }
 0x18d   : > { %v541_v27 = vadd.f32 %v3181_v26, %v3904_v25  ;;  %v532_v28 = vpop.f32.mrb[1].mxu0  ;;  %v3115_v26 = vcombine.high %v1029_v17, %v1033_v18 }
 0x18e   : > { %v533_v29 = vadd.f32 %v3904_v25, %v532_v28  ;;  %v3182_v30 = vpop.f32.mrb[2].mxu0 }
 0x18f   : > { %v544_v31 = vadd.f32 %v3182_v30, %v3904_v25  ;;  %v535_v32 = vpop.f32.mrb[3].mxu0  ;;  %v661_v34 = vmax.f32 %v541_v27, 0.0  ;;  %v1041_v30 = vld [vmem:[#allocation9 + $0x1a8] sm:$0xff] }
 0x190   : > { %v536_v33 = vadd.f32 %v3904_v25, %v535_v32  ;;  %v659_v36 = vmax.f32 %v533_v29, 0.0  ;;  %v1037_v29 = vld [vmem:[#allocation9 + $0x188] sm:$0xff] }
 0x191   : > { %v662_v35 = vmax.f32 %v544_v31, 0.0  ;;  %v3123_v38 = vcombine.high %v1037_v29, %v1041_v30 }
 0x192   : > { %v660_v37 = vmax.f32 %v536_v33, 0.0 }
 0x193   : > { %v700_v40 = vpack.c.bf16 %v662_v35, %v661_v34 }
 0x194   : > { %v3185_v41 = vpop.f32.mrb[4].mxu0  ;;  %v699_v42 = vpack.c.bf16 %v660_v37, %v659_v36  ;;  %v3114_v36 = vcombine.low %v1029_v17, %v1033_v18 }
 0x195   : > { %v557_v43 = vadd.f32 %v3185_v41, %v3904_v25  ;;  %v548_v44 = vpop.f32.mrb[5].mxu0 }
 0x196   : > { %v549_v46 = vadd.f32 %v3904_v25, %v548_v44  ;;  %3219 = vmatprep.mubr.msk.bf16.mxu1 %vm746_vm3, %v699_v42  ;;  %v3186_v47 = vpop.f32.mrb[6].mxu0 }
 0x197   : > { %v665_v50 = vmax.f32 %v557_v43, 0.0  ;;  %v560_v51 = vadd.f32 %v3186_v47, %v3904_v25  ;;  %3220 = vmatmul.mubr.msk.bf16.vlgmr.msra.gmra.mrb[0].mxu1 %vm746_vm3, %v700_v40  ;;  %v551_v52 = vpop.f32.mrb[7].mxu0  ;;  %v3122_v43 = vcombine.low %v1037_v29, %v1041_v30 }
 0x198   : > { %v663_v53 = vmax.f32 %v549_v46, 0.0  ;;  %v552_v54 = vadd.f32 %v3904_v25, %v551_v52  ;;  %1624 = vmatpush1.bf16.msra.mxu1 %v3074_v1  ;;  %v1021_v1 = vld [vmem:[#allocation9 + $0x108] sm:$0xff] }
 0x199   : > { %v666_v56 = vmax.f32 %v560_v51, 0.0  ;;  %1625 = vmatprep.subr.bf16.mxu1 %v3083_v45  ;;  %v3107_v15 = vcombine.high %v1021_v1, %v1025_v7  ;;  %v3106_v22 = vcombine.low %v1021_v1, %v1025_v7 }
 0x19a   : > { %v664_v58 = vmax.f32 %v552_v54, 0.0 }
 0x19b   : > { %v702_v63 = vpack.c.bf16 %v666_v56, %v665_v50 }
 0x19c   : > { %v701_v0 = vpack.c.bf16 %v664_v58, %v663_v53  ;;  %v3189_v2 = vpop.f32.mrb[8].mxu0  ;;  %1626 = vmatpush1.bf16.msra.mxu1 %v3082_v55 }
 0x19d   : > { %v573_v4 = vadd.f32 %v3189_v2, %v3904_v25  ;;  %v564_v5 = vpop.f32.mrb[9].mxu0  ;;  %1627 = vmatprep.subr.bf16.mxu1 %v3091_v57 }
 0x19e   : > { %3223 = vmatprep.mubr.msk.bf16.mxu1 %vm746_vm3, %v701_v0  ;;  %v565_v59 = vadd.f32 %v3904_v25, %v564_v5  ;;  %v3190_v62 = vpop.f32.mrb[10].mxu0 }
 0x19f   : > { %3224 = vmatmul.mubr.msk.bf16.gmra.mrb[4].mxu1 %vm746_vm3, %v702_v63  ;;  %v669_v8 = vmax.f32 %v573_v4, 0.0  ;;  %v576_v9 = vadd.f32 %v3190_v62, %v3904_v25  ;;  %v567_v10 = vpop.f32.mrb[11].mxu0 }
 0x1a0   : > { %v667_v11 = vmax.f32 %v565_v59, 0.0  ;;  %v568_v12 = vadd.f32 %v3904_v25, %v567_v10  ;;  %1628 = vmatpush1.bf16.msra.mxu1 %v3090_v3 }
 0x1a1   : > { %v670_v14 = vmax.f32 %v576_v9, 0.0  ;;  %1629 = vmatprep.subr.bf16.mxu1 %v3099_v6 }
 0x1a2   : > { %v668_v16 = vmax.f32 %v568_v12, 0.0 }
 0x1a3   : > { %v704_v19 = vpack.c.bf16 %v670_v14, %v669_v8 }
 0x1a4   : > { %v703_v20 = vpack.c.bf16 %v668_v16, %v667_v11  ;;  %v3193_v21 = vpop.f32.mrb[12].mxu0  ;;  %1630 = vmatpush1.bf16.msra.mxu1 %v3098_v13 }
 0x1a5   : > { %v589_v23 = vadd.f32 %v3193_v21, %v3904_v25  ;;  %v580_v24 = vpop.f32.mrb[13].mxu0  ;;  %1631 = vmatprep.subr.bf16.mxu1 %v3107_v15 }
 0x1a6   : > { %3227 = vmatprep.mubr.msk.bf16.mxu1 %vm746_vm3, %v703_v20  ;;  %v581_v27 = vadd.f32 %v3904_v25, %v580_v24  ;;  %v3194_v28 = vpop.f32.mrb[14].mxu0 }
 0x1a7   : > { %3228 = vmatmul.mubr.msk.bf16.gmra.mrb[8].mxu1 %vm746_vm3, %v704_v19  ;;  %v673_v31 = vmax.f32 %v589_v23, 0.0  ;;  %v592_v32 = vadd.f32 %v3194_v28, %v3904_v25  ;;  %v583_v33 = vpop.f32.mrb[15].mxu0 }
 0x1a8   : > { %v671_v34 = vmax.f32 %v581_v27, 0.0  ;;  %v584_v35 = vadd.f32 %v3904_v25, %v583_v33  ;;  %1632 = vmatpush1.bf16.msra.mxu1 %v3106_v22 }
 0x1a9   : > { %v674_v37 = vmax.f32 %v592_v32, 0.0  ;;  %1633 = vmatprep.subr.bf16.mxu1 %v3115_v26 }
 0x1aa   : > { %v672_v39 = vmax.f32 %v584_v35, 0.0 }
 0x1ab   : > { %v706_v40 = vpack.c.bf16 %v674_v37, %v673_v31  ;;  %v1048_v37 = vld [vmem:[#allocation9 + $0x1e0] sm:$0xff] }
 0x1ac   : > { %v705_v41 = vpack.c.bf16 %v672_v39, %v671_v34  ;;  %v3197_v42 = vpop.f32.mrb[16].mxu0  ;;  %1634 = vmatpush1.bf16.msra.mxu1 %v3114_v36  ;;  %v1044_v36 = vld [vmem:[#allocation9 + $0x1c0] sm:$0xff] }
 0x1ad   : > { %v605_v44 = vadd.f32 %v3197_v42, %v3904_v25  ;;  %v596_v45 = vpop.f32.mrb[17].mxu0  ;;  %1635 = vmatprep.subr.bf16.mxu1 %v3123_v38  ;;  %v1045_v38 = vld [vmem:[#allocation9 + $0x1c8] sm:$0xff]  ;;  %v3128_v39 = vcombine.low %v1044_v36, %v1048_v37 }
 0x1ae   : > { %3231 = vmatprep.mubr.msk.bf16.mxu1 %vm746_vm3, %v705_v41  ;;  %v597_v46 = vadd.f32 %v3904_v25, %v596_v45  ;;  %v3198_v47 = vpop.f32.mrb[18].mxu0  ;;  %v1049_v41 = vld [vmem:[#allocation9 + $0x1e8] sm:$0xff]  ;;  %v994_v45 = vld [vmem:[#allocation9 + $0x30] sm:$0xff] }
 0x1af   : > { %3232 = vmatmul.mubr.msk.bf16.gmra.mrb[12].mxu1 %vm746_vm3, %v706_v40  ;;  %v677_v48 = vmax.f32 %v605_v44, 0.0  ;;  %v608_v49 = vadd.f32 %v3198_v47, %v3904_v25  ;;  %v599_v50 = vpop.f32.mrb[19].mxu0  ;;  %v3129_v40 = vcombine.high %v1044_v36, %v1048_v37  ;;  %v3130_v42 = vcombine.low %v1045_v38, %v1049_v41  ;;  %v990_v44 = vld [vmem:[#allocation9 + $0x10] sm:$0xff] }
 0x1b0   : > { %v675_v51 = vmax.f32 %v597_v46, 0.0  ;;  %v600_v52 = vadd.f32 %v3904_v25, %v599_v50  ;;  %1636 = vmatpush1.bf16.msra.mxu1 %v3122_v43  ;;  %v3131_v43 = vcombine.high %v1045_v38, %v1049_v41  ;;  %v991_v46 = vld [vmem:[#allocation9 + $0x18] sm:$0xff]  ;;  %v3076_v47 = vcombine.low %v990_v44, %v994_v45 }
 0x1b1   : > { %v678_v53 = vmax.f32 %v608_v49, 0.0  ;;  %1444 = vmatprep.subr.bf16.mxu0 %v3129_v40  ;;  %v995_v49 = vld [vmem:[#allocation9 + $0x38] sm:$0xff] }
 0x1b2   : > { %v676_v54 = vmax.f32 %v600_v52, 0.0  ;;  %1637 = vmatprep.subr.bf16.mxu1 %v3131_v43  ;;  %1445 = vmatpush1.bf16.msra.mxu0 %v3128_v39  ;;  %v3078_v50 = vcombine.low %v991_v46, %v995_v49  ;;  %v3959_v52 = vld [vmem:[#allocation7] ss:$0 sm:$0xff]  ;;  %v1022_v43 = vld [vmem:[#allocation9 + $0x110] sm:$0xff] }
 0x1b3   : > { %v708_v55 = vpack.c.bf16 %v678_v53, %v677_v48  ;;  %v3077_v48 = vcombine.high %v990_v44, %v994_v45 }
 0x1b4   : > { %v707_v56 = vpack.c.bf16 %v676_v54, %v675_v51  ;;  %v3201_v57 = vpop.f32.mrb[20].mxu0  ;;  %1638 = vmatpush1.bf16.msra.mxu1 %v3130_v42  ;;  %v3079_v51 = vcombine.high %v991_v46, %v995_v49  ;;  %v1026_v46 = vld [vmem:[#allocation9 + $0x130] sm:$0xff] }
 0x1b5   : > { %v621_v58 = vadd.f32 %v3201_v57, %v3904_v25  ;;  %v612_v60 = vpop.f32.mrb[21].mxu0  ;;  %1816 = vmatprep.subr.bf16.mxu0 %v3077_v48  ;;  %v1027_v48 = vld [vmem:[#allocation9 + $0x138] sm:$0xff] }
 0x1b6   : > { %3235 = vmatprep.mubr.msk.bf16.mxu1 %vm746_vm3, %v707_v56  ;;  %v613_v61 = vadd.f32 %v3904_v25, %v612_v60  ;;  %v3202_v63 = vpop.f32.mrb[22].mxu0  ;;  %2009 = vmatprep.subr.bf16.mxu1 %v3079_v51 }
 0x1b7   : > { %3236 = vmatmul.mubr.msk.bf16.gmra.mrb[16].mxu1 %vm746_vm3, %v708_v55  ;;  %v681_v0 = vmax.f32 %v621_v58, 0.0  ;;  %v624_v2 = vadd.f32 %v3202_v63, %v3904_v25  ;;  %v615_v3 = vpop.f32.mrb[23].mxu0 }
 0x1b8   : > { %v679_v4 = vmax.f32 %v613_v61, 0.0  ;;  %v616_v5 = vadd.f32 %v3904_v25, %v615_v3 }
 0x1b9   : > { %v682_v6 = vmax.f32 %v624_v2, 0.0  ;;  %v998_v2 = vld [vmem:[#allocation9 + $0x50] sm:$0xff] }
 0x1ba   : > { %v680_v59 = vmax.f32 %v616_v5, 0.0  ;;  %v1002_v5 = vld [vmem:[#allocation9 + $0x70] sm:$0xff] }
 0x1bb   : > { %v710_v62 = vpack.c.bf16 %v682_v6, %v681_v0  ;;  %v999_v6 = vld [vmem:[#allocation9 + $0x58] sm:$0xff] }
 0x1bc   : > { %v709_v1 = vpack.c.bf16 %v680_v59, %v679_v4  ;;  %v3205_v7 = vpop.f32.mrb[24].mxu0  ;;  %v1003_v59 = vld [vmem:[#allocation9 + $0x78] sm:$0xff] }
 0x1bd   : > { %v637_v8 = vadd.f32 %v3205_v7, %v3904_v25  ;;  %v628_v9 = vpop.f32.mrb[25].mxu0 }
 0x1be   : > { %3239 = vmatprep.mubr.msk.bf16.mxu1 %vm746_vm3, %v709_v1  ;;  %v629_v10 = vadd.f32 %v3904_v25, %v628_v9  ;;  %v3206_v11 = vpop.f32.mrb[26].mxu0 }
 0x1bf   : > { %3240 = vmatmul.mubr.msk.bf16.gmra.mrb[20].mxu1 %vm746_vm3, %v710_v62  ;;  %v685_v12 = vmax.f32 %v637_v8, 0.0  ;;  %v640_v13 = vadd.f32 %v3206_v11, %v3904_v25  ;;  %v631_v14 = vpop.f32.mrb[27].mxu0  ;;  %v1006_v8 = vld [vmem:[#allocation9 + $0x90] sm:$0xff]  ;;  %v3085_v11 = vcombine.high %v998_v2, %v1002_v5 }
 0x1c0   : > { %v683_v15 = vmax.f32 %v629_v10, 0.0  ;;  %v632_v16 = vadd.f32 %v3904_v25, %v631_v14  ;;  %v1007_v14 = vld [vmem:[#allocation9 + $0x98] sm:$0xff] }
 0x1c1   : > { %v686_v17 = vmax.f32 %v640_v13, 0.0  ;;  %v1010_v13 = vld [vmem:[#allocation9 + $0xb0] sm:$0xff] }
 0x1c2   : > { %v684_v18 = vmax.f32 %v632_v16, 0.0  ;;  %v3092_v37 = vcombine.low %v1006_v8, %v1010_v13 }
 0x1c3   : > { %v712_v19 = vpack.c.bf16 %v686_v17, %v685_v12  ;;  %v3087_v12 = vcombine.high %v999_v6, %v1003_v59 }
 0x1c4   : > { %v711_v20 = vpack.c.bf16 %v684_v18, %v683_v15  ;;  %v3209_v21 = vpop.f32.mrb[28].mxu0  ;;  %v1011_v15 = vld [vmem:[#allocation9 + $0xb8] sm:$0xff] }
 0x1c5   : > { %v653_v22 = vadd.f32 %v3209_v21, %v3904_v25  ;;  %v644_v23 = vpop.f32.mrb[29].mxu0  ;;  %v3084_v21 = vcombine.low %v998_v2, %v1002_v5  ;;  %v3094_v38 = vcombine.low %v1007_v14, %v1011_v15  ;;  %v1031_v2 = vld [vmem:[#allocation9 + $0x158] sm:$0xff] }
 0x1c6   : > { %3243 = vmatprep.mubr.msk.bf16.mxu1 %vm746_vm3, %v711_v20  ;;  %v645_v24 = vadd.f32 %v3904_v25, %v644_v23  ;;  %v3210_v26 = vpop.f32.mrb[30].mxu0 }
 0x1c7   : > { %3244 = vmatmul.mubr.msk.bf16.gmra.mrb[24].mxu1 %vm746_vm3, %v712_v19  ;;  %v689_v27 = vmax.f32 %v653_v22, 0.0  ;;  %v656_v28 = vadd.f32 %v3210_v26, %v3904_v25  ;;  %v647_v29 = vpop.f32.mrb[31].mxu0  ;;  %v3086_v22 = vcombine.low %v999_v6, %v1003_v59  ;;  %v3093_v26 = vcombine.high %v1006_v8, %v1010_v13 }
 0x1c8   : > { %v687_v30 = vmax.f32 %v645_v24, 0.0  ;;  %v648_v31 = vadd.f32 %v3904_v25, %v647_v29  ;;  %v3600_v25 = vmov 0   ;;  %v1014_v29 = vld [vmem:[#allocation9 + $0xd0] sm:$0xff]  ;;  %v3108_v59 = vcombine.low %v1022_v43, %v1026_v46 }
 0x1c9   : > { %v690_v32 = vmax.f32 %v656_v28, 0.0  ;;  %1462 = vmatprep.mubr.bf16.mxu0 %v3600_v25 }
 0x1ca   : > { %v688_v33 = vmax.f32 %v648_v31, 0.0  ;;  %v1018_v31 = vld [vmem:[#allocation9 + $0xf0] sm:$0xff] }
 0x1cb   : > { %v714_v34 = vpack.c.bf16 %v690_v32, %v689_v27  ;;  %v3095_v27 = vcombine.high %v1007_v14, %v1011_v15  ;;  %v1015_v32 = vld [vmem:[#allocation9 + $0xd8] sm:$0xff]  ;;  %v3101_v41 = vcombine.high %v1014_v29, %v1018_v31  ;;  %v1042_v15 = vld [vmem:[#allocation9 + $0x1b0] sm:$0xff] }
 0x1cc   : > { %v713_v35 = vpack.c.bf16 %v688_v33, %v687_v30  ;;  %v1019_v33 = vld [vmem:[#allocation9 + $0xf8] sm:$0xff] }
 0x1cd   : > { %v3103_v42 = vcombine.high %v1015_v32, %v1019_v33 }
 0x1ce   : > { %3247 = vmatprep.mubr.msk.bf16.mxu1 %vm746_vm3, %v713_v35 }
 0x1cf   : > { %3248 = vmatmul.mubr.msk.bf16.gmra.mrb[28].mxu1 %vm746_vm3, %v714_v34 }
 0x1d0   : > { %1655 = vmatprep.mubr.bf16.mxu1 %v3600_v25 }
 0x26a   : > { %v3221_v53 = vpop.f32.mrb[0].mxu1 }
 0x26b   : > { %v838_v54 = vadd.f32 %v3221_v53, %v3959_v52  ;;  %v829_v55 = vpop.f32.mrb[1].mxu1 }
 0x26c   : > { %v830_v56 = vadd.f32 %v3959_v52, %v829_v55  ;;  %v3222_v57 = vpop.f32.mrb[2].mxu1  ;;  %v3100_v55 = vcombine.low %v1014_v29, %v1018_v31  ;;  %v1046_v29 = vld [vmem:[#allocation9 + $0x1d0] sm:$0xff] }
 0x26d   : > { %v841_v58 = vadd.f32 %v3222_v57, %v3959_v52  ;;  %v832_v60 = vpop.f32.mrb[3].mxu1  ;;  %v958_v63 = vmax.f32 %v838_v54, 0.0  ;;  %v1050_v31 = vld [vmem:[#allocation9 + $0x1f0] sm:$0xff] }
 0x26e   : > { %v833_v61 = vadd.f32 %v3959_v52, %v832_v60  ;;  %v956_v3 = vmax.f32 %v830_v56, 0.0  ;;  %v3102_v56 = vcombine.low %v1015_v32, %v1019_v33  ;;  %v1047_v32 = vld [vmem:[#allocation9 + $0x1d8] sm:$0xff] }
 0x26f   : > { %v959_v0 = vmax.f32 %v841_v58, 0.0  ;;  %v3109_v58 = vcombine.high %v1022_v43, %v1026_v46  ;;  %v1051_v33 = vld [vmem:[#allocation9 + $0x1f8] sm:$0xff]  ;;  %v3133_v43 = vcombine.high %v1046_v29, %v1050_v31 }
 0x270   : > { %v957_v4 = vmax.f32 %v833_v61, 0.0  ;;  %v1030_v61 = vld [vmem:[#allocation9 + $0x150] sm:$0xff] }
 0x271   : > { %v3965_v62 = vpack.c.bf16 %v959_v0, %v958_v63  ;;  %v1034_v0 = vld [vmem:[#allocation9 + $0x170] sm:$0xff] }
 0x272   : > { %v3967_v1 = vpack.c.bf16 %v957_v4, %v956_v3  ;;  %v3225_v7 = vpop.f32.mrb[4].mxu1  ;;  %v1035_v3 = vld [vmem:[#allocation9 + $0x178] sm:$0xff] }
 0x273   : > { %v854_v9 = vadd.f32 %v3225_v7, %v3959_v52  ;;  %v845_v10 = vpop.f32.mrb[5].mxu1 }
 0x274   : > { %v846_v16 = vadd.f32 %v3959_v52, %v845_v10  ;;  %1463 = vmatmul.mubr.bf16.vlgmr.msra.gmra.mrb[32].mxu0 %v3967_v1  ;;  %1656 = vmatmul.mubr.bf16.vlgmr.msra.gmra.mrb[32].mxu1 %v3967_v1  ;;  %v3226_v17 = vpop.f32.mrb[6].mxu1  ;;  %v3117_v10 = vcombine.high %v1030_v61, %v1034_v0 }
 0x275   : > { %v962_v18 = vmax.f32 %v854_v9, 0.0  ;;  %1817 = vmatpush1.bf16.msra.mxu0 %v3076_v47  ;;  %2010 = vmatpush1.bf16.msra.mxu1 %v3078_v50  ;;  %v857_v19 = vadd.f32 %v3226_v17, %v3959_v52  ;;  %v848_v20 = vpop.f32.mrb[7].mxu1  ;;  %v1023_v47 = vld [vmem:[#allocation9 + $0x118] sm:$0xff] }
 0x276   : > { %v960_v23 = vmax.f32 %v846_v16, 0.0  ;;  %v849_v24 = vadd.f32 %v3959_v52, %v848_v20  ;;  %1472 = vmatprep.mubr.bf16.mxu0 %v3600_v25  ;;  %1665 = vmatprep.mubr.bf16.mxu1 %v3600_v25  ;;  %v3111_v60 = vcombine.high %v1023_v47, %v1027_v48  ;;  %v3110_v7 = vcombine.low %v1023_v47, %v1027_v48  ;;  %v1039_v16 = vld [vmem:[#allocation9 + $0x198] sm:$0xff] }
 0x277   : > { %v963_v28 = vmax.f32 %v857_v19, 0.0  ;;  %1818 = vmatprep.subr.bf16.mxu0 %v3085_v11  ;;  %2011 = vmatprep.subr.bf16.mxu1 %v3087_v12  ;;  %v3119_v11 = vcombine.high %v1031_v2, %v1035_v3  ;;  %v1038_v12 = vld [vmem:[#allocation9 + $0x190] sm:$0xff]  ;;  %v1043_v17 = vld [vmem:[#allocation9 + $0x1b8] sm:$0xff] }
 0x278   : > { %v961_v30 = vmax.f32 %v849_v24, 0.0  ;;  %v3118_v24 = vcombine.low %v1031_v2, %v1035_v3 }
 0x279   : > { %v3977_v34 = vpack.c.bf16 %v963_v28, %v962_v18  ;;  %1819 = vmatpush1.bf16.msra.mxu0 %v3084_v21  ;;  %2012 = vmatpush1.bf16.msra.mxu1 %v3086_v22  ;;  %v3127_v28 = vcombine.high %v1039_v16, %v1043_v17 }
 0x27a   : > { %v3979_v35 = vpack.c.bf16 %v961_v30, %v960_v23  ;;  %v3229_v36 = vpop.f32.mrb[8].mxu1  ;;  %1820 = vmatprep.subr.bf16.mxu0 %v3093_v26  ;;  %2013 = vmatprep.subr.bf16.mxu1 %v3095_v27  ;;  %v3116_v23 = vcombine.low %v1030_v61, %v1034_v0  ;;  %v3125_v27 = vcombine.high %v1038_v12, %v1042_v15 }
 0x27b   : > { %v870_v39 = vadd.f32 %v3229_v36, %v3959_v52  ;;  %v861_v40 = vpop.f32.mrb[9].mxu1 }
 0x27c   : > { %1473 = vmatmul.mubr.bf16.gmra.mrb[36].mxu0 %v3965_v62  ;;  %1666 = vmatmul.mubr.bf16.gmra.mrb[36].mxu1 %v3965_v62  ;;  %v862_v44 = vadd.f32 %v3959_v52, %v861_v40  ;;  %v3230_v45 = vpop.f32.mrb[10].mxu1  ;;  %v3126_v40 = vcombine.low %v1039_v16, %v1043_v17 }
 0x27d   : > { %v966_v49 = vmax.f32 %v870_v39, 0.0  ;;  %1482 = vmatprep.mubr.bf16.mxu0 %v3600_v25  ;;  %1675 = vmatprep.mubr.bf16.mxu1 %v3600_v25  ;;  %v873_v50 = vadd.f32 %v3230_v45, %v3959_v52  ;;  %v864_v51 = vpop.f32.mrb[11].mxu1  ;;  %v3124_v39 = vcombine.low %v1038_v12, %v1042_v15 }
 0x27e   : > { %v964_v53 = vmax.f32 %v862_v44, 0.0  ;;  %v865_v54 = vadd.f32 %v3959_v52, %v864_v51  ;;  %1821 = vmatpush1.bf16.msra.mxu0 %v3092_v37  ;;  %2014 = vmatpush1.bf16.msra.mxu1 %v3094_v38  ;;  %v3135_v44 = vcombine.high %v1047_v32, %v1051_v33 }
 0x27f   : > { %v967_v57 = vmax.f32 %v873_v50, 0.0  ;;  %1822 = vmatprep.subr.bf16.mxu0 %v3101_v41  ;;  %2015 = vmatprep.subr.bf16.mxu1 %v3103_v42 }
 0x280   : > { %v965_v63 = vmax.f32 %v865_v54, 0.0  ;;  %v3134_v54 = vcombine.low %v1047_v32, %v1051_v33 }
 0x281   : > { %v3989_v4 = vpack.c.bf16 %v967_v57, %v966_v49 }
 0x282   : > { %v3991_v5 = vpack.c.bf16 %v965_v63, %v964_v53  ;;  %v3233_v6 = vpop.f32.mrb[12].mxu1  ;;  %1823 = vmatpush1.bf16.msra.mxu0 %v3100_v55  ;;  %2016 = vmatpush1.bf16.msra.mxu1 %v3102_v56  ;;  %v3132_v53 = vcombine.low %v1046_v29, %v1050_v31 }
 0x283   : > { %v886_v8 = vadd.f32 %v3233_v6, %v3959_v52  ;;  %v877_v9 = vpop.f32.mrb[13].mxu1  ;;  %1824 = vmatprep.subr.bf16.mxu0 %v3109_v58  ;;  %2017 = vmatprep.subr.bf16.mxu1 %v3111_v60 }
 0x284   : > { %1483 = vmatmul.mubr.bf16.gmra.mrb[40].mxu0 %v3979_v35  ;;  %1676 = vmatmul.mubr.bf16.gmra.mrb[40].mxu1 %v3979_v35  ;;  %v878_v13 = vadd.f32 %v3959_v52, %v877_v9  ;;  %v3234_v14 = vpop.f32.mrb[14].mxu1 }
 0x285   : > { %1492 = vmatprep.mubr.bf16.mxu0 %v3600_v25  ;;  %1685 = vmatprep.mubr.bf16.mxu1 %v3600_v25  ;;  %v970_v18 = vmax.f32 %v886_v8, 0.0  ;;  %v889_v19 = vadd.f32 %v3234_v14, %v3959_v52  ;;  %v880_v20 = vpop.f32.mrb[15].mxu1 }
 0x286   : > { %v968_v21 = vmax.f32 %v878_v13, 0.0  ;;  %v881_v22 = vadd.f32 %v3959_v52, %v880_v20  ;;  %1825 = vmatpush1.bf16.msra.mxu0 %v3108_v59  ;;  %2018 = vmatpush1.bf16.msra.mxu1 %v3110_v7 }
 0x287   : > { %v971_v26 = vmax.f32 %v889_v19, 0.0  ;;  %1826 = vmatprep.subr.bf16.mxu0 %v3117_v10  ;;  %2019 = vmatprep.subr.bf16.mxu1 %v3119_v11 }
 0x288   : > { %v969_v30 = vmax.f32 %v881_v22, 0.0 }
 0x289   : > { %v4001_v36 = vpack.c.bf16 %v971_v26, %v970_v18 }
 0x28a   : > { %v4003_v37 = vpack.c.bf16 %v969_v30, %v968_v21  ;;  %v3237_v38 = vpop.f32.mrb[16].mxu1  ;;  %1827 = vmatpush1.bf16.msra.mxu0 %v3116_v23  ;;  %2020 = vmatpush1.bf16.msra.mxu1 %v3118_v24 }
 0x28b   : > { %v902_v41 = vadd.f32 %v3237_v38, %v3959_v52  ;;  %v893_v42 = vpop.f32.mrb[17].mxu1  ;;  %1828 = vmatprep.subr.bf16.mxu0 %v3125_v27  ;;  %2021 = vmatprep.subr.bf16.mxu1 %v3127_v28 }
 0x28c   : > { %1493 = vmatmul.mubr.bf16.gmra.mrb[44].mxu0 %v3977_v34  ;;  %1686 = vmatmul.mubr.bf16.gmra.mrb[44].mxu1 %v3977_v34  ;;  %v894_v45 = vadd.f32 %v3959_v52, %v893_v42  ;;  %v3238_v46 = vpop.f32.mrb[18].mxu1 }
 0x28d   : > { %1502 = vmatprep.mubr.bf16.mxu0 %v3600_v25  ;;  %1695 = vmatprep.mubr.bf16.mxu1 %v3600_v25  ;;  %v974_v47 = vmax.f32 %v902_v41, 0.0  ;;  %v905_v48 = vadd.f32 %v3238_v46, %v3959_v52  ;;  %v896_v49 = vpop.f32.mrb[19].mxu1 }
 0x28e   : > { %v972_v50 = vmax.f32 %v894_v45, 0.0  ;;  %v897_v51 = vadd.f32 %v3959_v52, %v896_v49  ;;  %1829 = vmatpush1.bf16.msra.mxu0 %v3124_v39  ;;  %2022 = vmatpush1.bf16.msra.mxu1 %v3126_v40 }
 0x28f   : > { %v975_v55 = vmax.f32 %v905_v48, 0.0  ;;  %1830 = vmatprep.subr.bf16.mxu0 %v3133_v43  ;;  %2023 = vmatprep.subr.bf16.mxu1 %v3135_v44 }
 0x290   : > { %v973_v56 = vmax.f32 %v897_v51, 0.0 }
 0x291   : > { %v4013_v57 = vpack.c.bf16 %v975_v55, %v974_v47 }
 0x292   : > { %v4015_v58 = vpack.c.bf16 %v973_v56, %v972_v50  ;;  %v3241_v60 = vpop.f32.mrb[20].mxu1  ;;  %1831 = vmatpush1.bf16.msra.mxu0 %v3132_v53  ;;  %2024 = vmatpush1.bf16.msra.mxu1 %v3134_v54 }
 0x293   : > { %v918_v61 = vadd.f32 %v3241_v60, %v3959_v52  ;;  %v909_v63 = vpop.f32.mrb[21].mxu1 }
 0x294   : > { %1503 = vmatmul.mubr.bf16.gmra.mrb[48].mxu0 %v3991_v5  ;;  %1696 = vmatmul.mubr.bf16.gmra.mrb[48].mxu1 %v3991_v5  ;;  %v910_v0 = vadd.f32 %v3959_v52, %v909_v63  ;;  %v3242_v2 = vpop.f32.mrb[22].mxu1 }
 0x295   : > { %1512 = vmatprep.mubr.bf16.mxu0 %v3600_v25  ;;  %1705 = vmatprep.mubr.bf16.mxu1 %v3600_v25  ;;  %v978_v3 = vmax.f32 %v918_v61, 0.0  ;;  %v921_v6 = vadd.f32 %v3242_v2, %v3959_v52  ;;  %v912_v59 = vpop.f32.mrb[23].mxu1 }
 0x296   : > { %v976_v7 = vmax.f32 %v910_v0, 0.0  ;;  %v913_v8 = vadd.f32 %v3959_v52, %v912_v59 }
 0x297   : > { %v979_v9 = vmax.f32 %v921_v6, 0.0 }
 0x298   : > { %v977_v10 = vmax.f32 %v913_v8, 0.0 }
 0x299   : > { %v4025_v11 = vpack.c.bf16 %v979_v9, %v978_v3 }
 0x29a   : > { %v4027_v12 = vpack.c.bf16 %v977_v10, %v976_v7  ;;  %v3245_v13 = vpop.f32.mrb[24].mxu1 }
 0x29b   : > { %v934_v14 = vadd.f32 %v3245_v13, %v3959_v52  ;;  %v925_v15 = vpop.f32.mrb[25].mxu1 }
 0x29c   : > { %1513 = vmatmul.mubr.bf16.gmra.mrb[52].mxu0 %v3989_v4  ;;  %1706 = vmatmul.mubr.bf16.gmra.mrb[52].mxu1 %v3989_v4  ;;  %v926_v16 = vadd.f32 %v3959_v52, %v925_v15  ;;  %v3246_v17 = vpop.f32.mrb[26].mxu1 }
 0x29d   : > { %1522 = vmatprep.mubr.bf16.mxu0 %v3600_v25  ;;  %1715 = vmatprep.mubr.bf16.mxu1 %v3600_v25  ;;  %v982_v18 = vmax.f32 %v934_v14, 0.0  ;;  %v937_v19 = vadd.f32 %v3246_v17, %v3959_v52  ;;  %v928_v20 = vpop.f32.mrb[27].mxu1 }
 0x29e   : > { %v980_v21 = vmax.f32 %v926_v16, 0.0  ;;  %v929_v22 = vadd.f32 %v3959_v52, %v928_v20 }
 0x29f   : > { %v983_v23 = vmax.f32 %v937_v19, 0.0 }
 0x2a0   : > { %v981_v24 = vmax.f32 %v929_v22, 0.0 }
 0x2a1   : > { %v4037_v26 = vpack.c.bf16 %v983_v23, %v982_v18 }
 0x2a2   : > { %v4039_v27 = vpack.c.bf16 %v981_v24, %v980_v21  ;;  %v3249_v28 = vpop.f32.mrb[28].mxu1 }
 0x2a3   : > { %v950_v29 = vadd.f32 %v3249_v28, %v3959_v52  ;;  %v941_v30 = vpop.f32.mrb[29].mxu1 }
 0x2a4   : > { %1523 = vmatmul.mubr.bf16.gmra.mrb[56].mxu0 %v4003_v37  ;;  %1716 = vmatmul.mubr.bf16.gmra.mrb[56].mxu1 %v4003_v37  ;;  %v942_v31 = vadd.f32 %v3959_v52, %v941_v30  ;;  %v3250_v32 = vpop.f32.mrb[30].mxu1 }
 0x2a5   : > { %1532 = vmatprep.mubr.bf16.mxu0 %v3600_v25  ;;  %1725 = vmatprep.mubr.bf16.mxu1 %v3600_v25  ;;  %v986_v33 = vmax.f32 %v950_v29, 0.0  ;;  %v953_v38 = vadd.f32 %v3250_v32, %v3959_v52  ;;  %v944_v39 = vpop.f32.mrb[31].mxu1 }
 0x2a6   : > { %v984_v40 = vmax.f32 %v942_v31, 0.0  ;;  %v945_v41 = vadd.f32 %v3959_v52, %v944_v39  ;;  %v1070_v52 = vlaneseq }
 0x2a7   : > { %v987_v42 = vmax.f32 %v953_v38, 0.0 }
 0x2a8   : > { %v985_v43 = vmax.f32 %v945_v41, 0.0 }
 0x2a9   : > { %v4049_v44 = vpack.c.bf16 %v987_v42, %v986_v33 }
 0x2aa   : > { %v4051_v45 = vpack.c.bf16 %v985_v43, %v984_v40 }
 0x2ac   : > { %1533 = vmatmul.mubr.bf16.gmra.mrb[60].mxu0 %v4001_v36  ;;  %1726 = vmatmul.mubr.bf16.gmra.mrb[60].mxu1 %v4001_v36 }
 0x2ad   : > { %1542 = vmatprep.mubr.bf16.mxu0 %v3600_v25  ;;  %1735 = vmatprep.mubr.bf16.mxu1 %v3600_v25 }
 0x2b4   : > { %1543 = vmatmul.mubr.bf16.gmra.mrb[64].mxu0 %v4015_v58  ;;  %1736 = vmatmul.mubr.bf16.gmra.mrb[64].mxu1 %v4015_v58 }
 0x2b5   : > { %1552 = vmatprep.mubr.bf16.mxu0 %v3600_v25  ;;  %1745 = vmatprep.mubr.bf16.mxu1 %v3600_v25 }
 0x2bc   : > { %1553 = vmatmul.mubr.bf16.gmra.mrb[68].mxu0 %v4013_v57  ;;  %1746 = vmatmul.mubr.bf16.gmra.mrb[68].mxu1 %v4013_v57 }
 0x2bd   : > { %1562 = vmatprep.mubr.bf16.mxu0 %v3600_v25  ;;  %1755 = vmatprep.mubr.bf16.mxu1 %v3600_v25 }
 0x2c4   : > { %1563 = vmatmul.mubr.bf16.gmra.mrb[72].mxu0 %v4027_v12  ;;  %1756 = vmatmul.mubr.bf16.gmra.mrb[72].mxu1 %v4027_v12 }
 0x2c5   : > { %1572 = vmatprep.mubr.bf16.mxu0 %v3600_v25  ;;  %1765 = vmatprep.mubr.bf16.mxu1 %v3600_v25 }
 0x2cc   : > { %1573 = vmatmul.mubr.bf16.gmra.mrb[76].mxu0 %v4025_v11  ;;  %1766 = vmatmul.mubr.bf16.gmra.mrb[76].mxu1 %v4025_v11 }
 0x2cd   : > { %1582 = vmatprep.mubr.bf16.mxu0 %v3600_v25  ;;  %1775 = vmatprep.mubr.bf16.mxu1 %v3600_v25 }
 0x2d4   : > { %1583 = vmatmul.mubr.bf16.gmra.mrb[80].mxu0 %v4039_v27  ;;  %1776 = vmatmul.mubr.bf16.gmra.mrb[80].mxu1 %v4039_v27 }
 0x2d5   : > { %1592 = vmatprep.mubr.bf16.mxu0 %v3600_v25  ;;  %1785 = vmatprep.mubr.bf16.mxu1 %v3600_v25 }
 0x2dc   : > { %1593 = vmatmul.mubr.bf16.gmra.mrb[84].mxu0 %v4037_v26  ;;  %1786 = vmatmul.mubr.bf16.gmra.mrb[84].mxu1 %v4037_v26 }
 0x2dd   : > { %1602 = vmatprep.mubr.bf16.mxu0 %v3600_v25  ;;  %1795 = vmatprep.mubr.bf16.mxu1 %v3600_v25 }
 0x2e4   : > { %1603 = vmatmul.mubr.bf16.gmra.mrb[88].mxu0 %v4051_v45  ;;  %1796 = vmatmul.mubr.bf16.gmra.mrb[88].mxu1 %v4051_v45 }
 0x2e5   : > { %1612 = vmatprep.mubr.bf16.mxu0 %v3600_v25  ;;  %1805 = vmatprep.mubr.bf16.mxu1 %v3600_v25 }
 0x2ec   : > { %1613 = vmatmul.mubr.bf16.gmra.mrb[92].mxu0 %v4049_v44  ;;  %1806 = vmatmul.mubr.bf16.gmra.mrb[92].mxu1 %v4049_v44 }
 0x2ed   : > { %1848 = vmatprep.mubr.bf16.mxu0 %v3600_v25  ;;  %2041 = vmatprep.mubr.bf16.mxu1 %v3600_v25 }
 0x2f4   : > { %1849 = vmatmul.mubr.bf16.vlgmr.msra.gmra.mrb[96].mxu0 %v3967_v1  ;;  %2042 = vmatmul.mubr.bf16.vlgmr.msra.gmra.mrb[96].mxu1 %v3967_v1 }
 0x2f5   : > { %1858 = vmatprep.mubr.bf16.mxu0 %v3600_v25  ;;  %2051 = vmatprep.mubr.bf16.mxu1 %v3600_v25 }
 0x2fc   : > { %1859 = vmatmul.mubr.bf16.gmra.mrb[100].mxu0 %v3965_v62  ;;  %2052 = vmatmul.mubr.bf16.gmra.mrb[100].mxu1 %v3965_v62  ;;  %v4127_v62 = vshrl.u32 %v1070_v52, 7 }
 0x2fd   : > { %1868 = vmatprep.mubr.bf16.mxu0 %v3600_v25  ;;  %2061 = vmatprep.mubr.bf16.mxu1 %v3600_v25 }
 0x2fe   : > { %v1072_v1 = vsub.s32 0, %v4127_v62 }
 0x304   : > { %1869 = vmatmul.mubr.bf16.gmra.mrb[104].mxu0 %v3979_v35  ;;  %2062 = vmatmul.mubr.bf16.gmra.mrb[104].mxu1 %v3979_v35  ;;  %v1068_v35 = vld [vmem:[#allocation10] sm:$0xff] }
 0x305   : > { %1878 = vmatprep.mubr.bf16.mxu0 %v3600_v25  ;;  %2071 = vmatprep.mubr.bf16.mxu1 %v3600_v25 }
 0x30c   : > { %1879 = vmatmul.mubr.bf16.gmra.mrb[108].mxu0 %v3977_v34  ;;  %2072 = vmatmul.mubr.bf16.gmra.mrb[108].mxu1 %v3977_v34  ;;  %v1080_v34 = vsub.s32 2, %v4127_v62 }
 0x30d   : > { %1888 = vmatprep.mubr.bf16.mxu0 %v3600_v25  ;;  %2081 = vmatprep.mubr.bf16.mxu1 %v3600_v25 }
 0x314   : > { %1889 = vmatmul.mubr.bf16.gmra.mrb[112].mxu0 %v3991_v5  ;;  %2082 = vmatmul.mubr.bf16.gmra.mrb[112].mxu1 %v3991_v5  ;;  %v1084_v5 = vsub.s32 3, %v4127_v62 }
 0x315   : > { %1898 = vmatprep.mubr.bf16.mxu0 %v3600_v25  ;;  %2091 = vmatprep.mubr.bf16.mxu1 %v3600_v25 }
 0x316   : > { %v4143_v47 = vrot.slane %v1068_v35, %v1084_v5 }
 0x31c   : > { %1899 = vmatmul.mubr.bf16.gmra.mrb[116].mxu0 %v3989_v4  ;;  %2092 = vmatmul.mubr.bf16.gmra.mrb[116].mxu1 %v3989_v4  ;;  %v1076_v4 = vsub.s32 1, %v4127_v62 }
 0x31d   : > { %1908 = vmatprep.mubr.bf16.mxu0 %v3600_v25  ;;  %2101 = vmatprep.mubr.bf16.mxu1 %v3600_v25 }
 0x31e   : > { %v4141_v46 = vrot.slane %v1068_v35, %v1076_v4 }
 0x324   : > { %1909 = vmatmul.mubr.bf16.gmra.mrb[120].mxu0 %v4003_v37  ;;  %2102 = vmatmul.mubr.bf16.gmra.mrb[120].mxu1 %v4003_v37  ;;  %v4139_v37 = vrot.slane %v1068_v35, %v1080_v34 }
 0x325   : > { %1918 = vmatprep.mubr.bf16.mxu0 %v3600_v25  ;;  %2111 = vmatprep.mubr.bf16.mxu1 %v3600_v25 }
 0x32c   : > { %1919 = vmatmul.mubr.bf16.gmra.mrb[124].mxu0 %v4001_v36  ;;  %2112 = vmatmul.mubr.bf16.gmra.mrb[124].mxu1 %v4001_v36  ;;  %v4137_v36 = vrot.slane %v1068_v35, %v1072_v1 }
 0x32d   : > { %1928 = vmatprep.mubr.bf16.mxu0 %v3600_v25  ;;  %2121 = vmatprep.mubr.bf16.mxu1 %v3600_v25 }
 0x334   : > { %1929 = vmatmul.mubr.bf16.gmra.mrb[128].mxu0 %v4015_v58  ;;  %2122 = vmatmul.mubr.bf16.gmra.mrb[128].mxu1 %v4015_v58 }
 0x335   : > { %1938 = vmatprep.mubr.bf16.mxu0 %v3600_v25  ;;  %2131 = vmatprep.mubr.bf16.mxu1 %v3600_v25 }
 0x33c   : > { %1939 = vmatmul.mubr.bf16.gmra.mrb[132].mxu0 %v4013_v57  ;;  %2132 = vmatmul.mubr.bf16.gmra.mrb[132].mxu1 %v4013_v57 }
 0x33d   : > { %1948 = vmatprep.mubr.bf16.mxu0 %v3600_v25  ;;  %2141 = vmatprep.mubr.bf16.mxu1 %v3600_v25 }
 0x344   : > { %1949 = vmatmul.mubr.bf16.gmra.mrb[136].mxu0 %v4027_v12  ;;  %2142 = vmatmul.mubr.bf16.gmra.mrb[136].mxu1 %v4027_v12 }
 0x345   : > { %1958 = vmatprep.mubr.bf16.mxu0 %v3600_v25  ;;  %2151 = vmatprep.mubr.bf16.mxu1 %v3600_v25 }
 0x347   : > { %v1464_v48 = vpop.f32.mrb[32].mxu0  ;;  %v1657_v49 = vpop.f32.mrb[32].mxu1 }
 0x348   : > { %v1465_v50 = vadd.f32 %v1464_v48, %v4137_v36  ;;  %v1658_v51 = vadd.f32 %v1657_v49, %v4139_v37  ;;  %v1466_v53 = vpop.f32.mrb[33].mxu0  ;;  %v1659_v54 = vpop.f32.mrb[33].mxu1 }
 0x349   : > { %v1467_v55 = vadd.f32 %v1466_v53, %v4141_v46  ;;  %v1660_v56 = vadd.f32 %v1659_v54, %v4143_v47  ;;  %v1468_v57 = vpop.f32.mrb[34].mxu0  ;;  %v1661_v58 = vpop.f32.mrb[34].mxu1 }
 0x34a   : > { %v1469_v60 = vadd.f32 %v1468_v57, %v4137_v36  ;;  %v1662_v61 = vadd.f32 %v1661_v58, %v4139_v37  ;;  %v1470_v63 = vpop.f32.mrb[35].mxu0  ;;  %v1663_v0 = vpop.f32.mrb[35].mxu1  ;;  %v2202_v6 = vmax.f32 %v1465_v50, 0.0  ;;  %v2204_v59 = vmax.f32 %v1658_v51, 0.0 }
 0x34b   : > { %v1471_v2 = vadd.f32 %v1470_v63, %v4141_v46  ;;  %v1664_v3 = vadd.f32 %v1663_v0, %v4143_v47  ;;  %v2203_v9 = vmax.f32 %v1467_v55, 0.0  ;;  %v2205_v10 = vmax.f32 %v1660_v56, 0.0 }
 0x34c   : > { %v2210_v7 = vmax.f32 %v1469_v60, 0.0  ;;  %v2212_v8 = vmax.f32 %v1662_v61, 0.0  ;;  %1959 = vmatmul.mubr.bf16.gmra.mrb[140].mxu0 %v4025_v11  ;;  %2152 = vmatmul.mubr.bf16.gmra.mrb[140].mxu1 %v4025_v11 }
 0x34d   : > { %v2211_v12 = vmax.f32 %v1471_v2, 0.0  ;;  %v2213_v13 = vmax.f32 %v1664_v3, 0.0  ;;  %1968 = vmatprep.mubr.bf16.mxu0 %v3600_v25  ;;  %2161 = vmatprep.mubr.bf16.mxu1 %v3600_v25 }
 0x34e   : > { %v2458_v14 = vmax.f32 %v2202_v6, %v2210_v7  ;;  %v2532_v15 = vmax.f32 %v2204_v59, %v2212_v8 }
 0x34f   : > { %v2495_v16 = vmax.f32 %v2203_v9, %v2211_v12  ;;  %v2569_v17 = vmax.f32 %v2205_v10, %v2213_v13  ;;  %v1474_v18 = vpop.f32.mrb[36].mxu0  ;;  %v1667_v19 = vpop.f32.mrb[36].mxu1 }
 0x350   : > { %v1475_v20 = vadd.f32 %v1474_v18, %v4137_v36  ;;  %v1668_v21 = vadd.f32 %v1667_v19, %v4139_v37  ;;  %v1476_v22 = vpop.f32.mrb[37].mxu0  ;;  %v1669_v11 = vpop.f32.mrb[37].mxu1 }
 0x351   : > { %v1477_v23 = vadd.f32 %v1476_v22, %v4141_v46  ;;  %v1670_v24 = vadd.f32 %v1669_v11, %v4143_v47  ;;  %v1478_v28 = vpop.f32.mrb[38].mxu0  ;;  %v1671_v29 = vpop.f32.mrb[38].mxu1 }
 0x352   : > { %v2218_v30 = vmax.f32 %v1475_v20, 0.0  ;;  %v2220_v31 = vmax.f32 %v1668_v21, 0.0  ;;  %v1479_v32 = vadd.f32 %v1478_v28, %v4137_v36  ;;  %v1672_v33 = vadd.f32 %v1671_v29, %v4139_v37  ;;  %v1480_v38 = vpop.f32.mrb[39].mxu0  ;;  %v1673_v39 = vpop.f32.mrb[39].mxu1 }
 0x353   : > { %v2219_v40 = vmax.f32 %v1477_v23, 0.0  ;;  %v2221_v41 = vmax.f32 %v1670_v24, 0.0  ;;  %v1481_v42 = vadd.f32 %v1480_v38, %v4141_v46  ;;  %v1674_v43 = vadd.f32 %v1673_v39, %v4143_v47 }
 0x354   : > { %v2459_v52 = vmax.f32 %v2458_v14, %v2218_v30  ;;  %v2533_v1 = vmax.f32 %v2532_v15, %v2220_v31  ;;  %v2226_v34 = vmax.f32 %v1479_v32, 0.0  ;;  %v2228_v35 = vmax.f32 %v1672_v33, 0.0  ;;  %1969 = vmatmul.mubr.bf16.gmra.mrb[144].mxu0 %v4039_v27  ;;  %2162 = vmatmul.mubr.bf16.gmra.mrb[144].mxu1 %v4039_v27 }
 0x355   : > { %v2496_v4 = vmax.f32 %v2495_v16, %v2219_v40  ;;  %v2570_v5 = vmax.f32 %v2569_v17, %v2221_v41  ;;  %v2227_v48 = vmax.f32 %v1481_v42, 0.0  ;;  %v2229_v49 = vmax.f32 %v1674_v43, 0.0  ;;  %1978 = vmatprep.mubr.bf16.mxu0 %v3600_v25  ;;  %2171 = vmatprep.mubr.bf16.mxu1 %v3600_v25 }
 0x356   : > { %v2460_v50 = vmax.f32 %v2459_v52, %v2226_v34  ;;  %v2534_v51 = vmax.f32 %v2533_v1, %v2228_v35 }
 0x357   : > { %v2497_v53 = vmax.f32 %v2496_v4, %v2227_v48  ;;  %v2571_v54 = vmax.f32 %v2570_v5, %v2229_v49  ;;  %v1484_v55 = vpop.f32.mrb[40].mxu0  ;;  %v1677_v56 = vpop.f32.mrb[40].mxu1 }
 0x358   : > { %v1485_v57 = vadd.f32 %v1484_v55, %v4137_v36  ;;  %v1678_v58 = vadd.f32 %v1677_v56, %v4139_v37  ;;  %v1486_v60 = vpop.f32.mrb[41].mxu0  ;;  %v1679_v27 = vpop.f32.mrb[41].mxu1 }
 0x359   : > { %v1487_v61 = vadd.f32 %v1486_v60, %v4141_v46  ;;  %v1680_v63 = vadd.f32 %v1679_v27, %v4143_v47  ;;  %v1488_v0 = vpop.f32.mrb[42].mxu0  ;;  %v1681_v2 = vpop.f32.mrb[42].mxu1 }
 0x35a   : > { %v2234_v3 = vmax.f32 %v1485_v57, 0.0  ;;  %v2236_v6 = vmax.f32 %v1678_v58, 0.0  ;;  %v1489_v59 = vadd.f32 %v1488_v0, %v4137_v36  ;;  %v1682_v7 = vadd.f32 %v1681_v2, %v4139_v37  ;;  %v1490_v8 = vpop.f32.mrb[43].mxu0  ;;  %v1683_v9 = vpop.f32.mrb[43].mxu1 }
 0x35b   : > { %v2235_v10 = vmax.f32 %v1487_v61, 0.0  ;;  %v2237_v12 = vmax.f32 %v1680_v63, 0.0  ;;  %v1491_v13 = vadd.f32 %v1490_v8, %v4141_v46  ;;  %v1684_v14 = vadd.f32 %v1683_v9, %v4143_v47 }
 0x35c   : > { %v2461_v15 = vmax.f32 %v2460_v50, %v2234_v3  ;;  %v2535_v16 = vmax.f32 %v2534_v51, %v2236_v6  ;;  %v2242_v17 = vmax.f32 %v1489_v59, 0.0  ;;  %v2244_v18 = vmax.f32 %v1682_v7, 0.0  ;;  %1979 = vmatmul.mubr.bf16.gmra.mrb[148].mxu0 %v4037_v26  ;;  %2172 = vmatmul.mubr.bf16.gmra.mrb[148].mxu1 %v4037_v26 }
 0x35d   : > { %v2498_v19 = vmax.f32 %v2497_v53, %v2235_v10  ;;  %v2572_v20 = vmax.f32 %v2571_v54, %v2237_v12  ;;  %v2243_v21 = vmax.f32 %v1491_v13, 0.0  ;;  %v2245_v22 = vmax.f32 %v1684_v14, 0.0  ;;  %1988 = vmatprep.mubr.bf16.mxu0 %v3600_v25  ;;  %2181 = vmatprep.mubr.bf16.mxu1 %v3600_v25 }
 0x35e   : > { %v2462_v11 = vmax.f32 %v2461_v15, %v2242_v17  ;;  %v2536_v23 = vmax.f32 %v2535_v16, %v2244_v18 }
 0x35f   : > { %v2499_v24 = vmax.f32 %v2498_v19, %v2243_v21  ;;  %v2573_v28 = vmax.f32 %v2572_v20, %v2245_v22  ;;  %v1494_v29 = vpop.f32.mrb[44].mxu0  ;;  %v1687_v30 = vpop.f32.mrb[44].mxu1 }
 0x360   : > { %v1495_v31 = vadd.f32 %v1494_v29, %v4137_v36  ;;  %v1688_v32 = vadd.f32 %v1687_v30, %v4139_v37  ;;  %v1496_v33 = vpop.f32.mrb[45].mxu0  ;;  %v1689_v26 = vpop.f32.mrb[45].mxu1 }
 0x361   : > { %v1497_v38 = vadd.f32 %v1496_v33, %v4141_v46  ;;  %v1690_v39 = vadd.f32 %v1689_v26, %v4143_v47  ;;  %v1498_v40 = vpop.f32.mrb[46].mxu0  ;;  %v1691_v41 = vpop.f32.mrb[46].mxu1 }
 0x362   : > { %v2250_v42 = vmax.f32 %v1495_v31, 0.0  ;;  %v2252_v43 = vmax.f32 %v1688_v32, 0.0  ;;  %v1499_v52 = vadd.f32 %v1498_v40, %v4137_v36  ;;  %v1692_v1 = vadd.f32 %v1691_v41, %v4139_v37  ;;  %v1500_v34 = vpop.f32.mrb[47].mxu0  ;;  %v1693_v35 = vpop.f32.mrb[47].mxu1 }
 0x363   : > { %v2251_v4 = vmax.f32 %v1497_v38, 0.0  ;;  %v2253_v5 = vmax.f32 %v1690_v39, 0.0  ;;  %v1501_v48 = vadd.f32 %v1500_v34, %v4141_v46  ;;  %v1694_v49 = vadd.f32 %v1693_v35, %v4143_v47 }
 0x364   : > { %v2463_v50 = vmax.f32 %v2462_v11, %v2250_v42  ;;  %v2537_v51 = vmax.f32 %v2536_v23, %v2252_v43  ;;  %v2258_v53 = vmax.f32 %v1499_v52, 0.0  ;;  %v2260_v54 = vmax.f32 %v1692_v1, 0.0  ;;  %1989 = vmatmul.mubr.bf16.gmra.mrb[152].mxu0 %v4051_v45  ;;  %2182 = vmatmul.mubr.bf16.gmra.mrb[152].mxu1 %v4051_v45 }
 0x365   : > { %v2500_v55 = vmax.f32 %v2499_v24, %v2251_v4  ;;  %v2574_v56 = vmax.f32 %v2573_v28, %v2253_v5  ;;  %v2259_v57 = vmax.f32 %v1501_v48, 0.0  ;;  %v2261_v58 = vmax.f32 %v1694_v49, 0.0  ;;  %1998 = vmatprep.mubr.bf16.mxu0 %v3600_v25  ;;  %2191 = vmatprep.mubr.bf16.mxu1 %v3600_v25 }
 0x366   : > { %v2464_v60 = vmax.f32 %v2463_v50, %v2258_v53  ;;  %v2538_v27 = vmax.f32 %v2537_v51, %v2260_v54 }
 0x367   : > { %v2501_v61 = vmax.f32 %v2500_v55, %v2259_v57  ;;  %v2575_v63 = vmax.f32 %v2574_v56, %v2261_v58  ;;  %v1504_v0 = vpop.f32.mrb[48].mxu0  ;;  %v1697_v2 = vpop.f32.mrb[48].mxu1 }
 0x368   : > { %v1505_v3 = vadd.f32 %v1504_v0, %v4137_v36  ;;  %v1698_v6 = vadd.f32 %v1697_v2, %v4139_v37  ;;  %v1506_v59 = vpop.f32.mrb[49].mxu0  ;;  %v1699_v45 = vpop.f32.mrb[49].mxu1 }
 0x369   : > { %v1507_v7 = vadd.f32 %v1506_v59, %v4141_v46  ;;  %v1700_v8 = vadd.f32 %v1699_v45, %v4143_v47  ;;  %v1508_v9 = vpop.f32.mrb[50].mxu0  ;;  %v1701_v10 = vpop.f32.mrb[50].mxu1 }
 0x36a   : > { %v2266_v12 = vmax.f32 %v1505_v3, 0.0  ;;  %v2268_v25 = vmax.f32 %v1698_v6, 0.0  ;;  %v1509_v13 = vadd.f32 %v1508_v9, %v4137_v36  ;;  %v1702_v14 = vadd.f32 %v1701_v10, %v4139_v37  ;;  %v1510_v15 = vpop.f32.mrb[51].mxu0  ;;  %v1703_v16 = vpop.f32.mrb[51].mxu1 }
 0x36b   : > { %v2267_v17 = vmax.f32 %v1507_v7, 0.0  ;;  %v2269_v18 = vmax.f32 %v1700_v8, 0.0  ;;  %v1511_v19 = vadd.f32 %v1510_v15, %v4141_v46  ;;  %v1704_v20 = vadd.f32 %v1703_v16, %v4143_v47 }
 0x36c   : > { %v2465_v21 = vmax.f32 %v2464_v60, %v2266_v12  ;;  %v2539_v22 = vmax.f32 %v2538_v27, %v2268_v25  ;;  %v2274_v11 = vmax.f32 %v1509_v13, 0.0  ;;  %v2276_v23 = vmax.f32 %v1702_v14, 0.0  ;;  %1999 = vmatmul.mubr.bf16.gmra.mrb[156].mxu0 %v4049_v44  ;;  %2192 = vmatmul.mubr.bf16.gmra.mrb[156].mxu1 %v4049_v44 }
 0x36d   : > { %v2502_v24 = vmax.f32 %v2501_v61, %v2267_v17  ;;  %v2576_v28 = vmax.f32 %v2575_v63, %v2269_v18  ;;  %v2275_v29 = vmax.f32 %v1511_v19, 0.0  ;;  %v2277_v30 = vmax.f32 %v1704_v20, 0.0 }
 0x36e   : > { %v2466_v31 = vmax.f32 %v2465_v21, %v2274_v11  ;;  %v2540_v32 = vmax.f32 %v2539_v22, %v2276_v23 }
 0x36f   : > { %v2503_v33 = vmax.f32 %v2502_v24, %v2275_v29  ;;  %v2577_v26 = vmax.f32 %v2576_v28, %v2277_v30  ;;  %v1514_v38 = vpop.f32.mrb[52].mxu0  ;;  %v1707_v39 = vpop.f32.mrb[52].mxu1 }
 0x370   : > { %v1515_v40 = vadd.f32 %v1514_v38, %v4137_v36  ;;  %v1708_v41 = vadd.f32 %v1707_v39, %v4139_v37  ;;  %v1516_v42 = vpop.f32.mrb[53].mxu0  ;;  %v1709_v43 = vpop.f32.mrb[53].mxu1 }
 0x371   : > { %v1517_v52 = vadd.f32 %v1516_v42, %v4141_v46  ;;  %v1710_v44 = vadd.f32 %v1709_v43, %v4143_v47  ;;  %v1518_v1 = vpop.f32.mrb[54].mxu0  ;;  %v1711_v34 = vpop.f32.mrb[54].mxu1 }
 0x372   : > { %v2282_v35 = vmax.f32 %v1515_v40, 0.0  ;;  %v2284_v4 = vmax.f32 %v1708_v41, 0.0  ;;  %v1519_v5 = vadd.f32 %v1518_v1, %v4137_v36  ;;  %v1712_v48 = vadd.f32 %v1711_v34, %v4139_v37  ;;  %v1520_v49 = vpop.f32.mrb[55].mxu0  ;;  %v1713_v50 = vpop.f32.mrb[55].mxu1 }
 0x373   : > { %v2283_v51 = vmax.f32 %v1517_v52, 0.0  ;;  %v2285_v53 = vmax.f32 %v1710_v44, 0.0  ;;  %v1521_v54 = vadd.f32 %v1520_v49, %v4141_v46  ;;  %v1714_v55 = vadd.f32 %v1713_v50, %v4143_v47 }
 0x374   : > { %v2467_v56 = vmax.f32 %v2466_v31, %v2282_v35  ;;  %v2541_v57 = vmax.f32 %v2540_v32, %v2284_v4  ;;  %v2290_v58 = vmax.f32 %v1519_v5, 0.0  ;;  %v2292_v60 = vmax.f32 %v1712_v48, 0.0 }
 0x375   : > { %v2504_v27 = vmax.f32 %v2503_v33, %v2283_v51  ;;  %v2578_v61 = vmax.f32 %v2577_v26, %v2285_v53  ;;  %v2291_v63 = vmax.f32 %v1521_v54, 0.0  ;;  %v2293_v0 = vmax.f32 %v1714_v55, 0.0 }
 0x376   : > { %v2468_v2 = vmax.f32 %v2467_v56, %v2290_v58  ;;  %v2542_v3 = vmax.f32 %v2541_v57, %v2292_v60 }
 0x377   : > { %v2505_v6 = vmax.f32 %v2504_v27, %v2291_v63  ;;  %v2579_v59 = vmax.f32 %v2578_v61, %v2293_v0  ;;  %v1524_v45 = vpop.f32.mrb[56].mxu0  ;;  %v1717_v7 = vpop.f32.mrb[56].mxu1 }
 0x378   : > { %v1525_v8 = vadd.f32 %v1524_v45, %v4137_v36  ;;  %v1718_v9 = vadd.f32 %v1717_v7, %v4139_v37  ;;  %v1526_v10 = vpop.f32.mrb[57].mxu0  ;;  %v1719_v12 = vpop.f32.mrb[57].mxu1 }
 0x379   : > { %v1527_v25 = vadd.f32 %v1526_v10, %v4141_v46  ;;  %v1720_v13 = vadd.f32 %v1719_v12, %v4143_v47  ;;  %v1528_v14 = vpop.f32.mrb[58].mxu0  ;;  %v1721_v15 = vpop.f32.mrb[58].mxu1 }
 0x37a   : > { %v2298_v16 = vmax.f32 %v1525_v8, 0.0  ;;  %v2300_v17 = vmax.f32 %v1718_v9, 0.0  ;;  %v1529_v18 = vadd.f32 %v1528_v14, %v4137_v36  ;;  %v1722_v19 = vadd.f32 %v1721_v15, %v4139_v37  ;;  %v1530_v20 = vpop.f32.mrb[59].mxu0  ;;  %v1723_v21 = vpop.f32.mrb[59].mxu1 }
 0x37b   : > { %v2299_v22 = vmax.f32 %v1527_v25, 0.0  ;;  %v2301_v11 = vmax.f32 %v1720_v13, 0.0  ;;  %v1531_v23 = vadd.f32 %v1530_v20, %v4141_v46  ;;  %v1724_v24 = vadd.f32 %v1723_v21, %v4143_v47 }
 0x37c   : > { %v2469_v28 = vmax.f32 %v2468_v2, %v2298_v16  ;;  %v2543_v29 = vmax.f32 %v2542_v3, %v2300_v17  ;;  %v2306_v30 = vmax.f32 %v1529_v18, 0.0  ;;  %v2308_v31 = vmax.f32 %v1722_v19, 0.0 }
 0x37d   : > { %v2506_v32 = vmax.f32 %v2505_v6, %v2299_v22  ;;  %v2580_v33 = vmax.f32 %v2579_v59, %v2301_v11  ;;  %v2307_v26 = vmax.f32 %v1531_v23, 0.0  ;;  %v2309_v38 = vmax.f32 %v1724_v24, 0.0 }
 0x37e   : > { %v2470_v39 = vmax.f32 %v2469_v28, %v2306_v30  ;;  %v2544_v40 = vmax.f32 %v2543_v29, %v2308_v31 }
 0x37f   : > { %v2507_v41 = vmax.f32 %v2506_v32, %v2307_v26  ;;  %v2581_v42 = vmax.f32 %v2580_v33, %v2309_v38  ;;  %v1534_v43 = vpop.f32.mrb[60].mxu0  ;;  %v1727_v52 = vpop.f32.mrb[60].mxu1 }
 0x380   : > { %v1535_v44 = vadd.f32 %v1534_v43, %v4137_v36  ;;  %v1728_v1 = vadd.f32 %v1727_v52, %v4139_v37  ;;  %v1536_v34 = vpop.f32.mrb[61].mxu0  ;;  %v1729_v35 = vpop.f32.mrb[61].mxu1 }
 0x381   : > { %v1537_v4 = vadd.f32 %v1536_v34, %v4141_v46  ;;  %v1730_v5 = vadd.f32 %v1729_v35, %v4143_v47  ;;  %v1538_v48 = vpop.f32.mrb[62].mxu0  ;;  %v1731_v49 = vpop.f32.mrb[62].mxu1 }
 0x382   : > { %v2314_v50 = vmax.f32 %v1535_v44, 0.0  ;;  %v2316_v51 = vmax.f32 %v1728_v1, 0.0  ;;  %v1539_v53 = vadd.f32 %v1538_v48, %v4137_v36  ;;  %v1732_v54 = vadd.f32 %v1731_v49, %v4139_v37  ;;  %v1540_v55 = vpop.f32.mrb[63].mxu0  ;;  %v1733_v56 = vpop.f32.mrb[63].mxu1 }
 0x383   : > { %v2315_v57 = vmax.f32 %v1537_v4, 0.0  ;;  %v2317_v58 = vmax.f32 %v1730_v5, 0.0  ;;  %v1541_v60 = vadd.f32 %v1540_v55, %v4141_v46  ;;  %v1734_v27 = vadd.f32 %v1733_v56, %v4143_v47 }
 0x384   : > { %v2471_v61 = vmax.f32 %v2470_v39, %v2314_v50  ;;  %v2545_v63 = vmax.f32 %v2544_v40, %v2316_v51  ;;  %v2322_v0 = vmax.f32 %v1539_v53, 0.0  ;;  %v2324_v2 = vmax.f32 %v1732_v54, 0.0 }
 0x385   : > { %v2508_v3 = vmax.f32 %v2507_v41, %v2315_v57  ;;  %v2582_v6 = vmax.f32 %v2581_v42, %v2317_v58  ;;  %v2323_v59 = vmax.f32 %v1541_v60, 0.0  ;;  %v2325_v45 = vmax.f32 %v1734_v27, 0.0 }
 0x386   : > { %v2472_v7 = vmax.f32 %v2471_v61, %v2322_v0  ;;  %v2546_v8 = vmax.f32 %v2545_v63, %v2324_v2 }
 0x387   : > { %v2509_v9 = vmax.f32 %v2508_v3, %v2323_v59  ;;  %v2583_v10 = vmax.f32 %v2582_v6, %v2325_v45  ;;  %v1544_v12 = vpop.f32.mrb[64].mxu0  ;;  %v1737_v25 = vpop.f32.mrb[64].mxu1 }
 0x388   : > { %v1545_v13 = vadd.f32 %v1544_v12, %v4137_v36  ;;  %v1738_v14 = vadd.f32 %v1737_v25, %v4139_v37  ;;  %v1546_v15 = vpop.f32.mrb[65].mxu0  ;;  %v1739_v16 = vpop.f32.mrb[65].mxu1 }
 0x389   : > { %v1547_v17 = vadd.f32 %v1546_v15, %v4141_v46  ;;  %v1740_v18 = vadd.f32 %v1739_v16, %v4143_v47  ;;  %v1548_v19 = vpop.f32.mrb[66].mxu0  ;;  %v1741_v20 = vpop.f32.mrb[66].mxu1 }
 0x38a   : > { %v2330_v21 = vmax.f32 %v1545_v13, 0.0  ;;  %v2332_v22 = vmax.f32 %v1738_v14, 0.0  ;;  %v1549_v11 = vadd.f32 %v1548_v19, %v4137_v36  ;;  %v1742_v23 = vadd.f32 %v1741_v20, %v4139_v37  ;;  %v1550_v24 = vpop.f32.mrb[67].mxu0  ;;  %v1743_v28 = vpop.f32.mrb[67].mxu1 }
 0x38b   : > { %v2331_v29 = vmax.f32 %v1547_v17, 0.0  ;;  %v2333_v30 = vmax.f32 %v1740_v18, 0.0  ;;  %v1551_v31 = vadd.f32 %v1550_v24, %v4141_v46  ;;  %v1744_v32 = vadd.f32 %v1743_v28, %v4143_v47 }
 0x38c   : > { %v2473_v33 = vmax.f32 %v2472_v7, %v2330_v21  ;;  %v2547_v26 = vmax.f32 %v2546_v8, %v2332_v22  ;;  %v2338_v38 = vmax.f32 %v1549_v11, 0.0  ;;  %v2340_v39 = vmax.f32 %v1742_v23, 0.0 }
 0x38d   : > { %v2510_v40 = vmax.f32 %v2509_v9, %v2331_v29  ;;  %v2584_v41 = vmax.f32 %v2583_v10, %v2333_v30  ;;  %v2339_v42 = vmax.f32 %v1551_v31, 0.0  ;;  %v2341_v43 = vmax.f32 %v1744_v32, 0.0 }
 0x38e   : > { %v2474_v52 = vmax.f32 %v2473_v33, %v2338_v38  ;;  %v2548_v44 = vmax.f32 %v2547_v26, %v2340_v39 }
 0x38f   : > { %v2511_v1 = vmax.f32 %v2510_v40, %v2339_v42  ;;  %v2585_v34 = vmax.f32 %v2584_v41, %v2341_v43  ;;  %v1554_v35 = vpop.f32.mrb[68].mxu0  ;;  %v1747_v4 = vpop.f32.mrb[68].mxu1 }
 0x390   : > { %v1555_v5 = vadd.f32 %v1554_v35, %v4137_v36  ;;  %v1748_v48 = vadd.f32 %v1747_v4, %v4139_v37  ;;  %v1556_v49 = vpop.f32.mrb[69].mxu0  ;;  %v1749_v50 = vpop.f32.mrb[69].mxu1 }
 0x391   : > { %v1557_v51 = vadd.f32 %v1556_v49, %v4141_v46  ;;  %v1750_v53 = vadd.f32 %v1749_v50, %v4143_v47  ;;  %v1558_v54 = vpop.f32.mrb[70].mxu0  ;;  %v1751_v55 = vpop.f32.mrb[70].mxu1 }
 0x392   : > { %v2346_v56 = vmax.f32 %v1555_v5, 0.0  ;;  %v2348_v57 = vmax.f32 %v1748_v48, 0.0  ;;  %v1559_v58 = vadd.f32 %v1558_v54, %v4137_v36  ;;  %v1752_v60 = vadd.f32 %v1751_v55, %v4139_v37  ;;  %v1560_v27 = vpop.f32.mrb[71].mxu0  ;;  %v1753_v61 = vpop.f32.mrb[71].mxu1 }
 0x393   : > { %v2347_v63 = vmax.f32 %v1557_v51, 0.0  ;;  %v2349_v0 = vmax.f32 %v1750_v53, 0.0  ;;  %v1561_v2 = vadd.f32 %v1560_v27, %v4141_v46  ;;  %v1754_v3 = vadd.f32 %v1753_v61, %v4143_v47 }
 0x394   : > { %v2475_v6 = vmax.f32 %v2474_v52, %v2346_v56  ;;  %v2549_v59 = vmax.f32 %v2548_v44, %v2348_v57  ;;  %v2354_v45 = vmax.f32 %v1559_v58, 0.0  ;;  %v2356_v7 = vmax.f32 %v1752_v60, 0.0 }
 0x395   : > { %v2512_v8 = vmax.f32 %v2511_v1, %v2347_v63  ;;  %v2586_v9 = vmax.f32 %v2585_v34, %v2349_v0  ;;  %v2355_v10 = vmax.f32 %v1561_v2, 0.0  ;;  %v2357_v12 = vmax.f32 %v1754_v3, 0.0 }
 0x396   : > { %v2476_v25 = vmax.f32 %v2475_v6, %v2354_v45  ;;  %v2550_v13 = vmax.f32 %v2549_v59, %v2356_v7 }
 0x397   : > { %v2513_v14 = vmax.f32 %v2512_v8, %v2355_v10  ;;  %v2587_v15 = vmax.f32 %v2586_v9, %v2357_v12  ;;  %v1564_v16 = vpop.f32.mrb[72].mxu0  ;;  %v1757_v17 = vpop.f32.mrb[72].mxu1 }
 0x398   : > { %v1565_v18 = vadd.f32 %v1564_v16, %v4137_v36  ;;  %v1758_v19 = vadd.f32 %v1757_v17, %v4139_v37  ;;  %v1566_v20 = vpop.f32.mrb[73].mxu0  ;;  %v1759_v21 = vpop.f32.mrb[73].mxu1 }
 0x399   : > { %v1567_v22 = vadd.f32 %v1566_v20, %v4141_v46  ;;  %v1760_v11 = vadd.f32 %v1759_v21, %v4143_v47  ;;  %v1568_v23 = vpop.f32.mrb[74].mxu0  ;;  %v1761_v24 = vpop.f32.mrb[74].mxu1 }
 0x39a   : > { %v2362_v28 = vmax.f32 %v1565_v18, 0.0  ;;  %v2364_v29 = vmax.f32 %v1758_v19, 0.0  ;;  %v1569_v30 = vadd.f32 %v1568_v23, %v4137_v36  ;;  %v1762_v31 = vadd.f32 %v1761_v24, %v4139_v37  ;;  %v1570_v32 = vpop.f32.mrb[75].mxu0  ;;  %v1763_v33 = vpop.f32.mrb[75].mxu1 }
 0x39b   : > { %v2363_v26 = vmax.f32 %v1567_v22, 0.0  ;;  %v2365_v38 = vmax.f32 %v1760_v11, 0.0  ;;  %v1571_v39 = vadd.f32 %v1570_v32, %v4141_v46  ;;  %v1764_v40 = vadd.f32 %v1763_v33, %v4143_v47 }
 0x39c   : > { %v2477_v41 = vmax.f32 %v2476_v25, %v2362_v28  ;;  %v2551_v42 = vmax.f32 %v2550_v13, %v2364_v29  ;;  %v2370_v43 = vmax.f32 %v1569_v30, 0.0  ;;  %v2372_v52 = vmax.f32 %v1762_v31, 0.0 }
 0x39d   : > { %v2514_v44 = vmax.f32 %v2513_v14, %v2363_v26  ;;  %v2588_v1 = vmax.f32 %v2587_v15, %v2365_v38  ;;  %v2371_v34 = vmax.f32 %v1571_v39, 0.0  ;;  %v2373_v35 = vmax.f32 %v1764_v40, 0.0 }
 0x39e   : > { %v2478_v4 = vmax.f32 %v2477_v41, %v2370_v43  ;;  %v2552_v5 = vmax.f32 %v2551_v42, %v2372_v52 }
 0x39f   : > { %v2515_v48 = vmax.f32 %v2514_v44, %v2371_v34  ;;  %v2589_v49 = vmax.f32 %v2588_v1, %v2373_v35  ;;  %v1574_v50 = vpop.f32.mrb[76].mxu0  ;;  %v1767_v51 = vpop.f32.mrb[76].mxu1 }
 0x3a0   : > { %v1575_v53 = vadd.f32 %v1574_v50, %v4137_v36  ;;  %v1768_v54 = vadd.f32 %v1767_v51, %v4139_v37  ;;  %v1576_v55 = vpop.f32.mrb[77].mxu0  ;;  %v1769_v56 = vpop.f32.mrb[77].mxu1 }
 0x3a1   : > { %v1577_v57 = vadd.f32 %v1576_v55, %v4141_v46  ;;  %v1770_v58 = vadd.f32 %v1769_v56, %v4143_v47  ;;  %v1578_v60 = vpop.f32.mrb[78].mxu0  ;;  %v1771_v27 = vpop.f32.mrb[78].mxu1 }
 0x3a2   : > { %v2378_v61 = vmax.f32 %v1575_v53, 0.0  ;;  %v2380_v63 = vmax.f32 %v1768_v54, 0.0  ;;  %v1579_v0 = vadd.f32 %v1578_v60, %v4137_v36  ;;  %v1772_v2 = vadd.f32 %v1771_v27, %v4139_v37  ;;  %v1580_v3 = vpop.f32.mrb[79].mxu0  ;;  %v1773_v6 = vpop.f32.mrb[79].mxu1 }
 0x3a3   : > { %v2379_v59 = vmax.f32 %v1577_v57, 0.0  ;;  %v2381_v45 = vmax.f32 %v1770_v58, 0.0  ;;  %v1581_v7 = vadd.f32 %v1580_v3, %v4141_v46  ;;  %v1774_v8 = vadd.f32 %v1773_v6, %v4143_v47 }
 0x3a4   : > { %v2479_v9 = vmax.f32 %v2478_v4, %v2378_v61  ;;  %v2553_v10 = vmax.f32 %v2552_v5, %v2380_v63  ;;  %v2386_v12 = vmax.f32 %v1579_v0, 0.0  ;;  %v2388_v25 = vmax.f32 %v1772_v2, 0.0 }
 0x3a5   : > { %v2516_v13 = vmax.f32 %v2515_v48, %v2379_v59  ;;  %v2590_v14 = vmax.f32 %v2589_v49, %v2381_v45  ;;  %v2387_v15 = vmax.f32 %v1581_v7, 0.0  ;;  %v2389_v16 = vmax.f32 %v1774_v8, 0.0 }
 0x3a6   : > { %v2480_v17 = vmax.f32 %v2479_v9, %v2386_v12  ;;  %v2554_v18 = vmax.f32 %v2553_v10, %v2388_v25 }
 0x3a7   : > { %v2517_v19 = vmax.f32 %v2516_v13, %v2387_v15  ;;  %v2591_v20 = vmax.f32 %v2590_v14, %v2389_v16  ;;  %v1584_v21 = vpop.f32.mrb[80].mxu0  ;;  %v1777_v22 = vpop.f32.mrb[80].mxu1 }
 0x3a8   : > { %v1585_v11 = vadd.f32 %v1584_v21, %v4137_v36  ;;  %v1778_v23 = vadd.f32 %v1777_v22, %v4139_v37  ;;  %v1586_v24 = vpop.f32.mrb[81].mxu0  ;;  %v1779_v28 = vpop.f32.mrb[81].mxu1 }
 0x3a9   : > { %v1587_v29 = vadd.f32 %v1586_v24, %v4141_v46  ;;  %v1780_v30 = vadd.f32 %v1779_v28, %v4143_v47  ;;  %v1588_v31 = vpop.f32.mrb[82].mxu0  ;;  %v1781_v32 = vpop.f32.mrb[82].mxu1 }
 0x3aa   : > { %v2394_v33 = vmax.f32 %v1585_v11, 0.0  ;;  %v2396_v26 = vmax.f32 %v1778_v23, 0.0  ;;  %v1589_v38 = vadd.f32 %v1588_v31, %v4137_v36  ;;  %v1782_v39 = vadd.f32 %v1781_v32, %v4139_v37  ;;  %v1590_v40 = vpop.f32.mrb[83].mxu0  ;;  %v1783_v41 = vpop.f32.mrb[83].mxu1 }
 0x3ab   : > { %v2395_v42 = vmax.f32 %v1587_v29, 0.0  ;;  %v2397_v43 = vmax.f32 %v1780_v30, 0.0  ;;  %v1591_v52 = vadd.f32 %v1590_v40, %v4141_v46  ;;  %v1784_v44 = vadd.f32 %v1783_v41, %v4143_v47 }
 0x3ac   : > { %v2481_v1 = vmax.f32 %v2480_v17, %v2394_v33  ;;  %v2555_v34 = vmax.f32 %v2554_v18, %v2396_v26  ;;  %v2402_v35 = vmax.f32 %v1589_v38, 0.0  ;;  %v2404_v4 = vmax.f32 %v1782_v39, 0.0 }
 0x3ad   : > { %v2518_v5 = vmax.f32 %v2517_v19, %v2395_v42  ;;  %v2592_v48 = vmax.f32 %v2591_v20, %v2397_v43  ;;  %v2403_v49 = vmax.f32 %v1591_v52, 0.0  ;;  %v2405_v50 = vmax.f32 %v1784_v44, 0.0 }
 0x3ae   : > { %v2482_v51 = vmax.f32 %v2481_v1, %v2402_v35  ;;  %v2556_v53 = vmax.f32 %v2555_v34, %v2404_v4  ;;  %v1088_v26 = vsub.s32 4, %v4127_v62  ;;  %v1096_v38 = vsub.s32 6, %v4127_v62 }
 0x3af   : > { %v2519_v54 = vmax.f32 %v2518_v5, %v2403_v49  ;;  %v2593_v55 = vmax.f32 %v2592_v48, %v2405_v50  ;;  %v1594_v56 = vpop.f32.mrb[84].mxu0  ;;  %v1787_v57 = vpop.f32.mrb[84].mxu1  ;;  %v1092_v43 = vsub.s32 5, %v4127_v62  ;;  %v1100_v52 = vsub.s32 7, %v4127_v62 }
 0x3b0   : > { %v1595_v58 = vadd.f32 %v1594_v56, %v4137_v36  ;;  %v1788_v60 = vadd.f32 %v1787_v57, %v4139_v37  ;;  %v1596_v27 = vpop.f32.mrb[85].mxu0  ;;  %v1789_v61 = vpop.f32.mrb[85].mxu1 }
 0x3b1   : > { %v1597_v63 = vadd.f32 %v1596_v27, %v4141_v46  ;;  %v1790_v0 = vadd.f32 %v1789_v61, %v4143_v47  ;;  %v1598_v2 = vpop.f32.mrb[86].mxu0  ;;  %v1791_v3 = vpop.f32.mrb[86].mxu1 }
 0x3b2   : > { %v2410_v6 = vmax.f32 %v1595_v58, 0.0  ;;  %v2412_v59 = vmax.f32 %v1788_v60, 0.0  ;;  %v1599_v45 = vadd.f32 %v1598_v2, %v4137_v36  ;;  %v1792_v7 = vadd.f32 %v1791_v3, %v4139_v37  ;;  %v1600_v8 = vpop.f32.mrb[87].mxu0  ;;  %v1793_v9 = vpop.f32.mrb[87].mxu1 }
 0x3b3   : > { %v2411_v10 = vmax.f32 %v1597_v63, 0.0  ;;  %v2413_v12 = vmax.f32 %v1790_v0, 0.0  ;;  %v1601_v25 = vadd.f32 %v1600_v8, %v4141_v46  ;;  %v1794_v13 = vadd.f32 %v1793_v9, %v4143_v47  ;;  %v3364_v9 = vld [vmem:[#allocation10] sm:$0xff] }
 0x3b4   : > { %v2483_v14 = vmax.f32 %v2482_v51, %v2410_v6  ;;  %v2557_v15 = vmax.f32 %v2556_v53, %v2412_v59  ;;  %v2418_v16 = vmax.f32 %v1599_v45, 0.0  ;;  %v2420_v17 = vmax.f32 %v1792_v7, 0.0 }
 0x3b5   : > { %v2520_v18 = vmax.f32 %v2519_v54, %v2411_v10  ;;  %v2594_v19 = vmax.f32 %v2593_v55, %v2413_v12  ;;  %v2419_v20 = vmax.f32 %v1601_v25, 0.0  ;;  %v2421_v21 = vmax.f32 %v1794_v13, 0.0 }
 0x3b6   : > { %v2484_v22 = vmax.f32 %v2483_v14, %v2418_v16  ;;  %v2558_v11 = vmax.f32 %v2557_v15, %v2420_v17  ;;  %v4291_v10 = vrot.slane %v3364_v9, %v1088_v26  ;;  %v4293_v12 = vrot.slane %v3364_v9, %v1096_v38 }
 0x3b7   : > { %v2521_v23 = vmax.f32 %v2520_v18, %v2419_v20  ;;  %v2595_v24 = vmax.f32 %v2594_v19, %v2421_v21  ;;  %v1604_v28 = vpop.f32.mrb[88].mxu0  ;;  %v1797_v29 = vpop.f32.mrb[88].mxu1  ;;  %v4297_v16 = vrot.slane %v3364_v9, %v1092_v43  ;;  %v4299_v17 = vrot.slane %v3364_v9, %v1100_v52 }
 0x3b8   : > { %v1605_v30 = vadd.f32 %v1604_v28, %v4137_v36  ;;  %v1798_v31 = vadd.f32 %v1797_v29, %v4139_v37  ;;  %v1606_v32 = vpop.f32.mrb[89].mxu0  ;;  %v1799_v33 = vpop.f32.mrb[89].mxu1 }
 0x3b9   : > { %v1607_v39 = vadd.f32 %v1606_v32, %v4141_v46  ;;  %v1800_v40 = vadd.f32 %v1799_v33, %v4143_v47  ;;  %v1608_v41 = vpop.f32.mrb[90].mxu0  ;;  %v1801_v42 = vpop.f32.mrb[90].mxu1 }
 0x3ba   : > { %v2426_v44 = vmax.f32 %v1605_v30, 0.0  ;;  %v2428_v1 = vmax.f32 %v1798_v31, 0.0  ;;  %v1609_v34 = vadd.f32 %v1608_v41, %v4137_v36  ;;  %v1802_v35 = vadd.f32 %v1801_v42, %v4139_v37  ;;  %v1610_v4 = vpop.f32.mrb[91].mxu0  ;;  %v1803_v5 = vpop.f32.mrb[91].mxu1 }
 0x3bb   : > { %v2427_v48 = vmax.f32 %v1607_v39, 0.0  ;;  %v2429_v49 = vmax.f32 %v1800_v40, 0.0  ;;  %v1611_v50 = vadd.f32 %v1610_v4, %v4141_v46  ;;  %v1804_v51 = vadd.f32 %v1803_v5, %v4143_v47 }
 0x3bc   : > { %v2485_v53 = vmax.f32 %v2484_v22, %v2426_v44  ;;  %v2559_v54 = vmax.f32 %v2558_v11, %v2428_v1  ;;  %v2434_v55 = vmax.f32 %v1609_v34, 0.0  ;;  %v2436_v56 = vmax.f32 %v1802_v35, 0.0 }
 0x3bd   : > { %v2522_v57 = vmax.f32 %v2521_v23, %v2427_v48  ;;  %v2596_v58 = vmax.f32 %v2595_v24, %v2429_v49  ;;  %v2435_v60 = vmax.f32 %v1611_v50, 0.0  ;;  %v2437_v27 = vmax.f32 %v1804_v51, 0.0 }
 0x3be   : > { %v2486_v61 = vmax.f32 %v2485_v53, %v2434_v55  ;;  %v2560_v63 = vmax.f32 %v2559_v54, %v2436_v56 }
 0x3bf   : > { %v2523_v0 = vmax.f32 %v2522_v57, %v2435_v60  ;;  %v2597_v2 = vmax.f32 %v2596_v58, %v2437_v27  ;;  %v1614_v3 = vpop.f32.mrb[92].mxu0  ;;  %v1807_v6 = vpop.f32.mrb[92].mxu1 }
 0x3c0   : > { %v1615_v59 = vadd.f32 %v1614_v3, %v4137_v36  ;;  %v1808_v45 = vadd.f32 %v1807_v6, %v4139_v37  ;;  %v1616_v7 = vpop.f32.mrb[93].mxu0  ;;  %v1809_v8 = vpop.f32.mrb[93].mxu1 }
 0x3c1   : > { %v1617_v25 = vadd.f32 %v1616_v7, %v4141_v46  ;;  %v1810_v13 = vadd.f32 %v1809_v8, %v4143_v47  ;;  %v1618_v14 = vpop.f32.mrb[94].mxu0  ;;  %v1811_v15 = vpop.f32.mrb[94].mxu1 }
 0x3c2   : > { %v2442_v18 = vmax.f32 %v1615_v59, 0.0  ;;  %v2444_v19 = vmax.f32 %v1808_v45, 0.0  ;;  %v1619_v20 = vadd.f32 %v1618_v14, %v4137_v36  ;;  %v1812_v21 = vadd.f32 %v1811_v15, %v4139_v37  ;;  %v1620_v22 = vpop.f32.mrb[95].mxu0  ;;  %v1813_v11 = vpop.f32.mrb[95].mxu1 }
 0x3c3   : > { %v2443_v23 = vmax.f32 %v1617_v25, 0.0  ;;  %v2445_v24 = vmax.f32 %v1810_v13, 0.0  ;;  %v1621_v28 = vadd.f32 %v1620_v22, %v4141_v46  ;;  %v1814_v29 = vadd.f32 %v1813_v11, %v4143_v47 }
 0x3c4   : > { %v2487_v30 = vmax.f32 %v2486_v61, %v2442_v18  ;;  %v2561_v31 = vmax.f32 %v2560_v63, %v2444_v19  ;;  %v2450_v32 = vmax.f32 %v1619_v20, 0.0  ;;  %v2452_v33 = vmax.f32 %v1812_v21, 0.0 }
 0x3c5   : > { %v2524_v26 = vmax.f32 %v2523_v0, %v2443_v23  ;;  %v2598_v38 = vmax.f32 %v2597_v2, %v2445_v24  ;;  %v2451_v39 = vmax.f32 %v1621_v28, 0.0  ;;  %v2453_v40 = vmax.f32 %v1814_v29, 0.0 }
 0x3c6   : > { %v2488_v41 = vmax.f32 %v2487_v30, %v2450_v32  ;;  %v2562_v36 = vmax.f32 %v2561_v31, %v2452_v33 }
 0x3c7   : > { %v2525_v42 = vmax.f32 %v2524_v26, %v2451_v39  ;;  %v2599_v37 = vmax.f32 %v2598_v38, %v2453_v40  ;;  %v1850_v43 = vpop.f32.mrb[96].mxu0  ;;  %v2043_v52 = vpop.f32.mrb[96].mxu1 }
 0x3c8   : > { %v2489_v44 = vrot.slane %v2488_v41, 4  ;;  %v2563_v1 = vrot.slane %v2562_v36, 4  ;;  %v1851_v46 = vadd.f32 %v1850_v43, %v4291_v10  ;;  %v2044_v47 = vadd.f32 %v2043_v52, %v4293_v12  ;;  %v1852_v34 = vpop.f32.mrb[97].mxu0  ;;  %v2045_v35 = vpop.f32.mrb[97].mxu1 }
 0x3c9   : > { %v2526_v4 = vrot.slane %v2525_v42, 4  ;;  %v2600_v5 = vrot.slane %v2599_v37, 4  ;;  %v1853_v48 = vadd.f32 %v1852_v34, %v4297_v16  ;;  %v2046_v49 = vadd.f32 %v2045_v35, %v4299_v17  ;;  %v1854_v50 = vpop.f32.mrb[98].mxu0  ;;  %v2047_v51 = vpop.f32.mrb[98].mxu1 }
 0x3ca   : > { %v2490_v53 = vmax.f32 %v2488_v41, %v2489_v44  ;;  %v2564_v54 = vmax.f32 %v2562_v36, %v2563_v1  ;;  %v2206_v55 = vmax.f32 %v1851_v46, 0.0  ;;  %v2208_v56 = vmax.f32 %v2044_v47, 0.0  ;;  %v1856_v57 = vpop.f32.mrb[99].mxu0  ;;  %v2049_v58 = vpop.f32.mrb[99].mxu1 }
 0x3cb   : > { %v2527_v60 = vmax.f32 %v2525_v42, %v2526_v4  ;;  %v2601_v27 = vmax.f32 %v2599_v37, %v2600_v5  ;;  %v2207_v61 = vmax.f32 %v1853_v48, 0.0  ;;  %v2209_v63 = vmax.f32 %v2046_v49, 0.0 }
 0x3cc   : > { %v2491_v0 = vrot.slane %v2490_v53, 2  ;;  %v2565_v2 = vrot.slane %v2564_v54, 2  ;;  %v1855_v3 = vadd.f32 %v1854_v50, %v4291_v10  ;;  %v2048_v6 = vadd.f32 %v2047_v51, %v4293_v12 }
 0x3cd   : > { %v2528_v59 = vrot.slane %v2527_v60, 2  ;;  %v2602_v45 = vrot.slane %v2601_v27, 2  ;;  %v1857_v7 = vadd.f32 %v1856_v57, %v4297_v16  ;;  %v2050_v8 = vadd.f32 %v2049_v58, %v4299_v17 }
 0x3ce   : > { %v2492_v9 = vmax.f32 %v2490_v53, %v2491_v0  ;;  %v2566_v25 = vmax.f32 %v2564_v54, %v2565_v2  ;;  %v2214_v13 = vmax.f32 %v1855_v3, 0.0  ;;  %v2216_v14 = vmax.f32 %v2048_v6, 0.0 }
 0x3cf   : > { %v2529_v15 = vmax.f32 %v2527_v60, %v2528_v59  ;;  %v2603_v18 = vmax.f32 %v2601_v27, %v2602_v45  ;;  %v2215_v19 = vmax.f32 %v1857_v7, 0.0  ;;  %v2217_v20 = vmax.f32 %v2050_v8, 0.0  ;;  %v1860_v21 = vpop.f32.mrb[100].mxu0  ;;  %v2053_v22 = vpop.f32.mrb[100].mxu1 }
 0x3d0   : > { %v2493_v11 = vrot.slane %v2492_v9, 1  ;;  %v2567_v23 = vrot.slane %v2566_v25, 1  ;;  %v2606_v24 = vmax.f32 %v2206_v55, %v2214_v13  ;;  %v2680_v28 = vmax.f32 %v2208_v56, %v2216_v14  ;;  %v1862_v29 = vpop.f32.mrb[101].mxu0  ;;  %v2055_v30 = vpop.f32.mrb[101].mxu1 }
 0x3d1   : > { %v2530_v31 = vrot.slane %v2529_v15, 1  ;;  %v2604_v32 = vrot.slane %v2603_v18, 1  ;;  %v2643_v33 = vmax.f32 %v2207_v61, %v2215_v19  ;;  %v2717_v26 = vmax.f32 %v2209_v63, %v2217_v20  ;;  %v1864_v38 = vpop.f32.mrb[102].mxu0  ;;  %v2057_v39 = vpop.f32.mrb[102].mxu1 }
 0x3d2   : > { %v4313_v40 = vmax.f32 %v2492_v9, %v2493_v11  ;;  %v4315_v41 = vmax.f32 %v2566_v25, %v2567_v23  ;;  %v1861_v36 = vadd.f32 %v1860_v21, %v4291_v10  ;;  %v2054_v42 = vadd.f32 %v2053_v22, %v4293_v12  ;;  %v1866_v37 = vpop.f32.mrb[103].mxu0  ;;  %v2059_v43 = vpop.f32.mrb[103].mxu1 }
 0x3d3   : > { %v4319_v52 = vmax.f32 %v2529_v15, %v2530_v31  ;;  %v4321_v44 = vmax.f32 %v2603_v18, %v2604_v32  ;;  %v1863_v1 = vadd.f32 %v1862_v29, %v4297_v16  ;;  %v2056_v46 = vadd.f32 %v2055_v30, %v4299_v17 }
 0x3d4   : > { %v2222_v47 = vmax.f32 %v1861_v36, 0.0  ;;  %v2224_v34 = vmax.f32 %v2054_v42, 0.0  ;;  %v1865_v35 = vadd.f32 %v1864_v38, %v4291_v10  ;;  %v2058_v4 = vadd.f32 %v2057_v39, %v4293_v12 }
 0x3d5   : > { %v2223_v5 = vmax.f32 %v1863_v1, 0.0  ;;  %v2225_v48 = vmax.f32 %v2056_v46, 0.0  ;;  %v1867_v49 = vadd.f32 %v1866_v37, %v4297_v16  ;;  %v2060_v50 = vadd.f32 %v2059_v43, %v4299_v17 }
 0x3d6   : > { %v2607_v51 = vmax.f32 %v2606_v24, %v2222_v47  ;;  %v2681_v53 = vmax.f32 %v2680_v28, %v2224_v34  ;;  %v2230_v54 = vmax.f32 %v1865_v35, 0.0  ;;  %v2232_v55 = vmax.f32 %v2058_v4, 0.0 }
 0x3d7   : > { %v2644_v56 = vmax.f32 %v2643_v33, %v2223_v5  ;;  %v2718_v57 = vmax.f32 %v2717_v26, %v2225_v48  ;;  %v2231_v58 = vmax.f32 %v1867_v49, 0.0  ;;  %v2233_v60 = vmax.f32 %v2060_v50, 0.0  ;;  %v1870_v27 = vpop.f32.mrb[104].mxu0  ;;  %v2063_v61 = vpop.f32.mrb[104].mxu1 }
 0x3d8   : > { %v2608_v63 = vmax.f32 %v2607_v51, %v2230_v54  ;;  %v2682_v0 = vmax.f32 %v2681_v53, %v2232_v55  ;;  %v1871_v2 = vadd.f32 %v1870_v27, %v4291_v10  ;;  %v2064_v3 = vadd.f32 %v2063_v61, %v4293_v12  ;;  %v1872_v6 = vpop.f32.mrb[105].mxu0  ;;  %v2065_v59 = vpop.f32.mrb[105].mxu1 }
 0x3d9   : > { %v2645_v45 = vmax.f32 %v2644_v56, %v2231_v58  ;;  %v2719_v7 = vmax.f32 %v2718_v57, %v2233_v60  ;;  %v1873_v8 = vadd.f32 %v1872_v6, %v4297_v16  ;;  %v2066_v9 = vadd.f32 %v2065_v59, %v4299_v17  ;;  %v1874_v25 = vpop.f32.mrb[106].mxu0  ;;  %v2067_v13 = vpop.f32.mrb[106].mxu1 }
 0x3da   : > { %v2238_v14 = vmax.f32 %v1871_v2, 0.0  ;;  %v2240_v15 = vmax.f32 %v2064_v3, 0.0  ;;  %v1875_v18 = vadd.f32 %v1874_v25, %v4291_v10  ;;  %v2068_v19 = vadd.f32 %v2067_v13, %v4293_v12  ;;  %v1876_v20 = vpop.f32.mrb[107].mxu0  ;;  %v2069_v21 = vpop.f32.mrb[107].mxu1 }
 0x3db   : > { %v2239_v22 = vmax.f32 %v1873_v8, 0.0  ;;  %v2241_v11 = vmax.f32 %v2066_v9, 0.0  ;;  %v1877_v23 = vadd.f32 %v1876_v20, %v4297_v16  ;;  %v2070_v24 = vadd.f32 %v2069_v21, %v4299_v17 }
 0x3dc   : > { %v2609_v28 = vmax.f32 %v2608_v63, %v2238_v14  ;;  %v2683_v29 = vmax.f32 %v2682_v0, %v2240_v15  ;;  %v2246_v30 = vmax.f32 %v1875_v18, 0.0  ;;  %v2248_v31 = vmax.f32 %v2068_v19, 0.0 }
 0x3dd   : > { %v2646_v32 = vmax.f32 %v2645_v45, %v2239_v22  ;;  %v2720_v33 = vmax.f32 %v2719_v7, %v2241_v11  ;;  %v2247_v26 = vmax.f32 %v1877_v23, 0.0  ;;  %v2249_v38 = vmax.f32 %v2070_v24, 0.0 }
 0x3de   : > { %v2610_v39 = vmax.f32 %v2609_v28, %v2246_v30  ;;  %v2684_v36 = vmax.f32 %v2683_v29, %v2248_v31 }
 0x3df   : > { %v2647_v42 = vmax.f32 %v2646_v32, %v2247_v26  ;;  %v2721_v37 = vmax.f32 %v2720_v33, %v2249_v38  ;;  %v1880_v43 = vpop.f32.mrb[108].mxu0  ;;  %v2073_v1 = vpop.f32.mrb[108].mxu1 }
 0x3e0   : > { %v1881_v46 = vadd.f32 %v1880_v43, %v4291_v10  ;;  %v2074_v47 = vadd.f32 %v2073_v1, %v4293_v12  ;;  %v1882_v34 = vpop.f32.mrb[109].mxu0  ;;  %v2075_v35 = vpop.f32.mrb[109].mxu1 }
 0x3e1   : > { %v1883_v4 = vadd.f32 %v1882_v34, %v4297_v16  ;;  %v2076_v5 = vadd.f32 %v2075_v35, %v4299_v17  ;;  %v1884_v48 = vpop.f32.mrb[110].mxu0  ;;  %v2077_v49 = vpop.f32.mrb[110].mxu1 }
 0x3e2   : > { %v2254_v50 = vmax.f32 %v1881_v46, 0.0  ;;  %v2256_v51 = vmax.f32 %v2074_v47, 0.0  ;;  %v1885_v53 = vadd.f32 %v1884_v48, %v4291_v10  ;;  %v2078_v54 = vadd.f32 %v2077_v49, %v4293_v12  ;;  %v1886_v55 = vpop.f32.mrb[111].mxu0  ;;  %v2079_v56 = vpop.f32.mrb[111].mxu1 }
 0x3e3   : > { %v2255_v57 = vmax.f32 %v1883_v4, 0.0  ;;  %v2257_v58 = vmax.f32 %v2076_v5, 0.0  ;;  %v1887_v60 = vadd.f32 %v1886_v55, %v4297_v16  ;;  %v2080_v27 = vadd.f32 %v2079_v56, %v4299_v17 }
 0x3e4   : > { %v2611_v61 = vmax.f32 %v2610_v39, %v2254_v50  ;;  %v2685_v63 = vmax.f32 %v2684_v36, %v2256_v51  ;;  %v2262_v0 = vmax.f32 %v1885_v53, 0.0  ;;  %v2264_v2 = vmax.f32 %v2078_v54, 0.0 }
 0x3e5   : > { %v2648_v3 = vmax.f32 %v2647_v42, %v2255_v57  ;;  %v2722_v6 = vmax.f32 %v2721_v37, %v2257_v58  ;;  %v2263_v59 = vmax.f32 %v1887_v60, 0.0  ;;  %v2265_v45 = vmax.f32 %v2080_v27, 0.0 }
 0x3e6   : > { %v2612_v7 = vmax.f32 %v2611_v61, %v2262_v0  ;;  %v2686_v8 = vmax.f32 %v2685_v63, %v2264_v2 }
 0x3e7   : > { %v2649_v9 = vmax.f32 %v2648_v3, %v2263_v59  ;;  %v2723_v25 = vmax.f32 %v2722_v6, %v2265_v45  ;;  %v1890_v13 = vpop.f32.mrb[112].mxu0  ;;  %v2083_v14 = vpop.f32.mrb[112].mxu1 }
 0x3e8   : > { %v1891_v15 = vadd.f32 %v1890_v13, %v4291_v10  ;;  %v2084_v18 = vadd.f32 %v2083_v14, %v4293_v12  ;;  %v1892_v19 = vpop.f32.mrb[113].mxu0  ;;  %v2085_v20 = vpop.f32.mrb[113].mxu1 }
 0x3e9   : > { %v1893_v21 = vadd.f32 %v1892_v19, %v4297_v16  ;;  %v2086_v22 = vadd.f32 %v2085_v20, %v4299_v17  ;;  %v1894_v11 = vpop.f32.mrb[114].mxu0  ;;  %v2087_v23 = vpop.f32.mrb[114].mxu1 }
 0x3ea   : > { %v2270_v24 = vmax.f32 %v1891_v15, 0.0  ;;  %v2272_v28 = vmax.f32 %v2084_v18, 0.0  ;;  %v1895_v29 = vadd.f32 %v1894_v11, %v4291_v10  ;;  %v2088_v30 = vadd.f32 %v2087_v23, %v4293_v12  ;;  %v1896_v31 = vpop.f32.mrb[115].mxu0  ;;  %v2089_v32 = vpop.f32.mrb[115].mxu1 }
 0x3eb   : > { %v2271_v33 = vmax.f32 %v1893_v21, 0.0  ;;  %v2273_v26 = vmax.f32 %v2086_v22, 0.0  ;;  %v1897_v38 = vadd.f32 %v1896_v31, %v4297_v16  ;;  %v2090_v39 = vadd.f32 %v2089_v32, %v4299_v17 }
 0x3ec   : > { %v2613_v36 = vmax.f32 %v2612_v7, %v2270_v24  ;;  %v2687_v42 = vmax.f32 %v2686_v8, %v2272_v28  ;;  %v2278_v37 = vmax.f32 %v1895_v29, 0.0  ;;  %v2280_v43 = vmax.f32 %v2088_v30, 0.0 }
 0x3ed   : > { %v2650_v1 = vmax.f32 %v2649_v9, %v2271_v33  ;;  %v2724_v46 = vmax.f32 %v2723_v25, %v2273_v26  ;;  %v2279_v47 = vmax.f32 %v1897_v38, 0.0  ;;  %v2281_v34 = vmax.f32 %v2090_v39, 0.0 }
 0x3ee   : > { %v2614_v35 = vmax.f32 %v2613_v36, %v2278_v37  ;;  %v2688_v4 = vmax.f32 %v2687_v42, %v2280_v43 }
 0x3ef   : > { %v2651_v5 = vmax.f32 %v2650_v1, %v2279_v47  ;;  %v2725_v48 = vmax.f32 %v2724_v46, %v2281_v34  ;;  %v1900_v49 = vpop.f32.mrb[116].mxu0  ;;  %v2093_v50 = vpop.f32.mrb[116].mxu1 }
 0x3f0   : > { %v1901_v51 = vadd.f32 %v1900_v49, %v4291_v10  ;;  %v2094_v53 = vadd.f32 %v2093_v50, %v4293_v12  ;;  %v1902_v54 = vpop.f32.mrb[117].mxu0  ;;  %v2095_v55 = vpop.f32.mrb[117].mxu1 }
 0x3f1   : > { %v1903_v56 = vadd.f32 %v1902_v54, %v4297_v16  ;;  %v2096_v57 = vadd.f32 %v2095_v55, %v4299_v17  ;;  %v1904_v58 = vpop.f32.mrb[118].mxu0  ;;  %v2097_v60 = vpop.f32.mrb[118].mxu1 }
 0x3f2   : > { %v2286_v27 = vmax.f32 %v1901_v51, 0.0  ;;  %v2288_v61 = vmax.f32 %v2094_v53, 0.0  ;;  %v1905_v63 = vadd.f32 %v1904_v58, %v4291_v10  ;;  %v2098_v0 = vadd.f32 %v2097_v60, %v4293_v12  ;;  %v1906_v2 = vpop.f32.mrb[119].mxu0  ;;  %v2099_v3 = vpop.f32.mrb[119].mxu1 }
 0x3f3   : > { %v2287_v6 = vmax.f32 %v1903_v56, 0.0  ;;  %v2289_v59 = vmax.f32 %v2096_v57, 0.0  ;;  %v1907_v45 = vadd.f32 %v1906_v2, %v4297_v16  ;;  %v2100_v7 = vadd.f32 %v2099_v3, %v4299_v17 }
 0x3f4   : > { %v2615_v8 = vmax.f32 %v2614_v35, %v2286_v27  ;;  %v2689_v9 = vmax.f32 %v2688_v4, %v2288_v61  ;;  %v2294_v25 = vmax.f32 %v1905_v63, 0.0  ;;  %v2296_v13 = vmax.f32 %v2098_v0, 0.0 }
 0x3f5   : > { %v2652_v14 = vmax.f32 %v2651_v5, %v2287_v6  ;;  %v2726_v15 = vmax.f32 %v2725_v48, %v2289_v59  ;;  %v2295_v18 = vmax.f32 %v1907_v45, 0.0  ;;  %v2297_v19 = vmax.f32 %v2100_v7, 0.0 }
 0x3f6   : > { %v2616_v20 = vmax.f32 %v2615_v8, %v2294_v25  ;;  %v2690_v21 = vmax.f32 %v2689_v9, %v2296_v13 }
 0x3f7   : > { %v2653_v22 = vmax.f32 %v2652_v14, %v2295_v18  ;;  %v2727_v11 = vmax.f32 %v2726_v15, %v2297_v19  ;;  %v1910_v23 = vpop.f32.mrb[120].mxu0  ;;  %v2103_v24 = vpop.f32.mrb[120].mxu1 }
 0x3f8   : > { %v1911_v28 = vadd.f32 %v1910_v23, %v4291_v10  ;;  %v2104_v29 = vadd.f32 %v2103_v24, %v4293_v12  ;;  %v1912_v30 = vpop.f32.mrb[121].mxu0  ;;  %v2105_v31 = vpop.f32.mrb[121].mxu1 }
 0x3f9   : > { %v1913_v32 = vadd.f32 %v1912_v30, %v4297_v16  ;;  %v2106_v33 = vadd.f32 %v2105_v31, %v4299_v17  ;;  %v1914_v26 = vpop.f32.mrb[122].mxu0  ;;  %v2107_v38 = vpop.f32.mrb[122].mxu1 }
 0x3fa   : > { %v2302_v39 = vmax.f32 %v1911_v28, 0.0  ;;  %v2304_v36 = vmax.f32 %v2104_v29, 0.0  ;;  %v1915_v42 = vadd.f32 %v1914_v26, %v4291_v10  ;;  %v2108_v37 = vadd.f32 %v2107_v38, %v4293_v12  ;;  %v1916_v43 = vpop.f32.mrb[123].mxu0  ;;  %v2109_v1 = vpop.f32.mrb[123].mxu1 }
 0x3fb   : > { %v2303_v46 = vmax.f32 %v1913_v32, 0.0  ;;  %v2305_v47 = vmax.f32 %v2106_v33, 0.0  ;;  %v1917_v34 = vadd.f32 %v1916_v43, %v4297_v16  ;;  %v2110_v35 = vadd.f32 %v2109_v1, %v4299_v17 }
 0x3fc   : > { %v2617_v4 = vmax.f32 %v2616_v20, %v2302_v39  ;;  %v2691_v5 = vmax.f32 %v2690_v21, %v2304_v36  ;;  %v2310_v48 = vmax.f32 %v1915_v42, 0.0  ;;  %v2312_v49 = vmax.f32 %v2108_v37, 0.0 }
 0x3fd   : > { %v2654_v50 = vmax.f32 %v2653_v22, %v2303_v46  ;;  %v2728_v51 = vmax.f32 %v2727_v11, %v2305_v47  ;;  %v2311_v53 = vmax.f32 %v1917_v34, 0.0  ;;  %v2313_v54 = vmax.f32 %v2110_v35, 0.0 }
 0x3fe   : > { %v2618_v55 = vmax.f32 %v2617_v4, %v2310_v48  ;;  %v2692_v56 = vmax.f32 %v2691_v5, %v2312_v49 }
 0x3ff   : > { %v2655_v57 = vmax.f32 %v2654_v50, %v2311_v53  ;;  %v2729_v58 = vmax.f32 %v2728_v51, %v2313_v54  ;;  %v1920_v60 = vpop.f32.mrb[124].mxu0  ;;  %v2113_v27 = vpop.f32.mrb[124].mxu1 }
 0x400   : > { %v1921_v61 = vadd.f32 %v1920_v60, %v4291_v10  ;;  %v2114_v63 = vadd.f32 %v2113_v27, %v4293_v12  ;;  %v1922_v0 = vpop.f32.mrb[125].mxu0  ;;  %v2115_v2 = vpop.f32.mrb[125].mxu1 }
 0x401   : > { %v1923_v3 = vadd.f32 %v1922_v0, %v4297_v16  ;;  %v2116_v6 = vadd.f32 %v2115_v2, %v4299_v17  ;;  %v1924_v59 = vpop.f32.mrb[126].mxu0  ;;  %v2117_v45 = vpop.f32.mrb[126].mxu1 }
 0x402   : > { %v2318_v7 = vmax.f32 %v1921_v61, 0.0  ;;  %v2320_v8 = vmax.f32 %v2114_v63, 0.0  ;;  %v1925_v9 = vadd.f32 %v1924_v59, %v4291_v10  ;;  %v2118_v25 = vadd.f32 %v2117_v45, %v4293_v12  ;;  %v1926_v13 = vpop.f32.mrb[127].mxu0  ;;  %v2119_v14 = vpop.f32.mrb[127].mxu1 }
 0x403   : > { %v2319_v15 = vmax.f32 %v1923_v3, 0.0  ;;  %v2321_v18 = vmax.f32 %v2116_v6, 0.0  ;;  %v1927_v19 = vadd.f32 %v1926_v13, %v4297_v16  ;;  %v2120_v20 = vadd.f32 %v2119_v14, %v4299_v17 }
 0x404   : > { %v2619_v21 = vmax.f32 %v2618_v55, %v2318_v7  ;;  %v2693_v22 = vmax.f32 %v2692_v56, %v2320_v8  ;;  %v2326_v11 = vmax.f32 %v1925_v9, 0.0  ;;  %v2328_v23 = vmax.f32 %v2118_v25, 0.0 }
 0x405   : > { %v2656_v24 = vmax.f32 %v2655_v57, %v2319_v15  ;;  %v2730_v28 = vmax.f32 %v2729_v58, %v2321_v18  ;;  %v2327_v29 = vmax.f32 %v1927_v19, 0.0  ;;  %v2329_v30 = vmax.f32 %v2120_v20, 0.0 }
 0x406   : > { %v2620_v31 = vmax.f32 %v2619_v21, %v2326_v11  ;;  %v2694_v32 = vmax.f32 %v2693_v22, %v2328_v23 }
 0x407   : > { %v2657_v33 = vmax.f32 %v2656_v24, %v2327_v29  ;;  %v2731_v26 = vmax.f32 %v2730_v28, %v2329_v30  ;;  %v1930_v38 = vpop.f32.mrb[128].mxu0  ;;  %v2123_v39 = vpop.f32.mrb[128].mxu1 }
 0x408   : > { %v1931_v36 = vadd.f32 %v1930_v38, %v4291_v10  ;;  %v2124_v42 = vadd.f32 %v2123_v39, %v4293_v12  ;;  %v1932_v37 = vpop.f32.mrb[129].mxu0  ;;  %v2125_v43 = vpop.f32.mrb[129].mxu1 }
 0x409   : > { %v1933_v1 = vadd.f32 %v1932_v37, %v4297_v16  ;;  %v2126_v46 = vadd.f32 %v2125_v43, %v4299_v17  ;;  %v1934_v47 = vpop.f32.mrb[130].mxu0  ;;  %v2127_v34 = vpop.f32.mrb[130].mxu1 }
 0x40a   : > { %v2334_v35 = vmax.f32 %v1931_v36, 0.0  ;;  %v2336_v4 = vmax.f32 %v2124_v42, 0.0  ;;  %v1935_v5 = vadd.f32 %v1934_v47, %v4291_v10  ;;  %v2128_v48 = vadd.f32 %v2127_v34, %v4293_v12  ;;  %v1936_v49 = vpop.f32.mrb[131].mxu0  ;;  %v2129_v50 = vpop.f32.mrb[131].mxu1 }
 0x40b   : > { %v2335_v51 = vmax.f32 %v1933_v1, 0.0  ;;  %v2337_v53 = vmax.f32 %v2126_v46, 0.0  ;;  %v1937_v54 = vadd.f32 %v1936_v49, %v4297_v16  ;;  %v2130_v55 = vadd.f32 %v2129_v50, %v4299_v17 }
 0x40c   : > { %v2621_v56 = vmax.f32 %v2620_v31, %v2334_v35  ;;  %v2695_v57 = vmax.f32 %v2694_v32, %v2336_v4  ;;  %v2342_v58 = vmax.f32 %v1935_v5, 0.0  ;;  %v2344_v60 = vmax.f32 %v2128_v48, 0.0 }
 0x40d   : > { %v2658_v27 = vmax.f32 %v2657_v33, %v2335_v51  ;;  %v2732_v61 = vmax.f32 %v2731_v26, %v2337_v53  ;;  %v2343_v63 = vmax.f32 %v1937_v54, 0.0  ;;  %v2345_v0 = vmax.f32 %v2130_v55, 0.0 }
 0x40e   : > { %v2622_v2 = vmax.f32 %v2621_v56, %v2342_v58  ;;  %v2696_v3 = vmax.f32 %v2695_v57, %v2344_v60 }
 0x40f   : > { %v2659_v6 = vmax.f32 %v2658_v27, %v2343_v63  ;;  %v2733_v59 = vmax.f32 %v2732_v61, %v2345_v0  ;;  %v1940_v45 = vpop.f32.mrb[132].mxu0  ;;  %v2133_v7 = vpop.f32.mrb[132].mxu1 }
 0x410   : > { %v1941_v8 = vadd.f32 %v1940_v45, %v4291_v10  ;;  %v2134_v9 = vadd.f32 %v2133_v7, %v4293_v12  ;;  %v1942_v25 = vpop.f32.mrb[133].mxu0  ;;  %v2135_v13 = vpop.f32.mrb[133].mxu1 }
 0x411   : > { %v1943_v14 = vadd.f32 %v1942_v25, %v4297_v16  ;;  %v2136_v15 = vadd.f32 %v2135_v13, %v4299_v17  ;;  %v1944_v18 = vpop.f32.mrb[134].mxu0  ;;  %v2137_v19 = vpop.f32.mrb[134].mxu1 }
 0x412   : > { %v2350_v20 = vmax.f32 %v1941_v8, 0.0  ;;  %v2352_v21 = vmax.f32 %v2134_v9, 0.0  ;;  %v1945_v22 = vadd.f32 %v1944_v18, %v4291_v10  ;;  %v2138_v11 = vadd.f32 %v2137_v19, %v4293_v12  ;;  %v1946_v23 = vpop.f32.mrb[135].mxu0  ;;  %v2139_v24 = vpop.f32.mrb[135].mxu1 }
 0x413   : > { %v2351_v28 = vmax.f32 %v1943_v14, 0.0  ;;  %v2353_v29 = vmax.f32 %v2136_v15, 0.0  ;;  %v1947_v30 = vadd.f32 %v1946_v23, %v4297_v16  ;;  %v2140_v31 = vadd.f32 %v2139_v24, %v4299_v17 }
 0x414   : > { %v2623_v32 = vmax.f32 %v2622_v2, %v2350_v20  ;;  %v2697_v33 = vmax.f32 %v2696_v3, %v2352_v21  ;;  %v2358_v26 = vmax.f32 %v1945_v22, 0.0  ;;  %v2360_v38 = vmax.f32 %v2138_v11, 0.0 }
 0x415   : > { %v2660_v39 = vmax.f32 %v2659_v6, %v2351_v28  ;;  %v2734_v36 = vmax.f32 %v2733_v59, %v2353_v29  ;;  %v2359_v42 = vmax.f32 %v1947_v30, 0.0  ;;  %v2361_v37 = vmax.f32 %v2140_v31, 0.0 }
 0x416   : > { %v2624_v43 = vmax.f32 %v2623_v32, %v2358_v26  ;;  %v2698_v1 = vmax.f32 %v2697_v33, %v2360_v38 }
 0x417   : > { %v2661_v46 = vmax.f32 %v2660_v39, %v2359_v42  ;;  %v2735_v47 = vmax.f32 %v2734_v36, %v2361_v37  ;;  %v1950_v34 = vpop.f32.mrb[136].mxu0  ;;  %v2143_v35 = vpop.f32.mrb[136].mxu1 }
 0x418   : > { %v1951_v4 = vadd.f32 %v1950_v34, %v4291_v10  ;;  %v2144_v5 = vadd.f32 %v2143_v35, %v4293_v12  ;;  %v1952_v48 = vpop.f32.mrb[137].mxu0  ;;  %v2145_v49 = vpop.f32.mrb[137].mxu1 }
 0x419   : > { %v1953_v50 = vadd.f32 %v1952_v48, %v4297_v16  ;;  %v2146_v51 = vadd.f32 %v2145_v49, %v4299_v17  ;;  %v1954_v53 = vpop.f32.mrb[138].mxu0  ;;  %v2147_v54 = vpop.f32.mrb[138].mxu1 }
 0x41a   : > { %v2366_v55 = vmax.f32 %v1951_v4, 0.0  ;;  %v2368_v56 = vmax.f32 %v2144_v5, 0.0  ;;  %v1955_v57 = vadd.f32 %v1954_v53, %v4291_v10  ;;  %v2148_v58 = vadd.f32 %v2147_v54, %v4293_v12  ;;  %v1956_v60 = vpop.f32.mrb[139].mxu0  ;;  %v2149_v27 = vpop.f32.mrb[139].mxu1 }
 0x41b   : > { %v2367_v61 = vmax.f32 %v1953_v50, 0.0  ;;  %v2369_v63 = vmax.f32 %v2146_v51, 0.0  ;;  %v1957_v0 = vadd.f32 %v1956_v60, %v4297_v16  ;;  %v2150_v2 = vadd.f32 %v2149_v27, %v4299_v17 }
 0x41c   : > { %v2625_v3 = vmax.f32 %v2624_v43, %v2366_v55  ;;  %v2699_v6 = vmax.f32 %v2698_v1, %v2368_v56  ;;  %v2374_v59 = vmax.f32 %v1955_v57, 0.0  ;;  %v2376_v45 = vmax.f32 %v2148_v58, 0.0 }
 0x41d   : > { %v2662_v7 = vmax.f32 %v2661_v46, %v2367_v61  ;;  %v2736_v8 = vmax.f32 %v2735_v47, %v2369_v63  ;;  %v2375_v9 = vmax.f32 %v1957_v0, 0.0  ;;  %v2377_v25 = vmax.f32 %v2150_v2, 0.0 }
 0x41e   : > { %v2626_v13 = vmax.f32 %v2625_v3, %v2374_v59  ;;  %v2700_v14 = vmax.f32 %v2699_v6, %v2376_v45 }
 0x41f   : > { %v2663_v15 = vmax.f32 %v2662_v7, %v2375_v9  ;;  %v2737_v18 = vmax.f32 %v2736_v8, %v2377_v25  ;;  %v1960_v19 = vpop.f32.mrb[140].mxu0  ;;  %v2153_v20 = vpop.f32.mrb[140].mxu1 }
 0x420   : > { %v1961_v21 = vadd.f32 %v1960_v19, %v4291_v10  ;;  %v2154_v22 = vadd.f32 %v2153_v20, %v4293_v12  ;;  %v1962_v11 = vpop.f32.mrb[141].mxu0  ;;  %v2155_v23 = vpop.f32.mrb[141].mxu1 }
 0x421   : > { %v1963_v24 = vadd.f32 %v1962_v11, %v4297_v16  ;;  %v2156_v28 = vadd.f32 %v2155_v23, %v4299_v17  ;;  %v1964_v29 = vpop.f32.mrb[142].mxu0  ;;  %v2157_v30 = vpop.f32.mrb[142].mxu1 }
 0x422   : > { %v2382_v31 = vmax.f32 %v1961_v21, 0.0  ;;  %v2384_v32 = vmax.f32 %v2154_v22, 0.0  ;;  %v1965_v33 = vadd.f32 %v1964_v29, %v4291_v10  ;;  %v2158_v26 = vadd.f32 %v2157_v30, %v4293_v12  ;;  %v1966_v38 = vpop.f32.mrb[143].mxu0  ;;  %v2159_v39 = vpop.f32.mrb[143].mxu1 }
 0x423   : > { %v2383_v36 = vmax.f32 %v1963_v24, 0.0  ;;  %v2385_v42 = vmax.f32 %v2156_v28, 0.0  ;;  %v1967_v37 = vadd.f32 %v1966_v38, %v4297_v16  ;;  %v2160_v43 = vadd.f32 %v2159_v39, %v4299_v17 }
 0x424   : > { %v2627_v1 = vmax.f32 %v2626_v13, %v2382_v31  ;;  %v2701_v46 = vmax.f32 %v2700_v14, %v2384_v32  ;;  %v2390_v47 = vmax.f32 %v1965_v33, 0.0  ;;  %v2392_v34 = vmax.f32 %v2158_v26, 0.0 }
 0x425   : > { %v2664_v35 = vmax.f32 %v2663_v15, %v2383_v36  ;;  %v2738_v4 = vmax.f32 %v2737_v18, %v2385_v42  ;;  %v2391_v5 = vmax.f32 %v1967_v37, 0.0  ;;  %v2393_v48 = vmax.f32 %v2160_v43, 0.0 }
 0x426   : > { %v2628_v49 = vmax.f32 %v2627_v1, %v2390_v47  ;;  %v2702_v50 = vmax.f32 %v2701_v46, %v2392_v34 }
 0x427   : > { %v2665_v51 = vmax.f32 %v2664_v35, %v2391_v5  ;;  %v2739_v53 = vmax.f32 %v2738_v4, %v2393_v48  ;;  %v1970_v54 = vpop.f32.mrb[144].mxu0  ;;  %v2163_v55 = vpop.f32.mrb[144].mxu1 }
 0x428   : > { %v1971_v56 = vadd.f32 %v1970_v54, %v4291_v10  ;;  %v2164_v57 = vadd.f32 %v2163_v55, %v4293_v12  ;;  %v1972_v58 = vpop.f32.mrb[145].mxu0  ;;  %v2165_v60 = vpop.f32.mrb[145].mxu1 }
 0x429   : > { %v1973_v27 = vadd.f32 %v1972_v58, %v4297_v16  ;;  %v2166_v61 = vadd.f32 %v2165_v60, %v4299_v17  ;;  %v1974_v63 = vpop.f32.mrb[146].mxu0  ;;  %v2167_v0 = vpop.f32.mrb[146].mxu1 }
 0x42a   : > { %v2398_v2 = vmax.f32 %v1971_v56, 0.0  ;;  %v2400_v3 = vmax.f32 %v2164_v57, 0.0  ;;  %v1975_v6 = vadd.f32 %v1974_v63, %v4291_v10  ;;  %v2168_v59 = vadd.f32 %v2167_v0, %v4293_v12  ;;  %v1976_v45 = vpop.f32.mrb[147].mxu0  ;;  %v2169_v7 = vpop.f32.mrb[147].mxu1 }
 0x42b   : > { %v2399_v8 = vmax.f32 %v1973_v27, 0.0  ;;  %v2401_v9 = vmax.f32 %v2166_v61, 0.0  ;;  %v1977_v25 = vadd.f32 %v1976_v45, %v4297_v16  ;;  %v2170_v13 = vadd.f32 %v2169_v7, %v4299_v17 }
 0x42c   : > { %v2629_v14 = vmax.f32 %v2628_v49, %v2398_v2  ;;  %v2703_v15 = vmax.f32 %v2702_v50, %v2400_v3  ;;  %v2406_v18 = vmax.f32 %v1975_v6, 0.0  ;;  %v2408_v19 = vmax.f32 %v2168_v59, 0.0 }
 0x42d   : > { %v2666_v20 = vmax.f32 %v2665_v51, %v2399_v8  ;;  %v2740_v21 = vmax.f32 %v2739_v53, %v2401_v9  ;;  %v2407_v22 = vmax.f32 %v1977_v25, 0.0  ;;  %v2409_v11 = vmax.f32 %v2170_v13, 0.0 }
 0x42e   : > { %v2630_v23 = vmax.f32 %v2629_v14, %v2406_v18  ;;  %v2704_v24 = vmax.f32 %v2703_v15, %v2408_v19 }
 0x42f   : > { %v2667_v28 = vmax.f32 %v2666_v20, %v2407_v22  ;;  %v2741_v29 = vmax.f32 %v2740_v21, %v2409_v11  ;;  %v1980_v30 = vpop.f32.mrb[148].mxu0  ;;  %v2173_v31 = vpop.f32.mrb[148].mxu1 }
 0x430   : > { %v1981_v32 = vadd.f32 %v1980_v30, %v4291_v10  ;;  %v2174_v33 = vadd.f32 %v2173_v31, %v4293_v12  ;;  %v1982_v26 = vpop.f32.mrb[149].mxu0  ;;  %v2175_v38 = vpop.f32.mrb[149].mxu1 }
 0x431   : > { %v1983_v39 = vadd.f32 %v1982_v26, %v4297_v16  ;;  %v2176_v36 = vadd.f32 %v2175_v38, %v4299_v17  ;;  %v1984_v42 = vpop.f32.mrb[150].mxu0  ;;  %v2177_v37 = vpop.f32.mrb[150].mxu1 }
 0x432   : > { %v2414_v43 = vmax.f32 %v1981_v32, 0.0  ;;  %v2416_v1 = vmax.f32 %v2174_v33, 0.0  ;;  %v1985_v46 = vadd.f32 %v1984_v42, %v4291_v10  ;;  %v2178_v47 = vadd.f32 %v2177_v37, %v4293_v12  ;;  %v1986_v34 = vpop.f32.mrb[151].mxu0  ;;  %v2179_v35 = vpop.f32.mrb[151].mxu1 }
 0x433   : > { %v2415_v4 = vmax.f32 %v1983_v39, 0.0  ;;  %v2417_v5 = vmax.f32 %v2176_v36, 0.0  ;;  %v1987_v48 = vadd.f32 %v1986_v34, %v4297_v16  ;;  %v2180_v49 = vadd.f32 %v2179_v35, %v4299_v17 }
 0x434   : > { %v2631_v50 = vmax.f32 %v2630_v23, %v2414_v43  ;;  %v2705_v51 = vmax.f32 %v2704_v24, %v2416_v1  ;;  %v2422_v53 = vmax.f32 %v1985_v46, 0.0  ;;  %v2424_v54 = vmax.f32 %v2178_v47, 0.0 }
 0x435   : > { %v2668_v55 = vmax.f32 %v2667_v28, %v2415_v4  ;;  %v2742_v56 = vmax.f32 %v2741_v29, %v2417_v5  ;;  %v2423_v57 = vmax.f32 %v1987_v48, 0.0  ;;  %v2425_v58 = vmax.f32 %v2180_v49, 0.0 }
 0x436   : > { %v2632_v60 = vmax.f32 %v2631_v50, %v2422_v53  ;;  %v2706_v27 = vmax.f32 %v2705_v51, %v2424_v54 }
 0x437   : > { %v2669_v61 = vmax.f32 %v2668_v55, %v2423_v57  ;;  %v2743_v63 = vmax.f32 %v2742_v56, %v2425_v58  ;;  %v1990_v0 = vpop.f32.mrb[152].mxu0  ;;  %v2183_v2 = vpop.f32.mrb[152].mxu1 }
 0x438   : > { %v1991_v3 = vadd.f32 %v1990_v0, %v4291_v10  ;;  %v2184_v6 = vadd.f32 %v2183_v2, %v4293_v12  ;;  %v1992_v59 = vpop.f32.mrb[153].mxu0  ;;  %v2185_v45 = vpop.f32.mrb[153].mxu1 }
 0x439   : > { %v1993_v7 = vadd.f32 %v1992_v59, %v4297_v16  ;;  %v2186_v8 = vadd.f32 %v2185_v45, %v4299_v17  ;;  %v1994_v9 = vpop.f32.mrb[154].mxu0  ;;  %v2187_v25 = vpop.f32.mrb[154].mxu1 }
 0x43a   : > { %v2430_v13 = vmax.f32 %v1991_v3, 0.0  ;;  %v2432_v14 = vmax.f32 %v2184_v6, 0.0  ;;  %v1995_v15 = vadd.f32 %v1994_v9, %v4291_v10  ;;  %v2188_v18 = vadd.f32 %v2187_v25, %v4293_v12  ;;  %v1996_v19 = vpop.f32.mrb[155].mxu0  ;;  %v2189_v20 = vpop.f32.mrb[155].mxu1 }
 0x43b   : > { %v2431_v21 = vmax.f32 %v1993_v7, 0.0  ;;  %v2433_v22 = vmax.f32 %v2186_v8, 0.0  ;;  %v1997_v11 = vadd.f32 %v1996_v19, %v4297_v16  ;;  %v2190_v23 = vadd.f32 %v2189_v20, %v4299_v17 }
 0x43c   : > { %v2633_v24 = vmax.f32 %v2632_v60, %v2430_v13  ;;  %v2707_v28 = vmax.f32 %v2706_v27, %v2432_v14  ;;  %v2438_v29 = vmax.f32 %v1995_v15, 0.0  ;;  %v2440_v30 = vmax.f32 %v2188_v18, 0.0 }
 0x43d   : > { %v2670_v31 = vmax.f32 %v2669_v61, %v2431_v21  ;;  %v2744_v32 = vmax.f32 %v2743_v63, %v2433_v22  ;;  %v2439_v33 = vmax.f32 %v1997_v11, 0.0  ;;  %v2441_v26 = vmax.f32 %v2190_v23, 0.0 }
 0x43e   : > { %v2634_v38 = vmax.f32 %v2633_v24, %v2438_v29  ;;  %v2708_v39 = vmax.f32 %v2707_v28, %v2440_v30 }
 0x43f   : > { %v2671_v36 = vmax.f32 %v2670_v31, %v2439_v33  ;;  %v2745_v42 = vmax.f32 %v2744_v32, %v2441_v26  ;;  %v2000_v37 = vpop.f32.mrb[156].mxu0  ;;  %v2193_v43 = vpop.f32.mrb[156].mxu1 }
 0x440   : > { %v2001_v1 = vadd.f32 %v2000_v37, %v4291_v10  ;;  %v2194_v46 = vadd.f32 %v2193_v43, %v4293_v12  ;;  %v2002_v47 = vpop.f32.mrb[157].mxu0  ;;  %v2195_v34 = vpop.f32.mrb[157].mxu1  ;;  %v2767_v37 = vcombine.low (!%p3136_p3), %v4315_v41, %v4321_v44 }
 0x441   : > { %v2003_v35 = vadd.f32 %v2002_v47, %v4297_v16  ;;  %v2196_v4 = vadd.f32 %v2195_v34, %v4299_v17  ;;  %v2004_v5 = vpop.f32.mrb[158].mxu0  ;;  %v2197_v48 = vpop.f32.mrb[158].mxu1 }
 0x442   : > { %v2446_v49 = vmax.f32 %v2001_v1, 0.0  ;;  %v2448_v50 = vmax.f32 %v2194_v46, 0.0  ;;  %v2005_v51 = vadd.f32 %v2004_v5, %v4291_v10  ;;  %v2198_v53 = vadd.f32 %v2197_v48, %v4293_v12  ;;  %v2006_v54 = vpop.f32.mrb[159].mxu0  ;;  %v2199_v55 = vpop.f32.mrb[159].mxu1 }
 0x443   : > { %v2447_v56 = vmax.f32 %v2003_v35, 0.0  ;;  %v2449_v57 = vmax.f32 %v2196_v4, 0.0  ;;  %v2007_v58 = vadd.f32 %v2006_v54, %v4297_v16  ;;  %v2200_v60 = vadd.f32 %v2199_v55, %v4299_v17 }
 0x444   : > { %v2635_v27 = vmax.f32 %v2634_v38, %v2446_v49  ;;  %v2709_v61 = vmax.f32 %v2708_v39, %v2448_v50  ;;  %v2454_v63 = vmax.f32 %v2005_v51, 0.0  ;;  %v2456_v0 = vmax.f32 %v2198_v53, 0.0 }
 0x445   : > { %v2672_v2 = vmax.f32 %v2671_v36, %v2447_v56  ;;  %v2746_v3 = vmax.f32 %v2745_v42, %v2449_v57  ;;  %v2455_v6 = vmax.f32 %v2007_v58, 0.0  ;;  %v2457_v59 = vmax.f32 %v2200_v60, 0.0 }
 0x446   : > { %v2636_v45 = vmax.f32 %v2635_v27, %v2454_v63  ;;  %v2710_v10 = vmax.f32 %v2709_v61, %v2456_v0  ;;  %v3601_v39 = vmov (!%p3136_p3), 1966171168   ;;  %v2766_v42 = vcombine.low (!%p3136_p3), %v4313_v40, %v4319_v52 }
 0x447   : > { %v2673_v7 = vmax.f32 %v2672_v2, %v2455_v6  ;;  %v2747_v12 = vmax.f32 %v2746_v3, %v2457_v59  ;;  %v2771_v36 = vunpack.c.l.s4 (!%p3136_p3), %v3601_v39 }
 0x448   : > { %v2637_v8 = vrot.slane %v2636_v45, 4  ;;  %v2711_v9 = vrot.slane %v2710_v10, 4 }
 0x449   : > { %v2674_v25 = vrot.slane %v2673_v7, 4  ;;  %v2748_v13 = vrot.slane %v2747_v12, 4  ;;  %v2772_v46 = vunpack.c.0.s8 (!%p3136_p3), %v2771_v36 }
 0x44a   : > { %v2638_v14 = vmax.f32 %v2636_v45, %v2637_v8  ;;  %v2712_v16 = vmax.f32 %v2710_v10, %v2711_v9 }
 0x44b   : > { %v2675_v15 = vmax.f32 %v2673_v7, %v2674_v25  ;;  %v2749_v17 = vmax.f32 %v2747_v12, %v2748_v13  ;;  %v2775_v47 = vsub.s32 (!%p3136_p3), %v2772_v46, %v4127_v62 }
 0x44c   : > { %v2639_v18 = vrot.slane %v2638_v14, 2  ;;  %v2713_v19 = vrot.slane %v2712_v16, 2 }
 0x44d   : > { %v2676_v20 = vrot.slane %v2675_v15, 2  ;;  %v2750_v21 = vrot.slane %v2749_v17, 2  ;;  %2757 = sbr.rel (%p3136_p3) target bundleno = 1120 (0x460), region = 76  ;;  %v2776_v34 = vrot.slane (!%p3136_p3), %v2766_v42, %v2775_v47  ;;  %v2783_v35 = vrot.slane (!%p3136_p3), %v2767_v37, %v2775_v47 }
 0x44e   : > { %v2640_v22 = vmax.f32 %v2638_v14, %v2639_v18  ;;  %v2714_v11 = vmax.f32 %v2712_v16, %v2713_v19 }
 0x44f   : > { %v2677_v23 = vmax.f32 %v2675_v15, %v2676_v20  ;;  %v2751_v24 = vmax.f32 %v2749_v17, %v2750_v21  ;;  %v2798_v48 = vcombine.low (!%p3136_p3), %v2776_v34, %v2783_v35 }
 0x450   : > { %v2641_v28 = vrot.slane %v2640_v22, 1  ;;  %v2715_v29 = vrot.slane %v2714_v11, 1 }
 0x451   : > { %v2678_v30 = vrot.slane %v2677_v23, 1  ;;  %v2752_v31 = vrot.slane %v2751_v24, 1  ;;  %v2806_v50 = vrot.slane (!%p3136_p3), %v2798_v48, %v2775_v47 }
 0x452   : > { %v2642_v32 = vmax.f32 %v2640_v22, %v2641_v28  ;;  %v2716_v33 = vmax.f32 %v2714_v11, %v2715_v29 }
 0x453   : > { %v2679_v26 = vmax.f32 %v2677_v23, %v2678_v30  ;;  %v2753_v38 = vmax.f32 %v2751_v24, %v2752_v31 }
 0x455   : > { %v2768_v43 = vcombine.low %v2642_v32, %v2679_v26  ;;  %v2769_v1 = vcombine.low %v2716_v33, %v2753_v38 }
 0x457   : > { %v2790_v4 = vrot.slane %v2768_v43, %v2775_v47  ;;  %v2797_v5 = vrot.slane %v2769_v1, %v2775_v47 }
 0x459   : > { %v2799_v49 = vcombine.low %v2790_v4, %v2797_v5 }
 0x45b   : > { %v2813_v51 = vrot.slane %v2799_v49, %v2775_v47 }
 0x45d   : > { %v2814_v53 = vcombine.low %v2806_v50, %v2813_v51 }
 0x45f   : > { %2816 = vst [vmem:[%s3841_s9] sm:$0xff] %v2814_v53 }
 0x460 PF: > { %p3137_p10 = scmp.le.s32.totalorder %s3571_s24, 0 }
 0x461   : > { %v3602_v54 = vmov (!%p3137_p10), 1966171168   ;;  %v2830_v56 = vcombine.low (!%p3137_p10), %v4313_v40, %v4319_v52  ;;  %v2831_v57 = vcombine.low (!%p3137_p10), %v4315_v41, %v4321_v44  ;;  %v2832_v58 = vcombine.low (!%p3137_p10), %v2642_v32, %v2679_v26 }
 0x462   : > { %2820 = sbr.rel (%p3137_p10) target bundleno = 1139 (0x473), region = 80  ;;  %v2835_v55 = vunpack.c.l.s4 (!%p3137_p10), %v3602_v54  ;;  %v2833_v60 = vcombine.low (!%p3137_p10), %v2716_v33, %v2753_v38 }
 0x464   : > { %v2836_v27 = vunpack.c.0.s8 (!%p3137_p10), %v2835_v55 }
 0x466   : > { %v2839_v61 = vsub.s32 (!%p3137_p10), %v2836_v27, %v4127_v62  ;;  %v2821_v7 = vld [vmem:[%s3841_s9] sm:$0xff] (!%p3137_p10) }
 0x468   : > { %v2840_v63 = vrot.slane (!%p3137_p10), %v2830_v56, %v2839_v61  ;;  %v2847_v0 = vrot.slane (!%p3137_p10), %v2831_v57, %v2839_v61  ;;  %v2854_v2 = vrot.slane (!%p3137_p10), %v2832_v58, %v2839_v61  ;;  %v2861_v3 = vrot.slane (!%p3137_p10), %v2833_v60, %v2839_v61 }
 0x46a   : > { %v2862_v6 = vcombine.low %v2840_v63, %v2847_v0  ;;  %v2863_v59 = vcombine.low %v2854_v2, %v2861_v3 }
 0x46c   : > { %v2870_v45 = vrot.slane %v2862_v6, %v2839_v61  ;;  %v2877_v10 = vrot.slane %v2863_v59, %v2839_v61 }
 0x46e   : > { %v2878_v12 = vcombine.low %v2870_v45, %v2877_v10 }
 0x470   : > { %v2880_v40 = vmax.f32 %v2821_v7, %v2878_v12 }
 0x472   : > { %2881 = vst [vmem:[%s3841_s9] sm:$0xff] %v2880_v40 }
 0x473 PF: > { %s21_s28 = sadd.s32 1, %s3587_s28   ;;  %s4493_s24 = smov %s3579_s26 }
 0x474   : > { %p18_p11 = scmp.ge.s32.totalorder %s21_s28, 6   ;;  %s4494_s25 = smov %s3583_s27 }
 0x475   : > { %s4495_s26 = smov %s4498_s29  ;;  %s4496_s27 = smov %s4502_s8 }
 0x476   :  { %20 = sbr.rel (!%p18_p11) target bundleno = 9 (0x9), region = 111 }
 0x47d   :  { %2901 = vsyncpa [#allocation3], 1 }
 0x47e   :  { %2903 = vsyncpa [#allocation3 + $0x1], 1 }
 0x47f   :  { %2904 = vsyncpa [#allocation5], 1 }
 0x480   :  { %2905 = vsyncpa [#allocation8], 1 }
 0x481   :  { %2906 = vsyncpa [#allocation11], 1 }

// kernel: pointnet_densecls_forward.5
= control target key start
LH: loop header
LB: loop body
LE: loop exit
PB: predicated region body
PF: predicated region fallthrough
CT: control target
= control target key end

     0   :  { %v3533_v36 = vmov 1983009808   ;;  %v294_v38 = vlaneseq  ;;  %vm2637_vm0 = vcmask 66560   ;;  %s4680_s1 = inlined_call_operand.vmem [shape: bf16[1024,512], index: 1, kind: input, shape index: {}]   ;;  %s4681_s0 = inlined_call_operand.vmem [shape: f32[2,1024], index: 0, kind: input, shape index: {}]   ;;  %s4682_s3 = inlined_call_operand.vmem [shape: bf16[512,256], index: 3, kind: input, shape index: {}]   ;;  %s4683_s2 = inlined_call_operand.vmem [shape: f32[1,512], index: 2, kind: input, shape index: {}]   ;;  %s4684_s5 = inlined_call_operand.vmem [shape: bf16[256,9], index: 5, kind: input, shape index: {}]   ;;  %s4685_s4 = inlined_call_operand.vmem [shape: f32[1,256], index: 4, kind: input, shape index: {}]   ;;  %s4686_s6 = inlined_call_operand.vmem [shape: f32[1,9], index: 6, kind: input, shape index: {}]   ;;  %s4687_s7 = inlined_call_operand.vmem [shape: f32[2,9], index: 7, kind: input, shape index: {}]   ;;  %s4688_s8 = inlined_call_operand.vmem [shape: f32[2,9], index: 8, kind: output, shape index: {}]  }
   0x1   :  { %v3035_v0 = vld [vmem:[%s4680_s1 + $0x4] ss:$16 sps:$4 sm:$0xff]   ;;  %v3039_v2 = vld [vmem:[%s4680_s1] ss:$16 sps:$4 sm:$0xff]   ;;  %v292_v37 = vunpack.c.l.s4 %v3533_v36 }
   0x2   :  { %v3037_v1 = vld [vmem:[%s4680_s1 + $0x204] ss:$16 sps:$4 sm:$0xff]   ;;  %1642 = vmatprep.subr.bf16.mxu1 %v3035_v0  ;;  %v3040_v3 = vld [vmem:[%s4680_s1 + $0x200] ss:$16 sps:$4 sm:$0xff]   ;;  %v3696_v43 = vshrl.u32 %v294_v38, 7 }
   0x3   :  { %1683 = vmatprep.subr.bf16.mxu0 %v3037_v1  ;;  %v3041_v4 = vld [vmem:[%s4680_s1 + $0x24] ss:$16 sps:$4 sm:$0xff]   ;;  %1643 = vmatpush1.bf16.msra.mxu1 %v3039_v2  ;;  %v3045_v6 = vld [vmem:[%s4680_s1 + $0x20] ss:$16 sps:$4 sm:$0xff]   ;;  %v293_v42 = vunpack.c.0.s8 %v292_v37  ;;  %v3162_v37 = vld [vmem:[%s4680_s1 + $0x8c] ss:$16 sps:$4 sm:$0xff]  }
   0x4   :  { %1684 = vmatpush1.bf16.msra.mxu0 %v3040_v3  ;;  %v3043_v5 = vld [vmem:[%s4680_s1 + $0x224] ss:$16 sps:$4 sm:$0xff]   ;;  %1644 = vmatprep.subr.bf16.mxu1 %v3041_v4  ;;  %v3046_v7 = vld [vmem:[%s4680_s1 + $0x220] ss:$16 sps:$4 sm:$0xff]  }
   0x5   :  { %1685 = vmatprep.subr.bf16.mxu0 %v3043_v5  ;;  %v3047_v8 = vld [vmem:[%s4680_s1 + $0x44] ss:$16 sps:$4 sm:$0xff]   ;;  %v3051_v10 = vld [vmem:[%s4680_s1 + $0x40] ss:$16 sps:$4 sm:$0xff]   ;;  %v3714_v49 = vsub.s32 %v293_v42, %v3696_v43 }
   0x6   :  { %v3049_v9 = vld [vmem:[%s4680_s1 + $0x244] ss:$16 sps:$4 sm:$0xff]   ;;  %v3052_v11 = vld [vmem:[%s4680_s1 + $0x240] ss:$16 sps:$4 sm:$0xff]  }
   0x7   :  { %1645 = vmatpush1.bf16.msra.mxu1 %v3045_v6  ;;  %v3053_v12 = vld [vmem:[%s4680_s1 + $0x64] ss:$16 sps:$4 sm:$0xff]   ;;  %v3057_v14 = vld [vmem:[%s4680_s1 + $0x60] ss:$16 sps:$4 sm:$0xff]  }
   0x8   :  { %1686 = vmatpush1.bf16.msra.mxu0 %v3046_v7  ;;  %1646 = vmatprep.subr.bf16.mxu1 %v3047_v8  ;;  %v3055_v13 = vld [vmem:[%s4680_s1 + $0x264] ss:$16 sps:$4 sm:$0xff]   ;;  %v3058_v15 = vld [vmem:[%s4680_s1 + $0x260] ss:$16 sps:$4 sm:$0xff]   ;;  %v3769_v8 = vld [vmem:[%s4681_s0 + $0x8] sm:$0xff] }
   0x9   :  { %1687 = vmatprep.subr.bf16.mxu0 %v3049_v9  ;;  %v3059_v16 = vld [vmem:[%s4680_s1 + $0x84] ss:$16 sps:$4 sm:$0xff]   ;;  %v3063_v18 = vld [vmem:[%s4680_s1 + $0x80] ss:$16 sps:$4 sm:$0xff]  }
   0xa   :  { %v3061_v17 = vld [vmem:[%s4680_s1 + $0x284] ss:$16 sps:$4 sm:$0xff]   ;;  %v3064_v19 = vld [vmem:[%s4680_s1 + $0x280] ss:$16 sps:$4 sm:$0xff]  }
   0xb   :  { %1647 = vmatpush1.bf16.msra.mxu1 %v3051_v10  ;;  %v3065_v20 = vld [vmem:[%s4680_s1 + $0xa4] ss:$16 sps:$4 sm:$0xff]   ;;  %v3069_v22 = vld [vmem:[%s4680_s1 + $0xa0] ss:$16 sps:$4 sm:$0xff]  }
   0xc   :  { %1688 = vmatpush1.bf16.msra.mxu0 %v3052_v11  ;;  %1648 = vmatprep.subr.bf16.mxu1 %v3053_v12  ;;  %v3067_v21 = vld [vmem:[%s4680_s1 + $0x2a4] ss:$16 sps:$4 sm:$0xff]   ;;  %v3070_v23 = vld [vmem:[%s4680_s1 + $0x2a0] ss:$16 sps:$4 sm:$0xff]  }
   0xd   :  { %1689 = vmatprep.subr.bf16.mxu0 %v3055_v13  ;;  %v3071_v24 = vld [vmem:[%s4680_s1 + $0xc4] ss:$16 sps:$4 sm:$0xff]   ;;  %v3075_v26 = vld [vmem:[%s4680_s1 + $0xc0] ss:$16 sps:$4 sm:$0xff]   ;;  %v3785_v13 = vrot.slane %v3769_v8, %v3714_v49 }
   0xe   :  { %v3073_v25 = vld [vmem:[%s4680_s1 + $0x2c4] ss:$16 sps:$4 sm:$0xff]   ;;  %v3076_v27 = vld [vmem:[%s4680_s1 + $0x2c0] ss:$16 sps:$4 sm:$0xff]  }
   0xf   :  { %1649 = vmatpush1.bf16.msra.mxu1 %v3057_v14  ;;  %v3077_v28 = vld [vmem:[%s4680_s1 + $0xe4] ss:$16 sps:$4 sm:$0xff]   ;;  %v3081_v30 = vld [vmem:[%s4680_s1 + $0xe0] ss:$16 sps:$4 sm:$0xff]  }
  0x10   :  { %1690 = vmatpush1.bf16.msra.mxu0 %v3058_v15  ;;  %1650 = vmatprep.subr.bf16.mxu1 %v3059_v16  ;;  %v3079_v29 = vld [vmem:[%s4680_s1 + $0x2e4] ss:$16 sps:$4 sm:$0xff]   ;;  %v3082_v31 = vld [vmem:[%s4680_s1 + $0x2e0] ss:$16 sps:$4 sm:$0xff]  }
  0x11   :  { %1691 = vmatprep.subr.bf16.mxu0 %v3061_v17  ;;  %v3083_v32 = vld [vmem:[%s4680_s1 + $0x104] ss:$16 sps:$4 sm:$0xff]   ;;  %v3087_v34 = vld [vmem:[%s4680_s1 + $0x100] ss:$16 sps:$4 sm:$0xff]   ;;  %v3138_v17 = vld [vmem:[%s4680_s1 + $0xc] ss:$16 sps:$4 sm:$0xff]  }
  0x12   :  { %v3085_v33 = vld [vmem:[%s4680_s1 + $0x304] ss:$16 sps:$4 sm:$0xff]   ;;  %v3088_v35 = vld [vmem:[%s4680_s1 + $0x300] ss:$16 sps:$4 sm:$0xff]  }
  0x13   :  { %1651 = vmatpush1.bf16.msra.mxu1 %v3063_v18  ;;  %v3089_v39 = vld [vmem:[%s4680_s1 + $0x124] ss:$16 sps:$4 sm:$0xff]   ;;  %v3093_v41 = vld [vmem:[%s4680_s1 + $0x120] ss:$16 sps:$4 sm:$0xff]   ;;  %v322_v18 = vcombine.high %v3785_v13, %v3785_v13 }
  0x14   :  { %1692 = vmatpush1.bf16.msra.mxu0 %v3064_v19  ;;  %1652 = vmatprep.subr.bf16.mxu1 %v3065_v20  ;;  %v3091_v40 = vld [vmem:[%s4680_s1 + $0x324] ss:$16 sps:$4 sm:$0xff]   ;;  %v3094_v44 = vld [vmem:[%s4680_s1 + $0x320] ss:$16 sps:$4 sm:$0xff]  }
  0x15   :  { %1693 = vmatprep.subr.bf16.mxu0 %v3067_v21  ;;  %v3095_v45 = vld [vmem:[%s4680_s1 + $0x144] ss:$16 sps:$4 sm:$0xff]   ;;  %v3099_v47 = vld [vmem:[%s4680_s1 + $0x140] ss:$16 sps:$4 sm:$0xff]  }
  0x16   :  { %v3097_v46 = vld [vmem:[%s4680_s1 + $0x344] ss:$16 sps:$4 sm:$0xff]   ;;  %v3100_v48 = vld [vmem:[%s4680_s1 + $0x340] ss:$16 sps:$4 sm:$0xff]  }
  0x17   :  { %1653 = vmatpush1.bf16.msra.mxu1 %v3069_v22  ;;  %v3101_v50 = vld [vmem:[%s4680_s1 + $0x164] ss:$16 sps:$4 sm:$0xff]   ;;  %v3105_v55 = vld [vmem:[%s4680_s1 + $0x160] ss:$16 sps:$4 sm:$0xff]   ;;  %v3136_v22 = vld [vmem:[%s4680_s1 + $0x8] ss:$16 sps:$4 sm:$0xff]  }
  0x18   :  { %1694 = vmatpush1.bf16.msra.mxu0 %v3070_v23  ;;  %1654 = vmatprep.subr.bf16.mxu1 %v3071_v24  ;;  %v3103_v51 = vld [vmem:[%s4680_s1 + $0x364] ss:$16 sps:$4 sm:$0xff]   ;;  %v3106_v56 = vld [vmem:[%s4680_s1 + $0x360] ss:$16 sps:$4 sm:$0xff]   ;;  %v3144_v24 = vld [vmem:[%s4680_s1 + $0x2c] ss:$16 sps:$4 sm:$0xff]  }
  0x19   :  { %1695 = vmatprep.subr.bf16.mxu0 %v3073_v25  ;;  %v30_v52 = vld [vmem:[%s4681_s0] sm:$0xff]  ;;  %v3817_v25 = vpack.c.bf16 %v322_v18, %v322_v18  ;;  %v3222_v18 = vld [vmem:[%s4680_s1 + $0x1cc] ss:$16 sps:$4 sm:$0xff]  }
  0x1a   :  { %v297_v53 = vrot.slane %v30_v52, %v3714_v49  ;;  %v290_v54 = vcombine.high %v30_v52, %v30_v52  ;;  %v3107_v57 = vld [vmem:[%s4680_s1 + $0x184] ss:$16 sps:$4 sm:$0xff]   ;;  %v3111_v63 = vld [vmem:[%s4680_s1 + $0x180] ss:$16 sps:$4 sm:$0xff]  }
  0x1b   :  { %1655 = vmatpush1.bf16.msra.mxu1 %v3075_v26  ;;  %v3109_v58 = vld [vmem:[%s4680_s1 + $0x384] ss:$16 sps:$4 sm:$0xff]   ;;  %v3112_v0 = vld [vmem:[%s4680_s1 + $0x380] ss:$16 sps:$4 sm:$0xff]  }
  0x1c   :  { %1696 = vmatpush1.bf16.msra.mxu0 %v3076_v27  ;;  %1656 = vmatprep.subr.bf16.mxu1 %v3077_v28  ;;  %v305_v59 = vcombine.high %v297_v53, %v297_v53  ;;  %v304_v60 = vrot.slane %v290_v54, %v3714_v49  ;;  %v3113_v1 = vld [vmem:[%s4680_s1 + $0x1a4] ss:$16 sps:$4 sm:$0xff]   ;;  %v3117_v4 = vld [vmem:[%s4680_s1 + $0x1a0] ss:$16 sps:$4 sm:$0xff]   ;;  %v3801_v19 = vpack.c.bf16 %v297_v53, %v297_v53  ;;  %v3142_v27 = vld [vmem:[%s4680_s1 + $0x28] ss:$16 sps:$4 sm:$0xff]  }
  0x1d   :  { %1697 = vmatprep.subr.bf16.mxu0 %v3079_v29  ;;  %v3115_v2 = vld [vmem:[%s4680_s1 + $0x3a4] ss:$16 sps:$4 sm:$0xff]   ;;  %v3118_v5 = vld [vmem:[%s4680_s1 + $0x3a0] ss:$16 sps:$4 sm:$0xff]   ;;  %v3150_v29 = vld [vmem:[%s4680_s1 + $0x4c] ss:$16 sps:$4 sm:$0xff]  }
  0x1e   :  { %v333_v61 = vpack.c.bf16 %v305_v59, %v305_v59  ;;  %v306_v62 = vcombine.high %v304_v60, %v304_v60  ;;  %v3119_v6 = vld [vmem:[%s4680_s1 + $0x1c4] ss:$16 sps:$4 sm:$0xff]   ;;  %v3123_v9 = vld [vmem:[%s4680_s1 + $0x1c0] ss:$16 sps:$4 sm:$0xff]   ;;  %v3803_v20 = vpack.c.bf16 %v304_v60, %v304_v60  ;;  %v3178_v53 = vld [vmem:[%s4680_s1 + $0xe8] ss:$16 sps:$4 sm:$0xff]  }
  0x1f   :  { %1657 = vmatpush1.bf16.msra.mxu1 %v3081_v30  ;;  %v3121_v7 = vld [vmem:[%s4680_s1 + $0x3c4] ss:$16 sps:$4 sm:$0xff]   ;;  %v3124_v10 = vld [vmem:[%s4680_s1 + $0x3c0] ss:$16 sps:$4 sm:$0xff]   ;;  %v3192_v59 = vld [vmem:[%s4680_s1 + $0x12c] ss:$16 sps:$4 sm:$0xff]  }
  0x20   :  { %1698 = vmatpush1.bf16.msra.mxu0 %v3082_v31  ;;  %1658 = vmatprep.subr.bf16.mxu1 %v3083_v32  ;;  %v3751_v3 = vpack.c.bf16 %v306_v62, %v306_v62  ;;  %v3125_v11 = vld [vmem:[%s4680_s1 + $0x1e4] ss:$16 sps:$4 sm:$0xff]   ;;  %v3129_v14 = vld [vmem:[%s4680_s1 + $0x1e0] ss:$16 sps:$4 sm:$0xff]   ;;  %v3148_v31 = vld [vmem:[%s4680_s1 + $0x48] ss:$16 sps:$4 sm:$0xff]  }
  0x21   :  { %1699 = vmatprep.subr.bf16.mxu0 %v3085_v33  ;;  %1674 = vmatprep.mubr.bf16.mxu1 %v333_v61  ;;  %v3127_v12 = vld [vmem:[%s4680_s1 + $0x3e4] ss:$16 sps:$4 sm:$0xff]   ;;  %v3130_v15 = vld [vmem:[%s4680_s1 + $0x3e0] ss:$16 sps:$4 sm:$0xff]   ;;  %v3156_v33 = vld [vmem:[%s4680_s1 + $0x6c] ss:$16 sps:$4 sm:$0xff]  }
  0x22   :  { %1715 = vmatprep.mubr.bf16.mxu0 %v3751_v3  ;;  %v3135_v16 = vld [vmem:[%s4680_s1 + $0x404] ss:$16 sps:$4 sm:$0xff]   ;;  %v3133_v21 = vld [vmem:[%s4680_s1 + $0x400] ss:$16 sps:$4 sm:$0xff]  }
  0x23   :  { %1659 = vmatpush1.bf16.msra.mxu1 %v3087_v34  ;;  %v3141_v23 = vld [vmem:[%s4680_s1 + $0x424] ss:$16 sps:$4 sm:$0xff]   ;;  %v3139_v26 = vld [vmem:[%s4680_s1 + $0x420] ss:$16 sps:$4 sm:$0xff]  }
  0x24   :  { %1700 = vmatpush1.bf16.msra.mxu0 %v3088_v35  ;;  %1660 = vmatprep.subr.bf16.mxu1 %v3089_v39  ;;  %v3147_v28 = vld [vmem:[%s4680_s1 + $0x444] ss:$16 sps:$4 sm:$0xff]   ;;  %v3145_v30 = vld [vmem:[%s4680_s1 + $0x440] ss:$16 sps:$4 sm:$0xff]   ;;  %v3154_v35 = vld [vmem:[%s4680_s1 + $0x68] ss:$16 sps:$4 sm:$0xff]  }
  0x25   :  { %1701 = vmatprep.subr.bf16.mxu0 %v3091_v40  ;;  %v3153_v32 = vld [vmem:[%s4680_s1 + $0x464] ss:$16 sps:$4 sm:$0xff]   ;;  %v3151_v34 = vld [vmem:[%s4680_s1 + $0x460] ss:$16 sps:$4 sm:$0xff]   ;;  %v3160_v39 = vld [vmem:[%s4680_s1 + $0x88] ss:$16 sps:$4 sm:$0xff]  }
  0x26   :  { %v3159_v36 = vld [vmem:[%s4680_s1 + $0x484] ss:$16 sps:$4 sm:$0xff]   ;;  %v3157_v38 = vld [vmem:[%s4680_s1 + $0x480] ss:$16 sps:$4 sm:$0xff]  }
  0x27   :  { %1661 = vmatpush1.bf16.msra.mxu1 %v3093_v41  ;;  %v3165_v40 = vld [vmem:[%s4680_s1 + $0x4a4] ss:$16 sps:$4 sm:$0xff]   ;;  %v3168_v41 = vld [vmem:[%s4680_s1 + $0xac] ss:$16 sps:$4 sm:$0xff]   ;;  %v3163_v42 = vld [vmem:[%s4680_s1 + $0x4a0] ss:$16 sps:$4 sm:$0xff]  }
  0x28   :  { %1702 = vmatpush1.bf16.msra.mxu0 %v3094_v44  ;;  %1662 = vmatprep.subr.bf16.mxu1 %v3095_v45  ;;  %v3166_v44 = vld [vmem:[%s4680_s1 + $0xa8] ss:$16 sps:$4 sm:$0xff]   ;;  %v3171_v45 = vld [vmem:[%s4680_s1 + $0x4c4] ss:$16 sps:$4 sm:$0xff]   ;;  %v3175_v52 = vld [vmem:[%s4680_s1 + $0x4e0] ss:$16 sps:$4 sm:$0xff]  }
  0x29   :  { %1703 = vmatprep.subr.bf16.mxu0 %v3097_v46  ;;  %v3174_v46 = vld [vmem:[%s4680_s1 + $0xcc] ss:$16 sps:$4 sm:$0xff]   ;;  %v3183_v54 = vld [vmem:[%s4680_s1 + $0x504] ss:$16 sps:$4 sm:$0xff]   ;;  %v3187_v60 = vld [vmem:[%s4680_s1 + $0x520] ss:$16 sps:$4 sm:$0xff]  }
  0x2a   :  { %v3195_v62 = vld [vmem:[%s4680_s1 + $0x544] ss:$16 sps:$4 sm:$0xff]  }
  0x2b   :  { %1663 = vmatpush1.bf16.msra.mxu1 %v3099_v47  ;;  %v3169_v47 = vld [vmem:[%s4680_s1 + $0x4c0] ss:$16 sps:$4 sm:$0xff]  }
  0x2c   :  { %1704 = vmatpush1.bf16.msra.mxu0 %v3100_v48  ;;  %1664 = vmatprep.subr.bf16.mxu1 %v3101_v50  ;;  %v3172_v48 = vld [vmem:[%s4680_s1 + $0xc8] ss:$16 sps:$4 sm:$0xff]   ;;  %v3177_v50 = vld [vmem:[%s4680_s1 + $0x4e4] ss:$16 sps:$4 sm:$0xff]  }
  0x2d   :  { %1705 = vmatprep.subr.bf16.mxu0 %v3103_v51  ;;  %v3180_v51 = vld [vmem:[%s4680_s1 + $0xec] ss:$16 sps:$4 sm:$0xff]  }
  0x2f   :  { %1665 = vmatpush1.bf16.msra.mxu1 %v3105_v55  ;;  %v3186_v55 = vld [vmem:[%s4680_s1 + $0x10c] ss:$16 sps:$4 sm:$0xff]  }
  0x30   :  { %1706 = vmatpush1.bf16.msra.mxu0 %v3106_v56  ;;  %1666 = vmatprep.subr.bf16.mxu1 %v3107_v57  ;;  %v3181_v56 = vld [vmem:[%s4680_s1 + $0x500] ss:$16 sps:$4 sm:$0xff]   ;;  %v3184_v57 = vld [vmem:[%s4680_s1 + $0x108] ss:$16 sps:$4 sm:$0xff]  }
  0x31   :  { %1707 = vmatprep.subr.bf16.mxu0 %v3109_v58  ;;  %v3189_v58 = vld [vmem:[%s4680_s1 + $0x524] ss:$16 sps:$4 sm:$0xff]  }
  0x33   :  { %1667 = vmatpush1.bf16.msra.mxu1 %v3111_v63  ;;  %v3198_v63 = vld [vmem:[%s4680_s1 + $0x14c] ss:$16 sps:$4 sm:$0xff]  }
  0x34   :  { %1708 = vmatpush1.bf16.msra.mxu0 %v3112_v0  ;;  %1668 = vmatprep.subr.bf16.mxu1 %v3113_v1  ;;  %v3193_v0 = vld [vmem:[%s4680_s1 + $0x540] ss:$16 sps:$4 sm:$0xff]   ;;  %v3196_v1 = vld [vmem:[%s4680_s1 + $0x148] ss:$16 sps:$4 sm:$0xff]  }
  0x35   :  { %1709 = vmatprep.subr.bf16.mxu0 %v3115_v2  ;;  %v3201_v2 = vld [vmem:[%s4680_s1 + $0x564] ss:$16 sps:$4 sm:$0xff]  }
  0x37   :  { %1669 = vmatpush1.bf16.msra.mxu1 %v3117_v4  ;;  %v3204_v4 = vld [vmem:[%s4680_s1 + $0x16c] ss:$16 sps:$4 sm:$0xff]  }
  0x38   :  { %1710 = vmatpush1.bf16.msra.mxu0 %v3118_v5  ;;  %1670 = vmatprep.subr.bf16.mxu1 %v3119_v6  ;;  %v3199_v5 = vld [vmem:[%s4680_s1 + $0x560] ss:$16 sps:$4 sm:$0xff]   ;;  %v3202_v6 = vld [vmem:[%s4680_s1 + $0x168] ss:$16 sps:$4 sm:$0xff]  }
  0x39   :  { %1711 = vmatprep.subr.bf16.mxu0 %v3121_v7  ;;  %v3207_v7 = vld [vmem:[%s4680_s1 + $0x584] ss:$16 sps:$4 sm:$0xff]  }
  0x3b   :  { %1671 = vmatpush1.bf16.msra.mxu1 %v3123_v9  ;;  %v3210_v9 = vld [vmem:[%s4680_s1 + $0x18c] ss:$16 sps:$4 sm:$0xff]  }
  0x3c   :  { %1712 = vmatpush1.bf16.msra.mxu0 %v3124_v10  ;;  %1672 = vmatprep.subr.bf16.mxu1 %v3125_v11  ;;  %v3205_v10 = vld [vmem:[%s4680_s1 + $0x580] ss:$16 sps:$4 sm:$0xff]   ;;  %v3208_v11 = vld [vmem:[%s4680_s1 + $0x188] ss:$16 sps:$4 sm:$0xff]  }
  0x3d   :  { %1713 = vmatprep.subr.bf16.mxu0 %v3127_v12  ;;  %v3213_v12 = vld [vmem:[%s4680_s1 + $0x5a4] ss:$16 sps:$4 sm:$0xff]  }
  0x3f   :  { %1673 = vmatpush1.bf16.msra.mxu1 %v3129_v14  ;;  %v3216_v14 = vld [vmem:[%s4680_s1 + $0x1ac] ss:$16 sps:$4 sm:$0xff]  }
  0x40   :  { %1714 = vmatpush1.bf16.msra.mxu0 %v3130_v15  ;;  %1806 = vmatprep.subr.bf16.mxu1 %v3138_v17  ;;  %v3211_v15 = vld [vmem:[%s4680_s1 + $0x5a0] ss:$16 sps:$4 sm:$0xff]   ;;  %v3219_v17 = vld [vmem:[%s4680_s1 + $0x5c4] ss:$16 sps:$4 sm:$0xff]  }
  0x41   :  { %1724 = vmatprep.subr.bf16.mxu0 %v3135_v16  ;;  %v3214_v16 = vld [vmem:[%s4680_s1 + $0x1a8] ss:$16 sps:$4 sm:$0xff]  }
  0x42   :  { %1675 = vmatmul.mubr.bf16.vlgmr.msra.gmra.mrb[0].mxu1 %v3801_v19 }
  0x43   :  { %1716 = vmatmul.mubr.bf16.vlgmr.msra.gmra.mrb[0].mxu0 %v3803_v20  ;;  %1807 = vmatpush1.bf16.msra.mxu1 %v3136_v22  ;;  %v3217_v22 = vld [vmem:[%s4680_s1 + $0x5c0] ss:$16 sps:$4 sm:$0xff]  }
  0x44   :  { %1725 = vmatpush1.bf16.msra.mxu0 %v3133_v21  ;;  %1808 = vmatprep.subr.bf16.mxu1 %v3144_v24  ;;  %v307_v21 = vcombine.high %v3769_v8, %v3769_v8  ;;  %v3225_v24 = vld [vmem:[%s4680_s1 + $0x5e4] ss:$16 sps:$4 sm:$0xff]   ;;  %v3228_v8 = vld [vmem:[%s4680_s1 + $0x1ec] ss:$16 sps:$4 sm:$0xff]  }
  0x45   :  { %1726 = vmatprep.subr.bf16.mxu0 %v3141_v23  ;;  %1756 = vmatprep.mubr.bf16.mxu0 %v3817_v25  ;;  %v3220_v23 = vld [vmem:[%s4680_s1 + $0x1c8] ss:$16 sps:$4 sm:$0xff]  }
  0x46   :  { %1838 = vmatprep.mubr.bf16.mxu1 %v333_v61  ;;  %v3190_v61 = vld [vmem:[%s4680_s1 + $0x128] ss:$16 sps:$4 sm:$0xff]  }
  0x47   :  { %1809 = vmatpush1.bf16.msra.mxu1 %v3142_v27  ;;  %v3223_v27 = vld [vmem:[%s4680_s1 + $0x5e0] ss:$16 sps:$4 sm:$0xff]  }
  0x48   :  { %1727 = vmatpush1.bf16.msra.mxu0 %v3139_v26  ;;  %1810 = vmatprep.subr.bf16.mxu1 %v3150_v29  ;;  %v3993_v26 = vrot.slane %v307_v21, %v3714_v49  ;;  %v3231_v29 = vld [vmem:[%s4680_s1 + $0x604] ss:$16 sps:$4 sm:$0xff]   ;;  %v3234_v49 = vld [vmem:[%s4680_s1 + $0x20c] ss:$16 sps:$4 sm:$0xff]   ;;  %v3301_v21 = vld [vmem:[%s4680_s1 + $0x780] ss:$16 sps:$4 sm:$0xff]  }
  0x49   :  { %1728 = vmatprep.subr.bf16.mxu0 %v3147_v28  ;;  %v3226_v28 = vld [vmem:[%s4680_s1 + $0x1e8] ss:$16 sps:$4 sm:$0xff]  }
  0x4b   :  { %1811 = vmatpush1.bf16.msra.mxu1 %v3148_v31  ;;  %v4011_v31 = vpack.c.bf16 %v3785_v13, %v3785_v13  ;;  %v3240_v13 = vld [vmem:[%s4680_s1 + $0x22c] ss:$16 sps:$4 sm:$0xff]  }
  0x4c   :  { %1729 = vmatpush1.bf16.msra.mxu0 %v3145_v30  ;;  %1812 = vmatprep.subr.bf16.mxu1 %v3156_v33  ;;  %v323_v30 = vcombine.high %v3993_v26, %v3993_v26  ;;  %v3232_v33 = vld [vmem:[%s4680_s1 + $0x208] ss:$16 sps:$4 sm:$0xff]  }
  0x4d   :  { %1730 = vmatprep.subr.bf16.mxu0 %v3153_v32  ;;  %v3229_v32 = vld [vmem:[%s4680_s1 + $0x600] ss:$16 sps:$4 sm:$0xff]  }
  0x4f   :  { %1813 = vmatpush1.bf16.msra.mxu1 %v3154_v35  ;;  %v4025_v35 = vpack.c.bf16 %v323_v30, %v323_v30  ;;  %v3316_v30 = vld [vmem:[%s4680_s1 + $0x3c8] ss:$16 sps:$4 sm:$0xff]  }
  0x50   :  { %1731 = vmatpush1.bf16.msra.mxu0 %v3151_v34  ;;  %1814 = vmatprep.subr.bf16.mxu1 %v3162_v37  ;;  %v3237_v34 = vld [vmem:[%s4680_s1 + $0x624] ss:$16 sps:$4 sm:$0xff]   ;;  %v3238_v37 = vld [vmem:[%s4680_s1 + $0x228] ss:$16 sps:$4 sm:$0xff]  }
  0x51   :  { %1732 = vmatprep.subr.bf16.mxu0 %v3159_v36  ;;  %v3235_v36 = vld [vmem:[%s4680_s1 + $0x620] ss:$16 sps:$4 sm:$0xff]  }
  0x53   :  { %1815 = vmatpush1.bf16.msra.mxu1 %v3160_v39  ;;  %v3241_v39 = vld [vmem:[%s4680_s1 + $0x640] ss:$16 sps:$4 sm:$0xff]  }
  0x54   :  { %1733 = vmatpush1.bf16.msra.mxu0 %v3157_v38  ;;  %1816 = vmatprep.subr.bf16.mxu1 %v3168_v41  ;;  %v3243_v38 = vld [vmem:[%s4680_s1 + $0x644] ss:$16 sps:$4 sm:$0xff]  }
  0x55   :  { %1734 = vmatprep.subr.bf16.mxu0 %v3165_v40  ;;  %v3244_v40 = vld [vmem:[%s4680_s1 + $0x248] ss:$16 sps:$4 sm:$0xff]   ;;  %v3249_v41 = vld [vmem:[%s4680_s1 + $0x664] ss:$16 sps:$4 sm:$0xff]  }
  0x57   :  { %1817 = vmatpush1.bf16.msra.mxu1 %v3166_v44  ;;  %v3250_v44 = vld [vmem:[%s4680_s1 + $0x268] ss:$16 sps:$4 sm:$0xff]  }
  0x58   :  { %1735 = vmatpush1.bf16.msra.mxu0 %v3163_v42  ;;  %1818 = vmatprep.subr.bf16.mxu1 %v3174_v46  ;;  %v3247_v42 = vld [vmem:[%s4680_s1 + $0x660] ss:$16 sps:$4 sm:$0xff]   ;;  %v3258_v46 = vld [vmem:[%s4680_s1 + $0x28c] ss:$16 sps:$4 sm:$0xff]  }
  0x59   :  { %1736 = vmatprep.subr.bf16.mxu0 %v3171_v45  ;;  %v3255_v45 = vld [vmem:[%s4680_s1 + $0x684] ss:$16 sps:$4 sm:$0xff]  }
  0x5b   :  { %1819 = vmatpush1.bf16.msra.mxu1 %v3172_v48  ;;  %v3256_v48 = vld [vmem:[%s4680_s1 + $0x288] ss:$16 sps:$4 sm:$0xff]  }
  0x5c   :  { %1737 = vmatpush1.bf16.msra.mxu0 %v3169_v47  ;;  %1820 = vmatprep.subr.bf16.mxu1 %v3180_v51  ;;  %v3253_v47 = vld [vmem:[%s4680_s1 + $0x680] ss:$16 sps:$4 sm:$0xff]   ;;  %v3264_v51 = vld [vmem:[%s4680_s1 + $0x2ac] ss:$16 sps:$4 sm:$0xff]  }
  0x5d   :  { %1738 = vmatprep.subr.bf16.mxu0 %v3177_v50  ;;  %v3261_v50 = vld [vmem:[%s4680_s1 + $0x6a4] ss:$16 sps:$4 sm:$0xff]  }
  0x5f   :  { %1821 = vmatpush1.bf16.msra.mxu1 %v3178_v53  ;;  %v3262_v53 = vld [vmem:[%s4680_s1 + $0x2a8] ss:$16 sps:$4 sm:$0xff]  }
  0x60   :  { %1739 = vmatpush1.bf16.msra.mxu0 %v3175_v52  ;;  %1822 = vmatprep.subr.bf16.mxu1 %v3186_v55  ;;  %v3259_v52 = vld [vmem:[%s4680_s1 + $0x6a0] ss:$16 sps:$4 sm:$0xff]   ;;  %v3270_v55 = vld [vmem:[%s4680_s1 + $0x2cc] ss:$16 sps:$4 sm:$0xff]  }
  0x61   :  { %1740 = vmatprep.subr.bf16.mxu0 %v3183_v54  ;;  %v3267_v54 = vld [vmem:[%s4680_s1 + $0x6c4] ss:$16 sps:$4 sm:$0xff]  }
  0x63   :  { %1823 = vmatpush1.bf16.msra.mxu1 %v3184_v57  ;;  %v3268_v57 = vld [vmem:[%s4680_s1 + $0x2c8] ss:$16 sps:$4 sm:$0xff]  }
  0x64   :  { %1741 = vmatpush1.bf16.msra.mxu0 %v3181_v56  ;;  %1824 = vmatprep.subr.bf16.mxu1 %v3192_v59  ;;  %v3265_v56 = vld [vmem:[%s4680_s1 + $0x6c0] ss:$16 sps:$4 sm:$0xff]   ;;  %v3276_v59 = vld [vmem:[%s4680_s1 + $0x2ec] ss:$16 sps:$4 sm:$0xff]  }
  0x65   :  { %1742 = vmatprep.subr.bf16.mxu0 %v3189_v58  ;;  %v3273_v58 = vld [vmem:[%s4680_s1 + $0x6e4] ss:$16 sps:$4 sm:$0xff]  }
  0x67   :  { %1825 = vmatpush1.bf16.msra.mxu1 %v3190_v61  ;;  %v3274_v61 = vld [vmem:[%s4680_s1 + $0x2e8] ss:$16 sps:$4 sm:$0xff]  }
  0x68   :  { %1743 = vmatpush1.bf16.msra.mxu0 %v3187_v60  ;;  %1826 = vmatprep.subr.bf16.mxu1 %v3198_v63  ;;  %v3271_v60 = vld [vmem:[%s4680_s1 + $0x6e0] ss:$16 sps:$4 sm:$0xff]   ;;  %v3282_v63 = vld [vmem:[%s4680_s1 + $0x30c] ss:$16 sps:$4 sm:$0xff]  }
  0x69   :  { %1744 = vmatprep.subr.bf16.mxu0 %v3195_v62  ;;  %v3279_v62 = vld [vmem:[%s4680_s1 + $0x704] ss:$16 sps:$4 sm:$0xff]  }
  0x6b   :  { %1827 = vmatpush1.bf16.msra.mxu1 %v3196_v1  ;;  %v3280_v1 = vld [vmem:[%s4680_s1 + $0x308] ss:$16 sps:$4 sm:$0xff]  }
  0x6c   :  { %1745 = vmatpush1.bf16.msra.mxu0 %v3193_v0  ;;  %1828 = vmatprep.subr.bf16.mxu1 %v3204_v4  ;;  %v3277_v0 = vld [vmem:[%s4680_s1 + $0x700] ss:$16 sps:$4 sm:$0xff]   ;;  %v3288_v4 = vld [vmem:[%s4680_s1 + $0x32c] ss:$16 sps:$4 sm:$0xff]  }
  0x6d   :  { %1746 = vmatprep.subr.bf16.mxu0 %v3201_v2  ;;  %v3285_v2 = vld [vmem:[%s4680_s1 + $0x724] ss:$16 sps:$4 sm:$0xff]  }
  0x6f   :  { %1829 = vmatpush1.bf16.msra.mxu1 %v3202_v6  ;;  %v3286_v6 = vld [vmem:[%s4680_s1 + $0x328] ss:$16 sps:$4 sm:$0xff]  }
  0x70   :  { %1747 = vmatpush1.bf16.msra.mxu0 %v3199_v5  ;;  %1830 = vmatprep.subr.bf16.mxu1 %v3210_v9  ;;  %v3283_v5 = vld [vmem:[%s4680_s1 + $0x720] ss:$16 sps:$4 sm:$0xff]   ;;  %v3294_v9 = vld [vmem:[%s4680_s1 + $0x34c] ss:$16 sps:$4 sm:$0xff]  }
  0x71   :  { %1748 = vmatprep.subr.bf16.mxu0 %v3207_v7  ;;  %v3291_v7 = vld [vmem:[%s4680_s1 + $0x744] ss:$16 sps:$4 sm:$0xff]  }
  0x73   :  { %1831 = vmatpush1.bf16.msra.mxu1 %v3208_v11  ;;  %v3292_v11 = vld [vmem:[%s4680_s1 + $0x348] ss:$16 sps:$4 sm:$0xff]  }
  0x74   :  { %1749 = vmatpush1.bf16.msra.mxu0 %v3205_v10  ;;  %1832 = vmatprep.subr.bf16.mxu1 %v3216_v14  ;;  %v3289_v10 = vld [vmem:[%s4680_s1 + $0x740] ss:$16 sps:$4 sm:$0xff]   ;;  %v3300_v14 = vld [vmem:[%s4680_s1 + $0x36c] ss:$16 sps:$4 sm:$0xff]  }
  0x75   :  { %1750 = vmatprep.subr.bf16.mxu0 %v3213_v12  ;;  %v3297_v12 = vld [vmem:[%s4680_s1 + $0x764] ss:$16 sps:$4 sm:$0xff]  }
  0x77   :  { %1833 = vmatpush1.bf16.msra.mxu1 %v3214_v16  ;;  %v3298_v16 = vld [vmem:[%s4680_s1 + $0x368] ss:$16 sps:$4 sm:$0xff]  }
  0x78   :  { %1751 = vmatpush1.bf16.msra.mxu0 %v3211_v15  ;;  %1834 = vmatprep.subr.bf16.mxu1 %v3222_v18  ;;  %v3295_v15 = vld [vmem:[%s4680_s1 + $0x760] ss:$16 sps:$4 sm:$0xff]   ;;  %v3306_v18 = vld [vmem:[%s4680_s1 + $0x38c] ss:$16 sps:$4 sm:$0xff]  }
  0x79   :  { %1752 = vmatprep.subr.bf16.mxu0 %v3219_v17  ;;  %v3303_v17 = vld [vmem:[%s4680_s1 + $0x784] ss:$16 sps:$4 sm:$0xff]  }
  0x7b   :  { %1835 = vmatpush1.bf16.msra.mxu1 %v3220_v23  ;;  %v3309_v23 = vld [vmem:[%s4680_s1 + $0x7a4] ss:$16 sps:$4 sm:$0xff]  }
  0x7c   :  { %1753 = vmatpush1.bf16.msra.mxu0 %v3217_v22  ;;  %1836 = vmatprep.subr.bf16.mxu1 %v3228_v8  ;;  %v3304_v22 = vld [vmem:[%s4680_s1 + $0x388] ss:$16 sps:$4 sm:$0xff]   ;;  %v3307_v8 = vld [vmem:[%s4680_s1 + $0x7a0] ss:$16 sps:$4 sm:$0xff]  }
  0x7d   :  { %1754 = vmatprep.subr.bf16.mxu0 %v3225_v24  ;;  %v3312_v24 = vld [vmem:[%s4680_s1 + $0x3ac] ss:$16 sps:$4 sm:$0xff]  }
  0x7f   :  { %1837 = vmatpush1.bf16.msra.mxu1 %v3226_v28  ;;  %v3315_v28 = vld [vmem:[%s4680_s1 + $0x7c4] ss:$16 sps:$4 sm:$0xff]  }
  0x80   :  { %1755 = vmatpush1.bf16.msra.mxu0 %v3223_v27  ;;  %1847 = vmatprep.subr.bf16.mxu1 %v3234_v49  ;;  %v3310_v27 = vld [vmem:[%s4680_s1 + $0x3a8] ss:$16 sps:$4 sm:$0xff]   ;;  %v3313_v49 = vld [vmem:[%s4680_s1 + $0x7c0] ss:$16 sps:$4 sm:$0xff]  }
  0x81   :  { %1765 = vmatprep.subr.bf16.mxu0 %v3231_v29  ;;  %v3318_v29 = vld [vmem:[%s4680_s1 + $0x3cc] ss:$16 sps:$4 sm:$0xff]  }
  0x82   :  { %1839 = vmatmul.mubr.bf16.vlgmr.msra.gmra.mrb[4].mxu1 %v3801_v19  ;;  %v3246_v19 = vld [vmem:[%s4680_s1 + $0x24c] ss:$16 sps:$4 sm:$0xff]  }
  0x83   :  { %1757 = vmatmul.mubr.bf16.vlgmr.msra.gmra.mrb[0].mxu0 %v4011_v31  ;;  %1848 = vmatpush1.bf16.msra.mxu1 %v3232_v33  ;;  %v3324_v33 = vld [vmem:[%s4680_s1 + $0x3ec] ss:$16 sps:$4 sm:$0xff]  }
  0x84   :  { %1766 = vmatpush1.bf16.msra.mxu0 %v3229_v32  ;;  %1849 = vmatprep.subr.bf16.mxu1 %v3240_v13  ;;  %v3321_v32 = vld [vmem:[%s4680_s1 + $0x7e4] ss:$16 sps:$4 sm:$0xff]   ;;  %v3322_v13 = vld [vmem:[%s4680_s1 + $0x3e8] ss:$16 sps:$4 sm:$0xff]  }
  0x85   :  { %1767 = vmatprep.subr.bf16.mxu0 %v3237_v34  ;;  %1797 = vmatprep.mubr.bf16.mxu0 %v4025_v35  ;;  %v3319_v34 = vld [vmem:[%s4680_s1 + $0x7e0] ss:$16 sps:$4 sm:$0xff]  }
  0x86   :  { %1879 = vmatprep.mubr.bf16.mxu1 %v3751_v3  ;;  %v3252_v3 = vld [vmem:[%s4680_s1 + $0x26c] ss:$16 sps:$4 sm:$0xff]  }
  0x87   :  { %1850 = vmatpush1.bf16.msra.mxu1 %v3238_v37  ;;  %v4210_v37 = vpack.c.bf16 %v3993_v26, %v3993_v26  ;;  %v3328_v26 = vld [vmem:[%s4680_s1 + $0x428] ss:$16 sps:$4 sm:$0xff]  }
  0x88   :  { %1768 = vmatpush1.bf16.msra.mxu0 %v3235_v36  ;;  %1851 = vmatprep.subr.bf16.mxu1 %v3246_v19  ;;  %v3327_v36 = vld [vmem:[%s4680_s1 + $0x40c] ss:$16 sps:$4 sm:$0xff]  }
  0x89   :  { %1769 = vmatprep.subr.bf16.mxu0 %v3243_v38  ;;  %v3325_v38 = vld [vmem:[%s4680_s1 + $0x408] ss:$16 sps:$4 sm:$0xff]   ;;  %v3330_v19 = vld [vmem:[%s4680_s1 + $0x42c] ss:$16 sps:$4 sm:$0xff]  }
  0x8b   :  { %1852 = vmatpush1.bf16.msra.mxu1 %v3244_v40  ;;  %v3421_v40 = vld [vmem:[%s4682_s3] ss:$8 sps:$4 sm:$0xff]  }
  0x8c   :  { %1770 = vmatpush1.bf16.msra.mxu0 %v3241_v39  ;;  %1853 = vmatprep.subr.bf16.mxu1 %v3252_v3  ;;  %v3333_v39 = vld [vmem:[%s4680_s1 + $0x44c] ss:$16 sps:$4 sm:$0xff]   ;;  %v3331_v3 = vld [vmem:[%s4680_s1 + $0x448] ss:$16 sps:$4 sm:$0xff]  }
  0x8d   :  { %1771 = vmatprep.subr.bf16.mxu0 %v3249_v41  ;;  %v3426_v41 = vld [vmem:[%s4682_s3 + $0x14] ss:$8 sps:$4 sm:$0xff]  }
  0x8f   :  { %1854 = vmatpush1.bf16.msra.mxu1 %v3250_v44  ;;  %v3429_v44 = vld [vmem:[%s4682_s3 + $0x24] ss:$8 sps:$4 sm:$0xff]  }
  0x90   :  { %1772 = vmatpush1.bf16.msra.mxu0 %v3247_v42  ;;  %1855 = vmatprep.subr.bf16.mxu1 %v3258_v46  ;;  %v3424_v42 = vld [vmem:[%s4682_s3 + $0x10] ss:$8 sps:$4 sm:$0xff]   ;;  %v3339_v46 = vld [vmem:[%s4680_s1 + $0x48c] ss:$16 sps:$4 sm:$0xff]  }
  0x91   :  { %1773 = vmatprep.subr.bf16.mxu0 %v3255_v45  ;;  %v3334_v45 = vld [vmem:[%s4680_s1 + $0x468] ss:$16 sps:$4 sm:$0xff]  }
  0x93   :  { %1856 = vmatpush1.bf16.msra.mxu1 %v3256_v48  ;;  %v3432_v48 = vld [vmem:[%s4682_s3 + $0x34] ss:$8 sps:$4 sm:$0xff]  }
  0x94   :  { %1774 = vmatpush1.bf16.msra.mxu0 %v3253_v47  ;;  %1857 = vmatprep.subr.bf16.mxu1 %v3264_v51  ;;  %v3427_v47 = vld [vmem:[%s4682_s3 + $0x20] ss:$8 sps:$4 sm:$0xff]   ;;  %v3342_v51 = vld [vmem:[%s4680_s1 + $0x4ac] ss:$16 sps:$4 sm:$0xff]  }
  0x95   :  { %1775 = vmatprep.subr.bf16.mxu0 %v3261_v50  ;;  %v3337_v50 = vld [vmem:[%s4680_s1 + $0x488] ss:$16 sps:$4 sm:$0xff]  }
  0x97   :  { %1858 = vmatpush1.bf16.msra.mxu1 %v3262_v53  ;;  %v3435_v53 = vld [vmem:[%s4682_s3 + $0x44] ss:$8 sps:$4 sm:$0xff]  }
  0x98   :  { %1776 = vmatpush1.bf16.msra.mxu0 %v3259_v52  ;;  %1859 = vmatprep.subr.bf16.mxu1 %v3270_v55  ;;  %v3430_v52 = vld [vmem:[%s4682_s3 + $0x30] ss:$8 sps:$4 sm:$0xff]   ;;  %v3345_v55 = vld [vmem:[%s4680_s1 + $0x4cc] ss:$16 sps:$4 sm:$0xff]  }
  0x99   :  { %1777 = vmatprep.subr.bf16.mxu0 %v3267_v54  ;;  %v3340_v54 = vld [vmem:[%s4680_s1 + $0x4a8] ss:$16 sps:$4 sm:$0xff]  }
  0x9b   :  { %1860 = vmatpush1.bf16.msra.mxu1 %v3268_v57  ;;  %v3438_v57 = vld [vmem:[%s4682_s3 + $0x54] ss:$8 sps:$4 sm:$0xff]  }
  0x9c   :  { %1778 = vmatpush1.bf16.msra.mxu0 %v3265_v56  ;;  %1861 = vmatprep.subr.bf16.mxu1 %v3276_v59  ;;  %v3433_v56 = vld [vmem:[%s4682_s3 + $0x40] ss:$8 sps:$4 sm:$0xff]   ;;  %v3436_v59 = vld [vmem:[%s4682_s3 + $0x50] ss:$8 sps:$4 sm:$0xff]  }
  0x9d   :  { %1779 = vmatprep.subr.bf16.mxu0 %v3273_v58  ;;  %v3343_v58 = vld [vmem:[%s4680_s1 + $0x4c8] ss:$16 sps:$4 sm:$0xff]  }
  0x9f   :  { %1862 = vmatpush1.bf16.msra.mxu1 %v3274_v61  ;;  %v3441_v61 = vld [vmem:[%s4682_s3 + $0x64] ss:$8 sps:$4 sm:$0xff]  }
  0xa0   :  { %1780 = vmatpush1.bf16.msra.mxu0 %v3271_v60  ;;  %1863 = vmatprep.subr.bf16.mxu1 %v3282_v63  ;;  %v3348_v60 = vld [vmem:[%s4680_s1 + $0x4ec] ss:$16 sps:$4 sm:$0xff]   ;;  %v3439_v63 = vld [vmem:[%s4682_s3 + $0x60] ss:$8 sps:$4 sm:$0xff]  }
  0xa1   :  { %1781 = vmatprep.subr.bf16.mxu0 %v3279_v62  ;;  %v3346_v62 = vld [vmem:[%s4680_s1 + $0x4e8] ss:$16 sps:$4 sm:$0xff]  }
  0xa3   :  { %1864 = vmatpush1.bf16.msra.mxu1 %v3280_v1  ;;  %v3444_v1 = vld [vmem:[%s4682_s3 + $0x74] ss:$8 sps:$4 sm:$0xff]  }
  0xa4   :  { %1782 = vmatpush1.bf16.msra.mxu0 %v3277_v0  ;;  %1865 = vmatprep.subr.bf16.mxu1 %v3288_v4  ;;  %v3351_v0 = vld [vmem:[%s4680_s1 + $0x50c] ss:$16 sps:$4 sm:$0xff]   ;;  %v3442_v4 = vld [vmem:[%s4682_s3 + $0x70] ss:$8 sps:$4 sm:$0xff]  }
  0xa5   :  { %1783 = vmatprep.subr.bf16.mxu0 %v3285_v2  ;;  %v3349_v2 = vld [vmem:[%s4680_s1 + $0x508] ss:$16 sps:$4 sm:$0xff]  }
  0xa7   :  { %1866 = vmatpush1.bf16.msra.mxu1 %v3286_v6  ;;  %v3447_v6 = vld [vmem:[%s4682_s3 + $0x84] ss:$8 sps:$4 sm:$0xff]  }
  0xa8   :  { %1784 = vmatpush1.bf16.msra.mxu0 %v3283_v5  ;;  %1867 = vmatprep.subr.bf16.mxu1 %v3294_v9  ;;  %v3354_v5 = vld [vmem:[%s4680_s1 + $0x52c] ss:$16 sps:$4 sm:$0xff]   ;;  %v3445_v9 = vld [vmem:[%s4682_s3 + $0x80] ss:$8 sps:$4 sm:$0xff]  }
  0xa9   :  { %1785 = vmatprep.subr.bf16.mxu0 %v3291_v7  ;;  %v3352_v7 = vld [vmem:[%s4680_s1 + $0x528] ss:$16 sps:$4 sm:$0xff]  }
  0xab   :  { %1868 = vmatpush1.bf16.msra.mxu1 %v3292_v11  ;;  %v3450_v11 = vld [vmem:[%s4682_s3 + $0x94] ss:$8 sps:$4 sm:$0xff]  }
  0xac   :  { %1786 = vmatpush1.bf16.msra.mxu0 %v3289_v10  ;;  %1869 = vmatprep.subr.bf16.mxu1 %v3300_v14  ;;  %v3357_v10 = vld [vmem:[%s4680_s1 + $0x54c] ss:$16 sps:$4 sm:$0xff]   ;;  %v3448_v14 = vld [vmem:[%s4682_s3 + $0x90] ss:$8 sps:$4 sm:$0xff]  }
  0xad   :  { %1787 = vmatprep.subr.bf16.mxu0 %v3297_v12  ;;  %v3355_v12 = vld [vmem:[%s4680_s1 + $0x548] ss:$16 sps:$4 sm:$0xff]  }
  0xaf   :  { %1870 = vmatpush1.bf16.msra.mxu1 %v3298_v16  ;;  %v3453_v16 = vld [vmem:[%s4682_s3 + $0xa4] ss:$8 sps:$4 sm:$0xff]  }
  0xb0   :  { %1788 = vmatpush1.bf16.msra.mxu0 %v3295_v15  ;;  %1871 = vmatprep.subr.bf16.mxu1 %v3306_v18  ;;  %v3360_v15 = vld [vmem:[%s4680_s1 + $0x56c] ss:$16 sps:$4 sm:$0xff]   ;;  %v3451_v18 = vld [vmem:[%s4682_s3 + $0xa0] ss:$8 sps:$4 sm:$0xff]  }
  0xb1   :  { %1789 = vmatprep.subr.bf16.mxu0 %v3303_v17  ;;  %v3358_v17 = vld [vmem:[%s4680_s1 + $0x568] ss:$16 sps:$4 sm:$0xff]  }
  0xb3   :  { %1872 = vmatpush1.bf16.msra.mxu1 %v3304_v22  ;;  %v3456_v22 = vld [vmem:[%s4682_s3 + $0xb4] ss:$8 sps:$4 sm:$0xff]  }
  0xb4   :  { %1790 = vmatpush1.bf16.msra.mxu0 %v3301_v21  ;;  %1873 = vmatprep.subr.bf16.mxu1 %v3312_v24  ;;  %v3363_v21 = vld [vmem:[%s4680_s1 + $0x58c] ss:$16 sps:$4 sm:$0xff]   ;;  %v3454_v24 = vld [vmem:[%s4682_s3 + $0xb0] ss:$8 sps:$4 sm:$0xff]  }
  0xb5   :  { %1791 = vmatprep.subr.bf16.mxu0 %v3309_v23  ;;  %v3361_v23 = vld [vmem:[%s4680_s1 + $0x588] ss:$16 sps:$4 sm:$0xff]  }
  0xb7   :  { %1874 = vmatpush1.bf16.msra.mxu1 %v3310_v27  ;;  %v3459_v27 = vld [vmem:[%s4682_s3 + $0xc4] ss:$8 sps:$4 sm:$0xff]  }
  0xb8   :  { %1792 = vmatpush1.bf16.msra.mxu0 %v3307_v8  ;;  %1875 = vmatprep.subr.bf16.mxu1 %v3318_v29  ;;  %v3366_v8 = vld [vmem:[%s4680_s1 + $0x5ac] ss:$16 sps:$4 sm:$0xff]   ;;  %v3457_v29 = vld [vmem:[%s4682_s3 + $0xc0] ss:$8 sps:$4 sm:$0xff]  }
  0xb9   :  { %1793 = vmatprep.subr.bf16.mxu0 %v3315_v28  ;;  %v3364_v28 = vld [vmem:[%s4680_s1 + $0x5a8] ss:$16 sps:$4 sm:$0xff]  }
  0xbb   :  { %1876 = vmatpush1.bf16.msra.mxu1 %v3316_v30  ;;  %v3462_v30 = vld [vmem:[%s4682_s3 + $0xd4] ss:$8 sps:$4 sm:$0xff]  }
  0xbc   :  { %1794 = vmatpush1.bf16.msra.mxu0 %v3313_v49  ;;  %1877 = vmatprep.subr.bf16.mxu1 %v3324_v33  ;;  %v3369_v49 = vld [vmem:[%s4680_s1 + $0x5cc] ss:$16 sps:$4 sm:$0xff]   ;;  %v3460_v33 = vld [vmem:[%s4682_s3 + $0xd0] ss:$8 sps:$4 sm:$0xff]  }
  0xbd   :  { %1795 = vmatprep.subr.bf16.mxu0 %v3321_v32  ;;  %v3367_v32 = vld [vmem:[%s4680_s1 + $0x5c8] ss:$16 sps:$4 sm:$0xff]  }
  0xbf   :  { %1878 = vmatpush1.bf16.msra.mxu1 %v3322_v13  ;;  %v3370_v13 = vld [vmem:[%s4680_s1 + $0x5e8] ss:$16 sps:$4 sm:$0xff]  }
  0xc0   :  { %1796 = vmatpush1.bf16.msra.mxu0 %v3319_v34  ;;  %1888 = vmatprep.subr.bf16.mxu1 %v3327_v36  ;;  %v3372_v34 = vld [vmem:[%s4680_s1 + $0x5ec] ss:$16 sps:$4 sm:$0xff]  }
  0xc1   :  { %v3375_v36 = vld [vmem:[%s4680_s1 + $0x60c] ss:$16 sps:$4 sm:$0xff]  }
  0xc2   :  { %1880 = vmatmul.mubr.bf16.vlgmr.msra.gmra.mrb[4].mxu1 %v3803_v20  ;;  %v3423_v20 = vld [vmem:[%s4682_s3 + $0x4] ss:$8 sps:$4 sm:$0xff]  }
  0xc3   :  { %1798 = vmatmul.mubr.bf16.vlgmr.msra.gmra.mrb[0].mxu0 %v4210_v37  ;;  %1889 = vmatpush1.bf16.msra.mxu1 %v3325_v38  ;;  %v3373_v38 = vld [vmem:[%s4680_s1 + $0x608] ss:$16 sps:$4 sm:$0xff]  }
  0xc4   :  { %1920 = vmatprep.mubr.bf16.mxu1 %v3817_v25  ;;  %1890 = vmatprep.subr.bf16.mxu1 %v3330_v19  ;;  %v3336_v25 = vld [vmem:[%s4680_s1 + $0x46c] ss:$16 sps:$4 sm:$0xff]  }
  0xc5   :  { %2374 = vmatprep.subr.bf16.mxu0 %v3423_v20  ;;  %v3378_v19 = vld [vmem:[%s4680_s1 + $0x62c] ss:$16 sps:$4 sm:$0xff]  }
  0xc6   :  { %2375 = vmatpush1.bf16.msra.mxu0 %v3421_v40  ;;  %v3379_v40 = vld [vmem:[%s4680_s1 + $0x648] ss:$16 sps:$4 sm:$0xff]   ;;  %v3387_v20 = vld [vmem:[%s4680_s1 + $0x68c] ss:$16 sps:$4 sm:$0xff]  }
  0xc7   :  { %1891 = vmatpush1.bf16.msra.mxu1 %v3328_v26  ;;  %2376 = vmatprep.subr.bf16.mxu0 %v3426_v41  ;;  %v3376_v26 = vld [vmem:[%s4680_s1 + $0x628] ss:$16 sps:$4 sm:$0xff]  }
  0xc8   :  { %1892 = vmatprep.subr.bf16.mxu1 %v3333_v39  ;;  %v3381_v39 = vld [vmem:[%s4680_s1 + $0x64c] ss:$16 sps:$4 sm:$0xff]   ;;  %v3385_v41 = vld [vmem:[%s4680_s1 + $0x688] ss:$16 sps:$4 sm:$0xff]  }
  0xca   :  { %2377 = vmatpush1.bf16.msra.mxu0 %v3424_v42  ;;  %v3393_v42 = vld [vmem:[%s4680_s1 + $0x6cc] ss:$16 sps:$4 sm:$0xff]  }
  0xcb   :  { %1893 = vmatpush1.bf16.msra.mxu1 %v3331_v3  ;;  %2378 = vmatprep.subr.bf16.mxu0 %v3429_v44  ;;  %v3390_v3 = vld [vmem:[%s4680_s1 + $0x6ac] ss:$16 sps:$4 sm:$0xff]  }
  0xcc   :  { %1894 = vmatprep.subr.bf16.mxu1 %v3336_v25  ;;  %v3388_v25 = vld [vmem:[%s4680_s1 + $0x6a8] ss:$16 sps:$4 sm:$0xff]   ;;  %v3465_v44 = vld [vmem:[%s4682_s3 + $0xe4] ss:$8 sps:$4 sm:$0xff]  }
  0xce   :  { %2379 = vmatpush1.bf16.msra.mxu0 %v3427_v47 }
  0xcf   :  { %1895 = vmatpush1.bf16.msra.mxu1 %v3334_v45  ;;  %2380 = vmatprep.subr.bf16.mxu0 %v3432_v48 }
  0xd0   :  { %1896 = vmatprep.subr.bf16.mxu1 %v3339_v46  ;;  %v3463_v46 = vld [vmem:[%s4682_s3 + $0xe0] ss:$8 sps:$4 sm:$0xff]  }
  0xd2   :  { %2381 = vmatpush1.bf16.msra.mxu0 %v3430_v52  ;;  %v3396_v52 = vld [vmem:[%s4680_s1 + $0x6ec] ss:$16 sps:$4 sm:$0xff]  }
  0xd3   :  { %1897 = vmatpush1.bf16.msra.mxu1 %v3337_v50  ;;  %2382 = vmatprep.subr.bf16.mxu0 %v3435_v53  ;;  %v3391_v50 = vld [vmem:[%s4680_s1 + $0x6c8] ss:$16 sps:$4 sm:$0xff]   ;;  %v3468_v53 = vld [vmem:[%s4682_s3 + $0xf4] ss:$8 sps:$4 sm:$0xff]  }
  0xd4   :  { %1898 = vmatprep.subr.bf16.mxu1 %v3342_v51 }
  0xd6   :  { %2383 = vmatpush1.bf16.msra.mxu0 %v3433_v56  ;;  %v3399_v56 = vld [vmem:[%s4680_s1 + $0x70c] ss:$16 sps:$4 sm:$0xff]  }
  0xd7   :  { %1899 = vmatpush1.bf16.msra.mxu1 %v3340_v54  ;;  %2384 = vmatprep.subr.bf16.mxu0 %v3438_v57  ;;  %v3466_v54 = vld [vmem:[%s4682_s3 + $0xf0] ss:$8 sps:$4 sm:$0xff]   ;;  %v3471_v57 = vld [vmem:[%s4682_s3 + $0x104] ss:$8 sps:$4 sm:$0xff]  }
  0xd8   :  { %1900 = vmatprep.subr.bf16.mxu1 %v3345_v55  ;;  %v3394_v55 = vld [vmem:[%s4680_s1 + $0x6e8] ss:$16 sps:$4 sm:$0xff]  }
  0xda   :  { %2385 = vmatpush1.bf16.msra.mxu0 %v3436_v59  ;;  %v3402_v59 = vld [vmem:[%s4680_s1 + $0x72c] ss:$16 sps:$4 sm:$0xff]  }
  0xdb   :  { %1901 = vmatpush1.bf16.msra.mxu1 %v3343_v58  ;;  %2386 = vmatprep.subr.bf16.mxu0 %v3441_v61  ;;  %v3397_v58 = vld [vmem:[%s4680_s1 + $0x708] ss:$16 sps:$4 sm:$0xff]   ;;  %v3405_v61 = vld [vmem:[%s4680_s1 + $0x74c] ss:$16 sps:$4 sm:$0xff]  }
  0xdc   :  { %1902 = vmatprep.subr.bf16.mxu1 %v3348_v60  ;;  %v3400_v60 = vld [vmem:[%s4680_s1 + $0x728] ss:$16 sps:$4 sm:$0xff]  }
  0xde   :  { %2387 = vmatpush1.bf16.msra.mxu0 %v3439_v63  ;;  %v3408_v63 = vld [vmem:[%s4680_s1 + $0x76c] ss:$16 sps:$4 sm:$0xff]  }
  0xdf   :  { %1903 = vmatpush1.bf16.msra.mxu1 %v3346_v62  ;;  %2388 = vmatprep.subr.bf16.mxu0 %v3444_v1  ;;  %v3403_v62 = vld [vmem:[%s4680_s1 + $0x748] ss:$16 sps:$4 sm:$0xff]   ;;  %v3411_v1 = vld [vmem:[%s4680_s1 + $0x78c] ss:$16 sps:$4 sm:$0xff]  }
  0xe0   :  { %1904 = vmatprep.subr.bf16.mxu1 %v3351_v0  ;;  %v3406_v0 = vld [vmem:[%s4680_s1 + $0x768] ss:$16 sps:$4 sm:$0xff]  }
  0xe2   :  { %2389 = vmatpush1.bf16.msra.mxu0 %v3442_v4  ;;  %v3414_v4 = vld [vmem:[%s4680_s1 + $0x7ac] ss:$16 sps:$4 sm:$0xff]  }
  0xe3   :  { %1905 = vmatpush1.bf16.msra.mxu1 %v3349_v2  ;;  %2390 = vmatprep.subr.bf16.mxu0 %v3447_v6  ;;  %v3409_v2 = vld [vmem:[%s4680_s1 + $0x788] ss:$16 sps:$4 sm:$0xff]   ;;  %v3417_v6 = vld [vmem:[%s4680_s1 + $0x7cc] ss:$16 sps:$4 sm:$0xff]  }
  0xe4   :  { %1906 = vmatprep.subr.bf16.mxu1 %v3354_v5  ;;  %v3412_v5 = vld [vmem:[%s4680_s1 + $0x7a8] ss:$16 sps:$4 sm:$0xff]  }
  0xe6   :  { %2391 = vmatpush1.bf16.msra.mxu0 %v3445_v9  ;;  %v3420_v9 = vld [vmem:[%s4680_s1 + $0x7ec] ss:$16 sps:$4 sm:$0xff]  }
  0xe7   :  { %1907 = vmatpush1.bf16.msra.mxu1 %v3352_v7  ;;  %2392 = vmatprep.subr.bf16.mxu0 %v3450_v11  ;;  %v3415_v7 = vld [vmem:[%s4680_s1 + $0x7c8] ss:$16 sps:$4 sm:$0xff]   ;;  %v344_v11 = vsub.s32 0, %v3696_v43 }
  0xe8   :  { %1908 = vmatprep.subr.bf16.mxu1 %v3357_v10  ;;  %v3418_v10 = vld [vmem:[%s4680_s1 + $0x7e8] ss:$16 sps:$4 sm:$0xff]  }
  0xea   :  { %2393 = vmatpush1.bf16.msra.mxu0 %v3448_v14  ;;  %v348_v14 = vsub.s32 1, %v3696_v43 }
  0xeb   :  { %1909 = vmatpush1.bf16.msra.mxu1 %v3355_v12  ;;  %2394 = vmatprep.subr.bf16.mxu0 %v3453_v16  ;;  %v4510_v12 = vld [vmem:[%s4683_s2] sm:$0xf] }
  0xec   :  { %1910 = vmatprep.subr.bf16.mxu1 %v3360_v15  ;;  %v345_v15 = vrot.slane %v4510_v12, %v344_v11  ;;  %v349_v16 = vrot.slane %v4510_v12, %v348_v14 }
  0xee   :  { %2395 = vmatpush1.bf16.msra.mxu0 %v3451_v18 }
  0xef   :  { %1911 = vmatpush1.bf16.msra.mxu1 %v3358_v17  ;;  %2396 = vmatprep.subr.bf16.mxu0 %v3456_v22 }
  0xf0   :  { %1912 = vmatprep.subr.bf16.mxu1 %v3363_v21 }
  0xf2   :  { %2397 = vmatpush1.bf16.msra.mxu0 %v3454_v24 }
  0xf3   :  { %1913 = vmatpush1.bf16.msra.mxu1 %v3361_v23  ;;  %2398 = vmatprep.subr.bf16.mxu0 %v3459_v27 }
  0xf4   :  { %1914 = vmatprep.subr.bf16.mxu1 %v3366_v8 }
  0xf6   :  { %2399 = vmatpush1.bf16.msra.mxu0 %v3457_v29 }
  0xf7   :  { %1915 = vmatpush1.bf16.msra.mxu1 %v3364_v28  ;;  %2400 = vmatprep.subr.bf16.mxu0 %v3462_v30 }
  0xf8   :  { %1916 = vmatprep.subr.bf16.mxu1 %v3369_v49  ;;  %v3469_v49 = vld [vmem:[%s4682_s3 + $0x100] ss:$8 sps:$4 sm:$0xff]  }
  0xfa   :  { %2401 = vmatpush1.bf16.msra.mxu0 %v3460_v33  ;;  %v3472_v33 = vld [vmem:[%s4682_s3 + $0x110] ss:$8 sps:$4 sm:$0xff]  }
  0xfb   :  { %1917 = vmatpush1.bf16.msra.mxu1 %v3367_v32  ;;  %2402 = vmatprep.subr.bf16.mxu0 %v3465_v44  ;;  %v3474_v32 = vld [vmem:[%s4682_s3 + $0x114] ss:$8 sps:$4 sm:$0xff]   ;;  %v3525_v44 = vld [vmem:[%s4684_s5 + $0x60] sm:$0xff]  }
  0xfc   :  { %1918 = vmatprep.subr.bf16.mxu1 %v3372_v34  ;;  %v3477_v34 = vld [vmem:[%s4682_s3 + $0x124] ss:$8 sps:$4 sm:$0xff]  }
  0xfe   :  { %2403 = vmatpush1.bf16.msra.mxu0 %v3463_v46  ;;  %v3484_v46 = vld [vmem:[%s4682_s3 + $0x150] ss:$8 sps:$4 sm:$0xff]  }
  0xff   :  { %1919 = vmatpush1.bf16.msra.mxu1 %v3370_v13  ;;  %2404 = vmatprep.subr.bf16.mxu0 %v3468_v53  ;;  %v3517_v13 = vld [vmem:[%s4684_s5 + $0x40] sm:$0xff]   ;;  %v3490_v53 = vld [vmem:[%s4682_s3 + $0x170] ss:$8 sps:$4 sm:$0xff]  }
 0x100   :  { %1929 = vmatprep.subr.bf16.mxu1 %v3375_v36  ;;  %v3518_v36 = vld [vmem:[%s4684_s5] sm:$0xff]  }
 0x102   :  { %1921 = vmatmul.mubr.bf16.vlgmr.msra.gmra.mrb[4].mxu1 %v4011_v31  ;;  %v3384_v31 = vld [vmem:[%s4680_s1 + $0x66c] ss:$16 sps:$4 sm:$0xff]   ;;  %2405 = vmatpush1.bf16.msra.mxu0 %v3466_v54 }
 0x103   :  { %1930 = vmatpush1.bf16.msra.mxu1 %v3373_v38  ;;  %1961 = vmatprep.mubr.bf16.mxu1 %v4025_v35  ;;  %v3382_v35 = vld [vmem:[%s4680_s1 + $0x668] ss:$16 sps:$4 sm:$0xff]   ;;  %v3495_v54 = vld [vmem:[%s4682_s3 + $0x184] ss:$8 sps:$4 sm:$0xff]  }
 0x104   :  { %1931 = vmatprep.subr.bf16.mxu1 %v3378_v19  ;;  %2415 = vmatprep.subr.bf16.mxu0 %v3471_v57  ;;  %v3475_v38 = vld [vmem:[%s4682_s3 + $0x120] ss:$8 sps:$4 sm:$0xff]   ;;  %v3496_v57 = vld [vmem:[%s4682_s3 + $0x190] ss:$8 sps:$4 sm:$0xff]  }
 0x105   :  { %v3519_v19 = vld [vmem:[%s4684_s5 + $0x48] sm:$0xff]  }
 0x107   :  { %1932 = vmatpush1.bf16.msra.mxu1 %v3376_v26  ;;  %v3520_v26 = vld [vmem:[%s4684_s5 + $0x8] sm:$0xff]  }
 0x108   :  { %1933 = vmatprep.subr.bf16.mxu1 %v3381_v39  ;;  %v3521_v39 = vld [vmem:[%s4684_s5 + $0x50] sm:$0xff]  }
 0x10b   :  { %1934 = vmatpush1.bf16.msra.mxu1 %v3379_v40  ;;  %v3480_v40 = vld [vmem:[%s4682_s3 + $0x134] ss:$8 sps:$4 sm:$0xff]  }
 0x10c   :  { %1935 = vmatprep.subr.bf16.mxu1 %v3384_v31  ;;  %v3478_v31 = vld [vmem:[%s4682_s3 + $0x130] ss:$8 sps:$4 sm:$0xff]  }
 0x10f   :  { %1936 = vmatpush1.bf16.msra.mxu1 %v3382_v35  ;;  %v3522_v35 = vld [vmem:[%s4684_s5 + $0x10] sm:$0xff]  }
 0x110   :  { %1937 = vmatprep.subr.bf16.mxu1 %v3387_v20  ;;  %v3523_v20 = vld [vmem:[%s4684_s5 + $0x58] sm:$0xff]  }
 0x113   :  { %1938 = vmatpush1.bf16.msra.mxu1 %v3385_v41  ;;  %v3483_v41 = vld [vmem:[%s4682_s3 + $0x144] ss:$8 sps:$4 sm:$0xff]  }
 0x114   :  { %1939 = vmatprep.subr.bf16.mxu1 %v3390_v3  ;;  %v3481_v3 = vld [vmem:[%s4682_s3 + $0x140] ss:$8 sps:$4 sm:$0xff]  }
 0x115   :  { %v1676_v45 = vpop.f32.mrb[0].mxu1 }
 0x116   :  { %v1678_v47 = vpop.f32.mrb[1].mxu1  ;;  %v1677_v17 = vadd.f32 %v1676_v45, %v345_v15  ;;  %v3526_v45 = vld [vmem:[%s4684_s5 + $0x20] sm:$0xff]  }
 0x117   :  { %v1680_v48 = vpop.f32.mrb[2].mxu1  ;;  %1940 = vmatpush1.bf16.msra.mxu1 %v3388_v25  ;;  %v1679_v18 = vadd.f32 %v1678_v47, %v349_v16  ;;  %v3486_v25 = vld [vmem:[%s4682_s3 + $0x154] ss:$8 sps:$4 sm:$0xff]   ;;  %v3527_v47 = vld [vmem:[%s4684_s5 + $0x68] sm:$0xff]  }
 0x118   :  { %v1681_v51 = vpop.f32.mrb[3].mxu1  ;;  %1941 = vmatprep.subr.bf16.mxu1 %v3393_v42  ;;  %v3524_v42 = vld [vmem:[%s4684_s5 + $0x18] sm:$0xff]   ;;  %v3489_v48 = vld [vmem:[%s4682_s3 + $0x164] ss:$8 sps:$4 sm:$0xff]  }
 0x119   :  { %v3487_v51 = vld [vmem:[%s4682_s3 + $0x160] ss:$8 sps:$4 sm:$0xff]  }
 0x11b   :  { %1942 = vmatpush1.bf16.msra.mxu1 %v3391_v50  ;;  %v3528_v50 = vld [vmem:[%s4684_s5 + $0x28] sm:$0xff]  }
 0x11c   :  { %1943 = vmatprep.subr.bf16.mxu1 %v3396_v52  ;;  %v3492_v52 = vld [vmem:[%s4682_s3 + $0x174] ss:$8 sps:$4 sm:$0xff]  }
 0x11f   :  { %1944 = vmatpush1.bf16.msra.mxu1 %v3394_v55  ;;  %v3493_v55 = vld [vmem:[%s4682_s3 + $0x180] ss:$8 sps:$4 sm:$0xff]  }
 0x120   :  { %1945 = vmatprep.subr.bf16.mxu1 %v3399_v56  ;;  %v3498_v56 = vld [vmem:[%s4682_s3 + $0x194] ss:$8 sps:$4 sm:$0xff]  }
 0x123   :  { %1946 = vmatpush1.bf16.msra.mxu1 %v3397_v58  ;;  %v3501_v58 = vld [vmem:[%s4682_s3 + $0x1a4] ss:$8 sps:$4 sm:$0xff]  }
 0x124   :  { %1947 = vmatprep.subr.bf16.mxu1 %v3402_v59  ;;  %v3499_v59 = vld [vmem:[%s4682_s3 + $0x1a0] ss:$8 sps:$4 sm:$0xff]  }
 0x127   :  { %1948 = vmatpush1.bf16.msra.mxu1 %v3400_v60  ;;  %v3504_v60 = vld [vmem:[%s4682_s3 + $0x1b4] ss:$8 sps:$4 sm:$0xff]  }
 0x128   :  { %1949 = vmatprep.subr.bf16.mxu1 %v3405_v61  ;;  %v3502_v61 = vld [vmem:[%s4682_s3 + $0x1b0] ss:$8 sps:$4 sm:$0xff]  }
 0x12b   :  { %1950 = vmatpush1.bf16.msra.mxu1 %v3403_v62  ;;  %v3507_v62 = vld [vmem:[%s4682_s3 + $0x1c4] ss:$8 sps:$4 sm:$0xff]  }
 0x12c   :  { %1951 = vmatprep.subr.bf16.mxu1 %v3408_v63  ;;  %v3505_v63 = vld [vmem:[%s4682_s3 + $0x1c0] ss:$8 sps:$4 sm:$0xff]  }
 0x12f   :  { %1952 = vmatpush1.bf16.msra.mxu1 %v3406_v0  ;;  %v3510_v0 = vld [vmem:[%s4682_s3 + $0x1d4] ss:$8 sps:$4 sm:$0xff]  }
 0x130   :  { %1953 = vmatprep.subr.bf16.mxu1 %v3411_v1  ;;  %v3508_v1 = vld [vmem:[%s4682_s3 + $0x1d0] ss:$8 sps:$4 sm:$0xff]  }
 0x133   :  { %1954 = vmatpush1.bf16.msra.mxu1 %v3409_v2  ;;  %v3513_v2 = vld [vmem:[%s4682_s3 + $0x1e4] ss:$8 sps:$4 sm:$0xff]  }
 0x134   :  { %1955 = vmatprep.subr.bf16.mxu1 %v3414_v4  ;;  %v3511_v4 = vld [vmem:[%s4682_s3 + $0x1e0] ss:$8 sps:$4 sm:$0xff]  }
 0x137   :  { %1956 = vmatpush1.bf16.msra.mxu1 %v3412_v5  ;;  %v3516_v5 = vld [vmem:[%s4682_s3 + $0x1f4] ss:$8 sps:$4 sm:$0xff]  }
 0x138   :  { %1957 = vmatprep.subr.bf16.mxu1 %v3417_v6  ;;  %v3514_v6 = vld [vmem:[%s4682_s3 + $0x1f0] ss:$8 sps:$4 sm:$0xff]  }
 0x13b   :  { %1958 = vmatpush1.bf16.msra.mxu1 %v3415_v7  ;;  %v352_v7 = vsub.s32 2, %v3696_v43 }
 0x13c   :  { %1959 = vmatprep.subr.bf16.mxu1 %v3420_v9  ;;  %v356_v9 = vsub.s32 3, %v3696_v43 }
 0x13e   :  { %v357_v15 = vrot.slane %v4510_v12, %v356_v9 }
 0x13f   :  { %1960 = vmatpush1.bf16.msra.mxu1 %v3418_v10  ;;  %v353_v10 = vrot.slane %v4510_v12, %v352_v7  ;;  %v3530_v12 = vld [vmem:[%s4684_s5 + $0x30] sm:$0xff]  }
 0x140   :  { %2980 = vmatprep.subr.bf16.mxu1 %v3517_v13 }
 0x142   :  { %1962 = vmatmul.mubr.bf16.vlgmr.msra.gmra.mrb[4].mxu1 %v4210_v37 }
 0x143   :  { %2981 = vmatpush3.bf16.msra.mxu1 %v3518_v36 }
 0x144   :  { %2982 = vmatprep.subr.bf16.mxu1 %v3519_v19 }
 0x147   :  { %2983 = vmatpush3.bf16.msra.mxu1 %v3520_v26 }
 0x148   :  { %2984 = vmatprep.subr.bf16.mxu1 %v3521_v39 }
 0x14b   :  { %2985 = vmatpush3.bf16.msra.mxu1 %v3522_v35 }
 0x14c   :  { %2986 = vmatprep.subr.bf16.mxu1 %v3523_v20 }
 0x14f   :  { %2987 = vmatpush3.bf16.msra.mxu1 %v3524_v42 }
 0x150   :  { %2988 = vmatprep.subr.bf16.mxu1 %v3525_v44 }
 0x153   :  { %2989 = vmatpush3.bf16.msra.mxu1 %v3526_v45 }
 0x154   :  { %2990 = vmatprep.subr.bf16.mxu1 %v3527_v47 }
 0x157   :  { %2991 = vmatpush3.bf16.msra.mxu1 %v3528_v50 }
 0x196   :  { %v1799_v37 = vpop.f32.mrb[0].mxu0 }
 0x197   :  { %v3003_v21 = vadd.f32 %v1799_v37, %v1677_v17  ;;  %v1801_v22 = vpop.f32.mrb[1].mxu0 }
 0x198   :  { %v3005_v23 = vadd.f32 %v1801_v22, %v1679_v18  ;;  %v1803_v24 = vpop.f32.mrb[2].mxu0 }
 0x199   :  { %v1970_v8 = vmax.f32 %v3003_v21, 0.0  ;;  %v1804_v27 = vpop.f32.mrb[3].mxu0 }
 0x19a   :  { %v1971_v28 = vmax.f32 %v3005_v23, 0.0 }
 0x19b   :  { %v2038_v30 = vpack.c.bf16 %v1970_v8, %v1970_v8 }
 0x19c   :  { %v2039_v29 = vpack.c.bf16 %v1971_v28, %v1971_v28  ;;  %v3529_v28 = vld [vmem:[%s4684_s5 + $0x70] sm:$0xff]  }
 0x19d   :  { %2992 = vmatprep.subr.bf16.mxu1 %v3529_v28 }
 0x19e   :  { %2406 = vmatprep.mubr.bf16.mxu0 %v2039_v29  ;;  %2993 = vmatpush3.bf16.msra.mxu1 %v3530_v12  ;;  %v3531_v29 = vld [vmem:[%s4684_s5 + $0x78] sm:$0xff]  }
 0x19f   :  { %2407 = vmatmul.mubr.bf16.vlgmr.msra.gmra.mrb[4].mxu0 %v2038_v30  ;;  %2994 = vmatprep.subr.bf16.mxu1 %v3531_v29  ;;  %v2042_v30 = vld [vmem:[%s4685_s4] sm:$0x3] }
 0x1a0   :  { %2416 = vmatpush1.bf16.msra.mxu0 %v3469_v49  ;;  %v3532_v49 = vld [vmem:[%s4684_s5 + $0x38] sm:$0xff]  }
 0x1a1   :  { %2417 = vmatprep.subr.bf16.mxu0 %v3474_v32  ;;  %v2047_v32 = vrot.slane %v2042_v30, %v344_v11  ;;  %v2963_v11 = vld [vmem:[%s4686_s6] ss:$0 sm:$0xff] }
 0x1a2   :  { %2995 = vmatpush3.bf16.msra.mxu1 %v3532_v49 }
 0x1a4   :  { %2418 = vmatpush1.bf16.msra.mxu0 %v3472_v33  ;;  %v2051_v33 = vrot.slane %v2042_v30, %v348_v14 }
 0x1a5   :  { %2419 = vmatprep.subr.bf16.mxu0 %v3477_v34 }
 0x1a8   :  { %2420 = vmatpush1.bf16.msra.mxu0 %v3475_v38 }
 0x1a9   :  { %2421 = vmatprep.subr.bf16.mxu0 %v3480_v40 }
 0x1ac   :  { %2422 = vmatpush1.bf16.msra.mxu0 %v3478_v31 }
 0x1ad   :  { %2423 = vmatprep.subr.bf16.mxu0 %v3483_v41 }
 0x1b0   :  { %2424 = vmatpush1.bf16.msra.mxu0 %v3481_v3  ;;  %v2635_v3 = vld [vmem:[%s4687_s7] sm:$0x3] }
 0x1b1   :  { %2425 = vmatprep.subr.bf16.mxu0 %v3486_v25 }
 0x1b4   :  { %2426 = vmatpush1.bf16.msra.mxu0 %v3484_v46 }
 0x1b5   :  { %2427 = vmatprep.subr.bf16.mxu0 %v3489_v48 }
 0x1b8   :  { %2428 = vmatpush1.bf16.msra.mxu0 %v3487_v51 }
 0x1b9   :  { %2429 = vmatprep.subr.bf16.mxu0 %v3492_v52 }
 0x1bc   :  { %2430 = vmatpush1.bf16.msra.mxu0 %v3490_v53 }
 0x1bd   :  { %2431 = vmatprep.subr.bf16.mxu0 %v3495_v54 }
 0x1c0   :  { %2432 = vmatpush1.bf16.msra.mxu0 %v3493_v55 }
 0x1c1   :  { %2433 = vmatprep.subr.bf16.mxu0 %v3498_v56 }
 0x1c4   :  { %2434 = vmatpush1.bf16.msra.mxu0 %v3496_v57 }
 0x1c5   :  { %2435 = vmatprep.subr.bf16.mxu0 %v3501_v58 }
 0x1c8   :  { %2436 = vmatpush1.bf16.msra.mxu0 %v3499_v59 }
 0x1c9   :  { %2437 = vmatprep.subr.bf16.mxu0 %v3504_v60 }
 0x1cc   :  { %2438 = vmatpush1.bf16.msra.mxu0 %v3502_v61 }
 0x1cd   :  { %2439 = vmatprep.subr.bf16.mxu0 %v3507_v62 }
 0x1d0   :  { %2440 = vmatpush1.bf16.msra.mxu0 %v3505_v63 }
 0x1d1   :  { %2441 = vmatprep.subr.bf16.mxu0 %v3510_v0 }
 0x1d4   :  { %2442 = vmatpush1.bf16.msra.mxu0 %v3508_v1 }
 0x1d5   :  { %2443 = vmatprep.subr.bf16.mxu0 %v3513_v2 }
 0x1d8   :  { %2444 = vmatpush1.bf16.msra.mxu0 %v3511_v4 }
 0x1d9   :  { %2445 = vmatprep.subr.bf16.mxu0 %v3516_v5 }
 0x1dc   :  { %2446 = vmatpush1.bf16.msra.mxu0 %v3514_v6 }
 0x215   :  { %v1963_v16 = vpop.f32.mrb[4].mxu1 }
 0x216   :  { %v3006_v17 = vadd.f32 %v1963_v16, %v353_v10  ;;  %v1965_v18 = vpop.f32.mrb[5].mxu1 }
 0x217   :  { %v3007_v37 = vadd.f32 %v1965_v18, %v357_v15  ;;  %v1967_v21 = vpop.f32.mrb[6].mxu1 }
 0x218   :  { %v1972_v22 = vmax.f32 %v3006_v17, 0.0  ;;  %v1968_v23 = vpop.f32.mrb[7].mxu1 }
 0x219   :  { %v1973_v24 = vmax.f32 %v3007_v37, 0.0 }
 0x21a   :  { %v2040_v27 = vpack.c.bf16 %v1972_v22, %v1972_v22 }
 0x21b   :  { %v2041_v8 = vpack.c.bf16 %v1973_v24, %v1973_v24 }
 0x21d   :  { %2447 = vmatprep.mubr.bf16.mxu0 %v2041_v8 }
 0x21e   :  { %2448 = vmatmul.mubr.bf16.vlgmr.msra.gmra.mrb[4].mxu0 %v2040_v27 }
 0x2f1   :  { %v2449_v34 = vpop.f32.mrb[4].mxu0 }
 0x2f2   :  { %v3008_v13 = vadd.f32 %v2449_v34, %v2047_v32  ;;  %v2451_v36 = vpop.f32.mrb[5].mxu0 }
 0x2f3   :  { %v3009_v38 = vadd.f32 %v2451_v36, %v2051_v33  ;;  %v2453_v19 = vpop.f32.mrb[6].mxu0 }
 0x2f4   :  { %v2456_v26 = vmax.f32 %v3008_v13, 0.0  ;;  %v2454_v39 = vpop.f32.mrb[7].mxu0 }
 0x2f5   :  { %v2457_v40 = vmax.f32 %v3009_v38, 0.0 }
 0x2f6   :  { %v2490_v35 = vpack.c.bf16 %v2456_v26, %v2456_v26 }
 0x2f7   :  { %v2491_v31 = vpack.c.bf16 %v2457_v40, %v2457_v40 }
 0x2f9   :  { %2627 = vmatprep.mubr.bf16.mxu1 %v2491_v31 }
 0x2fa   :  { %2628 = vmatmul.mubr.bf16.vlgmr.msra.gmra.mrb[8].mxu1 %v2490_v35 }
 0x3cd   :  { %v2996_v20 = vpop.f32.mrb[8].mxu1 }
 0x3ce   :  { %v2997_v41 = vpop.f32.mrb[9].mxu1 }
 0x3cf   :  { %v2998_v43 = vadd.f32 %v2997_v41, %v2996_v20  ;;  %v2999_v14 = vpop.f32.mrb[10].mxu1 }
 0x3d0   :  { %v3000_v25 = vpop.f32.mrb[11].mxu1 }
 0x3d1   :  { %v2630_v42 = vadd.f32 %v2998_v43, %v2963_v11 }
 0x3d3   :  { %v2636_v44 = vadd.f32 %v2635_v3, %v2630_v42 }
 0x3d5   :  { %2638 = vst.msk [vmem:[%s4688_s8] sm:$0x3] %vm2637_vm0, %v2636_v44 }

// kernel: pointnet_densecls_forward.6
= control target key start
LH: loop header
LB: loop body
LE: loop exit
PB: predicated region body
PF: predicated region fallthrough
CT: control target
= control target key end

     0   :  { %s3799_s30 = smov 0   ;;  %s3801_s10 = smov 0   ;;  %s4803_s0 = inlined_call_operand.vmem [shape: f32[2,512,3], index: 0, kind: input, shape index: {}]   ;;  %s4804_s1 = inlined_call_operand.vmem [shape: f32[2,3,3], index: 1, kind: input, shape index: {}]   ;;  %s4805_s2 = inlined_call_operand.vmem [shape: bf16[3,64], index: 2, kind: input, shape index: {}]   ;;  %s4806_s3 = inlined_call_operand.vmem [shape: f32[1,64], index: 3, kind: input, shape index: {}]   ;;  %s4807_s4 = inlined_call_operand.vmem [shape: bf16[64,128], index: 4, kind: input, shape index: {}]   ;;  %s4808_s5 = inlined_call_operand.vmem [shape: f32[1,128], index: 5, kind: input, shape index: {}]   ;;  %s4809_s6 = inlined_call_operand.vmem [shape: bf16[128,1024], index: 6, kind: input, shape index: {}]   ;;  %s4810_s7 = inlined_call_operand.vmem [shape: f32[1,1024], index: 7, kind: input, shape index: {}]   ;;  %s4811_s8 = inlined_call_operand.vmem [shape: bf16[2,512,64], index: 8, kind: output, shape index: {0}]   ;;  %s4812_s9 = inlined_call_operand.vmem [shape: f32[2,1,1024], index: 9, kind: output, shape index: {1}]  }
   0x1   :  { %s3803_s11 = smov 0   ;;  %s3805_s12 = smov 0  }
   0x2   :  { %s3807_s13 = smov 0  }
   0x3 LB: > { %s29_s14 = sadd.s32 1, %s3735_s11  ;;  %s32_s15 = sadd.s32 1, %s3739_s12  ;;  %s3743_s13 = sphi %s3807_s13, %s20_s13   ;;  %s3739_s12 = sphi %s3805_s12, %s4816_s12   ;;  %s3735_s11 = sphi %s3803_s11, %s4815_s11   ;;  %s3731_s10 = sphi %s3801_s10, %s4814_s10   ;;  %s3727_s30 = sphi %s3799_s30, %s4813_s30  }
   0x4   : > { %p30_p0 = scmp.ge.s32.totalorder %s29_s14, 2  ;;  %p3249_p1 = scmp.ge.s32.totalorder %s3743_s13, 1 }
   0x5   : > { %p320_p2 = scmp.lt.s32.totalorder %s3743_s13, 5 }
   0x6   : > { %s4818_s14 = smov (%p30_p0, %s29_s14), 0  ;;  %s4820_s15 = smov (!%p30_p0, %s32_s15), %s3739_s12 }
   0x7   : > { %p321_p3 = pnand %p3249_p1, %p320_p2  ;;  %p34_p4 = scmp.ge.s32.totalorder %s4820_s15, 2 }
   0x8   : > { %s3250_s16 = sshll.u32 (!%p321_p3), %s3727_s30, 5  ;;  %p373_p5 = scmp.lt.s32.totalorder (!%p321_p3), %s3731_s10, 1  ;;  %vm531_vm0 = vcmask (!%p321_p3), 1042432   ;;  %v760_v0 = vld [vmem:[%s4805_s2] sm:$0x3] (!%p321_p3)  ;;  %vm832_vm1 = vcmask (!%p321_p3), 1040384  }
   0x9   : > { %s4822_s15 = smov (%p34_p4, %s4820_s15), 0  ;;  %324 = sbr.rel (%p321_p3) target bundleno = 1194 (0x4aa), region = 52 }
   0xa   : > { %p375_p6 = scmp.lt.s32.totalorder (!%p321_p3), %s3250_s16, 63  ;;  %vm833_vm2 = vcmask (!%p321_p3), 1041408   ;;  %v3745_v1 = vmov (!%p321_p3), 65535   ;;  %vm434_vm3 = vcmask (!%p321_p3), 23552   ;;  %v3701_v38 = vld [vmem:[%s4807_s4] sm:$0xff] (!%p321_p3)   ;;  %v3702_v39 = vld [vmem:[%s4807_s4 + $0x8] sm:$0xff] (!%p321_p3)  }
   0xb   : > { %v834_v2 = vsel (!%p321_p3), %vm832_vm1, 4294967295, %v3745_v1  ;;  %v3703_v40 = vld [vmem:[%s4807_s4 + $0x10] sm:$0xff] (!%p321_p3)   ;;  %vm1160_vm4 = vcmask (!%p321_p3), 519168   ;;  %vm1232_vm5 = vcmask (!%p321_p3), 523264   ;;  %p3425_p7 = scmp.ne.s32.totalorder (!%p321_p3), %s3727_s30, 0 }
   0xc   : > { %v835_v3 = vsel (!%p321_p3), %vm833_vm2, %v834_v2, 0 }
   0xd   : > { %v837_v4 = vand.u32 (!%p321_p3), %v835_v3, %v760_v0 }
  0x10   : > { %s4824_s10 = smov (!%p373_p5, %s3731_s10), 1  ;;  %s4826_s16 = smov (!%p375_p6, %s3250_s16), 63 }
  0x11   : > { %s3251_s19 = sshll.u32 %s4824_s10, 6  ;;  %s3253_s20 = sshll.u32 %s4824_s10, 2 }
  0x12   : > { %s3835_s21 = sadd.s32 %s3251_s19, %s4826_s16  ;;  %s385_s24 = scalar_lea.vmem %s4804_s1, %s3253_s20 }
  0x13   : > { %s3252_s25 = sshll.u32 %s3835_s21, 3  ;;  %v433_v5 = vld [vmem:[%s385_s24] sm:$0x7]  ;;  %s3257_s29 = sshll.u32 %s4824_s10, 3 }
  0x14   : > { %s3844_s28 = scalar_lea.vmem %s4803_s0, %s3252_s25  ;;  %3531 = vmatprep.subr.msk.mxu0 %vm531_vm0, %v433_v5  ;;  %3655 = vmatprep.subr.msk.mxu1 %vm531_vm0, %v433_v5  ;;  %s3856_s18 = scalar_lea.vmem %s4812_s9, %s3257_s29 }
  0x15   : > { %3532 = vmatpush3.msk.msra.mxu0 %vm531_vm0, %v433_v5  ;;  %v401_v6 = vld [vmem:[%s3844_s28] sm:$0xff]  ;;  %v402_v7 = vld [vmem:[%s3844_s28 + $0x8] sm:$0xff]  ;;  %v403_v8 = vld [vmem:[%s3844_s28 + $0x10] sm:$0xff]  ;;  %3656 = vmatpush3.msk.msra.mxu1 %vm531_vm0, %v433_v5  ;;  %s3256_s22 = sshll.u32 %s3835_s21, 2 }
  0x16   : > { %3533 = vmatprep.mubr.msk.f32.mxu0 %vm434_vm3, %v401_v6  ;;  %3581 = vmatprep.subr.bf16.mxu1 %v837_v4  ;;  %v404_v9 = vld [vmem:[%s3844_s28 + $0x18] sm:$0xff]  ;;  %v405_v10 = vld [vmem:[%s3844_s28 + $0x20] sm:$0xff]  ;;  %v418_v12 = vld [vmem:[%s3844_s28 + $0x88] sm:$0xff]  ;;  %s4015_s25 = scalar_lea.vmem %s4811_s8, %s3256_s22 }
  0x17   : > { %3534 = vmatmul.mubr.msk.f32.vlgmr.msra.gmra.mrb[0].mxu0 %vm434_vm3, %v402_v7  ;;  %v417_v11 = vld [vmem:[%s3844_s28 + $0x80] sm:$0xff]  ;;  %v419_v13 = vld [vmem:[%s3844_s28 + $0x90] sm:$0xff]  ;;  %v406_v14 = vld [vmem:[%s3844_s28 + $0x28] sm:$0xff]  ;;  %3615 = vmatprep.subr.bf16.mxu0 %v3701_v38 }
  0x18   : > { %3536 = vmatprep.mubr.msk.f32.mxu0 %vm434_vm3, %v403_v8  ;;  %3557 = vmatprep.mubr.msk.f32.mxu1 %vm434_vm3, %v417_v11  ;;  %v407_v15 = vld [vmem:[%s3844_s28 + $0x30] sm:$0xff]  ;;  %v420_v16 = vld [vmem:[%s3844_s28 + $0x98] sm:$0xff]  ;;  %v421_v17 = vld [vmem:[%s3844_s28 + $0xa0] sm:$0xff] }
  0x19   : > { %3558 = vmatmul.mubr.msk.f32.vlgmr.msra.gmra.mrb[0].mxu1 %vm434_vm3, %v418_v12  ;;  %v408_v18 = vld [vmem:[%s3844_s28 + $0x38] sm:$0xff]  ;;  %v409_v19 = vld [vmem:[%s3844_s28 + $0x40] sm:$0xff]  ;;  %v422_v20 = vld [vmem:[%s3844_s28 + $0xa8] sm:$0xff]  ;;  %3616 = vmatpush3.bf16.msra.mxu0 %v3701_v38 }
  0x1a   : > { %3560 = vmatprep.mubr.msk.f32.mxu1 %vm434_vm3, %v419_v13  ;;  %3582 = vmatpush3.bf16.msra.mxu1 %v837_v4  ;;  %v423_v21 = vld [vmem:[%s3844_s28 + $0xb0] sm:$0xff]  ;;  %v410_v22 = vld [vmem:[%s3844_s28 + $0x48] sm:$0xff]  ;;  %v424_v24 = vld [vmem:[%s3844_s28 + $0xb8] sm:$0xff] }
  0x1b   : > { %3537 = vmatmul.mubr.msk.f32.gmra.mrb[2].mxu0 %vm434_vm3, %v404_v9  ;;  %v411_v23 = vld [vmem:[%s3844_s28 + $0x50] sm:$0xff]  ;;  %v425_v25 = vld [vmem:[%s3844_s28 + $0xc0] sm:$0xff]  ;;  %v412_v26 = vld [vmem:[%s3844_s28 + $0x58] sm:$0xff]  ;;  %3617 = vmatprep.subr.bf16.mxu0 %v3702_v39 }
  0x1c   : > { %3539 = vmatprep.mubr.msk.f32.mxu0 %vm434_vm3, %v405_v10  ;;  %v413_v27 = vld [vmem:[%s3844_s28 + $0x60] sm:$0xff]  ;;  %v426_v28 = vld [vmem:[%s3844_s28 + $0xc8] sm:$0xff]  ;;  %v427_v29 = vld [vmem:[%s3844_s28 + $0xd0] sm:$0xff] }
  0x1d   : > { %3561 = vmatmul.mubr.msk.f32.gmra.mrb[2].mxu1 %vm434_vm3, %v420_v16  ;;  %v414_v30 = vld [vmem:[%s3844_s28 + $0x68] sm:$0xff]  ;;  %v415_v31 = vld [vmem:[%s3844_s28 + $0x70] sm:$0xff]  ;;  %v428_v32 = vld [vmem:[%s3844_s28 + $0xd8] sm:$0xff]  ;;  %3618 = vmatpush3.bf16.msra.mxu0 %v3702_v39 }
  0x1e   : > { %3563 = vmatprep.mubr.msk.f32.mxu1 %vm434_vm3, %v421_v17  ;;  %v429_v33 = vld [vmem:[%s3844_s28 + $0xe0] sm:$0xff]  ;;  %v416_v34 = vld [vmem:[%s3844_s28 + $0x78] sm:$0xff]  ;;  %v430_v35 = vld [vmem:[%s3844_s28 + $0xe8] sm:$0xff]  ;;  %3619 = vmatprep.subr.bf16.mxu0 %v3703_v40 }
  0x1f   : > { %3540 = vmatmul.mubr.msk.f32.gmra.mrb[4].mxu0 %vm434_vm3, %v406_v14  ;;  %v431_v36 = vld [vmem:[%s3844_s28 + $0xf0] sm:$0xff]  ;;  %v432_v37 = vld [vmem:[%s3844_s28 + $0xf8] sm:$0xff]  ;;  %v1494_v38 = vld [vmem:[%s4809_s6 + $0xa0] sm:$0xff] }
  0x20   : > { %3542 = vmatprep.mubr.msk.f32.mxu0 %vm434_vm3, %v407_v15 }
  0x21   : > { %3564 = vmatmul.mubr.msk.f32.gmra.mrb[4].mxu1 %vm434_vm3, %v422_v20  ;;  %3620 = vmatpush3.bf16.msra.mxu0 %v3703_v40 }
  0x22   : > { %3566 = vmatprep.mubr.msk.f32.mxu1 %vm434_vm3, %v423_v21 }
  0x23   : > { %3543 = vmatmul.mubr.msk.f32.gmra.mrb[6].mxu0 %vm434_vm3, %v408_v18 }
  0x24   : > { %3545 = vmatprep.mubr.msk.f32.mxu0 %vm434_vm3, %v409_v19 }
  0x25   : > { %3567 = vmatmul.mubr.msk.f32.gmra.mrb[6].mxu1 %vm434_vm3, %v424_v24 }
  0x26   : > { %3569 = vmatprep.mubr.msk.f32.mxu1 %vm434_vm3, %v425_v25  ;;  %v3704_v25 = vld [vmem:[%s4807_s4 + $0x18] sm:$0xff]  }
  0x27   : > { %3546 = vmatmul.mubr.msk.f32.gmra.mrb[8].mxu0 %vm434_vm3, %v410_v22  ;;  %3621 = vmatprep.subr.bf16.mxu0 %v3704_v25 }
  0x28   : > { %3548 = vmatprep.mubr.msk.f32.mxu0 %vm434_vm3, %v411_v23  ;;  %3622 = vmatpush3.bf16.msra.mxu0 %v3704_v25 }
  0x29   : > { %3570 = vmatmul.mubr.msk.f32.gmra.mrb[8].mxu1 %vm434_vm3, %v426_v28  ;;  %v3956_v28 = vld [vmem:[%s4809_s6 + $0x8] sm:$0xff] }
  0x2a   : > { %3572 = vmatprep.mubr.msk.f32.mxu1 %vm434_vm3, %v427_v29 }
  0x2b   : > { %3549 = vmatmul.mubr.msk.f32.gmra.mrb[10].mxu0 %vm434_vm3, %v412_v26  ;;  %v1474_v26 = vld [vmem:[%s4809_s6] sm:$0xff] }
  0x2c   : > { %3551 = vmatprep.mubr.msk.f32.mxu0 %vm434_vm3, %v413_v27  ;;  %v1478_v27 = vld [vmem:[%s4809_s6 + $0x20] sm:$0xff] }
  0x2d   : > { %3573 = vmatmul.mubr.msk.f32.gmra.mrb[10].mxu1 %vm434_vm3, %v428_v32  ;;  %v3361_v29 = vcombine.low %v1474_v26, %v1478_v27  ;;  %v1482_v32 = vld [vmem:[%s4809_s6 + $0x40] sm:$0xff] }
  0x2e   : > { %3575 = vmatprep.mubr.msk.f32.mxu1 %vm434_vm3, %v429_v33  ;;  %v1486_v33 = vld [vmem:[%s4809_s6 + $0x60] sm:$0xff] }
  0x2f   : > { %3552 = vmatmul.mubr.msk.f32.gmra.mrb[12].mxu0 %vm434_vm3, %v414_v30  ;;  %v3362_v30 = vcombine.high %v1474_v26, %v1478_v27  ;;  %v3369_v39 = vcombine.low %v1482_v32, %v1486_v33 }
  0x30   : > { %3554 = vmatprep.mubr.msk.f32.mxu0 %vm434_vm3, %v415_v31  ;;  %v3961_v31 = vld [vmem:[%s4809_s6 + $0x28] sm:$0xff] }
  0x31   : > { %3576 = vmatmul.mubr.msk.f32.gmra.mrb[12].mxu1 %vm434_vm3, %v430_v35  ;;  %v3364_v35 = vcombine.high %v3956_v28, %v3961_v31  ;;  %1916 = vmatprep.subr.bf16.mxu1 %v3362_v30 }
  0x32   : > { %3578 = vmatprep.mubr.msk.f32.mxu1 %vm434_vm3, %v431_v36  ;;  %v3370_v36 = vcombine.high %v1482_v32, %v1486_v33 }
  0x33   : > { %3555 = vmatmul.mubr.msk.f32.gmra.mrb[14].mxu0 %vm434_vm3, %v416_v34  ;;  %v3363_v34 = vcombine.low %v3956_v28, %v3961_v31  ;;  %2109 = vmatprep.subr.bf16.mxu0 %v3364_v35 }
  0x35   : > { %3579 = vmatmul.mubr.msk.f32.gmra.mrb[14].mxu1 %vm434_vm3, %v432_v37  ;;  %v1490_v37 = vld [vmem:[%s4809_s6 + $0x80] sm:$0xff] }
  0x36   : > { %v3378_v40 = vcombine.high %v1490_v37, %v1494_v38 }
  0xea   : > { %v3535_v41 = vpop.f32.mrb[0].mxu0 }
  0xeb   : > { %v601_v42 = vpop.f32.mrb[1].mxu0 }
  0xec   : > { %v761_v43 = vpack.c.bf16 %v3535_v41, %v601_v42  ;;  %v3559_v46 = vpop.f32.mrb[0].mxu1  ;;  %v1498_v41 = vld [vmem:[%s4809_s6 + $0xc0] sm:$0xff] }
  0xed   : > { %v681_v48 = vpop.f32.mrb[1].mxu1  ;;  %v1502_v42 = vld [vmem:[%s4809_s6 + $0xe0] sm:$0xff] }
  0xee   : > { %v3538_v44 = vpop.f32.mrb[2].mxu0  ;;  %3583 = vmatprep.mubr.msk.bf16.mxu1 %vm434_vm3, %v761_v43  ;;  %v769_v49 = vpack.c.bf16 %v3559_v46, %v681_v48  ;;  %v3377_v43 = vcombine.low %v1490_v37, %v1494_v38  ;;  %v1510_v46 = vld [vmem:[%s4809_s6 + $0x120] sm:$0xff]  ;;  %v1499_v37 = vld [vmem:[%s4809_s6 + $0xc8] sm:$0xff] }
  0xef   : > { %v611_v45 = vpop.f32.mrb[3].mxu0  ;;  %v1503_v38 = vld [vmem:[%s4809_s6 + $0xe8] sm:$0xff] }
  0xf0   : > { %v762_v47 = vpack.c.bf16 %v3538_v44, %v611_v45  ;;  %v3562_v52 = vpop.f32.mrb[2].mxu1  ;;  %v3386_v44 = vcombine.high %v1498_v41, %v1502_v42  ;;  %v1506_v45 = vld [vmem:[%s4809_s6 + $0x100] sm:$0xff] }
  0xf1   : > { %v691_v54 = vpop.f32.mrb[3].mxu1  ;;  %v3394_v48 = vcombine.high %v1506_v45, %v1510_v46 }
  0xf2   : > { %3584 = vmatmul.mubr.msk.bf16.vlgmr.msra.gmra.mrb[16].mxu1 %vm434_vm3, %v762_v47  ;;  %v3541_v50 = vpop.f32.mrb[4].mxu0  ;;  %v770_v55 = vpack.c.bf16 %v3562_v52, %v691_v54  ;;  %v3385_v47 = vcombine.low %v1498_v41, %v1502_v42  ;;  %v1526_v54 = vld [vmem:[%s4809_s6 + $0x1a0] sm:$0xff] }
  0xf3   : > { %v621_v51 = vpop.f32.mrb[5].mxu0  ;;  %1917 = vmatpush1.bf16.msra.mxu1 %v3361_v29 }
  0xf4   : > { %v763_v53 = vpack.c.bf16 %v3541_v50, %v621_v51  ;;  %v3565_v58 = vpop.f32.mrb[4].mxu1  ;;  %1918 = vmatprep.subr.bf16.mxu1 %v3370_v36  ;;  %v1518_v50 = vld [vmem:[%s4809_s6 + $0x160] sm:$0xff]  ;;  %v3393_v51 = vcombine.low %v1506_v45, %v1510_v46 }
  0xf5   : > { %v701_v60 = vpop.f32.mrb[5].mxu1 }
  0xf6   : > { %v3544_v56 = vpop.f32.mrb[6].mxu0  ;;  %3587 = vmatprep.mubr.msk.bf16.mxu1 %vm434_vm3, %v763_v53  ;;  %v771_v61 = vpack.c.bf16 %v3565_v58, %v701_v60  ;;  %v1522_v53 = vld [vmem:[%s4809_s6 + $0x180] sm:$0xff] }
  0xf7   : > { %v631_v57 = vpop.f32.mrb[7].mxu0  ;;  %1919 = vmatpush1.bf16.msra.mxu1 %v3369_v39  ;;  %v4006_v58 = vld [vmem:[%s4806_s3] ss:$0 sm:$0xff] }
  0xf8   : > { %v764_v59 = vpack.c.bf16 %v3544_v56, %v631_v57  ;;  %v3568_v0 = vpop.f32.mrb[6].mxu1  ;;  %1920 = vmatprep.subr.bf16.mxu1 %v3378_v40  ;;  %v3410_v56 = vcombine.high %v1522_v53, %v1526_v54  ;;  %v3409_v57 = vcombine.low %v1522_v53, %v1526_v54  ;;  %v3387_v54 = vcombine.low %v1499_v37, %v1503_v38 }
  0xf9   : > { %v711_v2 = vpop.f32.mrb[7].mxu1 }
  0xfa   : > { %3588 = vmatmul.mubr.msk.bf16.gmra.mrb[20].mxu1 %vm434_vm3, %v764_v59  ;;  %v3547_v62 = vpop.f32.mrb[8].mxu0  ;;  %v772_v3 = vpack.c.bf16 %v3568_v0, %v711_v2 }
  0xfb   : > { %v641_v63 = vpop.f32.mrb[9].mxu0  ;;  %1921 = vmatpush1.bf16.msra.mxu1 %v3377_v43 }
  0xfc   : > { %v765_v1 = vpack.c.bf16 %v3547_v62, %v641_v63  ;;  %v3571_v6 = vpop.f32.mrb[8].mxu1  ;;  %1922 = vmatprep.subr.bf16.mxu1 %v3386_v44  ;;  %v3388_v44 = vcombine.high %v1499_v37, %v1503_v38 }
  0xfd   : > { %v721_v8 = vpop.f32.mrb[9].mxu1 }
  0xfe   : > { %v3550_v4 = vpop.f32.mrb[10].mxu0  ;;  %3591 = vmatprep.mubr.msk.bf16.mxu1 %vm434_vm3, %v765_v1  ;;  %v773_v9 = vpack.c.bf16 %v3571_v6, %v721_v8 }
  0xff   : > { %v651_v5 = vpop.f32.mrb[11].mxu0  ;;  %1923 = vmatpush1.bf16.msra.mxu1 %v3385_v47  ;;  %v1507_v47 = vld [vmem:[%s4809_s6 + $0x108] sm:$0xff] }
 0x100   : > { %v766_v7 = vpack.c.bf16 %v3550_v4, %v651_v5  ;;  %v3574_v12 = vpop.f32.mrb[10].mxu1  ;;  %1924 = vmatprep.subr.bf16.mxu1 %v3394_v48  ;;  %v1511_v48 = vld [vmem:[%s4809_s6 + $0x128] sm:$0xff] }
 0x101   : > { %v731_v14 = vpop.f32.mrb[11].mxu1 }
 0x102   : > { %3592 = vmatmul.mubr.msk.bf16.gmra.mrb[24].mxu1 %vm434_vm3, %v766_v7  ;;  %v3553_v10 = vpop.f32.mrb[12].mxu0  ;;  %v774_v15 = vpack.c.bf16 %v3574_v12, %v731_v14 }
 0x103   : > { %v661_v11 = vpop.f32.mrb[13].mxu0  ;;  %1925 = vmatpush1.bf16.msra.mxu1 %v3393_v51 }
 0x104   : > { %v767_v13 = vpack.c.bf16 %v3553_v10, %v661_v11  ;;  %v3577_v18 = vpop.f32.mrb[12].mxu1  ;;  %v1487_v10 = vld [vmem:[%s4809_s6 + $0x68] sm:$0xff] }
 0x105   : > { %v741_v20 = vpop.f32.mrb[13].mxu1 }
 0x106   : > { %v3556_v16 = vpop.f32.mrb[14].mxu0  ;;  %3595 = vmatprep.mubr.msk.bf16.mxu1 %vm434_vm3, %v767_v13  ;;  %v775_v21 = vpack.c.bf16 %v3577_v18, %v741_v20 }
 0x107   : > { %v671_v17 = vpop.f32.mrb[15].mxu0 }
 0x108   : > { %v768_v19 = vpack.c.bf16 %v3556_v16, %v671_v17  ;;  %v3580_v22 = vpop.f32.mrb[14].mxu1 }
 0x109   : > { %v751_v23 = vpop.f32.mrb[15].mxu1 }
 0x10a   : > { %3596 = vmatmul.mubr.msk.bf16.gmra.mrb[28].mxu1 %vm434_vm3, %v768_v19  ;;  %v776_v24 = vpack.c.bf16 %v3580_v22, %v751_v23  ;;  %v1495_v22 = vld [vmem:[%s4809_s6 + $0xa8] sm:$0xff] }
 0x10b   : > { %3599 = vmatprep.mubr.msk.bf16.mxu1 %vm434_vm3, %v769_v49  ;;  %v1514_v49 = vld [vmem:[%s4809_s6 + $0x140] sm:$0xff] }
 0x10c   : > { %v3402_v52 = vcombine.high %v1514_v49, %v1518_v50 }
 0x10e   : > { %1926 = vmatprep.subr.bf16.mxu1 %v3402_v52 }
 0x112   : > { %3600 = vmatmul.mubr.msk.bf16.gmra.mrb[32].mxu1 %vm434_vm3, %v770_v55  ;;  %v3401_v55 = vcombine.low %v1514_v49, %v1518_v50 }
 0x113   : > { %3603 = vmatprep.mubr.msk.bf16.mxu1 %vm434_vm3, %v771_v61 }
 0x114   : > { %1927 = vmatpush1.bf16.msra.mxu1 %v3401_v55 }
 0x115   : > { %1928 = vmatprep.subr.bf16.mxu1 %v3410_v56 }
 0x118   : > { %1929 = vmatpush1.bf16.msra.mxu1 %v3409_v57  ;;  %v3396_v57 = vcombine.high %v1507_v47, %v1511_v48 }
 0x11a   : > { %3604 = vmatmul.mubr.msk.bf16.gmra.mrb[36].mxu1 %vm434_vm3, %v772_v3 }
 0x11b   : > { %3607 = vmatprep.mubr.msk.bf16.mxu1 %vm434_vm3, %v773_v9  ;;  %v1483_v9 = vld [vmem:[%s4809_s6 + $0x48] sm:$0xff] }
 0x11c   : > { %v3372_v18 = vcombine.high %v1483_v9, %v1487_v10  ;;  %v3371_v29 = vcombine.low %v1483_v9, %v1487_v10  ;;  %v1523_v10 = vld [vmem:[%s4809_s6 + $0x188] sm:$0xff] }
 0x122   : > { %3608 = vmatmul.mubr.msk.bf16.gmra.mrb[40].mxu1 %vm434_vm3, %v774_v15 }
 0x123   : > { %3611 = vmatprep.mubr.msk.bf16.mxu1 %vm434_vm3, %v775_v21  ;;  %v1491_v21 = vld [vmem:[%s4809_s6 + $0x88] sm:$0xff] }
 0x124   : > { %v3380_v33 = vcombine.high %v1491_v21, %v1495_v22  ;;  %v3379_v41 = vcombine.low %v1491_v21, %v1495_v22 }
 0x12a   : > { %3612 = vmatmul.mubr.msk.bf16.gmra.mrb[44].mxu1 %vm434_vm3, %v776_v24 }
 0x1c5   : > { %v3585_v59 = vpop.f32.mrb[16].mxu1 }
 0x1c6   : > { %v882_v60 = vadd.f32 %v3585_v59, %v4006_v58  ;;  %v873_v61 = vpop.f32.mrb[17].mxu1 }
 0x1c7   : > { %v874_v62 = vadd.f32 %v4006_v58, %v873_v61  ;;  %v3586_v63 = vpop.f32.mrb[18].mxu1  ;;  %v1515_v61 = vld [vmem:[%s4809_s6 + $0x148] sm:$0xff] }
 0x1c8   : > { %v1002_v0 = vmax.f32 %v882_v60, 0.0  ;;  %v885_v1 = vadd.f32 %v3586_v63, %v4006_v58  ;;  %v876_v2 = vpop.f32.mrb[19].mxu1 }
 0x1c9   : > { %v1000_v3 = vmax.f32 %v874_v62, 0.0  ;;  %v877_v4 = vadd.f32 %v4006_v58, %v876_v2  ;;  %v1519_v62 = vld [vmem:[%s4809_s6 + $0x168] sm:$0xff] }
 0x1ca   : > { %v3431_v5 = vpack.c.bf16 %v1002_v0, %v1002_v0  ;;  %v1003_v6 = vmax.f32 %v885_v1, 0.0 }
 0x1cb   : > { %v3429_v7 = vpack.c.bf16 %v1000_v3, %v1000_v3  ;;  %v1001_v8 = vmax.f32 %v877_v4, 0.0  ;;  %v3395_v4 = vcombine.low %v1507_v47, %v1511_v48 }
 0x1cc   : > { %1163 = vst.msk [vmem:[%s4015_s25 + $0x8] sm:$0xf] %vm1160_vm4, %v3431_v5  ;;  %v1033_v11 = vpack.c.bf16 %v1003_v6, %v1002_v0  ;;  %v3432_v12 = vpack.c.bf16 %v1003_v6, %v1003_v6 }
 0x1cd   : > { %1161 = vst.msk [vmem:[%s4015_s25] sm:$0xf] %vm1160_vm4, %v3429_v7  ;;  %v1032_v13 = vpack.c.bf16 %v1001_v8, %v1000_v3  ;;  %v3430_v14 = vpack.c.bf16 %v1001_v8, %v1001_v8  ;;  %v3589_v15 = vpop.f32.mrb[20].mxu1  ;;  %v3404_v7 = vcombine.high %v1515_v61, %v1519_v62 }
 0x1ce   : > { %1164 = vst.msk [vmem:[%s4015_s25 + $0xc] sm:$0xf] %vm1160_vm4, %v3432_v12  ;;  %v898_v16 = vadd.f32 %v3589_v15, %v4006_v58  ;;  %v889_v17 = vpop.f32.mrb[21].mxu1 }
 0x1cf   : > { %1162 = vst.msk [vmem:[%s4015_s25 + $0x4] sm:$0xf] %vm1160_vm4, %v3430_v14  ;;  %v890_v19 = vadd.f32 %v4006_v58, %v889_v17  ;;  %v3590_v20 = vpop.f32.mrb[22].mxu1  ;;  %3623 = vmatprep.mubr.msk.bf16.mxu0 %vm1232_vm5, %v1032_v13  ;;  %v3403_v17 = vcombine.low %v1515_v61, %v1519_v62 }
 0x1d0   : > { %v1006_v23 = vmax.f32 %v898_v16, 0.0  ;;  %v901_v24 = vadd.f32 %v3590_v20, %v4006_v58  ;;  %v892_v25 = vpop.f32.mrb[23].mxu1  ;;  %3624 = vmatmul.mubr.msk.bf16.vlgmr.msra.gmra.mrb[16].mxu0 %vm1232_vm5, %v1033_v11  ;;  %v1527_v11 = vld [vmem:[%s4809_s6 + $0x1a8] sm:$0xff] }
 0x1d1   : > { %v1004_v26 = vmax.f32 %v890_v19, 0.0  ;;  %v893_v27 = vadd.f32 %v4006_v58, %v892_v25  ;;  %2110 = vmatpush1.bf16.msra.mxu0 %v3363_v34  ;;  %v3412_v20 = vcombine.high %v1523_v10, %v1527_v11 }
 0x1d2   : > { %v3435_v30 = vpack.c.bf16 %v1006_v23, %v1006_v23  ;;  %v1007_v32 = vmax.f32 %v901_v24, 0.0  ;;  %2111 = vmatprep.subr.bf16.mxu0 %v3372_v18 }
 0x1d3   : > { %v3433_v35 = vpack.c.bf16 %v1004_v26, %v1004_v26  ;;  %v1005_v36 = vmax.f32 %v893_v27, 0.0 }
 0x1d4   : > { %1167 = vst.msk [vmem:[%s4015_s25 + $0x18] sm:$0xf] %vm1160_vm4, %v3435_v30  ;;  %v1035_v28 = vpack.c.bf16 %v1007_v32, %v1006_v23  ;;  %v3436_v31 = vpack.c.bf16 %v1007_v32, %v1007_v32 }
 0x1d5   : > { %1165 = vst.msk [vmem:[%s4015_s25 + $0x10] sm:$0xf] %vm1160_vm4, %v3433_v35  ;;  %v1034_v34 = vpack.c.bf16 %v1005_v36, %v1004_v26  ;;  %v3434_v39 = vpack.c.bf16 %v1005_v36, %v1005_v36  ;;  %v3593_v40 = vpop.f32.mrb[24].mxu1  ;;  %2112 = vmatpush1.bf16.msra.mxu0 %v3371_v29  ;;  %v3411_v29 = vcombine.low %v1523_v10, %v1527_v11 }
 0x1d6   : > { %1168 = vst.msk [vmem:[%s4015_s25 + $0x1c] sm:$0xf] %vm1160_vm4, %v3436_v31  ;;  %v914_v42 = vadd.f32 %v3593_v40, %v4006_v58  ;;  %v905_v43 = vpop.f32.mrb[25].mxu1  ;;  %2113 = vmatprep.subr.bf16.mxu0 %v3380_v33 }
 0x1d7   : > { %1166 = vst.msk [vmem:[%s4015_s25 + $0x14] sm:$0xf] %vm1160_vm4, %v3434_v39  ;;  %3627 = vmatprep.mubr.msk.bf16.mxu0 %vm1232_vm5, %v1034_v34  ;;  %v906_v45 = vadd.f32 %v4006_v58, %v905_v43  ;;  %v3594_v46 = vpop.f32.mrb[26].mxu1 }
 0x1d8   : > { %3628 = vmatmul.mubr.msk.bf16.gmra.mrb[20].mxu0 %vm1232_vm5, %v1035_v28  ;;  %v1010_v49 = vmax.f32 %v914_v42, 0.0  ;;  %v917_v50 = vadd.f32 %v3594_v46, %v4006_v58  ;;  %v908_v51 = vpop.f32.mrb[27].mxu1 }
 0x1d9   : > { %v1008_v52 = vmax.f32 %v906_v45, 0.0  ;;  %v909_v53 = vadd.f32 %v4006_v58, %v908_v51  ;;  %2114 = vmatpush1.bf16.msra.mxu0 %v3379_v41 }
 0x1da   : > { %v3439_v55 = vpack.c.bf16 %v1010_v49, %v1010_v49  ;;  %v1011_v56 = vmax.f32 %v917_v50, 0.0  ;;  %2115 = vmatprep.subr.bf16.mxu0 %v3388_v44 }
 0x1db   : > { %v3437_v59 = vpack.c.bf16 %v1008_v52, %v1008_v52  ;;  %v1009_v60 = vmax.f32 %v909_v53, 0.0 }
 0x1dc   : > { %1171 = vst.msk [vmem:[%s4015_s25 + $0x28] sm:$0xf] %vm1160_vm4, %v3439_v55  ;;  %v1037_v63 = vpack.c.bf16 %v1011_v56, %v1010_v49  ;;  %v3440_v0 = vpack.c.bf16 %v1011_v56, %v1011_v56 }
 0x1dd   : > { %1169 = vst.msk [vmem:[%s4015_s25 + $0x20] sm:$0xf] %vm1160_vm4, %v3437_v59  ;;  %v1036_v1 = vpack.c.bf16 %v1009_v60, %v1008_v52  ;;  %v3438_v2 = vpack.c.bf16 %v1009_v60, %v1009_v60  ;;  %v3597_v3 = vpop.f32.mrb[28].mxu1  ;;  %2116 = vmatpush1.bf16.msra.mxu0 %v3387_v54 }
 0x1de   : > { %1172 = vst.msk [vmem:[%s4015_s25 + $0x2c] sm:$0xf] %vm1160_vm4, %v3440_v0  ;;  %v930_v5 = vadd.f32 %v3597_v3, %v4006_v58  ;;  %v921_v6 = vpop.f32.mrb[29].mxu1  ;;  %2117 = vmatprep.subr.bf16.mxu0 %v3396_v57 }
 0x1df   : > { %1170 = vst.msk [vmem:[%s4015_s25 + $0x24] sm:$0xf] %vm1160_vm4, %v3438_v2  ;;  %3631 = vmatprep.mubr.msk.bf16.mxu0 %vm1232_vm5, %v1036_v1  ;;  %v922_v8 = vadd.f32 %v4006_v58, %v921_v6  ;;  %v3598_v9 = vpop.f32.mrb[30].mxu1 }
 0x1e0   : > { %3632 = vmatmul.mubr.msk.bf16.gmra.mrb[24].mxu0 %vm1232_vm5, %v1037_v63  ;;  %v1014_v12 = vmax.f32 %v930_v5, 0.0  ;;  %v933_v13 = vadd.f32 %v3598_v9, %v4006_v58  ;;  %v924_v14 = vpop.f32.mrb[31].mxu1 }
 0x1e1   : > { %v1012_v15 = vmax.f32 %v922_v8, 0.0  ;;  %v925_v16 = vadd.f32 %v4006_v58, %v924_v14  ;;  %2118 = vmatpush1.bf16.msra.mxu0 %v3395_v4 }
 0x1e2   : > { %v3443_v18 = vpack.c.bf16 %v1014_v12, %v1014_v12  ;;  %v1015_v19 = vmax.f32 %v933_v13, 0.0  ;;  %2119 = vmatprep.subr.bf16.mxu0 %v3404_v7 }
 0x1e3   : > { %v3441_v21 = vpack.c.bf16 %v1012_v15, %v1012_v15  ;;  %v1013_v22 = vmax.f32 %v925_v16, 0.0 }
 0x1e4   : > { %1175 = vst.msk [vmem:[%s4015_s25 + $0x38] sm:$0xf] %vm1160_vm4, %v3443_v18  ;;  %v1039_v23 = vpack.c.bf16 %v1015_v19, %v1014_v12  ;;  %v3444_v24 = vpack.c.bf16 %v1015_v19, %v1015_v19 }
 0x1e5   : > { %1173 = vst.msk [vmem:[%s4015_s25 + $0x30] sm:$0xf] %vm1160_vm4, %v3441_v21  ;;  %v1038_v25 = vpack.c.bf16 %v1013_v22, %v1012_v15  ;;  %v3442_v26 = vpack.c.bf16 %v1013_v22, %v1013_v22  ;;  %v3601_v27 = vpop.f32.mrb[32].mxu1  ;;  %2120 = vmatpush1.bf16.msra.mxu0 %v3403_v17 }
 0x1e6   : > { %1176 = vst.msk [vmem:[%s4015_s25 + $0x3c] sm:$0xf] %vm1160_vm4, %v3444_v24  ;;  %v946_v30 = vadd.f32 %v3601_v27, %v4006_v58  ;;  %v937_v32 = vpop.f32.mrb[33].mxu1  ;;  %2121 = vmatprep.subr.bf16.mxu0 %v3412_v20 }
 0x1e7   : > { %1174 = vst.msk [vmem:[%s4015_s25 + $0x34] sm:$0xf] %vm1160_vm4, %v3442_v26  ;;  %3635 = vmatprep.mubr.msk.bf16.mxu0 %vm1232_vm5, %v1038_v25  ;;  %v938_v33 = vadd.f32 %v4006_v58, %v937_v32  ;;  %v3602_v35 = vpop.f32.mrb[34].mxu1 }
 0x1e8   : > { %3636 = vmatmul.mubr.msk.bf16.gmra.mrb[28].mxu0 %vm1232_vm5, %v1039_v23  ;;  %v1018_v36 = vmax.f32 %v946_v30, 0.0  ;;  %v949_v37 = vadd.f32 %v3602_v35, %v4006_v58  ;;  %v940_v38 = vpop.f32.mrb[35].mxu1 }
 0x1e9   : > { %v1016_v28 = vmax.f32 %v938_v33, 0.0  ;;  %v941_v31 = vadd.f32 %v4006_v58, %v940_v38  ;;  %2122 = vmatpush1.bf16.msra.mxu0 %v3411_v29 }
 0x1ea   : > { %v3447_v34 = vpack.c.bf16 %v1018_v36, %v1018_v36  ;;  %v1019_v39 = vmax.f32 %v949_v37, 0.0 }
 0x1eb   : > { %v3445_v40 = vpack.c.bf16 %v1016_v28, %v1016_v28  ;;  %v1017_v41 = vmax.f32 %v941_v31, 0.0  ;;  %v1534_v31 = vld [vmem:[%s4809_s6 + $0x1e0] sm:$0xff] }
 0x1ec   : > { %1179 = vst.msk [vmem:[%s4015_s25 + $0x48] sm:$0xf] %vm1160_vm4, %v3447_v34  ;;  %v1041_v42 = vpack.c.bf16 %v1019_v39, %v1018_v36  ;;  %v3448_v43 = vpack.c.bf16 %v1019_v39, %v1019_v39  ;;  %v1531_v34 = vld [vmem:[%s4809_s6 + $0x1c8] sm:$0xff] }
 0x1ed   : > { %1177 = vst.msk [vmem:[%s4015_s25 + $0x40] sm:$0xf] %vm1160_vm4, %v3445_v40  ;;  %v1040_v44 = vpack.c.bf16 %v1017_v41, %v1016_v28  ;;  %v3446_v45 = vpack.c.bf16 %v1017_v41, %v1017_v41  ;;  %v3605_v46 = vpop.f32.mrb[36].mxu1  ;;  %v1535_v41 = vld [vmem:[%s4809_s6 + $0x1e8] sm:$0xff] }
 0x1ee   : > { %1180 = vst.msk [vmem:[%s4015_s25 + $0x4c] sm:$0xf] %vm1160_vm4, %v3448_v43  ;;  %v962_v47 = vadd.f32 %v3605_v46, %v4006_v58  ;;  %v953_v48 = vpop.f32.mrb[37].mxu1  ;;  %v3420_v43 = vcombine.high %v1531_v34, %v1535_v41  ;;  %v1480_v46 = vld [vmem:[%s4809_s6 + $0x30] sm:$0xff] }
 0x1ef   : > { %1178 = vst.msk [vmem:[%s4015_s25 + $0x44] sm:$0xf] %vm1160_vm4, %v3446_v45  ;;  %3639 = vmatprep.mubr.msk.bf16.mxu0 %vm1232_vm5, %v1040_v44  ;;  %v954_v49 = vadd.f32 %v4006_v58, %v953_v48  ;;  %v3606_v50 = vpop.f32.mrb[38].mxu1  ;;  %v3746_v44 = vmov 0   ;;  %v1476_v45 = vld [vmem:[%s4809_s6 + $0x10] sm:$0xff] }
 0x1f0   : > { %3640 = vmatmul.mubr.msk.bf16.gmra.mrb[32].mxu0 %vm1232_vm5, %v1041_v42  ;;  %v1022_v51 = vmax.f32 %v962_v47, 0.0  ;;  %v965_v52 = vadd.f32 %v3606_v50, %v4006_v58  ;;  %v956_v53 = vpop.f32.mrb[39].mxu1  ;;  %v3419_v42 = vcombine.low %v1531_v34, %v1535_v41  ;;  %2123 = vmatprep.subr.bf16.mxu0 %v3420_v43  ;;  %v1477_v47 = vld [vmem:[%s4809_s6 + $0x18] sm:$0xff]  ;;  %v3365_v48 = vcombine.low %v1476_v45, %v1480_v46  ;;  %v1508_v43 = vld [vmem:[%s4809_s6 + $0x110] sm:$0xff] }
 0x1f1   : > { %v1020_v54 = vmax.f32 %v954_v49, 0.0  ;;  %v957_v55 = vadd.f32 %v4006_v58, %v956_v53  ;;  %1948 = vmatprep.mubr.bf16.mxu1 %v3746_v44  ;;  %v3366_v49 = vcombine.high %v1476_v45, %v1480_v46  ;;  %v1481_v50 = vld [vmem:[%s4809_s6 + $0x38] sm:$0xff]  ;;  %v4194_v53 = vld [vmem:[%s4808_s5] ss:$0 sm:$0xff] }
 0x1f2   : > { %v3451_v56 = vpack.c.bf16 %v1022_v51, %v1022_v51  ;;  %v1023_v57 = vmax.f32 %v965_v52, 0.0  ;;  %2124 = vmatpush1.bf16.msra.mxu0 %v3419_v42  ;;  %v3368_v52 = vcombine.high %v1477_v47, %v1481_v50 }
 0x1f3   : > { %v3449_v59 = vpack.c.bf16 %v1020_v54, %v1020_v54  ;;  %v1021_v60 = vmax.f32 %v957_v55, 0.0 }
 0x1f4   : > { %1183 = vst.msk [vmem:[%s4015_s25 + $0x58] sm:$0xf] %vm1160_vm4, %v3451_v56  ;;  %v1043_v61 = vpack.c.bf16 %v1023_v57, %v1022_v51  ;;  %v3452_v62 = vpack.c.bf16 %v1023_v57, %v1023_v57  ;;  %v3367_v51 = vcombine.low %v1477_v47, %v1481_v50  ;;  %2495 = vmatprep.subr.bf16.mxu0 %v3368_v52  ;;  %v1512_v47 = vld [vmem:[%s4809_s6 + $0x130] sm:$0xff] }
 0x1f5   : > { %1181 = vst.msk [vmem:[%s4015_s25 + $0x50] sm:$0xf] %vm1160_vm4, %v3449_v59  ;;  %v1042_v63 = vpack.c.bf16 %v1021_v60, %v1020_v54  ;;  %v3450_v0 = vpack.c.bf16 %v1021_v60, %v1021_v60  ;;  %v3609_v1 = vpop.f32.mrb[40].mxu1 }
 0x1f6   : > { %1184 = vst.msk [vmem:[%s4015_s25 + $0x5c] sm:$0xf] %vm1160_vm4, %v3452_v62  ;;  %v978_v2 = vadd.f32 %v3609_v1, %v4006_v58  ;;  %v969_v3 = vpop.f32.mrb[41].mxu1  ;;  %v1484_v1 = vld [vmem:[%s4809_s6 + $0x50] sm:$0xff] }
 0x1f7   : > { %1182 = vst.msk [vmem:[%s4015_s25 + $0x54] sm:$0xf] %vm1160_vm4, %v3450_v0  ;;  %3643 = vmatprep.mubr.msk.bf16.mxu0 %vm1232_vm5, %v1042_v63  ;;  %v970_v4 = vadd.f32 %v4006_v58, %v969_v3  ;;  %v3610_v5 = vpop.f32.mrb[42].mxu1 }
 0x1f8   : > { %3644 = vmatmul.mubr.msk.bf16.gmra.mrb[36].mxu0 %vm1232_vm5, %v1043_v61  ;;  %v1026_v6 = vmax.f32 %v978_v2, 0.0  ;;  %v981_v7 = vadd.f32 %v3610_v5, %v4006_v58  ;;  %v972_v8 = vpop.f32.mrb[43].mxu1  ;;  %v1485_v5 = vld [vmem:[%s4809_s6 + $0x58] sm:$0xff] }
 0x1f9   : > { %v1024_v9 = vmax.f32 %v970_v4, 0.0  ;;  %v973_v10 = vadd.f32 %v4006_v58, %v972_v8  ;;  %v1488_v4 = vld [vmem:[%s4809_s6 + $0x70] sm:$0xff] }
 0x1fa   : > { %v3455_v11 = vpack.c.bf16 %v1026_v6, %v1026_v6  ;;  %v1027_v12 = vmax.f32 %v981_v7, 0.0 }
 0x1fb   : > { %v3453_v13 = vpack.c.bf16 %v1024_v9, %v1024_v9  ;;  %v1025_v14 = vmax.f32 %v973_v10, 0.0  ;;  %v1492_v10 = vld [vmem:[%s4809_s6 + $0x90] sm:$0xff] }
 0x1fc   : > { %1187 = vst.msk [vmem:[%s4015_s25 + $0x68] sm:$0xf] %vm1160_vm4, %v3455_v11  ;;  %v1045_v15 = vpack.c.bf16 %v1027_v12, %v1026_v6  ;;  %v3456_v16 = vpack.c.bf16 %v1027_v12, %v1027_v12  ;;  %v1489_v6 = vld [vmem:[%s4809_s6 + $0x78] sm:$0xff] }
 0x1fd   : > { %1185 = vst.msk [vmem:[%s4015_s25 + $0x60] sm:$0xf] %vm1160_vm4, %v3453_v13  ;;  %v1044_v17 = vpack.c.bf16 %v1025_v14, %v1024_v9  ;;  %v3454_v18 = vpack.c.bf16 %v1025_v14, %v1025_v14  ;;  %v3613_v19 = vpop.f32.mrb[44].mxu1  ;;  %v3374_v13 = vcombine.high %v1484_v1, %v1488_v4  ;;  %v3376_v14 = vcombine.high %v1485_v5, %v1489_v6 }
 0x1fe   : > { %1188 = vst.msk [vmem:[%s4015_s25 + $0x6c] sm:$0xf] %vm1160_vm4, %v3456_v16  ;;  %v994_v20 = vadd.f32 %v3613_v19, %v4006_v58  ;;  %v985_v21 = vpop.f32.mrb[45].mxu1  ;;  %v1493_v16 = vld [vmem:[%s4809_s6 + $0x98] sm:$0xff] }
 0x1ff   : > { %1186 = vst.msk [vmem:[%s4015_s25 + $0x64] sm:$0xf] %vm1160_vm4, %v3454_v18  ;;  %3647 = vmatprep.mubr.msk.bf16.mxu0 %vm1232_vm5, %v1044_v17  ;;  %v986_v22 = vadd.f32 %v4006_v58, %v985_v21  ;;  %v3614_v23 = vpop.f32.mrb[46].mxu1  ;;  %v1497_v17 = vld [vmem:[%s4809_s6 + $0xb8] sm:$0xff] }
 0x200   : > { %3648 = vmatmul.mubr.msk.bf16.gmra.mrb[40].mxu0 %vm1232_vm5, %v1045_v15  ;;  %v1030_v24 = vmax.f32 %v994_v20, 0.0  ;;  %v997_v25 = vadd.f32 %v3614_v23, %v4006_v58  ;;  %v988_v26 = vpop.f32.mrb[47].mxu1  ;;  %v1496_v15 = vld [vmem:[%s4809_s6 + $0xb0] sm:$0xff]  ;;  %v3373_v23 = vcombine.low %v1484_v1, %v1488_v4  ;;  %v3383_v34 = vcombine.low %v1493_v16, %v1497_v17  ;;  %v1517_v1 = vld [vmem:[%s4809_s6 + $0x158] sm:$0xff] }
 0x201   : > { %v1028_v27 = vmax.f32 %v986_v22, 0.0  ;;  %v989_v29 = vadd.f32 %v4006_v58, %v988_v26  ;;  %v1530_v58 = vld [vmem:[%s4809_s6 + $0x1c0] sm:$0xff] }
 0x202   : > { %v3459_v30 = vpack.c.bf16 %v1030_v24, %v1030_v24  ;;  %v1031_v32 = vmax.f32 %v997_v25, 0.0  ;;  %v3417_v39 = vcombine.low %v1530_v58, %v1534_v31  ;;  %v3418_v40 = vcombine.high %v1530_v58, %v1534_v31 }
 0x203   : > { %v3457_v33 = vpack.c.bf16 %v1028_v27, %v1028_v27  ;;  %v1029_v35 = vmax.f32 %v989_v29, 0.0  ;;  %v3384_v29 = vcombine.high %v1493_v16, %v1497_v17  ;;  %v3381_v31 = vcombine.low %v1492_v10, %v1496_v15  ;;  %v1528_v17 = vld [vmem:[%s4809_s6 + $0x1b0] sm:$0xff] }
 0x204   : > { %1191 = vst.msk [vmem:[%s4015_s25 + $0x78] sm:$0xf] %vm1160_vm4, %v3459_v30  ;;  %v1047_v36 = vpack.c.bf16 %v1031_v32, %v1030_v24  ;;  %v3460_v37 = vpack.c.bf16 %v1031_v32, %v1031_v32  ;;  %1930 = vmatprep.subr.bf16.mxu1 %v3418_v40  ;;  %v3375_v24 = vcombine.low %v1485_v5, %v1489_v6  ;;  %v1500_v32 = vld [vmem:[%s4809_s6 + $0xd0] sm:$0xff] }
 0x205   : > { %1189 = vst.msk [vmem:[%s4015_s25 + $0x70] sm:$0xf] %vm1160_vm4, %v3457_v33  ;;  %v1046_v38 = vpack.c.bf16 %v1029_v35, %v1028_v27  ;;  %v3458_v28 = vpack.c.bf16 %v1029_v35, %v1029_v35  ;;  %1931 = vmatpush1.bf16.msra.mxu1 %v3417_v39  ;;  %v3382_v27 = vcombine.high %v1492_v10, %v1496_v15  ;;  %v1504_v35 = vld [vmem:[%s4809_s6 + $0xf0] sm:$0xff] }
 0x206   : > { %1192 = vst.msk [vmem:[%s4015_s25 + $0x7c] sm:$0xf] %vm1160_vm4, %v3460_v37  ;;  %2302 = vmatprep.subr.bf16.mxu1 %v3366_v49  ;;  %v1505_v37 = vld [vmem:[%s4809_s6 + $0xf8] sm:$0xff]  ;;  %v3390_v41 = vcombine.high %v1500_v32, %v1504_v35  ;;  %v3397_v6 = vcombine.low %v1508_v43, %v1512_v47 }
 0x207   : > { %1190 = vst.msk [vmem:[%s4015_s25 + $0x74] sm:$0xf] %vm1160_vm4, %v3458_v28  ;;  %3651 = vmatprep.mubr.msk.bf16.mxu0 %vm1232_vm5, %v1046_v38  ;;  %v1513_v49 = vld [vmem:[%s4809_s6 + $0x138] sm:$0xff] }
 0x208   : > { %3652 = vmatmul.mubr.msk.bf16.gmra.mrb[44].mxu0 %vm1232_vm5, %v1047_v36  ;;  %v1501_v36 = vld [vmem:[%s4809_s6 + $0xd8] sm:$0xff] }
 0x209   : > { %2141 = vmatprep.mubr.bf16.mxu0 %v3746_v44  ;;  %v3392_v42 = vcombine.high %v1501_v36, %v1505_v37 }
 0x2a3   : > { %v3625_v54 = vpop.f32.mrb[16].mxu0 }
 0x2a4   : > { %v1324_v55 = vadd.f32 %v3625_v54, %v4194_v53  ;;  %v1315_v56 = vpop.f32.mrb[17].mxu0 }
 0x2a5   : > { %v1316_v57 = vadd.f32 %v4194_v53, %v1315_v56  ;;  %v3626_v59 = vpop.f32.mrb[18].mxu0  ;;  %v3389_v56 = vcombine.low %v1500_v32, %v1504_v35  ;;  %v1532_v32 = vld [vmem:[%s4809_s6 + $0x1d0] sm:$0xff] }
 0x2a6   : > { %v1327_v60 = vadd.f32 %v3626_v59, %v4194_v53  ;;  %v1318_v61 = vpop.f32.mrb[19].mxu0  ;;  %v1444_v63 = vmax.f32 %v1324_v55, 0.0  ;;  %v1536_v35 = vld [vmem:[%s4809_s6 + $0x1f0] sm:$0xff] }
 0x2a7   : > { %v1319_v62 = vadd.f32 %v4194_v53, %v1318_v61  ;;  %v1442_v2 = vmax.f32 %v1316_v57, 0.0  ;;  %v3391_v57 = vcombine.low %v1501_v36, %v1505_v37  ;;  %v1533_v36 = vld [vmem:[%s4809_s6 + $0x1d8] sm:$0xff] }
 0x2a8   : > { %v1445_v0 = vmax.f32 %v1327_v60, 0.0  ;;  %v3398_v60 = vcombine.high %v1508_v43, %v1512_v47  ;;  %v1537_v37 = vld [vmem:[%s4809_s6 + $0x1f8] sm:$0xff]  ;;  %v3422_v43 = vcombine.high %v1532_v32, %v1536_v35 }
 0x2a9   : > { %v1443_v3 = vmax.f32 %v1319_v62, 0.0  ;;  %v1516_v62 = vld [vmem:[%s4809_s6 + $0x150] sm:$0xff] }
 0x2aa   : > { %v4212_v7 = vpack.c.bf16 %v1445_v0, %v1444_v63  ;;  %v1520_v0 = vld [vmem:[%s4809_s6 + $0x170] sm:$0xff] }
 0x2ab   : > { %v4214_v8 = vpack.c.bf16 %v1443_v3, %v1442_v2  ;;  %v3629_v9 = vpop.f32.mrb[20].mxu0  ;;  %v1521_v2 = vld [vmem:[%s4809_s6 + $0x178] sm:$0xff] }
 0x2ac   : > { %v1340_v11 = vadd.f32 %v3629_v9, %v4194_v53  ;;  %v1331_v12 = vpop.f32.mrb[21].mxu0 }
 0x2ad   : > { %v1332_v18 = vadd.f32 %v4194_v53, %v1331_v12  ;;  %v3630_v19 = vpop.f32.mrb[22].mxu0  ;;  %1949 = vmatmul.mubr.bf16.vlgmr.msra.gmra.mrb[48].mxu1 %v4214_v8  ;;  %2142 = vmatmul.mubr.bf16.vlgmr.msra.gmra.mrb[48].mxu0 %v4214_v8  ;;  %v3406_v12 = vcombine.high %v1516_v62, %v1520_v0 }
 0x2ae   : > { %v1448_v20 = vmax.f32 %v1340_v11, 0.0  ;;  %v1343_v21 = vadd.f32 %v3630_v19, %v4194_v53  ;;  %2303 = vmatpush1.bf16.msra.mxu1 %v3365_v48  ;;  %2496 = vmatpush1.bf16.msra.mxu0 %v3367_v51  ;;  %v1334_v22 = vpop.f32.mrb[23].mxu0  ;;  %v1509_v48 = vld [vmem:[%s4809_s6 + $0x118] sm:$0xff] }
 0x2af   : > { %v1446_v25 = vmax.f32 %v1332_v18, 0.0  ;;  %v1335_v26 = vadd.f32 %v4194_v53, %v1334_v22  ;;  %1958 = vmatprep.mubr.bf16.mxu1 %v3746_v44  ;;  %2151 = vmatprep.mubr.bf16.mxu0 %v3746_v44  ;;  %v3400_v61 = vcombine.high %v1509_v48, %v1513_v49  ;;  %v3399_v9 = vcombine.low %v1509_v48, %v1513_v49  ;;  %v1525_v18 = vld [vmem:[%s4809_s6 + $0x198] sm:$0xff] }
 0x2b0   : > { %v1449_v30 = vmax.f32 %v1343_v21, 0.0  ;;  %2304 = vmatprep.subr.bf16.mxu1 %v3374_v13  ;;  %2497 = vmatprep.subr.bf16.mxu0 %v3376_v14  ;;  %v3408_v13 = vcombine.high %v1517_v1, %v1521_v2  ;;  %v1524_v14 = vld [vmem:[%s4809_s6 + $0x190] sm:$0xff]  ;;  %v1529_v19 = vld [vmem:[%s4809_s6 + $0x1b8] sm:$0xff] }
 0x2b1   : > { %v1447_v33 = vmax.f32 %v1335_v26, 0.0  ;;  %v3407_v26 = vcombine.low %v1517_v1, %v1521_v2 }
 0x2b2   : > { %v4248_v38 = vpack.c.bf16 %v1449_v30, %v1448_v20  ;;  %2305 = vmatpush1.bf16.msra.mxu1 %v3373_v23  ;;  %2498 = vmatpush1.bf16.msra.mxu0 %v3375_v24  ;;  %v3416_v30 = vcombine.high %v1525_v18, %v1529_v19 }
 0x2b3   : > { %v4250_v28 = vpack.c.bf16 %v1447_v33, %v1446_v25  ;;  %v3633_v58 = vpop.f32.mrb[24].mxu0  ;;  %2306 = vmatprep.subr.bf16.mxu1 %v3382_v27  ;;  %2499 = vmatprep.subr.bf16.mxu0 %v3384_v29  ;;  %v3405_v25 = vcombine.low %v1516_v62, %v1520_v0  ;;  %v3414_v29 = vcombine.high %v1524_v14, %v1528_v17 }
 0x2b4   : > { %v1356_v39 = vadd.f32 %v3633_v58, %v4194_v53  ;;  %v1347_v40 = vpop.f32.mrb[25].mxu0 }
 0x2b5   : > { %1959 = vmatmul.mubr.bf16.gmra.mrb[52].mxu1 %v4212_v7  ;;  %2152 = vmatmul.mubr.bf16.gmra.mrb[52].mxu0 %v4212_v7  ;;  %v1348_v45 = vadd.f32 %v4194_v53, %v1347_v40  ;;  %v3634_v46 = vpop.f32.mrb[26].mxu0  ;;  %v3415_v40 = vcombine.low %v1525_v18, %v1529_v19 }
 0x2b6   : > { %v1452_v50 = vmax.f32 %v1356_v39, 0.0  ;;  %1968 = vmatprep.mubr.bf16.mxu1 %v3746_v44  ;;  %2161 = vmatprep.mubr.bf16.mxu0 %v3746_v44  ;;  %v1359_v51 = vadd.f32 %v3634_v46, %v4194_v53  ;;  %v1350_v52 = vpop.f32.mrb[27].mxu0  ;;  %v3413_v39 = vcombine.low %v1524_v14, %v1528_v17 }
 0x2b7   : > { %v1450_v54 = vmax.f32 %v1348_v45, 0.0  ;;  %v1351_v55 = vadd.f32 %v4194_v53, %v1350_v52  ;;  %2307 = vmatpush1.bf16.msra.mxu1 %v3381_v31  ;;  %2500 = vmatpush1.bf16.msra.mxu0 %v3383_v34  ;;  %v3424_v45 = vcombine.high %v1533_v36, %v1537_v37 }
 0x2b8   : > { %v1453_v59 = vmax.f32 %v1359_v51, 0.0  ;;  %2308 = vmatprep.subr.bf16.mxu1 %v3390_v41  ;;  %2501 = vmatprep.subr.bf16.mxu0 %v3392_v42 }
 0x2b9   : > { %v1451_v63 = vmax.f32 %v1351_v55, 0.0  ;;  %v3423_v55 = vcombine.low %v1533_v36, %v1537_v37 }
 0x2ba   : > { %v4284_v3 = vpack.c.bf16 %v1453_v59, %v1452_v50 }
 0x2bb   : > { %v4286_v4 = vpack.c.bf16 %v1451_v63, %v1450_v54  ;;  %v3637_v5 = vpop.f32.mrb[28].mxu0  ;;  %2309 = vmatpush1.bf16.msra.mxu1 %v3389_v56  ;;  %2502 = vmatpush1.bf16.msra.mxu0 %v3391_v57  ;;  %v3421_v54 = vcombine.low %v1532_v32, %v1536_v35 }
 0x2bc   : > { %v1372_v10 = vadd.f32 %v3637_v5, %v4194_v53  ;;  %v1363_v11 = vpop.f32.mrb[29].mxu0  ;;  %2310 = vmatprep.subr.bf16.mxu1 %v3398_v60  ;;  %2503 = vmatprep.subr.bf16.mxu0 %v3400_v61 }
 0x2bd   : > { %1969 = vmatmul.mubr.bf16.gmra.mrb[56].mxu1 %v4250_v28  ;;  %2162 = vmatmul.mubr.bf16.gmra.mrb[56].mxu0 %v4250_v28  ;;  %v1364_v15 = vadd.f32 %v4194_v53, %v1363_v11  ;;  %v3638_v16 = vpop.f32.mrb[30].mxu0 }
 0x2be   : > { %1978 = vmatprep.mubr.bf16.mxu1 %v3746_v44  ;;  %2171 = vmatprep.mubr.bf16.mxu0 %v3746_v44  ;;  %v1456_v20 = vmax.f32 %v1372_v10, 0.0  ;;  %v1375_v21 = vadd.f32 %v3638_v16, %v4194_v53  ;;  %v1366_v22 = vpop.f32.mrb[31].mxu0 }
 0x2bf   : > { %v1454_v23 = vmax.f32 %v1364_v15, 0.0  ;;  %v1367_v24 = vadd.f32 %v4194_v53, %v1366_v22  ;;  %2311 = vmatpush1.bf16.msra.mxu1 %v3397_v6  ;;  %2504 = vmatpush1.bf16.msra.mxu0 %v3399_v9 }
 0x2c0   : > { %v1457_v27 = vmax.f32 %v1375_v21, 0.0  ;;  %2312 = vmatprep.subr.bf16.mxu1 %v3406_v12  ;;  %2505 = vmatprep.subr.bf16.mxu0 %v3408_v13 }
 0x2c1   : > { %v1455_v33 = vmax.f32 %v1367_v24, 0.0 }
 0x2c2   : > { %v4320_v58 = vpack.c.bf16 %v1457_v27, %v1456_v20 }
 0x2c3   : > { %v4322_v31 = vpack.c.bf16 %v1455_v33, %v1454_v23  ;;  %v3641_v34 = vpop.f32.mrb[32].mxu0  ;;  %2313 = vmatpush1.bf16.msra.mxu1 %v3405_v25  ;;  %2506 = vmatpush1.bf16.msra.mxu0 %v3407_v26 }
 0x2c4   : > { %v1388_v41 = vadd.f32 %v3641_v34, %v4194_v53  ;;  %v1379_v42 = vpop.f32.mrb[33].mxu0  ;;  %2314 = vmatprep.subr.bf16.mxu1 %v3414_v29  ;;  %2507 = vmatprep.subr.bf16.mxu0 %v3416_v30 }
 0x2c5   : > { %1979 = vmatmul.mubr.bf16.gmra.mrb[60].mxu1 %v4248_v38  ;;  %2172 = vmatmul.mubr.bf16.gmra.mrb[60].mxu0 %v4248_v38  ;;  %v1380_v46 = vadd.f32 %v4194_v53, %v1379_v42  ;;  %v3642_v47 = vpop.f32.mrb[34].mxu0 }
 0x2c6   : > { %1988 = vmatprep.mubr.bf16.mxu1 %v3746_v44  ;;  %2181 = vmatprep.mubr.bf16.mxu0 %v3746_v44  ;;  %v1460_v48 = vmax.f32 %v1388_v41, 0.0  ;;  %v1391_v49 = vadd.f32 %v3642_v47, %v4194_v53  ;;  %v1382_v50 = vpop.f32.mrb[35].mxu0 }
 0x2c7   : > { %v1458_v51 = vmax.f32 %v1380_v46, 0.0  ;;  %v1383_v52 = vadd.f32 %v4194_v53, %v1382_v50  ;;  %2315 = vmatpush1.bf16.msra.mxu1 %v3413_v39  ;;  %2508 = vmatpush1.bf16.msra.mxu0 %v3415_v40 }
 0x2c8   : > { %v1461_v56 = vmax.f32 %v1391_v49, 0.0  ;;  %2316 = vmatprep.subr.bf16.mxu1 %v3422_v43  ;;  %2509 = vmatprep.subr.bf16.mxu0 %v3424_v45 }
 0x2c9   : > { %v1459_v57 = vmax.f32 %v1383_v52, 0.0 }
 0x2ca   : > { %v4332_v59 = vpack.c.bf16 %v1461_v56, %v1460_v48 }
 0x2cb   : > { %v4334_v60 = vpack.c.bf16 %v1459_v57, %v1458_v51  ;;  %v3645_v61 = vpop.f32.mrb[36].mxu0  ;;  %2317 = vmatpush1.bf16.msra.mxu1 %v3421_v54  ;;  %2510 = vmatpush1.bf16.msra.mxu0 %v3423_v55 }
 0x2cc   : > { %v1404_v62 = vadd.f32 %v3645_v61, %v4194_v53  ;;  %v1395_v63 = vpop.f32.mrb[37].mxu0 }
 0x2cd   : > { %1989 = vmatmul.mubr.bf16.gmra.mrb[64].mxu1 %v4286_v4  ;;  %2182 = vmatmul.mubr.bf16.gmra.mrb[64].mxu0 %v4286_v4  ;;  %v1396_v0 = vadd.f32 %v4194_v53, %v1395_v63  ;;  %v3646_v1 = vpop.f32.mrb[38].mxu0 }
 0x2ce   : > { %1998 = vmatprep.mubr.bf16.mxu1 %v3746_v44  ;;  %2191 = vmatprep.mubr.bf16.mxu0 %v3746_v44  ;;  %v1464_v2 = vmax.f32 %v1404_v62, 0.0  ;;  %v1407_v5 = vadd.f32 %v3646_v1, %v4194_v53  ;;  %v1398_v6 = vpop.f32.mrb[39].mxu0 }
 0x2cf   : > { %v1462_v9 = vmax.f32 %v1396_v0, 0.0  ;;  %v1399_v10 = vadd.f32 %v4194_v53, %v1398_v6 }
 0x2d0   : > { %v1465_v11 = vmax.f32 %v1407_v5, 0.0 }
 0x2d1   : > { %v1463_v12 = vmax.f32 %v1399_v10, 0.0 }
 0x2d2   : > { %v4344_v13 = vpack.c.bf16 %v1465_v11, %v1464_v2 }
 0x2d3   : > { %v4346_v14 = vpack.c.bf16 %v1463_v12, %v1462_v9  ;;  %v3649_v15 = vpop.f32.mrb[40].mxu0 }
 0x2d4   : > { %v1420_v16 = vadd.f32 %v3649_v15, %v4194_v53  ;;  %v1411_v17 = vpop.f32.mrb[41].mxu0 }
 0x2d5   : > { %1999 = vmatmul.mubr.bf16.gmra.mrb[68].mxu1 %v4284_v3  ;;  %2192 = vmatmul.mubr.bf16.gmra.mrb[68].mxu0 %v4284_v3  ;;  %v1412_v18 = vadd.f32 %v4194_v53, %v1411_v17  ;;  %v3650_v19 = vpop.f32.mrb[42].mxu0 }
 0x2d6   : > { %2008 = vmatprep.mubr.bf16.mxu1 %v3746_v44  ;;  %2201 = vmatprep.mubr.bf16.mxu0 %v3746_v44  ;;  %v1468_v20 = vmax.f32 %v1420_v16, 0.0  ;;  %v1423_v21 = vadd.f32 %v3650_v19, %v4194_v53  ;;  %v1414_v22 = vpop.f32.mrb[43].mxu0 }
 0x2d7   : > { %v1466_v23 = vmax.f32 %v1412_v18, 0.0  ;;  %v1415_v24 = vadd.f32 %v4194_v53, %v1414_v22 }
 0x2d8   : > { %v1469_v25 = vmax.f32 %v1423_v21, 0.0 }
 0x2d9   : > { %v1467_v26 = vmax.f32 %v1415_v24, 0.0 }
 0x2da   : > { %v4356_v27 = vpack.c.bf16 %v1469_v25, %v1468_v20 }
 0x2db   : > { %v4358_v29 = vpack.c.bf16 %v1467_v26, %v1466_v23  ;;  %v3653_v30 = vpop.f32.mrb[44].mxu0 }
 0x2dc   : > { %v1436_v32 = vadd.f32 %v3653_v30, %v4194_v53  ;;  %v1427_v33 = vpop.f32.mrb[45].mxu0 }
 0x2dd   : > { %2009 = vmatmul.mubr.bf16.gmra.mrb[72].mxu1 %v4322_v31  ;;  %2202 = vmatmul.mubr.bf16.gmra.mrb[72].mxu0 %v4322_v31  ;;  %v1428_v35 = vadd.f32 %v4194_v53, %v1427_v33  ;;  %v3654_v36 = vpop.f32.mrb[46].mxu0 }
 0x2de   : > { %2018 = vmatprep.mubr.bf16.mxu1 %v3746_v44  ;;  %2211 = vmatprep.mubr.bf16.mxu0 %v3746_v44  ;;  %v1472_v37 = vmax.f32 %v1436_v32, 0.0  ;;  %v1439_v34 = vadd.f32 %v3654_v36, %v4194_v53  ;;  %v1430_v39 = vpop.f32.mrb[47].mxu0 }
 0x2df   : > { %v1470_v40 = vmax.f32 %v1428_v35, 0.0  ;;  %v1431_v41 = vadd.f32 %v4194_v53, %v1430_v39  ;;  %v1556_v53 = vlaneseq }
 0x2e0   : > { %v1473_v42 = vmax.f32 %v1439_v34, 0.0 }
 0x2e1   : > { %v1471_v43 = vmax.f32 %v1431_v41, 0.0 }
 0x2e2   : > { %v4368_v45 = vpack.c.bf16 %v1473_v42, %v1472_v37 }
 0x2e3   : > { %v4370_v46 = vpack.c.bf16 %v1471_v43, %v1470_v40 }
 0x2e5   : > { %2019 = vmatmul.mubr.bf16.gmra.mrb[76].mxu1 %v4320_v58  ;;  %2212 = vmatmul.mubr.bf16.gmra.mrb[76].mxu0 %v4320_v58 }
 0x2e6   : > { %2028 = vmatprep.mubr.bf16.mxu1 %v3746_v44  ;;  %2221 = vmatprep.mubr.bf16.mxu0 %v3746_v44 }
 0x2ed   : > { %2029 = vmatmul.mubr.bf16.gmra.mrb[80].mxu1 %v4334_v60  ;;  %2222 = vmatmul.mubr.bf16.gmra.mrb[80].mxu0 %v4334_v60 }
 0x2ee   : > { %2038 = vmatprep.mubr.bf16.mxu1 %v3746_v44  ;;  %2231 = vmatprep.mubr.bf16.mxu0 %v3746_v44 }
 0x2f5   : > { %2039 = vmatmul.mubr.bf16.gmra.mrb[84].mxu1 %v4332_v59  ;;  %2232 = vmatmul.mubr.bf16.gmra.mrb[84].mxu0 %v4332_v59 }
 0x2f6   : > { %2048 = vmatprep.mubr.bf16.mxu1 %v3746_v44  ;;  %2241 = vmatprep.mubr.bf16.mxu0 %v3746_v44 }
 0x2fd   : > { %2049 = vmatmul.mubr.bf16.gmra.mrb[88].mxu1 %v4346_v14  ;;  %2242 = vmatmul.mubr.bf16.gmra.mrb[88].mxu0 %v4346_v14 }
 0x2fe   : > { %2058 = vmatprep.mubr.bf16.mxu1 %v3746_v44  ;;  %2251 = vmatprep.mubr.bf16.mxu0 %v3746_v44 }
 0x305   : > { %2059 = vmatmul.mubr.bf16.gmra.mrb[92].mxu1 %v4344_v13  ;;  %2252 = vmatmul.mubr.bf16.gmra.mrb[92].mxu0 %v4344_v13 }
 0x306   : > { %2068 = vmatprep.mubr.bf16.mxu1 %v3746_v44  ;;  %2261 = vmatprep.mubr.bf16.mxu0 %v3746_v44 }
 0x30d   : > { %2069 = vmatmul.mubr.bf16.gmra.mrb[96].mxu1 %v4358_v29  ;;  %2262 = vmatmul.mubr.bf16.gmra.mrb[96].mxu0 %v4358_v29 }
 0x30e   : > { %2078 = vmatprep.mubr.bf16.mxu1 %v3746_v44  ;;  %2271 = vmatprep.mubr.bf16.mxu0 %v3746_v44 }
 0x315   : > { %2079 = vmatmul.mubr.bf16.gmra.mrb[100].mxu1 %v4356_v27  ;;  %2272 = vmatmul.mubr.bf16.gmra.mrb[100].mxu0 %v4356_v27 }
 0x316   : > { %2088 = vmatprep.mubr.bf16.mxu1 %v3746_v44  ;;  %2281 = vmatprep.mubr.bf16.mxu0 %v3746_v44 }
 0x31d   : > { %2089 = vmatmul.mubr.bf16.gmra.mrb[104].mxu1 %v4370_v46  ;;  %2282 = vmatmul.mubr.bf16.gmra.mrb[104].mxu0 %v4370_v46 }
 0x31e   : > { %2098 = vmatprep.mubr.bf16.mxu1 %v3746_v44  ;;  %2291 = vmatprep.mubr.bf16.mxu0 %v3746_v44 }
 0x325   : > { %2099 = vmatmul.mubr.bf16.gmra.mrb[108].mxu1 %v4368_v45  ;;  %2292 = vmatmul.mubr.bf16.gmra.mrb[108].mxu0 %v4368_v45 }
 0x326   : > { %2334 = vmatprep.mubr.bf16.mxu1 %v3746_v44  ;;  %2527 = vmatprep.mubr.bf16.mxu0 %v3746_v44 }
 0x32d   : > { %2335 = vmatmul.mubr.bf16.vlgmr.msra.gmra.mrb[112].mxu1 %v4214_v8  ;;  %2528 = vmatmul.mubr.bf16.vlgmr.msra.gmra.mrb[112].mxu0 %v4214_v8 }
 0x32e   : > { %2344 = vmatprep.mubr.bf16.mxu1 %v3746_v44  ;;  %2537 = vmatprep.mubr.bf16.mxu0 %v3746_v44 }
 0x335   : > { %2345 = vmatmul.mubr.bf16.gmra.mrb[116].mxu1 %v4212_v7  ;;  %2538 = vmatmul.mubr.bf16.gmra.mrb[116].mxu0 %v4212_v7  ;;  %v4448_v7 = vshrl.u32 %v1556_v53, 7 }
 0x336   : > { %2354 = vmatprep.mubr.bf16.mxu1 %v3746_v44  ;;  %2547 = vmatprep.mubr.bf16.mxu0 %v3746_v44 }
 0x337   : > { %v1558_v8 = vsub.s32 0, %v4448_v7 }
 0x33d   : > { %2355 = vmatmul.mubr.bf16.gmra.mrb[120].mxu1 %v4250_v28  ;;  %2548 = vmatmul.mubr.bf16.gmra.mrb[120].mxu0 %v4250_v28  ;;  %v4455_v28 = vld [vmem:[%s4810_s7] sm:$0xff] }
 0x33e   : > { %2364 = vmatprep.mubr.bf16.mxu1 %v3746_v44  ;;  %2557 = vmatprep.mubr.bf16.mxu0 %v3746_v44 }
 0x345   : > { %2365 = vmatmul.mubr.bf16.gmra.mrb[124].mxu1 %v4248_v38  ;;  %2558 = vmatmul.mubr.bf16.gmra.mrb[124].mxu0 %v4248_v38  ;;  %v1566_v38 = vsub.s32 2, %v4448_v7 }
 0x346   : > { %2374 = vmatprep.mubr.bf16.mxu1 %v3746_v44  ;;  %2567 = vmatprep.mubr.bf16.mxu0 %v3746_v44 }
 0x34d   : > { %2375 = vmatmul.mubr.bf16.gmra.mrb[128].mxu1 %v4286_v4  ;;  %2568 = vmatmul.mubr.bf16.gmra.mrb[128].mxu0 %v4286_v4  ;;  %v1570_v4 = vsub.s32 3, %v4448_v7 }
 0x34e   : > { %2384 = vmatprep.mubr.bf16.mxu1 %v3746_v44  ;;  %2577 = vmatprep.mubr.bf16.mxu0 %v3746_v44 }
 0x34f   : > { %v4473_v50 = vrot.slane %v4455_v28, %v1570_v4 }
 0x355   : > { %2385 = vmatmul.mubr.bf16.gmra.mrb[132].mxu1 %v4284_v3  ;;  %2578 = vmatmul.mubr.bf16.gmra.mrb[132].mxu0 %v4284_v3  ;;  %v1562_v3 = vsub.s32 1, %v4448_v7 }
 0x356   : > { %2394 = vmatprep.mubr.bf16.mxu1 %v3746_v44  ;;  %2587 = vmatprep.mubr.bf16.mxu0 %v3746_v44 }
 0x357   : > { %v4470_v49 = vrot.slane %v4455_v28, %v1562_v3 }
 0x35d   : > { %2395 = vmatmul.mubr.bf16.gmra.mrb[136].mxu1 %v4322_v31  ;;  %2588 = vmatmul.mubr.bf16.gmra.mrb[136].mxu0 %v4322_v31  ;;  %v4467_v31 = vrot.slane %v4455_v28, %v1566_v38 }
 0x35e   : > { %2404 = vmatprep.mubr.bf16.mxu1 %v3746_v44  ;;  %2597 = vmatprep.mubr.bf16.mxu0 %v3746_v44 }
 0x365   : > { %2405 = vmatmul.mubr.bf16.gmra.mrb[140].mxu1 %v4320_v58  ;;  %2598 = vmatmul.mubr.bf16.gmra.mrb[140].mxu0 %v4320_v58  ;;  %v4464_v58 = vrot.slane %v4455_v28, %v1558_v8 }
 0x366   : > { %2414 = vmatprep.mubr.bf16.mxu1 %v3746_v44  ;;  %2607 = vmatprep.mubr.bf16.mxu0 %v3746_v44 }
 0x36d   : > { %2415 = vmatmul.mubr.bf16.gmra.mrb[144].mxu1 %v4334_v60  ;;  %2608 = vmatmul.mubr.bf16.gmra.mrb[144].mxu0 %v4334_v60 }
 0x36e   : > { %2424 = vmatprep.mubr.bf16.mxu1 %v3746_v44  ;;  %2617 = vmatprep.mubr.bf16.mxu0 %v3746_v44 }
 0x375   : > { %2425 = vmatmul.mubr.bf16.gmra.mrb[148].mxu1 %v4332_v59  ;;  %2618 = vmatmul.mubr.bf16.gmra.mrb[148].mxu0 %v4332_v59 }
 0x376   : > { %2434 = vmatprep.mubr.bf16.mxu1 %v3746_v44  ;;  %2627 = vmatprep.mubr.bf16.mxu0 %v3746_v44 }
 0x37d   : > { %2435 = vmatmul.mubr.bf16.gmra.mrb[152].mxu1 %v4346_v14  ;;  %2628 = vmatmul.mubr.bf16.gmra.mrb[152].mxu0 %v4346_v14 }
 0x37e   : > { %2444 = vmatprep.mubr.bf16.mxu1 %v3746_v44  ;;  %2637 = vmatprep.mubr.bf16.mxu0 %v3746_v44 }
 0x380   : > { %v1950_v47 = vpop.f32.mrb[48].mxu1  ;;  %v2143_v48 = vpop.f32.mrb[48].mxu0 }
 0x381   : > { %v1952_v51 = vpop.f32.mrb[49].mxu1  ;;  %v2145_v52 = vpop.f32.mrb[49].mxu0  ;;  %v1951_v56 = vadd.f32 %v1950_v47, %v4464_v58  ;;  %v2144_v57 = vadd.f32 %v2143_v48, %v4467_v31 }
 0x382   : > { %v1954_v54 = vpop.f32.mrb[50].mxu1  ;;  %v2147_v55 = vpop.f32.mrb[50].mxu0  ;;  %v1953_v63 = vadd.f32 %v1952_v51, %v4470_v49  ;;  %v2146_v0 = vadd.f32 %v2145_v52, %v4473_v50 }
 0x383   : > { %v1955_v59 = vadd.f32 %v1954_v54, %v4464_v58  ;;  %v2148_v60 = vadd.f32 %v2147_v55, %v4467_v31  ;;  %v1956_v61 = vpop.f32.mrb[51].mxu1  ;;  %v2149_v62 = vpop.f32.mrb[51].mxu0 }
 0x384   : > { %v1957_v1 = vadd.f32 %v1956_v61, %v4470_v49  ;;  %v2150_v2 = vadd.f32 %v2149_v62, %v4473_v50 }
 0x385   : > { %v2688_v5 = vmax.f32 %v1951_v56, %v1955_v59  ;;  %v2762_v6 = vmax.f32 %v2144_v57, %v2148_v60  ;;  %2445 = vmatmul.mubr.bf16.gmra.mrb[156].mxu1 %v4344_v13  ;;  %2638 = vmatmul.mubr.bf16.gmra.mrb[156].mxu0 %v4344_v13 }
 0x386   : > { %v2725_v9 = vmax.f32 %v1953_v63, %v1957_v1  ;;  %v2799_v10 = vmax.f32 %v2146_v0, %v2150_v2  ;;  %2454 = vmatprep.mubr.bf16.mxu1 %v3746_v44  ;;  %2647 = vmatprep.mubr.bf16.mxu0 %v3746_v44 }
 0x388   : > { %v1960_v11 = vpop.f32.mrb[52].mxu1  ;;  %v2153_v12 = vpop.f32.mrb[52].mxu0 }
 0x389   : > { %v1961_v14 = vadd.f32 %v1960_v11, %v4464_v58  ;;  %v2154_v15 = vadd.f32 %v2153_v12, %v4467_v31  ;;  %v1962_v16 = vpop.f32.mrb[53].mxu1  ;;  %v2155_v17 = vpop.f32.mrb[53].mxu0 }
 0x38a   : > { %v1963_v18 = vadd.f32 %v1962_v16, %v4470_v49  ;;  %v2156_v19 = vadd.f32 %v2155_v17, %v4473_v50  ;;  %v1964_v20 = vpop.f32.mrb[54].mxu1  ;;  %v2157_v13 = vpop.f32.mrb[54].mxu0 }
 0x38b   : > { %v2689_v21 = vmax.f32 %v2688_v5, %v1961_v14  ;;  %v2763_v22 = vmax.f32 %v2762_v6, %v2154_v15  ;;  %v1965_v23 = vadd.f32 %v1964_v20, %v4464_v58  ;;  %v2158_v24 = vadd.f32 %v2157_v13, %v4467_v31  ;;  %v1966_v25 = vpop.f32.mrb[55].mxu1  ;;  %v2159_v26 = vpop.f32.mrb[55].mxu0 }
 0x38c   : > { %v2726_v30 = vmax.f32 %v2725_v9, %v1963_v18  ;;  %v2800_v32 = vmax.f32 %v2799_v10, %v2156_v19  ;;  %v1967_v33 = vadd.f32 %v1966_v25, %v4470_v49  ;;  %v2160_v35 = vadd.f32 %v2159_v26, %v4473_v50 }
 0x38d   : > { %v2690_v36 = vmax.f32 %v2689_v21, %v1965_v23  ;;  %v2764_v37 = vmax.f32 %v2763_v22, %v2158_v24  ;;  %2455 = vmatmul.mubr.bf16.gmra.mrb[160].mxu1 %v4358_v29  ;;  %2648 = vmatmul.mubr.bf16.gmra.mrb[160].mxu0 %v4358_v29 }
 0x38e   : > { %v2727_v34 = vmax.f32 %v2726_v30, %v1967_v33  ;;  %v2801_v39 = vmax.f32 %v2800_v32, %v2160_v35  ;;  %2464 = vmatprep.mubr.bf16.mxu1 %v3746_v44  ;;  %2657 = vmatprep.mubr.bf16.mxu0 %v3746_v44 }
 0x390   : > { %v1970_v40 = vpop.f32.mrb[56].mxu1  ;;  %v2163_v41 = vpop.f32.mrb[56].mxu0 }
 0x391   : > { %v1971_v42 = vadd.f32 %v1970_v40, %v4464_v58  ;;  %v2164_v43 = vadd.f32 %v2163_v41, %v4467_v31  ;;  %v1972_v53 = vpop.f32.mrb[57].mxu1  ;;  %v2165_v8 = vpop.f32.mrb[57].mxu0 }
 0x392   : > { %v1973_v38 = vadd.f32 %v1972_v53, %v4470_v49  ;;  %v2166_v3 = vadd.f32 %v2165_v8, %v4473_v50  ;;  %v1974_v4 = vpop.f32.mrb[58].mxu1  ;;  %v2167_v29 = vpop.f32.mrb[58].mxu0 }
 0x393   : > { %v2691_v47 = vmax.f32 %v2690_v36, %v1971_v42  ;;  %v2765_v48 = vmax.f32 %v2764_v37, %v2164_v43  ;;  %v1975_v51 = vadd.f32 %v1974_v4, %v4464_v58  ;;  %v2168_v52 = vadd.f32 %v2167_v29, %v4467_v31  ;;  %v1976_v54 = vpop.f32.mrb[59].mxu1  ;;  %v2169_v55 = vpop.f32.mrb[59].mxu0 }
 0x394   : > { %v2728_v56 = vmax.f32 %v2727_v34, %v1973_v38  ;;  %v2802_v57 = vmax.f32 %v2801_v39, %v2166_v3  ;;  %v1977_v59 = vadd.f32 %v1976_v54, %v4470_v49  ;;  %v2170_v60 = vadd.f32 %v2169_v55, %v4473_v50 }
 0x395   : > { %v2692_v61 = vmax.f32 %v2691_v47, %v1975_v51  ;;  %v2766_v62 = vmax.f32 %v2765_v48, %v2168_v52  ;;  %2465 = vmatmul.mubr.bf16.gmra.mrb[164].mxu1 %v4356_v27  ;;  %2658 = vmatmul.mubr.bf16.gmra.mrb[164].mxu0 %v4356_v27 }
 0x396   : > { %v2729_v63 = vmax.f32 %v2728_v56, %v1977_v59  ;;  %v2803_v0 = vmax.f32 %v2802_v57, %v2170_v60  ;;  %2474 = vmatprep.mubr.bf16.mxu1 %v3746_v44  ;;  %2667 = vmatprep.mubr.bf16.mxu0 %v3746_v44 }
 0x398   : > { %v1980_v1 = vpop.f32.mrb[60].mxu1  ;;  %v2173_v2 = vpop.f32.mrb[60].mxu0 }
 0x399   : > { %v1981_v5 = vadd.f32 %v1980_v1, %v4464_v58  ;;  %v2174_v6 = vadd.f32 %v2173_v2, %v4467_v31  ;;  %v1982_v9 = vpop.f32.mrb[61].mxu1  ;;  %v2175_v10 = vpop.f32.mrb[61].mxu0 }
 0x39a   : > { %v1983_v11 = vadd.f32 %v1982_v9, %v4470_v49  ;;  %v2176_v12 = vadd.f32 %v2175_v10, %v4473_v50  ;;  %v1984_v14 = vpop.f32.mrb[62].mxu1  ;;  %v2177_v27 = vpop.f32.mrb[62].mxu0 }
 0x39b   : > { %v2693_v15 = vmax.f32 %v2692_v61, %v1981_v5  ;;  %v2767_v16 = vmax.f32 %v2766_v62, %v2174_v6  ;;  %v1985_v17 = vadd.f32 %v1984_v14, %v4464_v58  ;;  %v2178_v18 = vadd.f32 %v2177_v27, %v4467_v31  ;;  %v1986_v19 = vpop.f32.mrb[63].mxu1  ;;  %v2179_v20 = vpop.f32.mrb[63].mxu0 }
 0x39c   : > { %v2730_v13 = vmax.f32 %v2729_v63, %v1983_v11  ;;  %v2804_v21 = vmax.f32 %v2803_v0, %v2176_v12  ;;  %v1987_v22 = vadd.f32 %v1986_v19, %v4470_v49  ;;  %v2180_v23 = vadd.f32 %v2179_v20, %v4473_v50 }
 0x39d   : > { %v2694_v24 = vmax.f32 %v2693_v15, %v1985_v17  ;;  %v2768_v25 = vmax.f32 %v2767_v16, %v2178_v18  ;;  %2475 = vmatmul.mubr.bf16.gmra.mrb[168].mxu1 %v4370_v46  ;;  %2668 = vmatmul.mubr.bf16.gmra.mrb[168].mxu0 %v4370_v46 }
 0x39e   : > { %v2731_v26 = vmax.f32 %v2730_v13, %v1987_v22  ;;  %v2805_v30 = vmax.f32 %v2804_v21, %v2180_v23  ;;  %2484 = vmatprep.mubr.bf16.mxu1 %v3746_v44  ;;  %2677 = vmatprep.mubr.bf16.mxu0 %v3746_v44 }
 0x3a0   : > { %v1990_v32 = vpop.f32.mrb[64].mxu1  ;;  %v2183_v33 = vpop.f32.mrb[64].mxu0 }
 0x3a1   : > { %v1991_v35 = vadd.f32 %v1990_v32, %v4464_v58  ;;  %v2184_v36 = vadd.f32 %v2183_v33, %v4467_v31  ;;  %v1992_v37 = vpop.f32.mrb[65].mxu1  ;;  %v2185_v34 = vpop.f32.mrb[65].mxu0 }
 0x3a2   : > { %v1993_v39 = vadd.f32 %v1992_v37, %v4470_v49  ;;  %v2186_v40 = vadd.f32 %v2185_v34, %v4473_v50  ;;  %v1994_v41 = vpop.f32.mrb[66].mxu1  ;;  %v2187_v46 = vpop.f32.mrb[66].mxu0 }
 0x3a3   : > { %v2695_v42 = vmax.f32 %v2694_v24, %v1991_v35  ;;  %v2769_v43 = vmax.f32 %v2768_v25, %v2184_v36  ;;  %v1995_v53 = vadd.f32 %v1994_v41, %v4464_v58  ;;  %v2188_v44 = vadd.f32 %v2187_v46, %v4467_v31  ;;  %v1996_v8 = vpop.f32.mrb[67].mxu1  ;;  %v2189_v38 = vpop.f32.mrb[67].mxu0 }
 0x3a4   : > { %v2732_v3 = vmax.f32 %v2731_v26, %v1993_v39  ;;  %v2806_v4 = vmax.f32 %v2805_v30, %v2186_v40  ;;  %v1997_v29 = vadd.f32 %v1996_v8, %v4470_v49  ;;  %v2190_v47 = vadd.f32 %v2189_v38, %v4473_v50 }
 0x3a5   : > { %v2696_v48 = vmax.f32 %v2695_v42, %v1995_v53  ;;  %v2770_v51 = vmax.f32 %v2769_v43, %v2188_v44  ;;  %2485 = vmatmul.mubr.bf16.gmra.mrb[172].mxu1 %v4368_v45  ;;  %2678 = vmatmul.mubr.bf16.gmra.mrb[172].mxu0 %v4368_v45 }
 0x3a6   : > { %v2733_v52 = vmax.f32 %v2732_v3, %v1997_v29  ;;  %v2807_v54 = vmax.f32 %v2806_v4, %v2190_v47 }
 0x3a8   : > { %v2000_v55 = vpop.f32.mrb[68].mxu1  ;;  %v2193_v56 = vpop.f32.mrb[68].mxu0 }
 0x3a9   : > { %v2001_v57 = vadd.f32 %v2000_v55, %v4464_v58  ;;  %v2194_v59 = vadd.f32 %v2193_v56, %v4467_v31  ;;  %v2002_v60 = vpop.f32.mrb[69].mxu1  ;;  %v2195_v61 = vpop.f32.mrb[69].mxu0 }
 0x3aa   : > { %v2003_v62 = vadd.f32 %v2002_v60, %v4470_v49  ;;  %v2196_v63 = vadd.f32 %v2195_v61, %v4473_v50  ;;  %v2004_v0 = vpop.f32.mrb[70].mxu1  ;;  %v2197_v1 = vpop.f32.mrb[70].mxu0 }
 0x3ab   : > { %v2697_v2 = vmax.f32 %v2696_v48, %v2001_v57  ;;  %v2771_v5 = vmax.f32 %v2770_v51, %v2194_v59  ;;  %v2005_v45 = vadd.f32 %v2004_v0, %v4464_v58  ;;  %v2198_v6 = vadd.f32 %v2197_v1, %v4467_v31  ;;  %v2006_v9 = vpop.f32.mrb[71].mxu1  ;;  %v2199_v10 = vpop.f32.mrb[71].mxu0 }
 0x3ac   : > { %v2734_v11 = vmax.f32 %v2733_v52, %v2003_v62  ;;  %v2808_v12 = vmax.f32 %v2807_v54, %v2196_v63  ;;  %v2007_v14 = vadd.f32 %v2006_v9, %v4470_v49  ;;  %v2200_v27 = vadd.f32 %v2199_v10, %v4473_v50 }
 0x3ad   : > { %v2698_v15 = vmax.f32 %v2697_v2, %v2005_v45  ;;  %v2772_v16 = vmax.f32 %v2771_v5, %v2198_v6 }
 0x3ae   : > { %v2735_v17 = vmax.f32 %v2734_v11, %v2007_v14  ;;  %v2809_v18 = vmax.f32 %v2808_v12, %v2200_v27 }
 0x3b0   : > { %v2010_v19 = vpop.f32.mrb[72].mxu1  ;;  %v2203_v20 = vpop.f32.mrb[72].mxu0 }
 0x3b1   : > { %v2011_v13 = vadd.f32 %v2010_v19, %v4464_v58  ;;  %v2204_v21 = vadd.f32 %v2203_v20, %v4467_v31  ;;  %v2012_v22 = vpop.f32.mrb[73].mxu1  ;;  %v2205_v23 = vpop.f32.mrb[73].mxu0 }
 0x3b2   : > { %v2013_v24 = vadd.f32 %v2012_v22, %v4470_v49  ;;  %v2206_v25 = vadd.f32 %v2205_v23, %v4473_v50  ;;  %v2014_v26 = vpop.f32.mrb[74].mxu1  ;;  %v2207_v30 = vpop.f32.mrb[74].mxu0 }
 0x3b3   : > { %v2699_v32 = vmax.f32 %v2698_v15, %v2011_v13  ;;  %v2773_v33 = vmax.f32 %v2772_v16, %v2204_v21  ;;  %v2015_v35 = vadd.f32 %v2014_v26, %v4464_v58  ;;  %v2208_v36 = vadd.f32 %v2207_v30, %v4467_v31  ;;  %v2016_v37 = vpop.f32.mrb[75].mxu1  ;;  %v2209_v34 = vpop.f32.mrb[75].mxu0 }
 0x3b4   : > { %v2736_v39 = vmax.f32 %v2735_v17, %v2013_v24  ;;  %v2810_v40 = vmax.f32 %v2809_v18, %v2206_v25  ;;  %v2017_v41 = vadd.f32 %v2016_v37, %v4470_v49  ;;  %v2210_v46 = vadd.f32 %v2209_v34, %v4473_v50 }
 0x3b5   : > { %v2700_v42 = vmax.f32 %v2699_v32, %v2015_v35  ;;  %v2774_v43 = vmax.f32 %v2773_v33, %v2208_v36 }
 0x3b6   : > { %v2737_v53 = vmax.f32 %v2736_v39, %v2017_v41  ;;  %v2811_v44 = vmax.f32 %v2810_v40, %v2210_v46 }
 0x3b8   : > { %v2020_v8 = vpop.f32.mrb[76].mxu1  ;;  %v2213_v38 = vpop.f32.mrb[76].mxu0 }
 0x3b9   : > { %v2021_v3 = vadd.f32 %v2020_v8, %v4464_v58  ;;  %v2214_v4 = vadd.f32 %v2213_v38, %v4467_v31  ;;  %v2022_v29 = vpop.f32.mrb[77].mxu1  ;;  %v2215_v47 = vpop.f32.mrb[77].mxu0 }
 0x3ba   : > { %v2023_v48 = vadd.f32 %v2022_v29, %v4470_v49  ;;  %v2216_v51 = vadd.f32 %v2215_v47, %v4473_v50  ;;  %v2024_v52 = vpop.f32.mrb[78].mxu1  ;;  %v2217_v54 = vpop.f32.mrb[78].mxu0 }
 0x3bb   : > { %v2701_v55 = vmax.f32 %v2700_v42, %v2021_v3  ;;  %v2775_v56 = vmax.f32 %v2774_v43, %v2214_v4  ;;  %v2025_v57 = vadd.f32 %v2024_v52, %v4464_v58  ;;  %v2218_v59 = vadd.f32 %v2217_v54, %v4467_v31  ;;  %v2026_v60 = vpop.f32.mrb[79].mxu1  ;;  %v2219_v61 = vpop.f32.mrb[79].mxu0 }
 0x3bc   : > { %v2738_v62 = vmax.f32 %v2737_v53, %v2023_v48  ;;  %v2812_v63 = vmax.f32 %v2811_v44, %v2216_v51  ;;  %v2027_v0 = vadd.f32 %v2026_v60, %v4470_v49  ;;  %v2220_v1 = vadd.f32 %v2219_v61, %v4473_v50 }
 0x3bd   : > { %v2702_v2 = vmax.f32 %v2701_v55, %v2025_v57  ;;  %v2776_v5 = vmax.f32 %v2775_v56, %v2218_v59 }
 0x3be   : > { %v2739_v45 = vmax.f32 %v2738_v62, %v2027_v0  ;;  %v2813_v6 = vmax.f32 %v2812_v63, %v2220_v1 }
 0x3c0   : > { %v2030_v9 = vpop.f32.mrb[80].mxu1  ;;  %v2223_v10 = vpop.f32.mrb[80].mxu0 }
 0x3c1   : > { %v2031_v11 = vadd.f32 %v2030_v9, %v4464_v58  ;;  %v2224_v12 = vadd.f32 %v2223_v10, %v4467_v31  ;;  %v2032_v14 = vpop.f32.mrb[81].mxu1  ;;  %v2225_v27 = vpop.f32.mrb[81].mxu0 }
 0x3c2   : > { %v2033_v15 = vadd.f32 %v2032_v14, %v4470_v49  ;;  %v2226_v16 = vadd.f32 %v2225_v27, %v4473_v50  ;;  %v2034_v17 = vpop.f32.mrb[82].mxu1  ;;  %v2227_v18 = vpop.f32.mrb[82].mxu0 }
 0x3c3   : > { %v2703_v19 = vmax.f32 %v2702_v2, %v2031_v11  ;;  %v2777_v20 = vmax.f32 %v2776_v5, %v2224_v12  ;;  %v2035_v13 = vadd.f32 %v2034_v17, %v4464_v58  ;;  %v2228_v21 = vadd.f32 %v2227_v18, %v4467_v31  ;;  %v2036_v22 = vpop.f32.mrb[83].mxu1  ;;  %v2229_v23 = vpop.f32.mrb[83].mxu0 }
 0x3c4   : > { %v2740_v24 = vmax.f32 %v2739_v45, %v2033_v15  ;;  %v2814_v25 = vmax.f32 %v2813_v6, %v2226_v16  ;;  %v2037_v26 = vadd.f32 %v2036_v22, %v4470_v49  ;;  %v2230_v30 = vadd.f32 %v2229_v23, %v4473_v50 }
 0x3c5   : > { %v2704_v32 = vmax.f32 %v2703_v19, %v2035_v13  ;;  %v2778_v33 = vmax.f32 %v2777_v20, %v2228_v21 }
 0x3c6   : > { %v2741_v35 = vmax.f32 %v2740_v24, %v2037_v26  ;;  %v2815_v36 = vmax.f32 %v2814_v25, %v2230_v30 }
 0x3c8   : > { %v2040_v37 = vpop.f32.mrb[84].mxu1  ;;  %v2233_v34 = vpop.f32.mrb[84].mxu0 }
 0x3c9   : > { %v2041_v39 = vadd.f32 %v2040_v37, %v4464_v58  ;;  %v2234_v40 = vadd.f32 %v2233_v34, %v4467_v31  ;;  %v2042_v41 = vpop.f32.mrb[85].mxu1  ;;  %v2235_v46 = vpop.f32.mrb[85].mxu0 }
 0x3ca   : > { %v2043_v42 = vadd.f32 %v2042_v41, %v4470_v49  ;;  %v2236_v43 = vadd.f32 %v2235_v46, %v4473_v50  ;;  %v2044_v53 = vpop.f32.mrb[86].mxu1  ;;  %v2237_v44 = vpop.f32.mrb[86].mxu0 }
 0x3cb   : > { %v2705_v8 = vmax.f32 %v2704_v32, %v2041_v39  ;;  %v2779_v38 = vmax.f32 %v2778_v33, %v2234_v40  ;;  %v2045_v3 = vadd.f32 %v2044_v53, %v4464_v58  ;;  %v2238_v4 = vadd.f32 %v2237_v44, %v4467_v31  ;;  %v2046_v29 = vpop.f32.mrb[87].mxu1  ;;  %v2239_v47 = vpop.f32.mrb[87].mxu0 }
 0x3cc   : > { %v2742_v48 = vmax.f32 %v2741_v35, %v2043_v42  ;;  %v2816_v51 = vmax.f32 %v2815_v36, %v2236_v43  ;;  %v2047_v52 = vadd.f32 %v2046_v29, %v4470_v49  ;;  %v2240_v54 = vadd.f32 %v2239_v47, %v4473_v50 }
 0x3cd   : > { %v2706_v55 = vmax.f32 %v2705_v8, %v2045_v3  ;;  %v2780_v56 = vmax.f32 %v2779_v38, %v2238_v4 }
 0x3ce   : > { %v2743_v57 = vmax.f32 %v2742_v48, %v2047_v52  ;;  %v2817_v59 = vmax.f32 %v2816_v51, %v2240_v54 }
 0x3d0   : > { %v2050_v60 = vpop.f32.mrb[88].mxu1  ;;  %v2243_v61 = vpop.f32.mrb[88].mxu0 }
 0x3d1   : > { %v2051_v62 = vadd.f32 %v2050_v60, %v4464_v58  ;;  %v2244_v63 = vadd.f32 %v2243_v61, %v4467_v31  ;;  %v2052_v0 = vpop.f32.mrb[89].mxu1  ;;  %v2245_v1 = vpop.f32.mrb[89].mxu0 }
 0x3d2   : > { %v2053_v2 = vadd.f32 %v2052_v0, %v4470_v49  ;;  %v2246_v5 = vadd.f32 %v2245_v1, %v4473_v50  ;;  %v2054_v45 = vpop.f32.mrb[90].mxu1  ;;  %v2247_v6 = vpop.f32.mrb[90].mxu0 }
 0x3d3   : > { %v2707_v9 = vmax.f32 %v2706_v55, %v2051_v62  ;;  %v2781_v10 = vmax.f32 %v2780_v56, %v2244_v63  ;;  %v2055_v11 = vadd.f32 %v2054_v45, %v4464_v58  ;;  %v2248_v12 = vadd.f32 %v2247_v6, %v4467_v31  ;;  %v2056_v14 = vpop.f32.mrb[91].mxu1  ;;  %v2249_v27 = vpop.f32.mrb[91].mxu0 }
 0x3d4   : > { %v2744_v15 = vmax.f32 %v2743_v57, %v2053_v2  ;;  %v2818_v16 = vmax.f32 %v2817_v59, %v2246_v5  ;;  %v2057_v17 = vadd.f32 %v2056_v14, %v4470_v49  ;;  %v2250_v18 = vadd.f32 %v2249_v27, %v4473_v50 }
 0x3d5   : > { %v2708_v19 = vmax.f32 %v2707_v9, %v2055_v11  ;;  %v2782_v20 = vmax.f32 %v2781_v10, %v2248_v12 }
 0x3d6   : > { %v2745_v13 = vmax.f32 %v2744_v15, %v2057_v17  ;;  %v2819_v21 = vmax.f32 %v2818_v16, %v2250_v18 }
 0x3d8   : > { %v2060_v22 = vpop.f32.mrb[92].mxu1  ;;  %v2253_v23 = vpop.f32.mrb[92].mxu0 }
 0x3d9   : > { %v2061_v24 = vadd.f32 %v2060_v22, %v4464_v58  ;;  %v2254_v25 = vadd.f32 %v2253_v23, %v4467_v31  ;;  %v2062_v26 = vpop.f32.mrb[93].mxu1  ;;  %v2255_v30 = vpop.f32.mrb[93].mxu0 }
 0x3da   : > { %v2063_v32 = vadd.f32 %v2062_v26, %v4470_v49  ;;  %v2256_v33 = vadd.f32 %v2255_v30, %v4473_v50  ;;  %v2064_v35 = vpop.f32.mrb[94].mxu1  ;;  %v2257_v36 = vpop.f32.mrb[94].mxu0 }
 0x3db   : > { %v2709_v37 = vmax.f32 %v2708_v19, %v2061_v24  ;;  %v2783_v34 = vmax.f32 %v2782_v20, %v2254_v25  ;;  %v2065_v39 = vadd.f32 %v2064_v35, %v4464_v58  ;;  %v2258_v40 = vadd.f32 %v2257_v36, %v4467_v31  ;;  %v2066_v41 = vpop.f32.mrb[95].mxu1  ;;  %v2259_v46 = vpop.f32.mrb[95].mxu0 }
 0x3dc   : > { %v2746_v42 = vmax.f32 %v2745_v13, %v2063_v32  ;;  %v2820_v43 = vmax.f32 %v2819_v21, %v2256_v33  ;;  %v2067_v53 = vadd.f32 %v2066_v41, %v4470_v49  ;;  %v2260_v44 = vadd.f32 %v2259_v46, %v4473_v50 }
 0x3dd   : > { %v2710_v8 = vmax.f32 %v2709_v37, %v2065_v39  ;;  %v2784_v38 = vmax.f32 %v2783_v34, %v2258_v40 }
 0x3de   : > { %v2747_v3 = vmax.f32 %v2746_v42, %v2067_v53  ;;  %v2821_v4 = vmax.f32 %v2820_v43, %v2260_v44 }
 0x3e0   : > { %v2070_v29 = vpop.f32.mrb[96].mxu1  ;;  %v2263_v47 = vpop.f32.mrb[96].mxu0 }
 0x3e1   : > { %v2071_v48 = vadd.f32 %v2070_v29, %v4464_v58  ;;  %v2264_v51 = vadd.f32 %v2263_v47, %v4467_v31  ;;  %v2072_v52 = vpop.f32.mrb[97].mxu1  ;;  %v2265_v54 = vpop.f32.mrb[97].mxu0 }
 0x3e2   : > { %v2073_v55 = vadd.f32 %v2072_v52, %v4470_v49  ;;  %v2266_v56 = vadd.f32 %v2265_v54, %v4473_v50  ;;  %v2074_v57 = vpop.f32.mrb[98].mxu1  ;;  %v2267_v59 = vpop.f32.mrb[98].mxu0 }
 0x3e3   : > { %v2711_v60 = vmax.f32 %v2710_v8, %v2071_v48  ;;  %v2785_v61 = vmax.f32 %v2784_v38, %v2264_v51  ;;  %v2075_v62 = vadd.f32 %v2074_v57, %v4464_v58  ;;  %v2268_v63 = vadd.f32 %v2267_v59, %v4467_v31  ;;  %v2076_v0 = vpop.f32.mrb[99].mxu1  ;;  %v2269_v1 = vpop.f32.mrb[99].mxu0 }
 0x3e4   : > { %v2748_v2 = vmax.f32 %v2747_v3, %v2073_v55  ;;  %v2822_v5 = vmax.f32 %v2821_v4, %v2266_v56  ;;  %v2077_v45 = vadd.f32 %v2076_v0, %v4470_v49  ;;  %v2270_v6 = vadd.f32 %v2269_v1, %v4473_v50 }
 0x3e5   : > { %v2712_v9 = vmax.f32 %v2711_v60, %v2075_v62  ;;  %v2786_v10 = vmax.f32 %v2785_v61, %v2268_v63 }
 0x3e6   : > { %v2749_v11 = vmax.f32 %v2748_v2, %v2077_v45  ;;  %v2823_v12 = vmax.f32 %v2822_v5, %v2270_v6 }
 0x3e8   : > { %v2080_v14 = vpop.f32.mrb[100].mxu1  ;;  %v2273_v27 = vpop.f32.mrb[100].mxu0 }
 0x3e9   : > { %v2081_v15 = vadd.f32 %v2080_v14, %v4464_v58  ;;  %v2274_v16 = vadd.f32 %v2273_v27, %v4467_v31  ;;  %v2082_v17 = vpop.f32.mrb[101].mxu1  ;;  %v2275_v18 = vpop.f32.mrb[101].mxu0 }
 0x3ea   : > { %v2083_v19 = vadd.f32 %v2082_v17, %v4470_v49  ;;  %v2276_v20 = vadd.f32 %v2275_v18, %v4473_v50  ;;  %v2084_v13 = vpop.f32.mrb[102].mxu1  ;;  %v2277_v21 = vpop.f32.mrb[102].mxu0 }
 0x3eb   : > { %v2713_v22 = vmax.f32 %v2712_v9, %v2081_v15  ;;  %v2787_v23 = vmax.f32 %v2786_v10, %v2274_v16  ;;  %v2085_v24 = vadd.f32 %v2084_v13, %v4464_v58  ;;  %v2278_v25 = vadd.f32 %v2277_v21, %v4467_v31  ;;  %v2086_v26 = vpop.f32.mrb[103].mxu1  ;;  %v2279_v30 = vpop.f32.mrb[103].mxu0 }
 0x3ec   : > { %v2750_v32 = vmax.f32 %v2749_v11, %v2083_v19  ;;  %v2824_v33 = vmax.f32 %v2823_v12, %v2276_v20  ;;  %v2087_v35 = vadd.f32 %v2086_v26, %v4470_v49  ;;  %v2280_v36 = vadd.f32 %v2279_v30, %v4473_v50 }
 0x3ed   : > { %v2714_v37 = vmax.f32 %v2713_v22, %v2085_v24  ;;  %v2788_v34 = vmax.f32 %v2787_v23, %v2278_v25  ;;  %v1574_v9 = vsub.s32 4, %v4448_v7  ;;  %v1582_v10 = vsub.s32 6, %v4448_v7 }
 0x3ee   : > { %v2751_v39 = vmax.f32 %v2750_v32, %v2087_v35  ;;  %v2825_v40 = vmax.f32 %v2824_v33, %v2280_v36  ;;  %v1578_v15 = vsub.s32 5, %v4448_v7  ;;  %v1586_v16 = vsub.s32 7, %v4448_v7 }
 0x3ef   : > { %v4626_v32 = vrot.slane %v4455_v28, %v1574_v9  ;;  %v4629_v33 = vrot.slane %v4455_v28, %v1582_v10 }
 0x3f0   : > { %v2090_v41 = vpop.f32.mrb[104].mxu1  ;;  %v2283_v46 = vpop.f32.mrb[104].mxu0  ;;  %v4635_v36 = vrot.slane %v4455_v28, %v1586_v16 }
 0x3f1   : > { %v2091_v42 = vadd.f32 %v2090_v41, %v4464_v58  ;;  %v2284_v43 = vadd.f32 %v2283_v46, %v4467_v31  ;;  %v2092_v53 = vpop.f32.mrb[105].mxu1  ;;  %v2285_v44 = vpop.f32.mrb[105].mxu0 }
 0x3f2   : > { %v2093_v8 = vadd.f32 %v2092_v53, %v4470_v49  ;;  %v2286_v38 = vadd.f32 %v2285_v44, %v4473_v50  ;;  %v2094_v3 = vpop.f32.mrb[106].mxu1  ;;  %v2287_v4 = vpop.f32.mrb[106].mxu0 }
 0x3f3   : > { %v2715_v29 = vmax.f32 %v2714_v37, %v2091_v42  ;;  %v2789_v47 = vmax.f32 %v2788_v34, %v2284_v43  ;;  %v2095_v48 = vadd.f32 %v2094_v3, %v4464_v58  ;;  %v2288_v51 = vadd.f32 %v2287_v4, %v4467_v31  ;;  %v2096_v52 = vpop.f32.mrb[107].mxu1  ;;  %v2289_v54 = vpop.f32.mrb[107].mxu0 }
 0x3f4   : > { %v2752_v55 = vmax.f32 %v2751_v39, %v2093_v8  ;;  %v2826_v56 = vmax.f32 %v2825_v40, %v2286_v38  ;;  %v2097_v57 = vadd.f32 %v2096_v52, %v4470_v49  ;;  %v2290_v59 = vadd.f32 %v2289_v54, %v4473_v50 }
 0x3f5   : > { %v2716_v60 = vmax.f32 %v2715_v29, %v2095_v48  ;;  %v2790_v61 = vmax.f32 %v2789_v47, %v2288_v51 }
 0x3f6   : > { %v2753_v62 = vmax.f32 %v2752_v55, %v2097_v57  ;;  %v2827_v63 = vmax.f32 %v2826_v56, %v2290_v59 }
 0x3f8   : > { %v2100_v0 = vpop.f32.mrb[108].mxu1  ;;  %v2293_v1 = vpop.f32.mrb[108].mxu0 }
 0x3f9   : > { %v2101_v2 = vadd.f32 %v2100_v0, %v4464_v58  ;;  %v2294_v5 = vadd.f32 %v2293_v1, %v4467_v31  ;;  %v2102_v45 = vpop.f32.mrb[109].mxu1  ;;  %v2295_v6 = vpop.f32.mrb[109].mxu0 }
 0x3fa   : > { %v2103_v11 = vadd.f32 %v2102_v45, %v4470_v49  ;;  %v2296_v12 = vadd.f32 %v2295_v6, %v4473_v50  ;;  %v2104_v14 = vpop.f32.mrb[110].mxu1  ;;  %v2297_v27 = vpop.f32.mrb[110].mxu0 }
 0x3fb   : > { %v2717_v17 = vmax.f32 %v2716_v60, %v2101_v2  ;;  %v2791_v18 = vmax.f32 %v2790_v61, %v2294_v5  ;;  %v2105_v19 = vadd.f32 %v2104_v14, %v4464_v58  ;;  %v2298_v20 = vadd.f32 %v2297_v27, %v4467_v31  ;;  %v2106_v13 = vpop.f32.mrb[111].mxu1  ;;  %v2299_v21 = vpop.f32.mrb[111].mxu0 }
 0x3fc   : > { %v2754_v22 = vmax.f32 %v2753_v62, %v2103_v11  ;;  %v2828_v23 = vmax.f32 %v2827_v63, %v2296_v12  ;;  %v2107_v24 = vadd.f32 %v2106_v13, %v4470_v49  ;;  %v2300_v25 = vadd.f32 %v2299_v21, %v4473_v50 }
 0x3fd   : > { %v2718_v26 = vmax.f32 %v2717_v17, %v2105_v19  ;;  %v2792_v30 = vmax.f32 %v2791_v18, %v2298_v20  ;;  %v4632_v31 = vrot.slane %v4455_v28, %v1578_v15 }
 0x3fe   : > { %v2755_v35 = vmax.f32 %v2754_v22, %v2107_v24  ;;  %v2829_v58 = vmax.f32 %v2828_v23, %v2300_v25 }
 0x3ff   : > { %v2719_v37 = vrot.slane %v2718_v26, 4  ;;  %v2793_v49 = vrot.slane %v2792_v30, 4 }
 0x400   : > { %v2756_v34 = vrot.slane %v2755_v35, 4  ;;  %v2830_v50 = vrot.slane %v2829_v58, 4  ;;  %v2336_v39 = vpop.f32.mrb[112].mxu1  ;;  %v2529_v40 = vpop.f32.mrb[112].mxu0 }
 0x401   : > { %v2720_v41 = vmax.f32 %v2718_v26, %v2719_v37  ;;  %v2794_v46 = vmax.f32 %v2792_v30, %v2793_v49  ;;  %v2337_v42 = vadd.f32 %v2336_v39, %v4626_v32  ;;  %v2530_v43 = vadd.f32 %v2529_v40, %v4629_v33  ;;  %v2338_v53 = vpop.f32.mrb[113].mxu1  ;;  %v2531_v44 = vpop.f32.mrb[113].mxu0 }
 0x402   : > { %v2757_v8 = vmax.f32 %v2755_v35, %v2756_v34  ;;  %v2831_v38 = vmax.f32 %v2829_v58, %v2830_v50  ;;  %v2339_v3 = vadd.f32 %v2338_v53, %v4632_v31  ;;  %v2532_v28 = vadd.f32 %v2531_v44, %v4635_v36  ;;  %v2340_v4 = vpop.f32.mrb[114].mxu1  ;;  %v2533_v29 = vpop.f32.mrb[114].mxu0 }
 0x403   : > { %v2721_v47 = vrot.slane %v2720_v41, 2  ;;  %v2795_v48 = vrot.slane %v2794_v46, 2  ;;  %v2341_v51 = vadd.f32 %v2340_v4, %v4626_v32  ;;  %v2534_v52 = vadd.f32 %v2533_v29, %v4629_v33  ;;  %v2342_v54 = vpop.f32.mrb[115].mxu1  ;;  %v2535_v55 = vpop.f32.mrb[115].mxu0 }
 0x404   : > { %v2758_v56 = vrot.slane %v2757_v8, 2  ;;  %v2832_v57 = vrot.slane %v2831_v38, 2  ;;  %v2343_v59 = vadd.f32 %v2342_v54, %v4632_v31  ;;  %v2536_v60 = vadd.f32 %v2535_v55, %v4635_v36 }
 0x405   : > { %v2722_v61 = vmax.f32 %v2720_v41, %v2721_v47  ;;  %v2796_v62 = vmax.f32 %v2794_v46, %v2795_v48  ;;  %v2836_v63 = vmax.f32 %v2337_v42, %v2341_v51  ;;  %v2910_v0 = vmax.f32 %v2530_v43, %v2534_v52 }
 0x406   : > { %v2759_v1 = vmax.f32 %v2757_v8, %v2758_v56  ;;  %v2833_v2 = vmax.f32 %v2831_v38, %v2832_v57  ;;  %v2873_v5 = vmax.f32 %v2339_v3, %v2343_v59  ;;  %v2947_v45 = vmax.f32 %v2532_v28, %v2536_v60 }
 0x407   : > { %v2723_v6 = vrot.slane %v2722_v61, 1  ;;  %v2797_v9 = vrot.slane %v2796_v62, 1 }
 0x408   : > { %v2760_v10 = vrot.slane %v2759_v1, 1  ;;  %v2834_v11 = vrot.slane %v2833_v2, 1  ;;  %v2346_v12 = vpop.f32.mrb[116].mxu1  ;;  %v2539_v14 = vpop.f32.mrb[116].mxu0 }
 0x409   : > { %v4645_v27 = vmax.f32 %v2722_v61, %v2723_v6  ;;  %v4647_v15 = vmax.f32 %v2796_v62, %v2797_v9  ;;  %v2347_v16 = vadd.f32 %v2346_v12, %v4626_v32  ;;  %v2540_v17 = vadd.f32 %v2539_v14, %v4629_v33  ;;  %v2348_v18 = vpop.f32.mrb[117].mxu1  ;;  %v2541_v19 = vpop.f32.mrb[117].mxu0 }
 0x40a   : > { %v4651_v20 = vmax.f32 %v2759_v1, %v2760_v10  ;;  %v4653_v13 = vmax.f32 %v2833_v2, %v2834_v11  ;;  %v2349_v21 = vadd.f32 %v2348_v18, %v4632_v31  ;;  %v2542_v22 = vadd.f32 %v2541_v19, %v4635_v36  ;;  %v2350_v23 = vpop.f32.mrb[118].mxu1  ;;  %v2543_v24 = vpop.f32.mrb[118].mxu0 }
 0x40b   : > { %v2837_v25 = vmax.f32 %v2836_v63, %v2347_v16  ;;  %v2911_v26 = vmax.f32 %v2910_v0, %v2540_v17  ;;  %v2351_v30 = vadd.f32 %v2350_v23, %v4626_v32  ;;  %v2544_v35 = vadd.f32 %v2543_v24, %v4629_v33  ;;  %v2352_v58 = vpop.f32.mrb[119].mxu1  ;;  %v2545_v37 = vpop.f32.mrb[119].mxu0 }
 0x40c   : > { %v2874_v49 = vmax.f32 %v2873_v5, %v2349_v21  ;;  %v2948_v34 = vmax.f32 %v2947_v45, %v2542_v22  ;;  %v2353_v50 = vadd.f32 %v2352_v58, %v4632_v31  ;;  %v2546_v39 = vadd.f32 %v2545_v37, %v4635_v36 }
 0x40d   : > { %v2838_v40 = vmax.f32 %v2837_v25, %v2351_v30  ;;  %v2912_v41 = vmax.f32 %v2911_v26, %v2544_v35 }
 0x40e   : > { %v2875_v46 = vmax.f32 %v2874_v49, %v2353_v50  ;;  %v2949_v42 = vmax.f32 %v2948_v34, %v2546_v39 }
 0x410   : > { %v2356_v43 = vpop.f32.mrb[120].mxu1  ;;  %v2549_v53 = vpop.f32.mrb[120].mxu0 }
 0x411   : > { %v2357_v44 = vadd.f32 %v2356_v43, %v4626_v32  ;;  %v2550_v8 = vadd.f32 %v2549_v53, %v4629_v33  ;;  %v2358_v38 = vpop.f32.mrb[121].mxu1  ;;  %v2551_v3 = vpop.f32.mrb[121].mxu0 }
 0x412   : > { %v2359_v28 = vadd.f32 %v2358_v38, %v4632_v31  ;;  %v2552_v4 = vadd.f32 %v2551_v3, %v4635_v36  ;;  %v2360_v29 = vpop.f32.mrb[122].mxu1  ;;  %v2553_v47 = vpop.f32.mrb[122].mxu0 }
 0x413   : > { %v2839_v48 = vmax.f32 %v2838_v40, %v2357_v44  ;;  %v2913_v51 = vmax.f32 %v2912_v41, %v2550_v8  ;;  %v2361_v52 = vadd.f32 %v2360_v29, %v4626_v32  ;;  %v2554_v54 = vadd.f32 %v2553_v47, %v4629_v33  ;;  %v2362_v55 = vpop.f32.mrb[123].mxu1  ;;  %v2555_v56 = vpop.f32.mrb[123].mxu0 }
 0x414   : > { %v2876_v57 = vmax.f32 %v2875_v46, %v2359_v28  ;;  %v2950_v59 = vmax.f32 %v2949_v42, %v2552_v4  ;;  %v2363_v60 = vadd.f32 %v2362_v55, %v4632_v31  ;;  %v2556_v61 = vadd.f32 %v2555_v56, %v4635_v36 }
 0x415   : > { %v2840_v62 = vmax.f32 %v2839_v48, %v2361_v52  ;;  %v2914_v63 = vmax.f32 %v2913_v51, %v2554_v54 }
 0x416   : > { %v2877_v0 = vmax.f32 %v2876_v57, %v2363_v60  ;;  %v2951_v1 = vmax.f32 %v2950_v59, %v2556_v61 }
 0x418   : > { %v2366_v2 = vpop.f32.mrb[124].mxu1  ;;  %v2559_v5 = vpop.f32.mrb[124].mxu0 }
 0x419   : > { %v2367_v45 = vadd.f32 %v2366_v2, %v4626_v32  ;;  %v2560_v6 = vadd.f32 %v2559_v5, %v4629_v33  ;;  %v2368_v9 = vpop.f32.mrb[125].mxu1  ;;  %v2561_v10 = vpop.f32.mrb[125].mxu0 }
 0x41a   : > { %v2369_v11 = vadd.f32 %v2368_v9, %v4632_v31  ;;  %v2562_v12 = vadd.f32 %v2561_v10, %v4635_v36  ;;  %v2370_v14 = vpop.f32.mrb[126].mxu1  ;;  %v2563_v16 = vpop.f32.mrb[126].mxu0 }
 0x41b   : > { %v2841_v17 = vmax.f32 %v2840_v62, %v2367_v45  ;;  %v2915_v18 = vmax.f32 %v2914_v63, %v2560_v6  ;;  %v2371_v19 = vadd.f32 %v2370_v14, %v4626_v32  ;;  %v2564_v21 = vadd.f32 %v2563_v16, %v4629_v33  ;;  %v2372_v22 = vpop.f32.mrb[127].mxu1  ;;  %v2565_v23 = vpop.f32.mrb[127].mxu0 }
 0x41c   : > { %v2878_v24 = vmax.f32 %v2877_v0, %v2369_v11  ;;  %v2952_v25 = vmax.f32 %v2951_v1, %v2562_v12  ;;  %v2373_v26 = vadd.f32 %v2372_v22, %v4632_v31  ;;  %v2566_v30 = vadd.f32 %v2565_v23, %v4635_v36 }
 0x41d   : > { %v2842_v35 = vmax.f32 %v2841_v17, %v2371_v19  ;;  %v2916_v58 = vmax.f32 %v2915_v18, %v2564_v21 }
 0x41e   : > { %v2879_v37 = vmax.f32 %v2878_v24, %v2373_v26  ;;  %v2953_v49 = vmax.f32 %v2952_v25, %v2566_v30 }
 0x420   : > { %v2376_v34 = vpop.f32.mrb[128].mxu1  ;;  %v2569_v50 = vpop.f32.mrb[128].mxu0 }
 0x421   : > { %v2377_v39 = vadd.f32 %v2376_v34, %v4626_v32  ;;  %v2570_v40 = vadd.f32 %v2569_v50, %v4629_v33  ;;  %v2378_v41 = vpop.f32.mrb[129].mxu1  ;;  %v2571_v46 = vpop.f32.mrb[129].mxu0 }
 0x422   : > { %v2379_v42 = vadd.f32 %v2378_v41, %v4632_v31  ;;  %v2572_v43 = vadd.f32 %v2571_v46, %v4635_v36  ;;  %v2380_v53 = vpop.f32.mrb[130].mxu1  ;;  %v2573_v44 = vpop.f32.mrb[130].mxu0 }
 0x423   : > { %v2843_v8 = vmax.f32 %v2842_v35, %v2377_v39  ;;  %v2917_v38 = vmax.f32 %v2916_v58, %v2570_v40  ;;  %v2381_v3 = vadd.f32 %v2380_v53, %v4626_v32  ;;  %v2574_v28 = vadd.f32 %v2573_v44, %v4629_v33  ;;  %v2382_v4 = vpop.f32.mrb[131].mxu1  ;;  %v2575_v29 = vpop.f32.mrb[131].mxu0 }
 0x424   : > { %v2880_v47 = vmax.f32 %v2879_v37, %v2379_v42  ;;  %v2954_v48 = vmax.f32 %v2953_v49, %v2572_v43  ;;  %v2383_v51 = vadd.f32 %v2382_v4, %v4632_v31  ;;  %v2576_v52 = vadd.f32 %v2575_v29, %v4635_v36 }
 0x425   : > { %v2844_v54 = vmax.f32 %v2843_v8, %v2381_v3  ;;  %v2918_v55 = vmax.f32 %v2917_v38, %v2574_v28 }
 0x426   : > { %v2881_v56 = vmax.f32 %v2880_v47, %v2383_v51  ;;  %v2955_v57 = vmax.f32 %v2954_v48, %v2576_v52 }
 0x428   : > { %v2386_v59 = vpop.f32.mrb[132].mxu1  ;;  %v2579_v60 = vpop.f32.mrb[132].mxu0 }
 0x429   : > { %v2387_v61 = vadd.f32 %v2386_v59, %v4626_v32  ;;  %v2580_v62 = vadd.f32 %v2579_v60, %v4629_v33  ;;  %v2388_v63 = vpop.f32.mrb[133].mxu1  ;;  %v2581_v0 = vpop.f32.mrb[133].mxu0 }
 0x42a   : > { %v2389_v1 = vadd.f32 %v2388_v63, %v4632_v31  ;;  %v2582_v2 = vadd.f32 %v2581_v0, %v4635_v36  ;;  %v2390_v5 = vpop.f32.mrb[134].mxu1  ;;  %v2583_v45 = vpop.f32.mrb[134].mxu0 }
 0x42b   : > { %v2845_v6 = vmax.f32 %v2844_v54, %v2387_v61  ;;  %v2919_v9 = vmax.f32 %v2918_v55, %v2580_v62  ;;  %v2391_v10 = vadd.f32 %v2390_v5, %v4626_v32  ;;  %v2584_v11 = vadd.f32 %v2583_v45, %v4629_v33  ;;  %v2392_v12 = vpop.f32.mrb[135].mxu1  ;;  %v2585_v14 = vpop.f32.mrb[135].mxu0 }
 0x42c   : > { %v2882_v16 = vmax.f32 %v2881_v56, %v2389_v1  ;;  %v2956_v17 = vmax.f32 %v2955_v57, %v2582_v2  ;;  %v2393_v18 = vadd.f32 %v2392_v12, %v4632_v31  ;;  %v2586_v19 = vadd.f32 %v2585_v14, %v4635_v36 }
 0x42d   : > { %v2846_v21 = vmax.f32 %v2845_v6, %v2391_v10  ;;  %v2920_v22 = vmax.f32 %v2919_v9, %v2584_v11 }
 0x42e   : > { %v2883_v23 = vmax.f32 %v2882_v16, %v2393_v18  ;;  %v2957_v24 = vmax.f32 %v2956_v17, %v2586_v19 }
 0x430   : > { %v2396_v25 = vpop.f32.mrb[136].mxu1  ;;  %v2589_v26 = vpop.f32.mrb[136].mxu0 }
 0x431   : > { %v2397_v30 = vadd.f32 %v2396_v25, %v4626_v32  ;;  %v2590_v35 = vadd.f32 %v2589_v26, %v4629_v33  ;;  %v2398_v58 = vpop.f32.mrb[137].mxu1  ;;  %v2591_v37 = vpop.f32.mrb[137].mxu0 }
 0x432   : > { %v2399_v49 = vadd.f32 %v2398_v58, %v4632_v31  ;;  %v2592_v34 = vadd.f32 %v2591_v37, %v4635_v36  ;;  %v2400_v50 = vpop.f32.mrb[138].mxu1  ;;  %v2593_v39 = vpop.f32.mrb[138].mxu0 }
 0x433   : > { %v2847_v40 = vmax.f32 %v2846_v21, %v2397_v30  ;;  %v2921_v41 = vmax.f32 %v2920_v22, %v2590_v35  ;;  %v2401_v46 = vadd.f32 %v2400_v50, %v4626_v32  ;;  %v2594_v42 = vadd.f32 %v2593_v39, %v4629_v33  ;;  %v2402_v43 = vpop.f32.mrb[139].mxu1  ;;  %v2595_v53 = vpop.f32.mrb[139].mxu0 }
 0x434   : > { %v2884_v44 = vmax.f32 %v2883_v23, %v2399_v49  ;;  %v2958_v8 = vmax.f32 %v2957_v24, %v2592_v34  ;;  %v2403_v38 = vadd.f32 %v2402_v43, %v4632_v31  ;;  %v2596_v3 = vadd.f32 %v2595_v53, %v4635_v36 }
 0x435   : > { %v2848_v28 = vmax.f32 %v2847_v40, %v2401_v46  ;;  %v2922_v4 = vmax.f32 %v2921_v41, %v2594_v42 }
 0x436   : > { %v2885_v29 = vmax.f32 %v2884_v44, %v2403_v38  ;;  %v2959_v47 = vmax.f32 %v2958_v8, %v2596_v3 }
 0x438   : > { %v2406_v48 = vpop.f32.mrb[140].mxu1  ;;  %v2599_v51 = vpop.f32.mrb[140].mxu0 }
 0x439   : > { %v2407_v52 = vadd.f32 %v2406_v48, %v4626_v32  ;;  %v2600_v54 = vadd.f32 %v2599_v51, %v4629_v33  ;;  %v2408_v55 = vpop.f32.mrb[141].mxu1  ;;  %v2601_v56 = vpop.f32.mrb[141].mxu0 }
 0x43a   : > { %v2409_v57 = vadd.f32 %v2408_v55, %v4632_v31  ;;  %v2602_v59 = vadd.f32 %v2601_v56, %v4635_v36  ;;  %v2410_v60 = vpop.f32.mrb[142].mxu1  ;;  %v2603_v61 = vpop.f32.mrb[142].mxu0 }
 0x43b   : > { %v2849_v62 = vmax.f32 %v2848_v28, %v2407_v52  ;;  %v2923_v63 = vmax.f32 %v2922_v4, %v2600_v54  ;;  %v2411_v0 = vadd.f32 %v2410_v60, %v4626_v32  ;;  %v2604_v1 = vadd.f32 %v2603_v61, %v4629_v33  ;;  %v2412_v2 = vpop.f32.mrb[143].mxu1  ;;  %v2605_v5 = vpop.f32.mrb[143].mxu0 }
 0x43c   : > { %v2886_v45 = vmax.f32 %v2885_v29, %v2409_v57  ;;  %v2960_v6 = vmax.f32 %v2959_v47, %v2602_v59  ;;  %v2413_v9 = vadd.f32 %v2412_v2, %v4632_v31  ;;  %v2606_v10 = vadd.f32 %v2605_v5, %v4635_v36 }
 0x43d   : > { %v2850_v11 = vmax.f32 %v2849_v62, %v2411_v0  ;;  %v2924_v12 = vmax.f32 %v2923_v63, %v2604_v1 }
 0x43e   : > { %v2887_v14 = vmax.f32 %v2886_v45, %v2413_v9  ;;  %v2961_v16 = vmax.f32 %v2960_v6, %v2606_v10 }
 0x440   : > { %v2416_v17 = vpop.f32.mrb[144].mxu1  ;;  %v2609_v18 = vpop.f32.mrb[144].mxu0 }
 0x441   : > { %v2417_v19 = vadd.f32 %v2416_v17, %v4626_v32  ;;  %v2610_v21 = vadd.f32 %v2609_v18, %v4629_v33  ;;  %v2418_v22 = vpop.f32.mrb[145].mxu1  ;;  %v2611_v23 = vpop.f32.mrb[145].mxu0 }
 0x442   : > { %v2419_v24 = vadd.f32 %v2418_v22, %v4632_v31  ;;  %v2612_v25 = vadd.f32 %v2611_v23, %v4635_v36  ;;  %v2420_v26 = vpop.f32.mrb[146].mxu1  ;;  %v2613_v30 = vpop.f32.mrb[146].mxu0 }
 0x443   : > { %v2851_v35 = vmax.f32 %v2850_v11, %v2417_v19  ;;  %v2925_v58 = vmax.f32 %v2924_v12, %v2610_v21  ;;  %v2421_v37 = vadd.f32 %v2420_v26, %v4626_v32  ;;  %v2614_v49 = vadd.f32 %v2613_v30, %v4629_v33  ;;  %v2422_v34 = vpop.f32.mrb[147].mxu1  ;;  %v2615_v50 = vpop.f32.mrb[147].mxu0 }
 0x444   : > { %v2888_v39 = vmax.f32 %v2887_v14, %v2419_v24  ;;  %v2962_v40 = vmax.f32 %v2961_v16, %v2612_v25  ;;  %v2423_v41 = vadd.f32 %v2422_v34, %v4632_v31  ;;  %v2616_v46 = vadd.f32 %v2615_v50, %v4635_v36 }
 0x445   : > { %v2852_v42 = vmax.f32 %v2851_v35, %v2421_v37  ;;  %v2926_v43 = vmax.f32 %v2925_v58, %v2614_v49 }
 0x446   : > { %v2889_v53 = vmax.f32 %v2888_v39, %v2423_v41  ;;  %v2963_v44 = vmax.f32 %v2962_v40, %v2616_v46 }
 0x448   : > { %v2426_v8 = vpop.f32.mrb[148].mxu1  ;;  %v2619_v38 = vpop.f32.mrb[148].mxu0 }
 0x449   : > { %v2427_v3 = vadd.f32 %v2426_v8, %v4626_v32  ;;  %v2620_v28 = vadd.f32 %v2619_v38, %v4629_v33  ;;  %v2428_v4 = vpop.f32.mrb[149].mxu1  ;;  %v2621_v29 = vpop.f32.mrb[149].mxu0 }
 0x44a   : > { %v2429_v47 = vadd.f32 %v2428_v4, %v4632_v31  ;;  %v2622_v48 = vadd.f32 %v2621_v29, %v4635_v36  ;;  %v2430_v51 = vpop.f32.mrb[150].mxu1  ;;  %v2623_v52 = vpop.f32.mrb[150].mxu0 }
 0x44b   : > { %v2853_v54 = vmax.f32 %v2852_v42, %v2427_v3  ;;  %v2927_v55 = vmax.f32 %v2926_v43, %v2620_v28  ;;  %v2431_v56 = vadd.f32 %v2430_v51, %v4626_v32  ;;  %v2624_v57 = vadd.f32 %v2623_v52, %v4629_v33  ;;  %v2432_v59 = vpop.f32.mrb[151].mxu1  ;;  %v2625_v60 = vpop.f32.mrb[151].mxu0 }
 0x44c   : > { %v2890_v61 = vmax.f32 %v2889_v53, %v2429_v47  ;;  %v2964_v62 = vmax.f32 %v2963_v44, %v2622_v48  ;;  %v2433_v63 = vadd.f32 %v2432_v59, %v4632_v31  ;;  %v2626_v0 = vadd.f32 %v2625_v60, %v4635_v36 }
 0x44d   : > { %v2854_v1 = vmax.f32 %v2853_v54, %v2431_v56  ;;  %v2928_v2 = vmax.f32 %v2927_v55, %v2624_v57 }
 0x44e   : > { %v2891_v5 = vmax.f32 %v2890_v61, %v2433_v63  ;;  %v2965_v45 = vmax.f32 %v2964_v62, %v2626_v0 }
 0x450   : > { %v2436_v6 = vpop.f32.mrb[152].mxu1  ;;  %v2629_v9 = vpop.f32.mrb[152].mxu0 }
 0x451   : > { %v2437_v10 = vadd.f32 %v2436_v6, %v4626_v32  ;;  %v2630_v11 = vadd.f32 %v2629_v9, %v4629_v33  ;;  %v2438_v12 = vpop.f32.mrb[153].mxu1  ;;  %v2631_v14 = vpop.f32.mrb[153].mxu0 }
 0x452   : > { %v2439_v16 = vadd.f32 %v2438_v12, %v4632_v31  ;;  %v2632_v17 = vadd.f32 %v2631_v14, %v4635_v36  ;;  %v2440_v18 = vpop.f32.mrb[154].mxu1  ;;  %v2633_v19 = vpop.f32.mrb[154].mxu0 }
 0x453   : > { %v2855_v21 = vmax.f32 %v2854_v1, %v2437_v10  ;;  %v2929_v22 = vmax.f32 %v2928_v2, %v2630_v11  ;;  %v2441_v23 = vadd.f32 %v2440_v18, %v4626_v32  ;;  %v2634_v24 = vadd.f32 %v2633_v19, %v4629_v33  ;;  %v2442_v25 = vpop.f32.mrb[155].mxu1  ;;  %v2635_v26 = vpop.f32.mrb[155].mxu0 }
 0x454   : > { %v2892_v30 = vmax.f32 %v2891_v5, %v2439_v16  ;;  %v2966_v35 = vmax.f32 %v2965_v45, %v2632_v17  ;;  %v2443_v58 = vadd.f32 %v2442_v25, %v4632_v31  ;;  %v2636_v37 = vadd.f32 %v2635_v26, %v4635_v36 }
 0x455   : > { %v2856_v49 = vmax.f32 %v2855_v21, %v2441_v23  ;;  %v2930_v34 = vmax.f32 %v2929_v22, %v2634_v24 }
 0x456   : > { %v2893_v50 = vmax.f32 %v2892_v30, %v2443_v58  ;;  %v2967_v39 = vmax.f32 %v2966_v35, %v2636_v37 }
 0x458   : > { %v2446_v40 = vpop.f32.mrb[156].mxu1  ;;  %v2639_v41 = vpop.f32.mrb[156].mxu0 }
 0x459   : > { %v2447_v46 = vadd.f32 %v2446_v40, %v4626_v32  ;;  %v2640_v42 = vadd.f32 %v2639_v41, %v4629_v33  ;;  %v2448_v43 = vpop.f32.mrb[157].mxu1  ;;  %v2641_v53 = vpop.f32.mrb[157].mxu0 }
 0x45a   : > { %v2449_v44 = vadd.f32 %v2448_v43, %v4632_v31  ;;  %v2642_v8 = vadd.f32 %v2641_v53, %v4635_v36  ;;  %v2450_v38 = vpop.f32.mrb[158].mxu1  ;;  %v2643_v3 = vpop.f32.mrb[158].mxu0 }
 0x45b   : > { %v2857_v28 = vmax.f32 %v2856_v49, %v2447_v46  ;;  %v2931_v4 = vmax.f32 %v2930_v34, %v2640_v42  ;;  %v2451_v29 = vadd.f32 %v2450_v38, %v4626_v32  ;;  %v2644_v47 = vadd.f32 %v2643_v3, %v4629_v33  ;;  %v2452_v48 = vpop.f32.mrb[159].mxu1  ;;  %v2645_v51 = vpop.f32.mrb[159].mxu0 }
 0x45c   : > { %v2894_v52 = vmax.f32 %v2893_v50, %v2449_v44  ;;  %v2968_v54 = vmax.f32 %v2967_v39, %v2642_v8  ;;  %v2453_v55 = vadd.f32 %v2452_v48, %v4632_v31  ;;  %v2646_v56 = vadd.f32 %v2645_v51, %v4635_v36 }
 0x45d   : > { %v2858_v57 = vmax.f32 %v2857_v28, %v2451_v29  ;;  %v2932_v59 = vmax.f32 %v2931_v4, %v2644_v47 }
 0x45e   : > { %v2895_v60 = vmax.f32 %v2894_v52, %v2453_v55  ;;  %v2969_v61 = vmax.f32 %v2968_v54, %v2646_v56 }
 0x460   : > { %v2456_v62 = vpop.f32.mrb[160].mxu1  ;;  %v2649_v63 = vpop.f32.mrb[160].mxu0 }
 0x461   : > { %v2457_v0 = vadd.f32 %v2456_v62, %v4626_v32  ;;  %v2650_v1 = vadd.f32 %v2649_v63, %v4629_v33  ;;  %v2458_v2 = vpop.f32.mrb[161].mxu1  ;;  %v2651_v5 = vpop.f32.mrb[161].mxu0 }
 0x462   : > { %v2459_v45 = vadd.f32 %v2458_v2, %v4632_v31  ;;  %v2652_v6 = vadd.f32 %v2651_v5, %v4635_v36  ;;  %v2460_v9 = vpop.f32.mrb[162].mxu1  ;;  %v2653_v10 = vpop.f32.mrb[162].mxu0 }
 0x463   : > { %v2859_v11 = vmax.f32 %v2858_v57, %v2457_v0  ;;  %v2933_v12 = vmax.f32 %v2932_v59, %v2650_v1  ;;  %v2461_v14 = vadd.f32 %v2460_v9, %v4626_v32  ;;  %v2654_v16 = vadd.f32 %v2653_v10, %v4629_v33  ;;  %v2462_v17 = vpop.f32.mrb[163].mxu1  ;;  %v2655_v18 = vpop.f32.mrb[163].mxu0 }
 0x464   : > { %v2896_v19 = vmax.f32 %v2895_v60, %v2459_v45  ;;  %v2970_v21 = vmax.f32 %v2969_v61, %v2652_v6  ;;  %v2463_v22 = vadd.f32 %v2462_v17, %v4632_v31  ;;  %v2656_v23 = vadd.f32 %v2655_v18, %v4635_v36 }
 0x465   : > { %v2860_v24 = vmax.f32 %v2859_v11, %v2461_v14  ;;  %v2934_v25 = vmax.f32 %v2933_v12, %v2654_v16 }
 0x466   : > { %v2897_v26 = vmax.f32 %v2896_v19, %v2463_v22  ;;  %v2971_v30 = vmax.f32 %v2970_v21, %v2656_v23 }
 0x468   : > { %v2466_v35 = vpop.f32.mrb[164].mxu1  ;;  %v2659_v58 = vpop.f32.mrb[164].mxu0 }
 0x469   : > { %v2467_v37 = vadd.f32 %v2466_v35, %v4626_v32  ;;  %v2660_v49 = vadd.f32 %v2659_v58, %v4629_v33  ;;  %v2468_v34 = vpop.f32.mrb[165].mxu1  ;;  %v2661_v50 = vpop.f32.mrb[165].mxu0 }
 0x46a   : > { %v2469_v39 = vadd.f32 %v2468_v34, %v4632_v31  ;;  %v2662_v40 = vadd.f32 %v2661_v50, %v4635_v36  ;;  %v2470_v41 = vpop.f32.mrb[166].mxu1  ;;  %v2663_v46 = vpop.f32.mrb[166].mxu0 }
 0x46b   : > { %v2861_v42 = vmax.f32 %v2860_v24, %v2467_v37  ;;  %v2935_v43 = vmax.f32 %v2934_v25, %v2660_v49  ;;  %v2471_v53 = vadd.f32 %v2470_v41, %v4626_v32  ;;  %v2664_v44 = vadd.f32 %v2663_v46, %v4629_v33  ;;  %v2472_v8 = vpop.f32.mrb[167].mxu1  ;;  %v2665_v38 = vpop.f32.mrb[167].mxu0 }
 0x46c   : > { %v2898_v3 = vmax.f32 %v2897_v26, %v2469_v39  ;;  %v2972_v28 = vmax.f32 %v2971_v30, %v2662_v40  ;;  %v2473_v4 = vadd.f32 %v2472_v8, %v4632_v31  ;;  %v2666_v29 = vadd.f32 %v2665_v38, %v4635_v36 }
 0x46d   : > { %v2862_v47 = vmax.f32 %v2861_v42, %v2471_v53  ;;  %v2936_v48 = vmax.f32 %v2935_v43, %v2664_v44 }
 0x46e   : > { %v2899_v51 = vmax.f32 %v2898_v3, %v2473_v4  ;;  %v2973_v52 = vmax.f32 %v2972_v28, %v2666_v29 }
 0x470   : > { %v2476_v54 = vpop.f32.mrb[168].mxu1  ;;  %v2669_v55 = vpop.f32.mrb[168].mxu0 }
 0x471   : > { %v2477_v56 = vadd.f32 %v2476_v54, %v4626_v32  ;;  %v2670_v57 = vadd.f32 %v2669_v55, %v4629_v33  ;;  %v2478_v59 = vpop.f32.mrb[169].mxu1  ;;  %v2671_v60 = vpop.f32.mrb[169].mxu0 }
 0x472   : > { %v2479_v61 = vadd.f32 %v2478_v59, %v4632_v31  ;;  %v2672_v62 = vadd.f32 %v2671_v60, %v4635_v36  ;;  %v2480_v63 = vpop.f32.mrb[170].mxu1  ;;  %v2673_v0 = vpop.f32.mrb[170].mxu0 }
 0x473   : > { %v2863_v1 = vmax.f32 %v2862_v47, %v2477_v56  ;;  %v2937_v2 = vmax.f32 %v2936_v48, %v2670_v57  ;;  %v2481_v5 = vadd.f32 %v2480_v63, %v4626_v32  ;;  %v2674_v45 = vadd.f32 %v2673_v0, %v4629_v33  ;;  %v2482_v6 = vpop.f32.mrb[171].mxu1  ;;  %v2675_v9 = vpop.f32.mrb[171].mxu0 }
 0x474   : > { %v2900_v10 = vmax.f32 %v2899_v51, %v2479_v61  ;;  %v2974_v11 = vmax.f32 %v2973_v52, %v2672_v62  ;;  %v2483_v12 = vadd.f32 %v2482_v6, %v4632_v31  ;;  %v2676_v14 = vadd.f32 %v2675_v9, %v4635_v36 }
 0x475   : > { %v2864_v16 = vmax.f32 %v2863_v1, %v2481_v5  ;;  %v2938_v17 = vmax.f32 %v2937_v2, %v2674_v45  ;;  %v3747_v45 = vmov (!%p3425_p7), 1966171168   ;;  %v2996_v9 = vcombine.low (!%p3425_p7), %v4645_v27, %v4651_v20 }
 0x476   : > { %v2901_v18 = vmax.f32 %v2900_v10, %v2483_v12  ;;  %v2975_v19 = vmax.f32 %v2974_v11, %v2676_v14  ;;  %v3001_v6 = vunpack.c.l.s4 (!%p3425_p7), %v3747_v45  ;;  %v2997_v10 = vcombine.low (!%p3425_p7), %v4647_v15, %v4653_v13 }
 0x478   : > { %v2486_v21 = vpop.f32.mrb[172].mxu1  ;;  %v2679_v22 = vpop.f32.mrb[172].mxu0  ;;  %v3002_v14 = vunpack.c.0.s8 (!%p3425_p7), %v3001_v6 }
 0x479   : > { %v2487_v23 = vadd.f32 %v2486_v21, %v4626_v32  ;;  %v2680_v24 = vadd.f32 %v2679_v22, %v4629_v33  ;;  %v2488_v25 = vpop.f32.mrb[173].mxu1  ;;  %v2681_v26 = vpop.f32.mrb[173].mxu0 }
 0x47a   : > { %v2489_v30 = vadd.f32 %v2488_v25, %v4632_v31  ;;  %v2682_v35 = vadd.f32 %v2681_v26, %v4635_v36  ;;  %v2490_v58 = vpop.f32.mrb[174].mxu1  ;;  %v2683_v37 = vpop.f32.mrb[174].mxu0 }
 0x47b   : > { %v2865_v49 = vmax.f32 %v2864_v16, %v2487_v23  ;;  %v2939_v34 = vmax.f32 %v2938_v17, %v2680_v24  ;;  %v2491_v50 = vadd.f32 %v2490_v58, %v4626_v32  ;;  %v2684_v39 = vadd.f32 %v2683_v37, %v4629_v33  ;;  %v2492_v40 = vpop.f32.mrb[175].mxu1  ;;  %v2685_v41 = vpop.f32.mrb[175].mxu0 }
 0x47c   : > { %v2902_v46 = vmax.f32 %v2901_v18, %v2489_v30  ;;  %v2976_v42 = vmax.f32 %v2975_v19, %v2682_v35  ;;  %v2493_v43 = vadd.f32 %v2492_v40, %v4632_v31  ;;  %v2686_v53 = vadd.f32 %v2685_v41, %v4635_v36 }
 0x47d   : > { %v2866_v44 = vmax.f32 %v2865_v49, %v2491_v50  ;;  %v2940_v8 = vmax.f32 %v2939_v34, %v2684_v39  ;;  %v3005_v16 = vsub.s32 (!%p3425_p7), %v3002_v14, %v4448_v7 }
 0x47e   : > { %v2903_v38 = vmax.f32 %v2902_v46, %v2493_v43  ;;  %v2977_v3 = vmax.f32 %v2976_v42, %v2686_v53 }
 0x47f   : > { %v2867_v28 = vrot.slane %v2866_v44, 4  ;;  %v2941_v4 = vrot.slane %v2940_v8, 4  ;;  %v3006_v17 = vrot.slane (!%p3425_p7), %v2996_v9, %v3005_v16  ;;  %v3013_v18 = vrot.slane (!%p3425_p7), %v2997_v10, %v3005_v16 }
 0x480   : > { %v2904_v29 = vrot.slane %v2903_v38, 4  ;;  %v2978_v47 = vrot.slane %v2977_v3, 4 }
 0x481   : > { %v2868_v48 = vmax.f32 %v2866_v44, %v2867_v28  ;;  %v2942_v32 = vmax.f32 %v2940_v8, %v2941_v4  ;;  %v3028_v22 = vcombine.low (!%p3425_p7), %v3006_v17, %v3013_v18 }
 0x482   : > { %v2905_v51 = vmax.f32 %v2903_v38, %v2904_v29  ;;  %v2979_v33 = vmax.f32 %v2977_v3, %v2978_v47 }
 0x483   : > { %v2869_v52 = vrot.slane %v2868_v48, 2  ;;  %v2943_v54 = vrot.slane %v2942_v32, 2  ;;  %v3036_v24 = vrot.slane (!%p3425_p7), %v3028_v22, %v3005_v16 }
 0x484   : > { %v2906_v55 = vrot.slane %v2905_v51, 2  ;;  %v2980_v56 = vrot.slane %v2979_v33, 2  ;;  %2987 = sbr.rel (%p3425_p7) target bundleno = 1175 (0x497), region = 56 }
 0x485   : > { %v2870_v57 = vmax.f32 %v2868_v48, %v2869_v52  ;;  %v2944_v31 = vmax.f32 %v2942_v32, %v2943_v54 }
 0x486   : > { %v2907_v59 = vmax.f32 %v2905_v51, %v2906_v55  ;;  %v2981_v36 = vmax.f32 %v2979_v33, %v2980_v56 }
 0x487   : > { %v2871_v60 = vrot.slane %v2870_v57, 1  ;;  %v2945_v61 = vrot.slane %v2944_v31, 1 }
 0x488   : > { %v2908_v62 = vrot.slane %v2907_v59, 1  ;;  %v2982_v63 = vrot.slane %v2981_v36, 1 }
 0x489   : > { %v2872_v0 = vmax.f32 %v2870_v57, %v2871_v60  ;;  %v2946_v1 = vmax.f32 %v2944_v31, %v2945_v61 }
 0x48a   : > { %v2909_v2 = vmax.f32 %v2907_v59, %v2908_v62  ;;  %v2983_v5 = vmax.f32 %v2981_v36, %v2982_v63 }
 0x48c   : > { %v2998_v11 = vcombine.low %v2872_v0, %v2909_v2  ;;  %v2999_v12 = vcombine.low %v2946_v1, %v2983_v5 }
 0x48e   : > { %v3020_v19 = vrot.slane %v2998_v11, %v3005_v16  ;;  %v3027_v21 = vrot.slane %v2999_v12, %v3005_v16 }
 0x490   : > { %v3029_v23 = vcombine.low %v3020_v19, %v3027_v21 }
 0x492   : > { %v3043_v25 = vrot.slane %v3029_v23, %v3005_v16 }
 0x494   : > { %v3044_v26 = vcombine.low %v3036_v24, %v3043_v25 }
 0x496   : > { %3046 = vst [vmem:[%s3856_s18] sm:$0xff] %v3044_v26 }
 0x497 PF: > { %p3426_p8 = scmp.le.s32.totalorder %s3727_s30, 0 }
 0x498   : > { %v3748_v30 = vmov (!%p3426_p8), 1966171168   ;;  %v3060_v58 = vcombine.low (!%p3426_p8), %v4645_v27, %v4651_v20  ;;  %v3061_v37 = vcombine.low (!%p3426_p8), %v4647_v15, %v4653_v13  ;;  %v3062_v49 = vcombine.low (!%p3426_p8), %v2872_v0, %v2909_v2 }
 0x499   : > { %3050 = sbr.rel (%p3426_p8) target bundleno = 1194 (0x4aa), region = 60  ;;  %v3065_v35 = vunpack.c.l.s4 (!%p3426_p8), %v3748_v30  ;;  %v3063_v34 = vcombine.low (!%p3426_p8), %v2946_v1, %v2983_v5 }
 0x49b   : > { %v3066_v50 = vunpack.c.0.s8 (!%p3426_p8), %v3065_v35 }
 0x49d   : > { %v3069_v39 = vsub.s32 (!%p3426_p8), %v3066_v50, %v4448_v7  ;;  %v3051_v38 = vld [vmem:[%s3856_s18] sm:$0xff] (!%p3426_p8) }
 0x49f   : > { %v3070_v40 = vrot.slane (!%p3426_p8), %v3060_v58, %v3069_v39  ;;  %v3077_v41 = vrot.slane (!%p3426_p8), %v3061_v37, %v3069_v39  ;;  %v3084_v46 = vrot.slane (!%p3426_p8), %v3062_v49, %v3069_v39  ;;  %v3091_v42 = vrot.slane (!%p3426_p8), %v3063_v34, %v3069_v39 }
 0x4a1   : > { %v3092_v43 = vcombine.low %v3070_v40, %v3077_v41  ;;  %v3093_v53 = vcombine.low %v3084_v46, %v3091_v42 }
 0x4a3   : > { %v3100_v44 = vrot.slane %v3092_v43, %v3069_v39  ;;  %v3107_v8 = vrot.slane %v3093_v53, %v3069_v39 }
 0x4a5   : > { %v3108_v3 = vcombine.low %v3100_v44, %v3107_v8 }
 0x4a7   : > { %v3110_v27 = vmax.f32 %v3051_v38, %v3108_v3 }
 0x4a9   : > { %3111 = vst [vmem:[%s3856_s18] sm:$0xff] %v3110_v27 }
 0x4aa PF: > { %s20_s13 = sadd.s32 1, %s3743_s13   ;;  %s4813_s30 = smov %s3735_s11 }
 0x4ab   : > { %p17_p9 = scmp.ge.s32.totalorder %s20_s13, 6   ;;  %s4814_s10 = smov %s3739_s12 }
 0x4ac   : > { %s4815_s11 = smov %s4818_s14  ;;  %s4816_s12 = smov %s4822_s15 }
 0x4ad   :  { %19 = sbr.rel (!%p17_p9) target bundleno = 3 (0x3), region = 105 }

// kernel: pointnet_densecls_forward.7
= control target key start
LH: loop header
LB: loop body
LE: loop exit
PB: predicated region body
PF: predicated region fallthrough
CT: control target
= control target key end

     0   :  { %s6851_s17 = smov 0   ;;  %s6853_s18 = smov 0   ;;  %s8974_s0 = inlined_call_operand.vmem [shape: bf16[2,512,64], index: 0, kind: input, shape index: {}]   ;;  %s8975_s1 = inlined_call_operand.vmem [shape: f32[2,1,1024], index: 1, kind: input, shape index: {}]   ;;  %s8976_s2 = inlined_call_operand.vmem [shape: bf16[1024,512], index: 2, kind: input, shape index: {}]   ;;  %s8977_s3 = inlined_call_operand.vmem [shape: bf16[64,512], index: 3, kind: input, shape index: {}]   ;;  %s8978_s4 = inlined_call_operand.vmem [shape: f32[1,512], index: 4, kind: input, shape index: {}]   ;;  %s8979_s5 = inlined_call_operand.vmem [shape: bf16[512,256], index: 5, kind: input, shape index: {}]   ;;  %s8980_s6 = inlined_call_operand.vmem [shape: f32[1,256], index: 6, kind: input, shape index: {}]   ;;  %s8981_s7 = inlined_call_operand.vmem [shape: bf16[256,128], index: 7, kind: input, shape index: {}]   ;;  %s8982_s8 = inlined_call_operand.vmem [shape: f32[1,128], index: 8, kind: input, shape index: {}]   ;;  %s8983_s9 = inlined_call_operand.vmem [shape: bf16[128,128], index: 9, kind: input, shape index: {}]   ;;  %s8984_s10 = inlined_call_operand.vmem [shape: f32[1,128], index: 10, kind: input, shape index: {}]   ;;  %s8985_s11 = inlined_call_operand.vmem [shape: f32[2,512,128], index: 11, kind: output, shape index: {}]  }
   0x1   :  { %s6855_s19 = smov 0   ;;  %s6857_s20 = smov 0  }
   0x2   :  { %s6859_s21 = smov 0  }
   0x3 LB: > { %s30_s22 = sadd.s32 1, %s6780_s19  ;;  %s33_s23 = sadd.s32 1, %s6784_s20  ;;  %s6788_s21 = sphi %s6859_s21, %s21_s21   ;;  %s6784_s20 = sphi %s6857_s20, %s8989_s20   ;;  %s6780_s19 = sphi %s6855_s19, %s8988_s19   ;;  %s6776_s18 = sphi %s6853_s18, %s8987_s18   ;;  %s6772_s17 = sphi %s6851_s17, %s8986_s17  }
   0x4   : > { %p31_p0 = scmp.ge.s32.totalorder %s30_s22, 2  ;;  %p5271_p1 = scmp.ge.s32.totalorder %s6788_s21, 1 }
   0x5   : > { %p367_p2 = scmp.lt.s32.totalorder %s6788_s21, 5 }
   0x6   : > { %s8991_s22 = smov (%p31_p0, %s30_s22), 0  ;;  %s8993_s23 = smov (!%p31_p0, %s33_s23), %s6784_s20 }
   0x7   : > { %p368_p3 = pnand %p5271_p1, %p367_p2  ;;  %p35_p4 = scmp.ge.s32.totalorder %s8993_s23, 2 }
   0x8   : > { %v6076_v0 = vld [vmem:[%s8976_s2 + $0x4] ss:$16 sps:$4 sm:$0xff] (!%p368_p3)   ;;  %v6078_v1 = vld [vmem:[%s8976_s2 + $0xc] ss:$16 sps:$4 sm:$0xff] (!%p368_p3)   ;;  %v6080_v2 = vld [vmem:[%s8976_s2] ss:$16 sps:$4 sm:$0xff] (!%p368_p3)   ;;  %v734_v36 = vlaneseq (!%p368_p3) }
   0x9   : > { %s8995_s23 = smov (%p35_p4, %s8993_s23), 0  ;;  %371 = sbr.rel (%p368_p3) target bundleno = 1735 (0x6c7), region = 64 }
   0xa   : > { %2062 = vmatprep.subr.bf16.mxu0 (!%p368_p3), %v6076_v0  ;;  %v6081_v3 = vld [vmem:[%s8976_s2 + $0x8] ss:$16 sps:$4 sm:$0xff] (!%p368_p3)   ;;  %2226 = vmatprep.subr.bf16.mxu1 (!%p368_p3), %v6078_v1  ;;  %v6082_v4 = vld [vmem:[%s8976_s2 + $0x24] ss:$16 sps:$4 sm:$0xff] (!%p368_p3)   ;;  %v6084_v5 = vld [vmem:[%s8976_s2 + $0x2c] ss:$16 sps:$4 sm:$0xff] (!%p368_p3)  }
   0xb   : > { %2063 = vmatpush1.bf16.msra.mxu0 (!%p368_p3), %v6080_v2  ;;  %2227 = vmatpush1.bf16.msra.mxu1 (!%p368_p3), %v6081_v3  ;;  %v6086_v6 = vld [vmem:[%s8976_s2 + $0x20] ss:$16 sps:$4 sm:$0xff] (!%p368_p3)   ;;  %v6087_v7 = vld [vmem:[%s8976_s2 + $0x28] ss:$16 sps:$4 sm:$0xff] (!%p368_p3)   ;;  %v6088_v8 = vld [vmem:[%s8976_s2 + $0x44] ss:$16 sps:$4 sm:$0xff] (!%p368_p3)  }
   0xc   : > { %2064 = vmatprep.subr.bf16.mxu0 (!%p368_p3), %v6082_v4  ;;  %2228 = vmatprep.subr.bf16.mxu1 (!%p368_p3), %v6084_v5  ;;  %v6090_v9 = vld [vmem:[%s8976_s2 + $0x4c] ss:$16 sps:$4 sm:$0xff] (!%p368_p3)   ;;  %v6092_v10 = vld [vmem:[%s8976_s2 + $0x40] ss:$16 sps:$4 sm:$0xff] (!%p368_p3)   ;;  %v6093_v11 = vld [vmem:[%s8976_s2 + $0x48] ss:$16 sps:$4 sm:$0xff] (!%p368_p3)  }
   0xd   : > { %v6094_v12 = vld [vmem:[%s8976_s2 + $0x64] ss:$16 sps:$4 sm:$0xff] (!%p368_p3)   ;;  %v6096_v13 = vld [vmem:[%s8976_s2 + $0x6c] ss:$16 sps:$4 sm:$0xff] (!%p368_p3)   ;;  %v6098_v14 = vld [vmem:[%s8976_s2 + $0x60] ss:$16 sps:$4 sm:$0xff] (!%p368_p3)  }
   0xe   : > { %v6099_v15 = vld [vmem:[%s8976_s2 + $0x68] ss:$16 sps:$4 sm:$0xff] (!%p368_p3)   ;;  %v6100_v16 = vld [vmem:[%s8976_s2 + $0x84] ss:$16 sps:$4 sm:$0xff] (!%p368_p3)   ;;  %v6102_v17 = vld [vmem:[%s8976_s2 + $0x8c] ss:$16 sps:$4 sm:$0xff] (!%p368_p3)  }
   0xf   : > { %2065 = vmatpush1.bf16.msra.mxu0 (!%p368_p3), %v6086_v6  ;;  %2229 = vmatpush1.bf16.msra.mxu1 (!%p368_p3), %v6087_v7  ;;  %v6104_v18 = vld [vmem:[%s8976_s2 + $0x80] ss:$16 sps:$4 sm:$0xff] (!%p368_p3)   ;;  %v6105_v19 = vld [vmem:[%s8976_s2 + $0x88] ss:$16 sps:$4 sm:$0xff] (!%p368_p3)   ;;  %v6106_v20 = vld [vmem:[%s8976_s2 + $0xa4] ss:$16 sps:$4 sm:$0xff] (!%p368_p3)  }
  0x10   : > { %2066 = vmatprep.subr.bf16.mxu0 %v6088_v8  ;;  %2230 = vmatprep.subr.bf16.mxu1 %v6090_v9  ;;  %v6108_v21 = vld [vmem:[%s8976_s2 + $0xac] ss:$16 sps:$4 sm:$0xff]   ;;  %v6110_v22 = vld [vmem:[%s8976_s2 + $0xa0] ss:$16 sps:$4 sm:$0xff]   ;;  %v6111_v23 = vld [vmem:[%s8976_s2 + $0xa8] ss:$16 sps:$4 sm:$0xff]  }
  0x11   : > { %v6112_v24 = vld [vmem:[%s8976_s2 + $0xc4] ss:$16 sps:$4 sm:$0xff]   ;;  %v6114_v25 = vld [vmem:[%s8976_s2 + $0xcc] ss:$16 sps:$4 sm:$0xff]   ;;  %v6116_v26 = vld [vmem:[%s8976_s2 + $0xc0] ss:$16 sps:$4 sm:$0xff]  }
  0x12   : > { %v6117_v27 = vld [vmem:[%s8976_s2 + $0xc8] ss:$16 sps:$4 sm:$0xff]   ;;  %v6118_v28 = vld [vmem:[%s8976_s2 + $0xe4] ss:$16 sps:$4 sm:$0xff]   ;;  %v6120_v29 = vld [vmem:[%s8976_s2 + $0xec] ss:$16 sps:$4 sm:$0xff]  }
  0x13   : > { %2067 = vmatpush1.bf16.msra.mxu0 %v6092_v10  ;;  %2231 = vmatpush1.bf16.msra.mxu1 %v6093_v11  ;;  %v6122_v30 = vld [vmem:[%s8976_s2 + $0xe0] ss:$16 sps:$4 sm:$0xff]   ;;  %v6123_v31 = vld [vmem:[%s8976_s2 + $0xe8] ss:$16 sps:$4 sm:$0xff]   ;;  %v6124_v32 = vld [vmem:[%s8976_s2 + $0x104] ss:$16 sps:$4 sm:$0xff]  }
  0x14   : > { %2068 = vmatprep.subr.bf16.mxu0 %v6094_v12  ;;  %2232 = vmatprep.subr.bf16.mxu1 %v6096_v13  ;;  %p420_p5 = scmp.lt.s32.totalorder %s6776_s18, 1  ;;  %v6126_v33 = vld [vmem:[%s8976_s2 + $0x10c] ss:$16 sps:$4 sm:$0xff]   ;;  %v6128_v34 = vld [vmem:[%s8976_s2 + $0x100] ss:$16 sps:$4 sm:$0xff]   ;;  %v7006_v40 = vshrl.u32 %v734_v36, 7 }
  0x15   : > { %v6129_v35 = vld [vmem:[%s8976_s2 + $0x108] ss:$16 sps:$4 sm:$0xff]   ;;  %v6130_v37 = vld [vmem:[%s8976_s2 + $0x124] ss:$16 sps:$4 sm:$0xff]   ;;  %v6132_v38 = vld [vmem:[%s8976_s2 + $0x12c] ss:$16 sps:$4 sm:$0xff]  }
  0x16   : > { %s8997_s18 = smov (!%p420_p5, %s6776_s18), 1  ;;  %v6134_v39 = vld [vmem:[%s8976_s2 + $0x120] ss:$16 sps:$4 sm:$0xff]   ;;  %v6135_v41 = vld [vmem:[%s8976_s2 + $0x128] ss:$16 sps:$4 sm:$0xff]   ;;  %v7030_v46 = vsub.s32 1, %v7006_v40 }
  0x17   : > { %2069 = vmatpush1.bf16.msra.mxu0 %v6098_v14  ;;  %2233 = vmatpush1.bf16.msra.mxu1 %v6099_v15  ;;  %v6136_v42 = vld [vmem:[%s8976_s2 + $0x144] ss:$16 sps:$4 sm:$0xff]   ;;  %s5275_s15 = sshll.u32 %s8997_s18, 3  ;;  %v6138_v43 = vld [vmem:[%s8976_s2 + $0x14c] ss:$16 sps:$4 sm:$0xff]   ;;  %v748_v53 = vsub.s32 3, %v7006_v40 }
  0x18   : > { %2070 = vmatprep.subr.bf16.mxu0 %v6100_v16  ;;  %2234 = vmatprep.subr.bf16.mxu1 %v6102_v17  ;;  %v6140_v44 = vld [vmem:[%s8976_s2 + $0x140] ss:$16 sps:$4 sm:$0xff]   ;;  %v6141_v45 = vld [vmem:[%s8976_s2 + $0x148] ss:$16 sps:$4 sm:$0xff]   ;;  %s7027_s12 = scalar_lea.vmem %s8975_s1, %s5275_s15  ;;  %v6142_v47 = vld [vmem:[%s8976_s2 + $0x164] ss:$16 sps:$4 sm:$0xff]  }
  0x19   : > { %v6144_v48 = vld [vmem:[%s8976_s2 + $0x16c] ss:$16 sps:$4 sm:$0xff]   ;;  %v7039_v49 = vld [vmem:[%s7027_s12] sm:$0xff]  ;;  %v6147_v51 = vld [vmem:[%s8976_s2 + $0x168] ss:$16 sps:$4 sm:$0xff]   ;;  %v744_v56 = vsub.s32 2, %v7006_v40 }
  0x1a   : > { %v6146_v50 = vld [vmem:[%s8976_s2 + $0x160] ss:$16 sps:$4 sm:$0xff]   ;;  %v741_v52 = vrot.slane %v7039_v49, %v7030_v46  ;;  %v6148_v54 = vld [vmem:[%s8976_s2 + $0x184] ss:$16 sps:$4 sm:$0xff]   ;;  %v6150_v55 = vld [vmem:[%s8976_s2 + $0x18c] ss:$16 sps:$4 sm:$0xff]   ;;  %v749_v15 = vrot.slane %v7039_v49, %v748_v53 }
  0x1b   : > { %2071 = vmatpush1.bf16.msra.mxu0 %v6104_v18  ;;  %2235 = vmatpush1.bf16.msra.mxu1 %v6105_v19  ;;  %v3017_v58 = vld [vmem:[%s8978_s4] sm:$0xf]  ;;  %v6153_v62 = vld [vmem:[%s8976_s2 + $0x188] ss:$16 sps:$4 sm:$0xff]   ;;  %v6154_v63 = vld [vmem:[%s8976_s2 + $0x1a4] ss:$16 sps:$4 sm:$0xff]  }
  0x1c   : > { %2072 = vmatprep.subr.bf16.mxu0 %v6106_v20  ;;  %2236 = vmatprep.subr.bf16.mxu1 %v6108_v21  ;;  %v775_v57 = vpack.c.bf16 %v741_v52, %v741_v52  ;;  %v7060_v59 = vrot.slane %v3017_v58, %v748_v53  ;;  %v7064_v60 = vrot.slane %v3017_v58, %v744_v56  ;;  %v6152_v61 = vld [vmem:[%s8976_s2 + $0x180] ss:$16 sps:$4 sm:$0xff]   ;;  %v6156_v0 = vld [vmem:[%s8976_s2 + $0x1ac] ss:$16 sps:$4 sm:$0xff]   ;;  %v6159_v2 = vld [vmem:[%s8976_s2 + $0x1a8] ss:$16 sps:$4 sm:$0xff]  }
  0x1d   : > { %v6158_v1 = vld [vmem:[%s8976_s2 + $0x1a0] ss:$16 sps:$4 sm:$0xff]   ;;  %v6160_v3 = vld [vmem:[%s8976_s2 + $0x1c4] ss:$16 sps:$4 sm:$0xff]   ;;  %v6162_v4 = vld [vmem:[%s8976_s2 + $0x1cc] ss:$16 sps:$4 sm:$0xff]   ;;  %v777_v21 = vpack.c.bf16 %v749_v15, %v749_v15 }
  0x1e   : > { %2094 = vmatprep.mubr.bf16.mxu0 %v775_v57  ;;  %2258 = vmatprep.mubr.bf16.mxu1 %v775_v57  ;;  %v6164_v5 = vld [vmem:[%s8976_s2 + $0x1c0] ss:$16 sps:$4 sm:$0xff]   ;;  %v7094_v6 = vsub.s32 0, %v7006_v40  ;;  %v6165_v7 = vld [vmem:[%s8976_s2 + $0x1c8] ss:$16 sps:$4 sm:$0xff]   ;;  %s5272_s27 = sshll.u32 %s6772_s17, 5 }
  0x1f   : > { %2073 = vmatpush1.bf16.msra.mxu0 %v6110_v22  ;;  %2237 = vmatpush1.bf16.msra.mxu1 %v6111_v23  ;;  %v6166_v8 = vld [vmem:[%s8976_s2 + $0x1e4] ss:$16 sps:$4 sm:$0xff]   ;;  %v6168_v9 = vld [vmem:[%s8976_s2 + $0x1ec] ss:$16 sps:$4 sm:$0xff]   ;;  %v6170_v10 = vld [vmem:[%s8976_s2 + $0x1e0] ss:$16 sps:$4 sm:$0xff]  }
  0x20   : > { %2074 = vmatprep.subr.bf16.mxu0 %v6112_v24  ;;  %2238 = vmatprep.subr.bf16.mxu1 %v6114_v25  ;;  %v737_v11 = vrot.slane %v7039_v49, %v7094_v6  ;;  %v6171_v12 = vld [vmem:[%s8976_s2 + $0x1e8] ss:$16 sps:$4 sm:$0xff]   ;;  %v6174_v13 = vld [vmem:[%s8976_s2 + $0x204] ss:$16 sps:$4 sm:$0xff]   ;;  %v6177_v14 = vld [vmem:[%s8976_s2 + $0x20c] ss:$16 sps:$4 sm:$0xff]  }
  0x21   : > { %v6172_v16 = vld [vmem:[%s8976_s2 + $0x200] ss:$16 sps:$4 sm:$0xff]   ;;  %v6175_v18 = vld [vmem:[%s8976_s2 + $0x208] ss:$16 sps:$4 sm:$0xff]   ;;  %v6180_v19 = vld [vmem:[%s8976_s2 + $0x224] ss:$16 sps:$4 sm:$0xff]  }
  0x22   : > { %v774_v17 = vpack.c.bf16 %v737_v11, %v737_v11  ;;  %v6183_v20 = vld [vmem:[%s8976_s2 + $0x22c] ss:$16 sps:$4 sm:$0xff]   ;;  %v6178_v22 = vld [vmem:[%s8976_s2 + $0x220] ss:$16 sps:$4 sm:$0xff]   ;;  %v6181_v23 = vld [vmem:[%s8976_s2 + $0x228] ss:$16 sps:$4 sm:$0xff]  }
  0x23   : > { %2075 = vmatpush1.bf16.msra.mxu0 %v6116_v26  ;;  %2239 = vmatpush1.bf16.msra.mxu1 %v6117_v27  ;;  %v6186_v24 = vld [vmem:[%s8976_s2 + $0x244] ss:$16 sps:$4 sm:$0xff]   ;;  %v6189_v25 = vld [vmem:[%s8976_s2 + $0x24c] ss:$16 sps:$4 sm:$0xff]   ;;  %v6184_v26 = vld [vmem:[%s8976_s2 + $0x240] ss:$16 sps:$4 sm:$0xff]  }
  0x24   : > { %2076 = vmatprep.subr.bf16.mxu0 %v6118_v28  ;;  %2240 = vmatprep.subr.bf16.mxu1 %v6120_v29  ;;  %v6187_v27 = vld [vmem:[%s8976_s2 + $0x248] ss:$16 sps:$4 sm:$0xff]   ;;  %v6192_v28 = vld [vmem:[%s8976_s2 + $0x264] ss:$16 sps:$4 sm:$0xff]   ;;  %v6195_v29 = vld [vmem:[%s8976_s2 + $0x26c] ss:$16 sps:$4 sm:$0xff]  }
  0x25   : > { %v6204_v36 = vld [vmem:[%s8976_s2 + $0x2a4] ss:$16 sps:$4 sm:$0xff]   ;;  %v6225_v52 = vld [vmem:[%s8976_s2 + $0x30c] ss:$16 sps:$4 sm:$0xff]   ;;  %v6220_v53 = vld [vmem:[%s8976_s2 + $0x300] ss:$16 sps:$4 sm:$0xff]  }
  0x26   : > { %v6231_v57 = vld [vmem:[%s8976_s2 + $0x32c] ss:$16 sps:$4 sm:$0xff]   ;;  %v6226_v58 = vld [vmem:[%s8976_s2 + $0x320] ss:$16 sps:$4 sm:$0xff]   ;;  %v6252_v11 = vld [vmem:[%s8976_s2 + $0x3a4] ss:$16 sps:$4 sm:$0xff]  }
  0x27   : > { %2077 = vmatpush1.bf16.msra.mxu0 %v6122_v30  ;;  %2241 = vmatpush1.bf16.msra.mxu1 %v6123_v31  ;;  %v6190_v30 = vld [vmem:[%s8976_s2 + $0x260] ss:$16 sps:$4 sm:$0xff]   ;;  %v6193_v31 = vld [vmem:[%s8976_s2 + $0x268] ss:$16 sps:$4 sm:$0xff]   ;;  %v6258_v15 = vld [vmem:[%s8976_s2 + $0x3c4] ss:$16 sps:$4 sm:$0xff]  }
  0x28   : > { %2078 = vmatprep.subr.bf16.mxu0 %v6124_v32  ;;  %2242 = vmatprep.subr.bf16.mxu1 %v6126_v33  ;;  %v6198_v32 = vld [vmem:[%s8976_s2 + $0x284] ss:$16 sps:$4 sm:$0xff]   ;;  %v6201_v33 = vld [vmem:[%s8976_s2 + $0x28c] ss:$16 sps:$4 sm:$0xff]   ;;  %p422_p6 = scmp.lt.s32.totalorder %s5272_s27, 63  ;;  %s5273_s16 = sshll.u32 %s8997_s18, 6 }
  0x29   : > { %vm2582_vm0 = vcmask 523264  }
  0x2a   : > { %s8999_s27 = smov (!%p422_p6, %s5272_s27), 63 }
  0x2b   : > { %2079 = vmatpush1.bf16.msra.mxu0 %v6128_v34  ;;  %2243 = vmatpush1.bf16.msra.mxu1 %v6129_v35  ;;  %v6196_v34 = vld [vmem:[%s8976_s2 + $0x280] ss:$16 sps:$4 sm:$0xff]   ;;  %v6199_v35 = vld [vmem:[%s8976_s2 + $0x288] ss:$16 sps:$4 sm:$0xff]   ;;  %s7451_s18 = sadd.s32 %s5273_s16, %s8999_s27 }
  0x2c   : > { %2080 = vmatprep.subr.bf16.mxu0 %v6130_v37  ;;  %2244 = vmatprep.subr.bf16.mxu1 %v6132_v38  ;;  %v6207_v37 = vld [vmem:[%s8976_s2 + $0x2ac] ss:$16 sps:$4 sm:$0xff]   ;;  %v6202_v38 = vld [vmem:[%s8976_s2 + $0x2a0] ss:$16 sps:$4 sm:$0xff]   ;;  %s5274_s26 = sshll.u32 %s7451_s18, 2  ;;  %s5278_s17 = sshll.u32 %s7451_s18, 3 }
  0x2d   : > { %s7472_s14 = scalar_lea.vmem %s8974_s0, %s5274_s26  ;;  %s8893_s16 = scalar_lea.vmem %s8985_s11, %s5278_s17 }
  0x2f   : > { %2081 = vmatpush1.bf16.msra.mxu0 %v6134_v39  ;;  %2245 = vmatpush1.bf16.msra.mxu1 %v6135_v41  ;;  %v6205_v39 = vld [vmem:[%s8976_s2 + $0x2a8] ss:$16 sps:$4 sm:$0xff]   ;;  %v6210_v41 = vld [vmem:[%s8976_s2 + $0x2c4] ss:$16 sps:$4 sm:$0xff]  }
  0x30   : > { %2082 = vmatprep.subr.bf16.mxu0 %v6136_v42  ;;  %2246 = vmatprep.subr.bf16.mxu1 %v6138_v43  ;;  %v6213_v42 = vld [vmem:[%s8976_s2 + $0x2cc] ss:$16 sps:$4 sm:$0xff]   ;;  %v6208_v43 = vld [vmem:[%s8976_s2 + $0x2c0] ss:$16 sps:$4 sm:$0xff]  }
  0x33   : > { %2083 = vmatpush1.bf16.msra.mxu0 %v6140_v44  ;;  %2247 = vmatpush1.bf16.msra.mxu1 %v6141_v45  ;;  %v6211_v44 = vld [vmem:[%s8976_s2 + $0x2c8] ss:$16 sps:$4 sm:$0xff]   ;;  %v6216_v45 = vld [vmem:[%s8976_s2 + $0x2e4] ss:$16 sps:$4 sm:$0xff]  }
  0x34   : > { %2084 = vmatprep.subr.bf16.mxu0 %v6142_v47  ;;  %2248 = vmatprep.subr.bf16.mxu1 %v6144_v48  ;;  %v6219_v47 = vld [vmem:[%s8976_s2 + $0x2ec] ss:$16 sps:$4 sm:$0xff]   ;;  %v6214_v48 = vld [vmem:[%s8976_s2 + $0x2e0] ss:$16 sps:$4 sm:$0xff]  }
  0x37   : > { %2085 = vmatpush1.bf16.msra.mxu0 %v6146_v50  ;;  %2249 = vmatpush1.bf16.msra.mxu1 %v6147_v51  ;;  %v6217_v50 = vld [vmem:[%s8976_s2 + $0x2e8] ss:$16 sps:$4 sm:$0xff]   ;;  %v6222_v51 = vld [vmem:[%s8976_s2 + $0x304] ss:$16 sps:$4 sm:$0xff]  }
  0x38   : > { %2086 = vmatprep.subr.bf16.mxu0 %v6148_v54  ;;  %2250 = vmatprep.subr.bf16.mxu1 %v6150_v55  ;;  %v6223_v54 = vld [vmem:[%s8976_s2 + $0x308] ss:$16 sps:$4 sm:$0xff]   ;;  %v6228_v55 = vld [vmem:[%s8976_s2 + $0x324] ss:$16 sps:$4 sm:$0xff]  }
  0x3b   : > { %2087 = vmatpush1.bf16.msra.mxu0 %v6152_v61  ;;  %2251 = vmatpush1.bf16.msra.mxu1 %v6153_v62  ;;  %v6229_v61 = vld [vmem:[%s8976_s2 + $0x328] ss:$16 sps:$4 sm:$0xff]   ;;  %v6234_v62 = vld [vmem:[%s8976_s2 + $0x344] ss:$16 sps:$4 sm:$0xff]  }
  0x3c   : > { %2088 = vmatprep.subr.bf16.mxu0 %v6154_v63  ;;  %2252 = vmatprep.subr.bf16.mxu1 %v6156_v0  ;;  %v6237_v63 = vld [vmem:[%s8976_s2 + $0x34c] ss:$16 sps:$4 sm:$0xff]   ;;  %v6232_v0 = vld [vmem:[%s8976_s2 + $0x340] ss:$16 sps:$4 sm:$0xff]  }
  0x3f   : > { %2089 = vmatpush1.bf16.msra.mxu0 %v6158_v1  ;;  %2253 = vmatpush1.bf16.msra.mxu1 %v6159_v2  ;;  %v6235_v1 = vld [vmem:[%s8976_s2 + $0x348] ss:$16 sps:$4 sm:$0xff]   ;;  %v6240_v2 = vld [vmem:[%s8976_s2 + $0x364] ss:$16 sps:$4 sm:$0xff]  }
  0x40   : > { %2090 = vmatprep.subr.bf16.mxu0 %v6160_v3  ;;  %2254 = vmatprep.subr.bf16.mxu1 %v6162_v4  ;;  %v6243_v3 = vld [vmem:[%s8976_s2 + $0x36c] ss:$16 sps:$4 sm:$0xff]   ;;  %v6238_v4 = vld [vmem:[%s8976_s2 + $0x360] ss:$16 sps:$4 sm:$0xff]  }
  0x43   : > { %2091 = vmatpush1.bf16.msra.mxu0 %v6164_v5  ;;  %2255 = vmatpush1.bf16.msra.mxu1 %v6165_v7  ;;  %v6241_v5 = vld [vmem:[%s8976_s2 + $0x368] ss:$16 sps:$4 sm:$0xff]   ;;  %v6246_v7 = vld [vmem:[%s8976_s2 + $0x384] ss:$16 sps:$4 sm:$0xff]  }
  0x44   : > { %2092 = vmatprep.subr.bf16.mxu0 %v6166_v8  ;;  %2256 = vmatprep.subr.bf16.mxu1 %v6168_v9  ;;  %v6249_v8 = vld [vmem:[%s8976_s2 + $0x38c] ss:$16 sps:$4 sm:$0xff]   ;;  %v6244_v9 = vld [vmem:[%s8976_s2 + $0x380] ss:$16 sps:$4 sm:$0xff]  }
  0x47   : > { %2093 = vmatpush1.bf16.msra.mxu0 %v6170_v10  ;;  %2257 = vmatpush1.bf16.msra.mxu1 %v6171_v12  ;;  %v6247_v10 = vld [vmem:[%s8976_s2 + $0x388] ss:$16 sps:$4 sm:$0xff]   ;;  %v6255_v12 = vld [vmem:[%s8976_s2 + $0x3ac] ss:$16 sps:$4 sm:$0xff]  }
  0x48   : > { %2103 = vmatprep.subr.bf16.mxu0 %v6174_v13  ;;  %2267 = vmatprep.subr.bf16.mxu1 %v6177_v14  ;;  %v6250_v13 = vld [vmem:[%s8976_s2 + $0x3a0] ss:$16 sps:$4 sm:$0xff]   ;;  %v6253_v14 = vld [vmem:[%s8976_s2 + $0x3a8] ss:$16 sps:$4 sm:$0xff]  }
  0x4a   : > { %2095 = vmatmul.mubr.bf16.vlgmr.msra.gmra.mrb[0].mxu0 %v774_v17  ;;  %2259 = vmatmul.mubr.bf16.vlgmr.msra.gmra.mrb[0].mxu1 %v774_v17  ;;  %v6256_v17 = vld [vmem:[%s8976_s2 + $0x3c0] ss:$16 sps:$4 sm:$0xff]  }
  0x4b   : > { %2104 = vmatpush1.bf16.msra.mxu0 %v6172_v16  ;;  %2268 = vmatpush1.bf16.msra.mxu1 %v6175_v18  ;;  %v6261_v16 = vld [vmem:[%s8976_s2 + $0x3cc] ss:$16 sps:$4 sm:$0xff]   ;;  %v6259_v18 = vld [vmem:[%s8976_s2 + $0x3c8] ss:$16 sps:$4 sm:$0xff]  }
  0x4c   : > { %2105 = vmatprep.subr.bf16.mxu0 %v6180_v19  ;;  %2269 = vmatprep.subr.bf16.mxu1 %v6183_v20  ;;  %v6264_v19 = vld [vmem:[%s8976_s2 + $0x3e4] ss:$16 sps:$4 sm:$0xff]   ;;  %v6267_v20 = vld [vmem:[%s8976_s2 + $0x3ec] ss:$16 sps:$4 sm:$0xff]  }
  0x4d   : > { %2135 = vmatprep.mubr.bf16.mxu0 %v777_v21  ;;  %2299 = vmatprep.mubr.bf16.mxu1 %v777_v21  ;;  %v756_v21 = vsub.s32 5, %v7006_v40 }
  0x4f   : > { %2106 = vmatpush1.bf16.msra.mxu0 %v6178_v22  ;;  %2270 = vmatpush1.bf16.msra.mxu1 %v6181_v23  ;;  %v6262_v22 = vld [vmem:[%s8976_s2 + $0x3e0] ss:$16 sps:$4 sm:$0xff]   ;;  %v745_v23 = vrot.slane %v7039_v49, %v744_v56 }
  0x50   : > { %2107 = vmatprep.subr.bf16.mxu0 %v6186_v24  ;;  %2271 = vmatprep.subr.bf16.mxu1 %v6189_v25  ;;  %v6265_v24 = vld [vmem:[%s8976_s2 + $0x3e8] ss:$16 sps:$4 sm:$0xff]   ;;  %v6270_v25 = vld [vmem:[%s8976_s2 + $0x404] ss:$16 sps:$4 sm:$0xff]   ;;  %v6268_v56 = vld [vmem:[%s8976_s2 + $0x400] ss:$16 sps:$4 sm:$0xff]  }
  0x53   : > { %2108 = vmatpush1.bf16.msra.mxu0 %v6184_v26  ;;  %2272 = vmatpush1.bf16.msra.mxu1 %v6187_v27  ;;  %v6273_v26 = vld [vmem:[%s8976_s2 + $0x40c] ss:$16 sps:$4 sm:$0xff]   ;;  %v757_v27 = vrot.slane %v7039_v49, %v756_v21  ;;  %v6348_v21 = vld [vmem:[%s8976_s2 + $0x5a4] ss:$16 sps:$4 sm:$0xff]  }
  0x54   : > { %2109 = vmatprep.subr.bf16.mxu0 %v6192_v28  ;;  %2273 = vmatprep.subr.bf16.mxu1 %v6195_v29  ;;  %v776_v28 = vpack.c.bf16 %v745_v23, %v745_v23  ;;  %v6271_v29 = vld [vmem:[%s8976_s2 + $0x408] ss:$16 sps:$4 sm:$0xff]   ;;  %v6279_v49 = vld [vmem:[%s8976_s2 + $0x42c] ss:$16 sps:$4 sm:$0xff]   ;;  %v6346_v23 = vld [vmem:[%s8976_s2 + $0x5a0] ss:$16 sps:$4 sm:$0xff]  }
  0x57   : > { %2110 = vmatpush1.bf16.msra.mxu0 %v6190_v30  ;;  %2274 = vmatpush1.bf16.msra.mxu1 %v6193_v31  ;;  %v6276_v30 = vld [vmem:[%s8976_s2 + $0x424] ss:$16 sps:$4 sm:$0xff]   ;;  %v779_v31 = vpack.c.bf16 %v757_v27, %v757_v27  ;;  %v6352_v27 = vld [vmem:[%s8976_s2 + $0x5c0] ss:$16 sps:$4 sm:$0xff]  }
  0x58   : > { %2111 = vmatprep.subr.bf16.mxu0 %v6198_v32  ;;  %2275 = vmatprep.subr.bf16.mxu1 %v6201_v33  ;;  %v6274_v32 = vld [vmem:[%s8976_s2 + $0x420] ss:$16 sps:$4 sm:$0xff]   ;;  %v6277_v33 = vld [vmem:[%s8976_s2 + $0x428] ss:$16 sps:$4 sm:$0xff]  }
  0x5b   : > { %2112 = vmatpush1.bf16.msra.mxu0 %v6196_v34  ;;  %2276 = vmatpush1.bf16.msra.mxu1 %v6199_v35  ;;  %v6282_v34 = vld [vmem:[%s8976_s2 + $0x444] ss:$16 sps:$4 sm:$0xff]   ;;  %v6285_v35 = vld [vmem:[%s8976_s2 + $0x44c] ss:$16 sps:$4 sm:$0xff]  }
  0x5c   : > { %2113 = vmatprep.subr.bf16.mxu0 %v6204_v36  ;;  %2277 = vmatprep.subr.bf16.mxu1 %v6207_v37  ;;  %v6280_v36 = vld [vmem:[%s8976_s2 + $0x440] ss:$16 sps:$4 sm:$0xff]   ;;  %v6283_v37 = vld [vmem:[%s8976_s2 + $0x448] ss:$16 sps:$4 sm:$0xff]  }
  0x5f   : > { %2114 = vmatpush1.bf16.msra.mxu0 %v6202_v38  ;;  %2278 = vmatpush1.bf16.msra.mxu1 %v6205_v39  ;;  %v6288_v38 = vld [vmem:[%s8976_s2 + $0x464] ss:$16 sps:$4 sm:$0xff]   ;;  %v6291_v39 = vld [vmem:[%s8976_s2 + $0x46c] ss:$16 sps:$4 sm:$0xff]  }
  0x60   : > { %2115 = vmatprep.subr.bf16.mxu0 %v6210_v41  ;;  %2279 = vmatprep.subr.bf16.mxu1 %v6213_v42  ;;  %v6286_v41 = vld [vmem:[%s8976_s2 + $0x460] ss:$16 sps:$4 sm:$0xff]   ;;  %v6289_v42 = vld [vmem:[%s8976_s2 + $0x468] ss:$16 sps:$4 sm:$0xff]  }
  0x63   : > { %2116 = vmatpush1.bf16.msra.mxu0 %v6208_v43  ;;  %2280 = vmatpush1.bf16.msra.mxu1 %v6211_v44  ;;  %v6294_v43 = vld [vmem:[%s8976_s2 + $0x484] ss:$16 sps:$4 sm:$0xff]   ;;  %v6297_v44 = vld [vmem:[%s8976_s2 + $0x48c] ss:$16 sps:$4 sm:$0xff]  }
  0x64   : > { %2117 = vmatprep.subr.bf16.mxu0 %v6216_v45  ;;  %2281 = vmatprep.subr.bf16.mxu1 %v6219_v47  ;;  %v6292_v45 = vld [vmem:[%s8976_s2 + $0x480] ss:$16 sps:$4 sm:$0xff]   ;;  %v6295_v47 = vld [vmem:[%s8976_s2 + $0x488] ss:$16 sps:$4 sm:$0xff]  }
  0x67   : > { %2118 = vmatpush1.bf16.msra.mxu0 %v6214_v48  ;;  %2282 = vmatpush1.bf16.msra.mxu1 %v6217_v50  ;;  %v6300_v48 = vld [vmem:[%s8976_s2 + $0x4a4] ss:$16 sps:$4 sm:$0xff]   ;;  %v6303_v50 = vld [vmem:[%s8976_s2 + $0x4ac] ss:$16 sps:$4 sm:$0xff]  }
  0x68   : > { %2119 = vmatprep.subr.bf16.mxu0 %v6222_v51  ;;  %2283 = vmatprep.subr.bf16.mxu1 %v6225_v52  ;;  %v6298_v51 = vld [vmem:[%s8976_s2 + $0x4a0] ss:$16 sps:$4 sm:$0xff]   ;;  %v6301_v52 = vld [vmem:[%s8976_s2 + $0x4a8] ss:$16 sps:$4 sm:$0xff]  }
  0x6b   : > { %2120 = vmatpush1.bf16.msra.mxu0 %v6220_v53  ;;  %2284 = vmatpush1.bf16.msra.mxu1 %v6223_v54  ;;  %v6306_v53 = vld [vmem:[%s8976_s2 + $0x4c4] ss:$16 sps:$4 sm:$0xff]   ;;  %v6309_v54 = vld [vmem:[%s8976_s2 + $0x4cc] ss:$16 sps:$4 sm:$0xff]  }
  0x6c   : > { %2121 = vmatprep.subr.bf16.mxu0 %v6228_v55  ;;  %2285 = vmatprep.subr.bf16.mxu1 %v6231_v57  ;;  %v6304_v55 = vld [vmem:[%s8976_s2 + $0x4c0] ss:$16 sps:$4 sm:$0xff]   ;;  %v6307_v57 = vld [vmem:[%s8976_s2 + $0x4c8] ss:$16 sps:$4 sm:$0xff]  }
  0x6f   : > { %2122 = vmatpush1.bf16.msra.mxu0 %v6226_v58  ;;  %2286 = vmatpush1.bf16.msra.mxu1 %v6229_v61  ;;  %v6312_v58 = vld [vmem:[%s8976_s2 + $0x4e4] ss:$16 sps:$4 sm:$0xff]   ;;  %v6315_v61 = vld [vmem:[%s8976_s2 + $0x4ec] ss:$16 sps:$4 sm:$0xff]  }
  0x70   : > { %2123 = vmatprep.subr.bf16.mxu0 %v6234_v62  ;;  %2287 = vmatprep.subr.bf16.mxu1 %v6237_v63  ;;  %v6310_v62 = vld [vmem:[%s8976_s2 + $0x4e0] ss:$16 sps:$4 sm:$0xff]   ;;  %v6313_v63 = vld [vmem:[%s8976_s2 + $0x4e8] ss:$16 sps:$4 sm:$0xff]  }
  0x73   : > { %2124 = vmatpush1.bf16.msra.mxu0 %v6232_v0  ;;  %2288 = vmatpush1.bf16.msra.mxu1 %v6235_v1  ;;  %v6318_v0 = vld [vmem:[%s8976_s2 + $0x504] ss:$16 sps:$4 sm:$0xff]   ;;  %v6321_v1 = vld [vmem:[%s8976_s2 + $0x50c] ss:$16 sps:$4 sm:$0xff]  }
  0x74   : > { %2125 = vmatprep.subr.bf16.mxu0 %v6240_v2  ;;  %2289 = vmatprep.subr.bf16.mxu1 %v6243_v3  ;;  %v6316_v2 = vld [vmem:[%s8976_s2 + $0x500] ss:$16 sps:$4 sm:$0xff]   ;;  %v6319_v3 = vld [vmem:[%s8976_s2 + $0x508] ss:$16 sps:$4 sm:$0xff]  }
  0x77   : > { %2126 = vmatpush1.bf16.msra.mxu0 %v6238_v4  ;;  %2290 = vmatpush1.bf16.msra.mxu1 %v6241_v5  ;;  %v6324_v4 = vld [vmem:[%s8976_s2 + $0x524] ss:$16 sps:$4 sm:$0xff]   ;;  %v6327_v5 = vld [vmem:[%s8976_s2 + $0x52c] ss:$16 sps:$4 sm:$0xff]  }
  0x78   : > { %2127 = vmatprep.subr.bf16.mxu0 %v6246_v7  ;;  %2291 = vmatprep.subr.bf16.mxu1 %v6249_v8  ;;  %v6322_v7 = vld [vmem:[%s8976_s2 + $0x520] ss:$16 sps:$4 sm:$0xff]   ;;  %v6325_v8 = vld [vmem:[%s8976_s2 + $0x528] ss:$16 sps:$4 sm:$0xff]  }
  0x7b   : > { %2128 = vmatpush1.bf16.msra.mxu0 %v6244_v9  ;;  %2292 = vmatpush1.bf16.msra.mxu1 %v6247_v10  ;;  %v6330_v9 = vld [vmem:[%s8976_s2 + $0x544] ss:$16 sps:$4 sm:$0xff]   ;;  %v6333_v10 = vld [vmem:[%s8976_s2 + $0x54c] ss:$16 sps:$4 sm:$0xff]  }
  0x7c   : > { %2129 = vmatprep.subr.bf16.mxu0 %v6252_v11  ;;  %2293 = vmatprep.subr.bf16.mxu1 %v6255_v12  ;;  %v6328_v11 = vld [vmem:[%s8976_s2 + $0x540] ss:$16 sps:$4 sm:$0xff]   ;;  %v6331_v12 = vld [vmem:[%s8976_s2 + $0x548] ss:$16 sps:$4 sm:$0xff]  }
  0x7f   : > { %2130 = vmatpush1.bf16.msra.mxu0 %v6250_v13  ;;  %2294 = vmatpush1.bf16.msra.mxu1 %v6253_v14  ;;  %v6336_v13 = vld [vmem:[%s8976_s2 + $0x564] ss:$16 sps:$4 sm:$0xff]   ;;  %v6339_v14 = vld [vmem:[%s8976_s2 + $0x56c] ss:$16 sps:$4 sm:$0xff]  }
  0x80   : > { %2131 = vmatprep.subr.bf16.mxu0 %v6258_v15  ;;  %2295 = vmatprep.subr.bf16.mxu1 %v6261_v16  ;;  %v6334_v15 = vld [vmem:[%s8976_s2 + $0x560] ss:$16 sps:$4 sm:$0xff]   ;;  %v6337_v16 = vld [vmem:[%s8976_s2 + $0x568] ss:$16 sps:$4 sm:$0xff]  }
  0x83   : > { %2132 = vmatpush1.bf16.msra.mxu0 %v6256_v17  ;;  %2296 = vmatpush1.bf16.msra.mxu1 %v6259_v18  ;;  %v6342_v17 = vld [vmem:[%s8976_s2 + $0x584] ss:$16 sps:$4 sm:$0xff]   ;;  %v6345_v18 = vld [vmem:[%s8976_s2 + $0x58c] ss:$16 sps:$4 sm:$0xff]  }
  0x84   : > { %2133 = vmatprep.subr.bf16.mxu0 %v6264_v19  ;;  %2297 = vmatprep.subr.bf16.mxu1 %v6267_v20  ;;  %v6340_v19 = vld [vmem:[%s8976_s2 + $0x580] ss:$16 sps:$4 sm:$0xff]   ;;  %v6343_v20 = vld [vmem:[%s8976_s2 + $0x588] ss:$16 sps:$4 sm:$0xff]  }
  0x87   : > { %2134 = vmatpush1.bf16.msra.mxu0 %v6262_v22  ;;  %2298 = vmatpush1.bf16.msra.mxu1 %v6265_v24  ;;  %v6351_v22 = vld [vmem:[%s8976_s2 + $0x5ac] ss:$16 sps:$4 sm:$0xff]   ;;  %v6349_v24 = vld [vmem:[%s8976_s2 + $0x5a8] ss:$16 sps:$4 sm:$0xff]  }
  0x88   : > { %2144 = vmatprep.subr.bf16.mxu0 %v6270_v25  ;;  %2308 = vmatprep.subr.bf16.mxu1 %v6273_v26  ;;  %v6354_v25 = vld [vmem:[%s8976_s2 + $0x5c4] ss:$16 sps:$4 sm:$0xff]   ;;  %v6357_v26 = vld [vmem:[%s8976_s2 + $0x5cc] ss:$16 sps:$4 sm:$0xff]  }
  0x8a   : > { %2136 = vmatmul.mubr.bf16.vlgmr.msra.gmra.mrb[0].mxu0 %v776_v28  ;;  %2300 = vmatmul.mubr.bf16.vlgmr.msra.gmra.mrb[0].mxu1 %v776_v28  ;;  %v6355_v28 = vld [vmem:[%s8976_s2 + $0x5c8] ss:$16 sps:$4 sm:$0xff]  }
  0x8b   : > { %2145 = vmatpush1.bf16.msra.mxu0 %v6268_v56  ;;  %2309 = vmatpush1.bf16.msra.mxu1 %v6271_v29  ;;  %v752_v56 = vsub.s32 4, %v7006_v40  ;;  %v6360_v29 = vld [vmem:[%s8976_s2 + $0x5e4] ss:$16 sps:$4 sm:$0xff]  }
  0x8c   : > { %2146 = vmatprep.subr.bf16.mxu0 %v6276_v30  ;;  %2310 = vmatprep.subr.bf16.mxu1 %v6279_v49  ;;  %v6363_v30 = vld [vmem:[%s8976_s2 + $0x5ec] ss:$16 sps:$4 sm:$0xff]   ;;  %v764_v49 = vsub.s32 7, %v7006_v40 }
  0x8d   : > { %2176 = vmatprep.mubr.bf16.mxu0 %v779_v31  ;;  %2340 = vmatprep.mubr.bf16.mxu1 %v779_v31  ;;  %v6358_v31 = vld [vmem:[%s8976_s2 + $0x5e0] ss:$16 sps:$4 sm:$0xff]  }
  0x8f   : > { %2147 = vmatpush1.bf16.msra.mxu0 %v6274_v32  ;;  %2311 = vmatpush1.bf16.msra.mxu1 %v6277_v33  ;;  %v7513_v32 = vld [vmem:[%s7027_s12] sm:$0xff] }
  0x90   : > { %2148 = vmatprep.subr.bf16.mxu0 %v6282_v34  ;;  %2312 = vmatprep.subr.bf16.mxu1 %v6285_v35  ;;  %v753_v33 = vrot.slane %v7513_v32, %v752_v56  ;;  %v6361_v34 = vld [vmem:[%s8976_s2 + $0x5e8] ss:$16 sps:$4 sm:$0xff]   ;;  %v6366_v35 = vld [vmem:[%s8976_s2 + $0x604] ss:$16 sps:$4 sm:$0xff]  }
  0x91   : > { %v6433_v56 = vld [vmem:[%s8976_s2 + $0x768] ss:$16 sps:$4 sm:$0xff]  }
  0x93   : > { %2149 = vmatpush1.bf16.msra.mxu0 %v6280_v36  ;;  %2313 = vmatpush1.bf16.msra.mxu1 %v6283_v37  ;;  %v6369_v36 = vld [vmem:[%s8976_s2 + $0x60c] ss:$16 sps:$4 sm:$0xff]   ;;  %v6364_v37 = vld [vmem:[%s8976_s2 + $0x600] ss:$16 sps:$4 sm:$0xff]  }
  0x94   : > { %2150 = vmatprep.subr.bf16.mxu0 %v6288_v38  ;;  %2314 = vmatprep.subr.bf16.mxu1 %v6291_v39  ;;  %v765_v38 = vrot.slane %v7513_v32, %v764_v49  ;;  %v6367_v39 = vld [vmem:[%s8976_s2 + $0x608] ss:$16 sps:$4 sm:$0xff]  }
  0x95   : > { %v6439_v49 = vld [vmem:[%s8976_s2 + $0x788] ss:$16 sps:$4 sm:$0xff]  }
  0x97   : > { %2151 = vmatpush1.bf16.msra.mxu0 %v6286_v41  ;;  %2315 = vmatpush1.bf16.msra.mxu1 %v6289_v42  ;;  %v778_v41 = vpack.c.bf16 %v753_v33, %v753_v33  ;;  %v6372_v42 = vld [vmem:[%s8976_s2 + $0x624] ss:$16 sps:$4 sm:$0xff]   ;;  %v6447_v33 = vld [vmem:[%s8976_s2 + $0x7ac] ss:$16 sps:$4 sm:$0xff]  }
  0x98   : > { %2152 = vmatprep.subr.bf16.mxu0 %v6294_v43  ;;  %2316 = vmatprep.subr.bf16.mxu1 %v6297_v44  ;;  %v6375_v43 = vld [vmem:[%s8976_s2 + $0x62c] ss:$16 sps:$4 sm:$0xff]   ;;  %v6370_v44 = vld [vmem:[%s8976_s2 + $0x620] ss:$16 sps:$4 sm:$0xff]  }
  0x9b   : > { %2153 = vmatpush1.bf16.msra.mxu0 %v6292_v45  ;;  %2317 = vmatpush1.bf16.msra.mxu1 %v6295_v47  ;;  %v6373_v45 = vld [vmem:[%s8976_s2 + $0x628] ss:$16 sps:$4 sm:$0xff]   ;;  %v781_v47 = vpack.c.bf16 %v765_v38, %v765_v38  ;;  %v760_v38 = vsub.s32 6, %v7006_v40  ;;  %v6459_v40 = vld [vmem:[%s8976_s2 + $0x7ec] ss:$16 sps:$4 sm:$0xff]  }
  0x9c   : > { %2154 = vmatprep.subr.bf16.mxu0 %v6300_v48  ;;  %2318 = vmatprep.subr.bf16.mxu1 %v6303_v50  ;;  %v6378_v48 = vld [vmem:[%s8976_s2 + $0x644] ss:$16 sps:$4 sm:$0xff]   ;;  %v6381_v50 = vld [vmem:[%s8976_s2 + $0x64c] ss:$16 sps:$4 sm:$0xff]  }
  0x9f   : > { %2155 = vmatpush1.bf16.msra.mxu0 %v6298_v51  ;;  %2319 = vmatpush1.bf16.msra.mxu1 %v6301_v52  ;;  %v6376_v51 = vld [vmem:[%s8976_s2 + $0x640] ss:$16 sps:$4 sm:$0xff]   ;;  %v6379_v52 = vld [vmem:[%s8976_s2 + $0x648] ss:$16 sps:$4 sm:$0xff]  }
  0xa0   : > { %2156 = vmatprep.subr.bf16.mxu0 %v6306_v53  ;;  %2320 = vmatprep.subr.bf16.mxu1 %v6309_v54  ;;  %v6384_v53 = vld [vmem:[%s8976_s2 + $0x664] ss:$16 sps:$4 sm:$0xff]   ;;  %v6387_v54 = vld [vmem:[%s8976_s2 + $0x66c] ss:$16 sps:$4 sm:$0xff]  }
  0xa3   : > { %2157 = vmatpush1.bf16.msra.mxu0 %v6304_v55  ;;  %2321 = vmatpush1.bf16.msra.mxu1 %v6307_v57  ;;  %v6382_v55 = vld [vmem:[%s8976_s2 + $0x660] ss:$16 sps:$4 sm:$0xff]   ;;  %v6385_v57 = vld [vmem:[%s8976_s2 + $0x668] ss:$16 sps:$4 sm:$0xff]  }
  0xa4   : > { %2158 = vmatprep.subr.bf16.mxu0 %v6312_v58  ;;  %2322 = vmatprep.subr.bf16.mxu1 %v6315_v61  ;;  %v6390_v58 = vld [vmem:[%s8976_s2 + $0x684] ss:$16 sps:$4 sm:$0xff]   ;;  %v6393_v61 = vld [vmem:[%s8976_s2 + $0x68c] ss:$16 sps:$4 sm:$0xff]  }
  0xa7   : > { %2159 = vmatpush1.bf16.msra.mxu0 %v6310_v62  ;;  %2323 = vmatpush1.bf16.msra.mxu1 %v6313_v63  ;;  %v6388_v62 = vld [vmem:[%s8976_s2 + $0x680] ss:$16 sps:$4 sm:$0xff]   ;;  %v6391_v63 = vld [vmem:[%s8976_s2 + $0x688] ss:$16 sps:$4 sm:$0xff]  }
  0xa8   : > { %2160 = vmatprep.subr.bf16.mxu0 %v6318_v0  ;;  %2324 = vmatprep.subr.bf16.mxu1 %v6321_v1  ;;  %v6396_v0 = vld [vmem:[%s8976_s2 + $0x6a4] ss:$16 sps:$4 sm:$0xff]   ;;  %v6399_v1 = vld [vmem:[%s8976_s2 + $0x6ac] ss:$16 sps:$4 sm:$0xff]  }
  0xab   : > { %2161 = vmatpush1.bf16.msra.mxu0 %v6316_v2  ;;  %2325 = vmatpush1.bf16.msra.mxu1 %v6319_v3  ;;  %v6394_v2 = vld [vmem:[%s8976_s2 + $0x6a0] ss:$16 sps:$4 sm:$0xff]   ;;  %v6397_v3 = vld [vmem:[%s8976_s2 + $0x6a8] ss:$16 sps:$4 sm:$0xff]  }
  0xac   : > { %2162 = vmatprep.subr.bf16.mxu0 %v6324_v4  ;;  %2326 = vmatprep.subr.bf16.mxu1 %v6327_v5  ;;  %v6402_v4 = vld [vmem:[%s8976_s2 + $0x6c4] ss:$16 sps:$4 sm:$0xff]   ;;  %v6405_v5 = vld [vmem:[%s8976_s2 + $0x6cc] ss:$16 sps:$4 sm:$0xff]  }
  0xaf   : > { %2163 = vmatpush1.bf16.msra.mxu0 %v6322_v7  ;;  %2327 = vmatpush1.bf16.msra.mxu1 %v6325_v8  ;;  %v6400_v7 = vld [vmem:[%s8976_s2 + $0x6c0] ss:$16 sps:$4 sm:$0xff]   ;;  %v6403_v8 = vld [vmem:[%s8976_s2 + $0x6c8] ss:$16 sps:$4 sm:$0xff]  }
  0xb0   : > { %2164 = vmatprep.subr.bf16.mxu0 %v6330_v9  ;;  %2328 = vmatprep.subr.bf16.mxu1 %v6333_v10  ;;  %v6408_v9 = vld [vmem:[%s8976_s2 + $0x6e4] ss:$16 sps:$4 sm:$0xff]   ;;  %v6411_v10 = vld [vmem:[%s8976_s2 + $0x6ec] ss:$16 sps:$4 sm:$0xff]  }
  0xb3   : > { %2165 = vmatpush1.bf16.msra.mxu0 %v6328_v11  ;;  %2329 = vmatpush1.bf16.msra.mxu1 %v6331_v12  ;;  %v6406_v11 = vld [vmem:[%s8976_s2 + $0x6e0] ss:$16 sps:$4 sm:$0xff]   ;;  %v6409_v12 = vld [vmem:[%s8976_s2 + $0x6e8] ss:$16 sps:$4 sm:$0xff]  }
  0xb4   : > { %2166 = vmatprep.subr.bf16.mxu0 %v6336_v13  ;;  %2330 = vmatprep.subr.bf16.mxu1 %v6339_v14  ;;  %v6414_v13 = vld [vmem:[%s8976_s2 + $0x704] ss:$16 sps:$4 sm:$0xff]   ;;  %v6417_v14 = vld [vmem:[%s8976_s2 + $0x70c] ss:$16 sps:$4 sm:$0xff]  }
  0xb7   : > { %2167 = vmatpush1.bf16.msra.mxu0 %v6334_v15  ;;  %2331 = vmatpush1.bf16.msra.mxu1 %v6337_v16  ;;  %v6412_v15 = vld [vmem:[%s8976_s2 + $0x700] ss:$16 sps:$4 sm:$0xff]   ;;  %v6415_v16 = vld [vmem:[%s8976_s2 + $0x708] ss:$16 sps:$4 sm:$0xff]  }
  0xb8   : > { %2168 = vmatprep.subr.bf16.mxu0 %v6342_v17  ;;  %2332 = vmatprep.subr.bf16.mxu1 %v6345_v18  ;;  %v6420_v17 = vld [vmem:[%s8976_s2 + $0x724] ss:$16 sps:$4 sm:$0xff]   ;;  %v6423_v18 = vld [vmem:[%s8976_s2 + $0x72c] ss:$16 sps:$4 sm:$0xff]  }
  0xbb   : > { %2169 = vmatpush1.bf16.msra.mxu0 %v6340_v19  ;;  %2333 = vmatpush1.bf16.msra.mxu1 %v6343_v20  ;;  %v6418_v19 = vld [vmem:[%s8976_s2 + $0x720] ss:$16 sps:$4 sm:$0xff]   ;;  %v6421_v20 = vld [vmem:[%s8976_s2 + $0x728] ss:$16 sps:$4 sm:$0xff]  }
  0xbc   : > { %2170 = vmatprep.subr.bf16.mxu0 %v6348_v21  ;;  %2334 = vmatprep.subr.bf16.mxu1 %v6351_v22  ;;  %v6426_v21 = vld [vmem:[%s8976_s2 + $0x744] ss:$16 sps:$4 sm:$0xff]   ;;  %v6429_v22 = vld [vmem:[%s8976_s2 + $0x74c] ss:$16 sps:$4 sm:$0xff]  }
  0xbf   : > { %2171 = vmatpush1.bf16.msra.mxu0 %v6346_v23  ;;  %2335 = vmatpush1.bf16.msra.mxu1 %v6349_v24  ;;  %v6424_v23 = vld [vmem:[%s8976_s2 + $0x740] ss:$16 sps:$4 sm:$0xff]   ;;  %v6427_v24 = vld [vmem:[%s8976_s2 + $0x748] ss:$16 sps:$4 sm:$0xff]  }
  0xc0   : > { %2172 = vmatprep.subr.bf16.mxu0 %v6354_v25  ;;  %2336 = vmatprep.subr.bf16.mxu1 %v6357_v26  ;;  %v6432_v25 = vld [vmem:[%s8976_s2 + $0x764] ss:$16 sps:$4 sm:$0xff]   ;;  %v6435_v26 = vld [vmem:[%s8976_s2 + $0x76c] ss:$16 sps:$4 sm:$0xff]  }
  0xc3   : > { %2173 = vmatpush1.bf16.msra.mxu0 %v6352_v27  ;;  %2337 = vmatpush1.bf16.msra.mxu1 %v6355_v28  ;;  %v6430_v27 = vld [vmem:[%s8976_s2 + $0x760] ss:$16 sps:$4 sm:$0xff]   ;;  %v6438_v28 = vld [vmem:[%s8976_s2 + $0x784] ss:$16 sps:$4 sm:$0xff]  }
  0xc4   : > { %2174 = vmatprep.subr.bf16.mxu0 %v6360_v29  ;;  %2338 = vmatprep.subr.bf16.mxu1 %v6363_v30  ;;  %v6441_v29 = vld [vmem:[%s8976_s2 + $0x78c] ss:$16 sps:$4 sm:$0xff]   ;;  %v6436_v30 = vld [vmem:[%s8976_s2 + $0x780] ss:$16 sps:$4 sm:$0xff]  }
  0xc7   : > { %2175 = vmatpush1.bf16.msra.mxu0 %v6358_v31  ;;  %2339 = vmatpush1.bf16.msra.mxu1 %v6361_v34  ;;  %v6444_v31 = vld [vmem:[%s8976_s2 + $0x7a4] ss:$16 sps:$4 sm:$0xff]   ;;  %v6442_v34 = vld [vmem:[%s8976_s2 + $0x7a0] ss:$16 sps:$4 sm:$0xff]  }
  0xc8   : > { %2185 = vmatprep.subr.bf16.mxu0 %v6366_v35  ;;  %2349 = vmatprep.subr.bf16.mxu1 %v6369_v36  ;;  %v6445_v35 = vld [vmem:[%s8976_s2 + $0x7a8] ss:$16 sps:$4 sm:$0xff]   ;;  %v6450_v36 = vld [vmem:[%s8976_s2 + $0x7c4] ss:$16 sps:$4 sm:$0xff]  }
  0xca   : > { %2177 = vmatmul.mubr.bf16.vlgmr.msra.gmra.mrb[0].mxu0 %v778_v41  ;;  %2341 = vmatmul.mubr.bf16.vlgmr.msra.gmra.mrb[0].mxu1 %v778_v41  ;;  %v6451_v41 = vld [vmem:[%s8976_s2 + $0x7c8] ss:$16 sps:$4 sm:$0xff]  }
  0xcb   : > { %2186 = vmatpush1.bf16.msra.mxu0 %v6364_v37  ;;  %2350 = vmatpush1.bf16.msra.mxu1 %v6367_v39  ;;  %v6453_v37 = vld [vmem:[%s8976_s2 + $0x7cc] ss:$16 sps:$4 sm:$0xff]   ;;  %v6448_v39 = vld [vmem:[%s8976_s2 + $0x7c0] ss:$16 sps:$4 sm:$0xff]  }
  0xcc   : > { %2187 = vmatprep.subr.bf16.mxu0 %v6372_v42  ;;  %2351 = vmatprep.subr.bf16.mxu1 %v6375_v43  ;;  %v6456_v42 = vld [vmem:[%s8976_s2 + $0x7e4] ss:$16 sps:$4 sm:$0xff]   ;;  %v761_v43 = vrot.slane %v7513_v32, %v760_v38  ;;  %v6460_v32 = vld [vmem:[%s8977_s3] ss:$16 sps:$4 sm:$0xff]  }
  0xcd   : > { %2217 = vmatprep.mubr.bf16.mxu0 %v781_v47  ;;  %2381 = vmatprep.mubr.bf16.mxu1 %v781_v47  ;;  %v6462_v47 = vld [vmem:[%s8977_s3 + $0x4] ss:$16 sps:$4 sm:$0xff]   ;;  %v6533_v38 = vld [vmem:[%s8979_s5 + $0xb0] ss:$8 sps:$4 sm:$0xff]  }
  0xcf   : > { %2188 = vmatpush1.bf16.msra.mxu0 %v6370_v44  ;;  %2352 = vmatpush1.bf16.msra.mxu1 %v6373_v45  ;;  %v6454_v44 = vld [vmem:[%s8976_s2 + $0x7e0] ss:$16 sps:$4 sm:$0xff]   ;;  %v6457_v45 = vld [vmem:[%s8976_s2 + $0x7e8] ss:$16 sps:$4 sm:$0xff]  }
  0xd0   : > { %2189 = vmatprep.subr.bf16.mxu0 %v6378_v48  ;;  %2353 = vmatprep.subr.bf16.mxu1 %v6381_v50  ;;  %v780_v48 = vpack.c.bf16 %v761_v43, %v761_v43  ;;  %v6465_v50 = vld [vmem:[%s8977_s3 + $0x24] ss:$16 sps:$4 sm:$0xff]   ;;  %v6536_v43 = vld [vmem:[%s8979_s5 + $0xc0] ss:$8 sps:$4 sm:$0xff]  }
  0xd3   : > { %2190 = vmatpush1.bf16.msra.mxu0 %v6376_v51  ;;  %2354 = vmatpush1.bf16.msra.mxu1 %v6379_v52  ;;  %v6463_v51 = vld [vmem:[%s8977_s3 + $0x20] ss:$16 sps:$4 sm:$0xff]   ;;  %v6468_v52 = vld [vmem:[%s8977_s3 + $0x44] ss:$16 sps:$4 sm:$0xff]  }
  0xd4   : > { %2191 = vmatprep.subr.bf16.mxu0 %v6384_v53  ;;  %2355 = vmatprep.subr.bf16.mxu1 %v6387_v54  ;;  %v6790_v53 = vmov 0   ;;  %v6466_v54 = vld [vmem:[%s8977_s3 + $0x40] ss:$16 sps:$4 sm:$0xff]  }
  0xd7   : > { %2192 = vmatpush1.bf16.msra.mxu0 %v6382_v55  ;;  %2356 = vmatpush1.bf16.msra.mxu1 %v6385_v57  ;;  %v6471_v55 = vld [vmem:[%s8977_s3 + $0x64] ss:$16 sps:$4 sm:$0xff]   ;;  %v6469_v57 = vld [vmem:[%s8977_s3 + $0x60] ss:$16 sps:$4 sm:$0xff]  }
  0xd8   : > { %2193 = vmatprep.subr.bf16.mxu0 %v6390_v58  ;;  %2357 = vmatprep.subr.bf16.mxu1 %v6393_v61  ;;  %v6480_v58 = vld [vmem:[%s8977_s3 + $0xc] ss:$16 sps:$4 sm:$0xff]  }
  0xd9   : > { %v6502_v61 = vld [vmem:[%s8979_s5 + $0x4] ss:$8 sps:$4 sm:$0xff]  }
  0xdb   : > { %2194 = vmatpush1.bf16.msra.mxu0 %v6388_v62  ;;  %2358 = vmatpush1.bf16.msra.mxu1 %v6391_v63  ;;  %v7747_v62 = vld [vmem:[%s7472_s14] sm:$0xff]  }
  0xdc   : > { %2195 = vmatprep.subr.bf16.mxu0 %v6396_v0  ;;  %2359 = vmatprep.subr.bf16.mxu1 %v6399_v1  ;;  %v7750_v63 = vld [vmem:[%s7472_s14 + $0x60] sm:$0xff]   ;;  %v6478_v0 = vld [vmem:[%s8977_s3 + $0x8] ss:$16 sps:$4 sm:$0xff]  }
  0xdd   : > { %v6500_v1 = vld [vmem:[%s8979_s5] ss:$8 sps:$4 sm:$0xff]  }
  0xdf   : > { %2196 = vmatpush1.bf16.msra.mxu0 %v6394_v2  ;;  %2360 = vmatpush1.bf16.msra.mxu1 %v6397_v3  ;;  %v6483_v2 = vld [vmem:[%s8977_s3 + $0x2c] ss:$16 sps:$4 sm:$0xff]  }
  0xe0   : > { %2197 = vmatprep.subr.bf16.mxu0 %v6402_v4  ;;  %2361 = vmatprep.subr.bf16.mxu1 %v6405_v5  ;;  %v6505_v3 = vld [vmem:[%s8979_s5 + $0x14] ss:$8 sps:$4 sm:$0xff]   ;;  %v6481_v4 = vld [vmem:[%s8977_s3 + $0x28] ss:$16 sps:$4 sm:$0xff]  }
  0xe1   : > { %v6503_v5 = vld [vmem:[%s8979_s5 + $0x10] ss:$8 sps:$4 sm:$0xff]  }
  0xe3   : > { %2198 = vmatpush1.bf16.msra.mxu0 %v6400_v7  ;;  %2362 = vmatpush1.bf16.msra.mxu1 %v6403_v8  ;;  %v6488_v7 = vld [vmem:[%s8977_s3 + $0x4c] ss:$16 sps:$4 sm:$0xff]  }
  0xe4   : > { %2199 = vmatprep.subr.bf16.mxu0 %v6408_v9  ;;  %2363 = vmatprep.subr.bf16.mxu1 %v6411_v10  ;;  %v7780_v8 = vld [vmem:[%s7472_s14 + $0x8] sm:$0xff]  }
  0xe5   : > { %v7783_v9 = vld [vmem:[%s7472_s14 + $0x68] sm:$0xff]  }
  0xe6   : > { %v6486_v10 = vld [vmem:[%s8977_s3 + $0x48] ss:$16 sps:$4 sm:$0xff]  }
  0xe7   : > { %2200 = vmatpush1.bf16.msra.mxu0 %v6406_v11  ;;  %2364 = vmatpush1.bf16.msra.mxu1 %v6409_v12  ;;  %v6491_v11 = vld [vmem:[%s8977_s3 + $0x6c] ss:$16 sps:$4 sm:$0xff]   ;;  %v6506_v12 = vld [vmem:[%s8979_s5 + $0x20] ss:$8 sps:$4 sm:$0xff]  }
  0xe8   : > { %2201 = vmatprep.subr.bf16.mxu0 %v6414_v13  ;;  %2365 = vmatprep.subr.bf16.mxu1 %v6417_v14  ;;  %v6508_v13 = vld [vmem:[%s8979_s5 + $0x24] ss:$8 sps:$4 sm:$0xff]   ;;  %v6489_v14 = vld [vmem:[%s8977_s3 + $0x68] ss:$16 sps:$4 sm:$0xff]  }
  0xeb   : > { %2202 = vmatpush1.bf16.msra.mxu0 %v6412_v15  ;;  %2366 = vmatpush1.bf16.msra.mxu1 %v6415_v16  ;;  %v6476_v15 = vld [vmem:[%s7472_s14 + $0x10] sm:$0xff]  }
  0xec   : > { %2203 = vmatprep.subr.bf16.mxu0 %v6420_v17  ;;  %2367 = vmatprep.subr.bf16.mxu1 %v6423_v18  ;;  %v7808_v16 = vld [vmem:[%s7472_s14 + $0x70] sm:$0xff]  }
  0xed   : > { %v6509_v17 = vld [vmem:[%s8979_s5 + $0x30] ss:$8 sps:$4 sm:$0xff]   ;;  %v6511_v18 = vld [vmem:[%s8979_s5 + $0x34] ss:$8 sps:$4 sm:$0xff]  }
  0xef   : > { %2204 = vmatpush1.bf16.msra.mxu0 %v6418_v19  ;;  %2368 = vmatpush1.bf16.msra.mxu1 %v6421_v20  ;;  %v6514_v19 = vld [vmem:[%s8979_s5 + $0x44] ss:$8 sps:$4 sm:$0xff]   ;;  %v6512_v20 = vld [vmem:[%s8979_s5 + $0x40] ss:$8 sps:$4 sm:$0xff]  }
  0xf0   : > { %2205 = vmatprep.subr.bf16.mxu0 %v6426_v21  ;;  %2369 = vmatprep.subr.bf16.mxu1 %v6429_v22  ;;  %v6484_v21 = vld [vmem:[%s7472_s14 + $0x18] sm:$0xff]  }
  0xf1   : > { %v7829_v22 = vld [vmem:[%s7472_s14 + $0x78] sm:$0xff]  }
  0xf3   : > { %2206 = vmatpush1.bf16.msra.mxu0 %v6424_v23  ;;  %2370 = vmatpush1.bf16.msra.mxu1 %v6427_v24  ;;  %v6515_v23 = vld [vmem:[%s8979_s5 + $0x50] ss:$8 sps:$4 sm:$0xff]   ;;  %v6517_v24 = vld [vmem:[%s8979_s5 + $0x54] ss:$8 sps:$4 sm:$0xff]  }
  0xf4   : > { %2207 = vmatprep.subr.bf16.mxu0 %v6432_v25  ;;  %2371 = vmatprep.subr.bf16.mxu1 %v6435_v26  ;;  %v6520_v25 = vld [vmem:[%s8979_s5 + $0x64] ss:$8 sps:$4 sm:$0xff]   ;;  %v6518_v26 = vld [vmem:[%s8979_s5 + $0x60] ss:$8 sps:$4 sm:$0xff]  }
  0xf7   : > { %2208 = vmatpush1.bf16.msra.mxu0 %v6430_v27  ;;  %2372 = vmatpush1.bf16.msra.mxu1 %v6433_v56  ;;  %v6492_v27 = vld [vmem:[%s7472_s14 + $0x20] sm:$0xff]   ;;  %v6523_v56 = vld [vmem:[%s8979_s5 + $0x74] ss:$8 sps:$4 sm:$0xff]  }
  0xf8   : > { %2209 = vmatprep.subr.bf16.mxu0 %v6438_v28  ;;  %2373 = vmatprep.subr.bf16.mxu1 %v6441_v29  ;;  %v6521_v28 = vld [vmem:[%s8979_s5 + $0x70] ss:$8 sps:$4 sm:$0xff]   ;;  %v6526_v29 = vld [vmem:[%s8979_s5 + $0x84] ss:$8 sps:$4 sm:$0xff]  }
  0xfb   : > { %2210 = vmatpush1.bf16.msra.mxu0 %v6436_v30  ;;  %2374 = vmatpush1.bf16.msra.mxu1 %v6439_v49  ;;  %v6524_v30 = vld [vmem:[%s8979_s5 + $0x80] ss:$8 sps:$4 sm:$0xff]  }
  0xfc   : > { %2211 = vmatprep.subr.bf16.mxu0 %v6444_v31  ;;  %2375 = vmatprep.subr.bf16.mxu1 %v6447_v33  ;;  %v6493_v49 = vld [vmem:[%s7472_s14 + $0x28] sm:$0xff]   ;;  %v6529_v31 = vld [vmem:[%s8979_s5 + $0x94] ss:$8 sps:$4 sm:$0xff]   ;;  %v6527_v33 = vld [vmem:[%s8979_s5 + $0x90] ss:$8 sps:$4 sm:$0xff]  }
  0xff   : > { %2212 = vmatpush1.bf16.msra.mxu0 %v6442_v34  ;;  %2376 = vmatpush1.bf16.msra.mxu1 %v6445_v35  ;;  %v6532_v34 = vld [vmem:[%s8979_s5 + $0xa4] ss:$8 sps:$4 sm:$0xff]   ;;  %v6530_v35 = vld [vmem:[%s8979_s5 + $0xa0] ss:$8 sps:$4 sm:$0xff]  }
 0x100   : > { %2213 = vmatprep.subr.bf16.mxu0 %v6450_v36  ;;  %2377 = vmatprep.subr.bf16.mxu1 %v6453_v37  ;;  %v6494_v36 = vld [vmem:[%s7472_s14 + $0x30] sm:$0xff]  }
 0x101   : > { %v6535_v37 = vld [vmem:[%s8979_s5 + $0xb4] ss:$8 sps:$4 sm:$0xff]  }
 0x103   : > { %2214 = vmatpush1.bf16.msra.mxu0 %v6448_v39  ;;  %2378 = vmatpush1.bf16.msra.mxu1 %v6451_v41  ;;  %v6495_v39 = vld [vmem:[%s7472_s14 + $0x38] sm:$0xff]   ;;  %v6496_v41 = vld [vmem:[%s7472_s14 + $0x40] sm:$0xff]  }
 0x104   : > { %2215 = vmatprep.subr.bf16.mxu0 %v6456_v42  ;;  %2379 = vmatprep.subr.bf16.mxu1 %v6459_v40  ;;  %v6497_v42 = vld [vmem:[%s7472_s14 + $0x48] sm:$0xff]  }
 0x105   : > { %v6538_v40 = vld [vmem:[%s8979_s5 + $0xc4] ss:$8 sps:$4 sm:$0xff]  }
 0x107   : > { %2216 = vmatpush1.bf16.msra.mxu0 %v6454_v44  ;;  %2380 = vmatpush1.bf16.msra.mxu1 %v6457_v45  ;;  %v6541_v44 = vld [vmem:[%s8979_s5 + $0xd4] ss:$8 sps:$4 sm:$0xff]   ;;  %v6539_v45 = vld [vmem:[%s8979_s5 + $0xd0] ss:$8 sps:$4 sm:$0xff]  }
 0x108   : > { %2631 = vmatprep.subr.bf16.mxu0 %v6462_v47  ;;  %5875 = vmatprep.subr.bf16.mxu1 %v6462_v47  ;;  %v6498_v47 = vld [vmem:[%s7472_s14 + $0x50] sm:$0xff]  }
 0x10a   : > { %2218 = vmatmul.mubr.bf16.vlgmr.msra.gmra.mrb[0].mxu0 %v780_v48  ;;  %2382 = vmatmul.mubr.bf16.vlgmr.msra.gmra.mrb[0].mxu1 %v780_v48  ;;  %v6499_v48 = vld [vmem:[%s7472_s14 + $0x58] sm:$0xff]  }
 0x10b   : > { %2632 = vmatpush1.bf16.msra.mxu0 %v6460_v32  ;;  %5879 = vmatpush1.bf16.msra.mxu1 %v6460_v32  ;;  %v6544_v32 = vld [vmem:[%s8979_s5 + $0xe4] ss:$8 sps:$4 sm:$0xff]  }
 0x10c   : > { %2633 = vmatprep.subr.bf16.mxu0 %v6465_v50  ;;  %5876 = vmatprep.subr.bf16.mxu1 %v6465_v50  ;;  %v6542_v50 = vld [vmem:[%s8979_s5 + $0xe0] ss:$8 sps:$4 sm:$0xff]  }
 0x10d   : > { %2663 = vmatprep.mubr.bf16.mxu0 %v6790_v53  ;;  %2783 = vmatprep.mubr.bf16.mxu1 %v6790_v53 }
 0x10f   : > { %2634 = vmatpush1.bf16.msra.mxu0 %v6463_v51  ;;  %5880 = vmatpush1.bf16.msra.mxu1 %v6463_v51  ;;  %v6547_v51 = vld [vmem:[%s8979_s5 + $0xf4] ss:$8 sps:$4 sm:$0xff]  }
 0x110   : > { %2635 = vmatprep.subr.bf16.mxu0 %v6468_v52  ;;  %5877 = vmatprep.subr.bf16.mxu1 %v6468_v52  ;;  %v6545_v52 = vld [vmem:[%s8979_s5 + $0xf0] ss:$8 sps:$4 sm:$0xff]  }
 0x113   : > { %2636 = vmatpush1.bf16.msra.mxu0 %v6466_v54  ;;  %5881 = vmatpush1.bf16.msra.mxu1 %v6466_v54  ;;  %v6550_v54 = vld [vmem:[%s8979_s5 + $0x104] ss:$8 sps:$4 sm:$0xff]  }
 0x114   : > { %2637 = vmatprep.subr.bf16.mxu0 %v6471_v55  ;;  %5878 = vmatprep.subr.bf16.mxu1 %v6471_v55 }
 0x117   : > { %2638 = vmatpush1.bf16.msra.mxu0 %v6469_v57  ;;  %5882 = vmatpush1.bf16.msra.mxu1 %v6469_v57 }
 0x118   : > { %2824 = vmatprep.subr.bf16.mxu1 %v6480_v58  ;;  %3755 = vmatprep.subr.bf16.mxu0 %v6502_v61 }
 0x11a   : > { %5567 = vmatmul.mubr.msk.bf16.vlgmr.msra.gmra.mrb[4].mxu0 %vm2582_vm0, %v7747_v62  ;;  %5579 = vmatmul.mubr.msk.bf16.vlgmr.msra.gmra.mrb[4].mxu1 %vm2582_vm0, %v7750_v63 }
 0x11b   : > { %2673 = vmatprep.mubr.bf16.mxu0 %v6790_v53  ;;  %2793 = vmatprep.mubr.bf16.mxu1 %v6790_v53 }
 0x11c   : > { %2825 = vmatpush1.bf16.msra.mxu1 %v6478_v0  ;;  %3756 = vmatpush1.bf16.msra.mxu0 %v6500_v1 }
 0x11d   : > { %2826 = vmatprep.subr.bf16.mxu1 %v6483_v2  ;;  %3757 = vmatprep.subr.bf16.mxu0 %v6505_v3  ;;  %v6749_v2 = vld [vmem:[%s8978_s4] sm:$0xf] }
 0x11e   : > { %v7973_v3 = vrot.slane %v6749_v2, %v7094_v6 }
 0x120   : > { %2827 = vmatpush1.bf16.msra.mxu1 %v6481_v4  ;;  %3758 = vmatpush1.bf16.msra.mxu0 %v6503_v5  ;;  %v7979_v4 = vrot.slane %v6749_v2, %v7030_v46  ;;  %v6553_v2 = vld [vmem:[%s8979_s5 + $0x114] ss:$8 sps:$4 sm:$0xff]  }
 0x121   : > { %2828 = vmatprep.subr.bf16.mxu1 %v6488_v7  ;;  %3759 = vmatprep.subr.bf16.mxu0 %v6508_v13 }
 0x122   : > { %5568 = vmatmul.mubr.msk.bf16.gmra.mrb[8].mxu0 %vm2582_vm0, %v7780_v8  ;;  %5580 = vmatmul.mubr.msk.bf16.gmra.mrb[8].mxu1 %vm2582_vm0, %v7783_v9 }
 0x123   : > { %2683 = vmatprep.mubr.bf16.mxu0 %v6790_v53  ;;  %2803 = vmatprep.mubr.bf16.mxu1 %v6790_v53 }
 0x124   : > { %2829 = vmatpush1.bf16.msra.mxu1 %v6486_v10  ;;  %3760 = vmatpush1.bf16.msra.mxu0 %v6506_v12 }
 0x125   : > { %2830 = vmatprep.subr.bf16.mxu1 %v6491_v11  ;;  %3761 = vmatprep.subr.bf16.mxu0 %v6511_v18 }
 0x128   : > { %2831 = vmatpush1.bf16.msra.mxu1 %v6489_v14  ;;  %3762 = vmatpush1.bf16.msra.mxu0 %v6509_v17 }
 0x129   : > { %3763 = vmatprep.subr.bf16.mxu0 %v6514_v19 }
 0x12a   : > { %5569 = vmatmul.mubr.msk.bf16.gmra.mrb[12].mxu0 %vm2582_vm0, %v6476_v15  ;;  %5581 = vmatmul.mubr.msk.bf16.gmra.mrb[12].mxu1 %vm2582_vm0, %v7808_v16 }
 0x12b   : > { %2693 = vmatprep.mubr.bf16.mxu0 %v6790_v53  ;;  %2813 = vmatprep.mubr.bf16.mxu1 %v6790_v53 }
 0x12c   : > { %3764 = vmatpush1.bf16.msra.mxu0 %v6512_v20 }
 0x12d   : > { %3765 = vmatprep.subr.bf16.mxu0 %v6517_v24 }
 0x130   : > { %3766 = vmatpush1.bf16.msra.mxu0 %v6515_v23 }
 0x131   : > { %3767 = vmatprep.subr.bf16.mxu0 %v6520_v25 }
 0x132   : > { %5570 = vmatmul.mubr.msk.bf16.gmra.mrb[16].mxu0 %vm2582_vm0, %v6484_v21  ;;  %5582 = vmatmul.mubr.msk.bf16.gmra.mrb[16].mxu1 %vm2582_vm0, %v7829_v22 }
 0x133   : > { %2703 = vmatprep.mubr.bf16.mxu0 %v6790_v53  ;;  %2856 = vmatprep.mubr.bf16.mxu1 %v6790_v53 }
 0x134   : > { %3768 = vmatpush1.bf16.msra.mxu0 %v6518_v26 }
 0x135   : > { %3769 = vmatprep.subr.bf16.mxu0 %v6523_v56 }
 0x138   : > { %3770 = vmatpush1.bf16.msra.mxu0 %v6521_v28 }
 0x139   : > { %3771 = vmatprep.subr.bf16.mxu0 %v6526_v29 }
 0x13a   : > { %5571 = vmatmul.mubr.msk.bf16.gmra.mrb[20].mxu0 %vm2582_vm0, %v6492_v27  ;;  %5583 = vmatmul.mubr.msk.bf16.vlgmr.msra.gmra.mrb[20].mxu1 %vm2582_vm0, %v7747_v62 }
 0x13b   : > { %2713 = vmatprep.mubr.bf16.mxu0 %v6790_v53  ;;  %2866 = vmatprep.mubr.bf16.mxu1 %v6790_v53 }
 0x13c   : > { %3772 = vmatpush1.bf16.msra.mxu0 %v6524_v30 }
 0x13d   : > { %3773 = vmatprep.subr.bf16.mxu0 %v6529_v31 }
 0x140   : > { %3774 = vmatpush1.bf16.msra.mxu0 %v6527_v33 }
 0x141   : > { %3775 = vmatprep.subr.bf16.mxu0 %v6532_v34 }
 0x142   : > { %5572 = vmatmul.mubr.msk.bf16.gmra.mrb[24].mxu0 %vm2582_vm0, %v6493_v49  ;;  %5584 = vmatmul.mubr.msk.bf16.gmra.mrb[24].mxu1 %vm2582_vm0, %v7780_v8 }
 0x143   : > { %2723 = vmatprep.mubr.bf16.mxu0 %v6790_v53  ;;  %2876 = vmatprep.mubr.bf16.mxu1 %v6790_v53 }
 0x144   : > { %3776 = vmatpush1.bf16.msra.mxu0 %v6530_v35 }
 0x145   : > { %3777 = vmatprep.subr.bf16.mxu0 %v6535_v37 }
 0x148   : > { %3778 = vmatpush1.bf16.msra.mxu0 %v6533_v38 }
 0x149   : > { %3779 = vmatprep.subr.bf16.mxu0 %v6538_v40 }
 0x14a   : > { %5573 = vmatmul.mubr.msk.bf16.gmra.mrb[28].mxu0 %vm2582_vm0, %v6494_v36  ;;  %5585 = vmatmul.mubr.msk.bf16.gmra.mrb[28].mxu1 %vm2582_vm0, %v6476_v15 }
 0x14b   : > { %2733 = vmatprep.mubr.bf16.mxu0 %v6790_v53  ;;  %2886 = vmatprep.mubr.bf16.mxu1 %v6790_v53 }
 0x14c   : > { %3780 = vmatpush1.bf16.msra.mxu0 %v6536_v43 }
 0x14d   : > { %3781 = vmatprep.subr.bf16.mxu0 %v6541_v44 }
 0x150   : > { %3782 = vmatpush1.bf16.msra.mxu0 %v6539_v45 }
 0x151   : > { %3783 = vmatprep.subr.bf16.mxu0 %v6544_v32 }
 0x152   : > { %5574 = vmatmul.mubr.msk.bf16.gmra.mrb[32].mxu0 %vm2582_vm0, %v6495_v39  ;;  %5586 = vmatmul.mubr.msk.bf16.gmra.mrb[32].mxu1 %vm2582_vm0, %v6484_v21 }
 0x153   : > { %2743 = vmatprep.mubr.bf16.mxu0 %v6790_v53  ;;  %2896 = vmatprep.mubr.bf16.mxu1 %v6790_v53 }
 0x154   : > { %3784 = vmatpush1.bf16.msra.mxu0 %v6542_v50 }
 0x155   : > { %3785 = vmatprep.subr.bf16.mxu0 %v6547_v51 }
 0x158   : > { %3786 = vmatpush1.bf16.msra.mxu0 %v6545_v52  ;;  %v6548_v52 = vld [vmem:[%s8979_s5 + $0x100] ss:$8 sps:$4 sm:$0xff]  }
 0x159   : > { %3948 = vmatprep.subr.bf16.mxu0 %v6550_v54 }
 0x15a   : > { %5575 = vmatmul.mubr.msk.bf16.gmra.mrb[36].mxu0 %vm2582_vm0, %v6496_v41  ;;  %5587 = vmatmul.mubr.msk.bf16.gmra.mrb[36].mxu1 %vm2582_vm0, %v6492_v27 }
 0x15b   : > { %2753 = vmatprep.mubr.bf16.mxu0 %v6790_v53  ;;  %2906 = vmatprep.mubr.bf16.mxu1 %v6790_v53 }
 0x162   : > { %5576 = vmatmul.mubr.msk.bf16.gmra.mrb[40].mxu0 %vm2582_vm0, %v6497_v42  ;;  %5588 = vmatmul.mubr.msk.bf16.gmra.mrb[40].mxu1 %vm2582_vm0, %v6493_v49 }
 0x163   : > { %2763 = vmatprep.mubr.bf16.mxu0 %v6790_v53  ;;  %2916 = vmatprep.mubr.bf16.mxu1 %v6790_v53 }
 0x16a   : > { %5577 = vmatmul.mubr.msk.bf16.gmra.mrb[44].mxu0 %vm2582_vm0, %v6498_v47  ;;  %5589 = vmatmul.mubr.msk.bf16.gmra.mrb[44].mxu1 %vm2582_vm0, %v6494_v36 }
 0x16b   : > { %2773 = vmatprep.mubr.bf16.mxu0 %v6790_v53  ;;  %2926 = vmatprep.mubr.bf16.mxu1 %v6790_v53 }
 0x172   : > { %5578 = vmatmul.mubr.msk.bf16.gmra.mrb[48].mxu0 %vm2582_vm0, %v6499_v48  ;;  %5590 = vmatmul.mubr.msk.bf16.gmra.mrb[48].mxu1 %vm2582_vm0, %v6495_v39 }
 0x173   : > { %2936 = vmatprep.mubr.bf16.mxu1 %v6790_v53 }
 0x17a   : > { %5591 = vmatmul.mubr.msk.bf16.gmra.mrb[52].mxu1 %vm2582_vm0, %v6496_v41 }
 0x17b   : > { %2946 = vmatprep.mubr.bf16.mxu1 %v6790_v53 }
 0x182   : > { %5592 = vmatmul.mubr.msk.bf16.gmra.mrb[56].mxu1 %vm2582_vm0, %v6497_v42 }
 0x183   : > { %2956 = vmatprep.mubr.bf16.mxu1 %v6790_v53 }
 0x18a   : > { %5593 = vmatmul.mubr.msk.bf16.gmra.mrb[60].mxu1 %vm2582_vm0, %v6498_v47 }
 0x18b   : > { %2966 = vmatprep.mubr.bf16.mxu1 %v6790_v53 }
 0x192   : > { %5594 = vmatmul.mubr.msk.bf16.gmra.mrb[64].mxu1 %vm2582_vm0, %v6499_v48 }
 0x193   : > { %2976 = vmatprep.mubr.bf16.mxu1 %v6790_v53 }
 0x19a   : > { %5595 = vmatmul.mubr.msk.bf16.gmra.mrb[68].mxu1 %vm2582_vm0, %v7750_v63 }
 0x19b   : > { %2986 = vmatprep.mubr.bf16.mxu1 %v6790_v53 }
 0x1a2   : > { %5596 = vmatmul.mubr.msk.bf16.gmra.mrb[72].mxu1 %vm2582_vm0, %v7783_v9 }
 0x1a3   : > { %2996 = vmatprep.mubr.bf16.mxu1 %v6790_v53 }
 0x1aa   : > { %5597 = vmatmul.mubr.msk.bf16.gmra.mrb[76].mxu1 %vm2582_vm0, %v7808_v16 }
 0x1ab   : > { %3006 = vmatprep.mubr.bf16.mxu1 %v6790_v53 }
 0x1b2   : > { %5598 = vmatmul.mubr.msk.bf16.gmra.mrb[80].mxu1 %vm2582_vm0, %v7829_v22 }
 0x1dd   : > { %v2219_v55 = vpop.f32.mrb[0].mxu0  ;;  %v7965_v57 = vpop.f32.mrb[0].mxu1 }
 0x1de   : > { %v2221_v58 = vpop.f32.mrb[1].mxu0  ;;  %v7967_v61 = vpop.f32.mrb[1].mxu1  ;;  %v7976_v53 = vrot.slane %v2219_v55, %v7094_v6 }
 0x1df   : > { %v2223_v62 = vpop.f32.mrb[2].mxu0  ;;  %v2387_v63 = vpop.f32.mrb[2].mxu1  ;;  %v7982_v5 = vrot.slane %v2221_v58, %v7094_v6 }
 0x1e0   : > { %v2224_v0 = vpop.f32.mrb[3].mxu0  ;;  %v2388_v1 = vpop.f32.mrb[3].mxu1 }
 0x1ed   : > { %v2665_v7 = vpop.f32.mrb[4].mxu0  ;;  %v2785_v8 = vpop.f32.mrb[4].mxu1 }
 0x1ee   : > { %v2666_v9 = vadd.f32 %v2665_v7, %v7976_v53  ;;  %v2786_v10 = vadd.f32 %v2785_v8, %v7976_v53  ;;  %v2667_v11 = vpop.f32.mrb[5].mxu0  ;;  %v2787_v12 = vpop.f32.mrb[5].mxu1 }
 0x1ef   : > { %v2668_v13 = vadd.f32 %v2667_v11, %v7982_v5  ;;  %v2788_v14 = vadd.f32 %v2787_v12, %v7982_v5  ;;  %v2669_v15 = vpop.f32.mrb[6].mxu0  ;;  %v2789_v16 = vpop.f32.mrb[6].mxu1 }
 0x1f0   : > { %v3039_v17 = vadd.f32 %v7973_v3, %v2666_v9  ;;  %v3135_v18 = vadd.f32 %v7973_v3, %v2786_v10  ;;  %v2670_v19 = vadd.f32 %v2669_v15, %v7976_v53  ;;  %v2790_v20 = vadd.f32 %v2789_v16, %v7976_v53  ;;  %v2671_v21 = vpop.f32.mrb[7].mxu0  ;;  %v2791_v22 = vpop.f32.mrb[7].mxu1  ;;  %v6551_v15 = vld [vmem:[%s8979_s5 + $0x110] ss:$8 sps:$4 sm:$0xff]  }
 0x1f1   : > { %v3040_v23 = vadd.f32 %v7979_v4, %v2668_v13  ;;  %v3136_v24 = vadd.f32 %v7979_v4, %v2788_v14  ;;  %v2672_v25 = vadd.f32 %v2671_v21, %v7982_v5  ;;  %v2792_v26 = vadd.f32 %v2791_v22, %v7982_v5 }
 0x1f2   : > { %v3043_v27 = vadd.f32 %v7973_v3, %v2670_v19  ;;  %v3139_v56 = vadd.f32 %v7973_v3, %v2790_v20  ;;  %v3167_v30 = vmax.f32 %v3039_v17, 0.0  ;;  %v3263_v49 = vmax.f32 %v3135_v18, 0.0  ;;  %v6556_v20 = vld [vmem:[%s8979_s5 + $0x124] ss:$8 sps:$4 sm:$0xff]  }
 0x1f3   : > { %v3044_v28 = vadd.f32 %v7979_v4, %v2672_v25  ;;  %v3140_v29 = vadd.f32 %v7979_v4, %v2792_v26  ;;  %v3168_v34 = vmax.f32 %v3040_v23, 0.0  ;;  %v3264_v35 = vmax.f32 %v3136_v24, 0.0 }
 0x1f4   : > { %v3171_v31 = vmax.f32 %v3043_v27, 0.0  ;;  %v3267_v33 = vmax.f32 %v3139_v56, 0.0 }
 0x1f5   : > { %v3172_v36 = vmax.f32 %v3044_v28, 0.0  ;;  %v3268_v37 = vmax.f32 %v3140_v29, 0.0  ;;  %v2675_v38 = vpop.f32.mrb[8].mxu0  ;;  %v2795_v39 = vpop.f32.mrb[8].mxu1 }
 0x1f6   : > { %v3359_v41 = vpack.c.bf16 %v3171_v31, %v3167_v30  ;;  %v2676_v42 = vadd.f32 %v2675_v38, %v7976_v53  ;;  %v2796_v40 = vadd.f32 %v2795_v39, %v7976_v53  ;;  %v2677_v43 = vpop.f32.mrb[9].mxu0  ;;  %v2797_v44 = vpop.f32.mrb[9].mxu1  ;;  %v8002_v45 = vpack.c.bf16 %v3267_v33, %v3263_v49 }
 0x1f7   : > { %v2678_v47 = vadd.f32 %v2677_v43, %v7982_v5  ;;  %v2798_v48 = vadd.f32 %v2797_v44, %v7982_v5  ;;  %v2679_v32 = vpop.f32.mrb[10].mxu0  ;;  %v2799_v50 = vpop.f32.mrb[10].mxu1  ;;  %v3360_v51 = vpack.c.bf16 %v3172_v36, %v3168_v34  ;;  %v8009_v54 = vpack.c.bf16 %v3268_v37, %v3264_v35  ;;  %v6554_v37 = vld [vmem:[%s8979_s5 + $0x120] ss:$8 sps:$4 sm:$0xff]  }
 0x1f8   : > { %v3047_v55 = vadd.f32 %v7973_v3, %v2676_v42  ;;  %v3143_v58 = vadd.f32 %v7973_v3, %v2796_v40  ;;  %v2680_v62 = vadd.f32 %v2679_v32, %v7976_v53  ;;  %v2800_v63 = vadd.f32 %v2799_v50, %v7976_v53  ;;  %v2681_v0 = vpop.f32.mrb[11].mxu0  ;;  %v2801_v1 = vpop.f32.mrb[11].mxu1 }
 0x1f9   : > { %v3048_v7 = vadd.f32 %v7979_v4, %v2678_v47  ;;  %v3144_v8 = vadd.f32 %v7979_v4, %v2798_v48  ;;  %v2682_v9 = vadd.f32 %v2681_v0, %v7982_v5  ;;  %v2802_v10 = vadd.f32 %v2801_v1, %v7982_v5  ;;  %3787 = vmatprep.mubr.bf16.mxu0 %v3360_v51  ;;  %v6559_v47 = vld [vmem:[%s8979_s5 + $0x134] ss:$8 sps:$4 sm:$0xff]  }
 0x1fa   : > { %v3051_v11 = vadd.f32 %v7973_v3, %v2680_v62  ;;  %v3147_v12 = vadd.f32 %v7973_v3, %v2800_v63  ;;  %3788 = vmatmul.mubr.bf16.vlgmr.msra.gmra.mrb[52].mxu0 %v3359_v41  ;;  %v3175_v16 = vmax.f32 %v3047_v55, 0.0  ;;  %v3271_v17 = vmax.f32 %v3143_v58, 0.0  ;;  %v6557_v63 = vld [vmem:[%s8979_s5 + $0x130] ss:$8 sps:$4 sm:$0xff]  }
 0x1fb   : > { %v3052_v13 = vadd.f32 %v7979_v4, %v2682_v9  ;;  %v3148_v14 = vadd.f32 %v7979_v4, %v2802_v10  ;;  %3949 = vmatpush1.bf16.msra.mxu0 %v6548_v52  ;;  %v3176_v21 = vmax.f32 %v3048_v7, 0.0  ;;  %v3272_v22 = vmax.f32 %v3144_v8, 0.0  ;;  %v6562_v8 = vld [vmem:[%s8979_s5 + $0x144] ss:$8 sps:$4 sm:$0xff]  }
 0x1fc   : > { %v3179_v18 = vmax.f32 %v3051_v11, 0.0  ;;  %v3275_v19 = vmax.f32 %v3147_v12, 0.0  ;;  %3950 = vmatprep.subr.bf16.mxu0 %v6553_v2 }
 0x1fd   : > { %v3180_v23 = vmax.f32 %v3052_v13, 0.0  ;;  %v3276_v24 = vmax.f32 %v3148_v14, 0.0  ;;  %v2685_v25 = vpop.f32.mrb[12].mxu0  ;;  %v2805_v26 = vpop.f32.mrb[12].mxu1 }
 0x1fe   : > { %v2686_v27 = vadd.f32 %v2685_v25, %v7976_v53  ;;  %v2806_v56 = vadd.f32 %v2805_v26, %v7976_v53  ;;  %v2687_v28 = vpop.f32.mrb[13].mxu0  ;;  %v2807_v29 = vpop.f32.mrb[13].mxu1  ;;  %v3363_v30 = vpack.c.bf16 %v3179_v18, %v3175_v16  ;;  %v8034_v49 = vpack.c.bf16 %v3275_v19, %v3271_v17  ;;  %v6560_v26 = vld [vmem:[%s8979_s5 + $0x140] ss:$8 sps:$4 sm:$0xff]  }
 0x1ff   : > { %v2688_v31 = vadd.f32 %v2687_v28, %v7982_v5  ;;  %v2808_v33 = vadd.f32 %v2807_v29, %v7982_v5  ;;  %v2689_v34 = vpop.f32.mrb[14].mxu0  ;;  %v2809_v35 = vpop.f32.mrb[14].mxu1  ;;  %v3364_v36 = vpack.c.bf16 %v3180_v23, %v3176_v21  ;;  %3951 = vmatpush1.bf16.msra.mxu0 %v6551_v15  ;;  %v8041_v38 = vpack.c.bf16 %v3276_v24, %v3272_v22 }
 0x200   : > { %v3055_v39 = vadd.f32 %v7973_v3, %v2686_v27  ;;  %v3151_v41 = vadd.f32 %v7973_v3, %v2806_v56  ;;  %v2690_v42 = vadd.f32 %v2689_v34, %v7976_v53  ;;  %v2810_v40 = vadd.f32 %v2809_v35, %v7976_v53  ;;  %v2691_v43 = vpop.f32.mrb[15].mxu0  ;;  %v2811_v44 = vpop.f32.mrb[15].mxu1  ;;  %3952 = vmatprep.subr.bf16.mxu0 %v6556_v20  ;;  %v6565_v34 = vld [vmem:[%s8979_s5 + $0x154] ss:$8 sps:$4 sm:$0xff]  }
 0x201   : > { %v3056_v48 = vadd.f32 %v7979_v4, %v2688_v31  ;;  %v3152_v32 = vadd.f32 %v7979_v4, %v2808_v33  ;;  %v2692_v50 = vadd.f32 %v2691_v43, %v7982_v5  ;;  %v2812_v51 = vadd.f32 %v2811_v44, %v7982_v5  ;;  %3797 = vmatprep.mubr.bf16.mxu0 %v3364_v36 }
 0x202   : > { %v3059_v52 = vadd.f32 %v7973_v3, %v2690_v42  ;;  %v3155_v55 = vadd.f32 %v7973_v3, %v2810_v40  ;;  %3798 = vmatmul.mubr.bf16.gmra.mrb[56].mxu0 %v3363_v30  ;;  %v3183_v0 = vmax.f32 %v3055_v39, 0.0  ;;  %v3279_v1 = vmax.f32 %v3151_v41, 0.0 }
 0x203   : > { %v3060_v58 = vadd.f32 %v7979_v4, %v2692_v50  ;;  %v3156_v62 = vadd.f32 %v7979_v4, %v2812_v51  ;;  %3953 = vmatpush1.bf16.msra.mxu0 %v6554_v37  ;;  %v3184_v9 = vmax.f32 %v3056_v48, 0.0  ;;  %v3280_v10 = vmax.f32 %v3152_v32, 0.0  ;;  %v6563_v48 = vld [vmem:[%s8979_s5 + $0x150] ss:$8 sps:$4 sm:$0xff]  }
 0x204   : > { %v3187_v2 = vmax.f32 %v3059_v52, 0.0  ;;  %v3283_v7 = vmax.f32 %v3155_v55, 0.0  ;;  %3954 = vmatprep.subr.bf16.mxu0 %v6559_v47  ;;  %v8090_v40 = vrot.slane %v7965_v57, %v7094_v6  ;;  %v8094_v43 = vrot.slane %v7967_v61, %v7094_v6  ;;  %v6568_v57 = vld [vmem:[%s8979_s5 + $0x164] ss:$8 sps:$4 sm:$0xff]  }
 0x205   : > { %v3188_v11 = vmax.f32 %v3060_v58, 0.0  ;;  %v3284_v12 = vmax.f32 %v3156_v62, 0.0  ;;  %v2695_v13 = vpop.f32.mrb[16].mxu0  ;;  %v2815_v14 = vpop.f32.mrb[16].mxu1 }
 0x206   : > { %v2696_v15 = vadd.f32 %v2695_v13, %v7976_v53  ;;  %v2816_v16 = vadd.f32 %v2815_v14, %v7976_v53  ;;  %v2697_v17 = vpop.f32.mrb[17].mxu0  ;;  %v2817_v18 = vpop.f32.mrb[17].mxu1  ;;  %v3367_v19 = vpack.c.bf16 %v3187_v2, %v3183_v0  ;;  %v8066_v20 = vpack.c.bf16 %v3283_v7, %v3279_v1 }
 0x207   : > { %v2698_v21 = vadd.f32 %v2697_v17, %v7982_v5  ;;  %v2818_v22 = vadd.f32 %v2817_v18, %v7982_v5  ;;  %v2699_v23 = vpop.f32.mrb[18].mxu0  ;;  %v2819_v24 = vpop.f32.mrb[18].mxu1  ;;  %v3368_v25 = vpack.c.bf16 %v3188_v11, %v3184_v9  ;;  %3955 = vmatpush1.bf16.msra.mxu0 %v6557_v63  ;;  %v8073_v27 = vpack.c.bf16 %v3284_v12, %v3280_v10 }
 0x208   : > { %v3063_v56 = vadd.f32 %v7973_v3, %v2696_v15  ;;  %v3159_v28 = vadd.f32 %v7973_v3, %v2816_v16  ;;  %v2700_v29 = vadd.f32 %v2699_v23, %v7976_v53  ;;  %v2820_v30 = vadd.f32 %v2819_v24, %v7976_v53  ;;  %v2701_v31 = vpop.f32.mrb[19].mxu0  ;;  %v2821_v33 = vpop.f32.mrb[19].mxu1  ;;  %3956 = vmatprep.subr.bf16.mxu0 %v6562_v8  ;;  %v6566_v16 = vld [vmem:[%s8979_s5 + $0x160] ss:$8 sps:$4 sm:$0xff]  }
 0x209   : > { %v3064_v35 = vadd.f32 %v7979_v4, %v2698_v21  ;;  %v3160_v36 = vadd.f32 %v7979_v4, %v2818_v22  ;;  %v2702_v37 = vadd.f32 %v2701_v31, %v7982_v5  ;;  %v2822_v39 = vadd.f32 %v2821_v33, %v7982_v5  ;;  %3807 = vmatprep.mubr.bf16.mxu0 %v3368_v25  ;;  %v6571_v25 = vld [vmem:[%s8979_s5 + $0x174] ss:$8 sps:$4 sm:$0xff]  }
 0x20a   : > { %v3067_v41 = vadd.f32 %v7973_v3, %v2700_v29  ;;  %v3163_v42 = vadd.f32 %v7973_v3, %v2820_v30  ;;  %3808 = vmatmul.mubr.bf16.gmra.mrb[60].mxu0 %v3367_v19  ;;  %v3191_v32 = vmax.f32 %v3063_v56, 0.0  ;;  %v3287_v50 = vmax.f32 %v3159_v28, 0.0 }
 0x20b   : > { %v3068_v44 = vadd.f32 %v7979_v4, %v2702_v37  ;;  %v3164_v47 = vadd.f32 %v7979_v4, %v2822_v39  ;;  %3957 = vmatpush1.bf16.msra.mxu0 %v6560_v26  ;;  %v3192_v61 = vmax.f32 %v3064_v35, 0.0  ;;  %v3288_v55 = vmax.f32 %v3160_v36, 0.0  ;;  %v6569_v35 = vld [vmem:[%s8979_s5 + $0x170] ss:$8 sps:$4 sm:$0xff]  }
 0x20c   : > { %v3195_v51 = vmax.f32 %v3067_v41, 0.0  ;;  %v3291_v52 = vmax.f32 %v3163_v42, 0.0  ;;  %3958 = vmatprep.subr.bf16.mxu0 %v6565_v34  ;;  %v6574_v42 = vld [vmem:[%s8979_s5 + $0x184] ss:$8 sps:$4 sm:$0xff]  }
 0x20d   : > { %v3196_v58 = vmax.f32 %v3068_v44, 0.0  ;;  %v3292_v62 = vmax.f32 %v3164_v47, 0.0  ;;  %v2705_v63 = vpop.f32.mrb[20].mxu0  ;;  %v2858_v0 = vpop.f32.mrb[20].mxu1 }
 0x20e   : > { %v2706_v1 = vadd.f32 %v2705_v63, %v7976_v53  ;;  %v2859_v2 = vadd.f32 %v2858_v0, %v8090_v40  ;;  %v2707_v7 = vpop.f32.mrb[21].mxu0  ;;  %v2860_v8 = vpop.f32.mrb[21].mxu1  ;;  %v3371_v9 = vpack.c.bf16 %v3195_v51, %v3191_v32  ;;  %v8106_v10 = vpack.c.bf16 %v3291_v52, %v3287_v50 }
 0x20f   : > { %v2708_v11 = vadd.f32 %v2707_v7, %v7982_v5  ;;  %v2861_v12 = vadd.f32 %v2860_v8, %v8094_v43  ;;  %v2709_v13 = vpop.f32.mrb[22].mxu0  ;;  %v2862_v14 = vpop.f32.mrb[22].mxu1  ;;  %v3372_v15 = vpack.c.bf16 %v3196_v58, %v3192_v61  ;;  %3959 = vmatpush1.bf16.msra.mxu0 %v6563_v48  ;;  %v8113_v17 = vpack.c.bf16 %v3292_v62, %v3288_v55  ;;  %v6572_v8 = vld [vmem:[%s8979_s5 + $0x180] ss:$8 sps:$4 sm:$0xff]  }
 0x210   : > { %v3071_v18 = vadd.f32 %v7973_v3, %v2706_v1  ;;  %v3041_v19 = vadd.f32 %v7064_v60, %v2859_v2  ;;  %v2710_v21 = vadd.f32 %v2709_v13, %v7976_v53  ;;  %v2863_v22 = vadd.f32 %v2862_v14, %v8090_v40  ;;  %v2711_v23 = vpop.f32.mrb[23].mxu0  ;;  %v2864_v24 = vpop.f32.mrb[23].mxu1  ;;  %3960 = vmatprep.subr.bf16.mxu0 %v6568_v57 }
 0x211   : > { %v3072_v26 = vadd.f32 %v7979_v4, %v2708_v11  ;;  %v3042_v56 = vadd.f32 %v7060_v59, %v2861_v12  ;;  %v2712_v28 = vadd.f32 %v2711_v23, %v7982_v5  ;;  %v2865_v29 = vadd.f32 %v2864_v24, %v8094_v43  ;;  %3817 = vmatprep.mubr.bf16.mxu0 %v3372_v15 }
 0x212   : > { %v3075_v30 = vadd.f32 %v7973_v3, %v2710_v21  ;;  %v3045_v31 = vadd.f32 %v7064_v60, %v2863_v22  ;;  %3818 = vmatmul.mubr.bf16.gmra.mrb[64].mxu0 %v3371_v9  ;;  %v3199_v36 = vmax.f32 %v3071_v18, 0.0  ;;  %v3169_v37 = vmax.f32 %v3041_v19, 0.0  ;;  %v6577_v18 = vld [vmem:[%s8979_s5 + $0x194] ss:$8 sps:$4 sm:$0xff]  }
 0x213   : > { %v3076_v33 = vadd.f32 %v7979_v4, %v2712_v28  ;;  %v3046_v34 = vadd.f32 %v7060_v59, %v2865_v29  ;;  %3961 = vmatpush1.bf16.msra.mxu0 %v6566_v16  ;;  %v3200_v44 = vmax.f32 %v3072_v26, 0.0  ;;  %v3170_v47 = vmax.f32 %v3042_v56, 0.0  ;;  %v6575_v28 = vld [vmem:[%s8979_s5 + $0x190] ss:$8 sps:$4 sm:$0xff]  }
 0x214   : > { %v3203_v39 = vmax.f32 %v3075_v30, 0.0  ;;  %v3173_v41 = vmax.f32 %v3045_v31, 0.0  ;;  %3962 = vmatprep.subr.bf16.mxu0 %v6571_v25 }
 0x215   : > { %v3204_v48 = vmax.f32 %v3076_v33, 0.0  ;;  %v3174_v32 = vmax.f32 %v3046_v34, 0.0  ;;  %v2715_v50 = vpop.f32.mrb[24].mxu0  ;;  %v2868_v51 = vpop.f32.mrb[24].mxu1  ;;  %v6580_v34 = vld [vmem:[%s8979_s5 + $0x1a4] ss:$8 sps:$4 sm:$0xff]  }
 0x216   : > { %v8136_v52 = vpack.c.bf16 %v3173_v41, %v3169_v37  ;;  %v2716_v57 = vadd.f32 %v2715_v50, %v7976_v53  ;;  %v2869_v61 = vadd.f32 %v2868_v51, %v8090_v40  ;;  %v2717_v55 = vpop.f32.mrb[25].mxu0  ;;  %v2870_v58 = vpop.f32.mrb[25].mxu1  ;;  %v3375_v62 = vpack.c.bf16 %v3203_v39, %v3199_v36 }
 0x217   : > { %v2718_v63 = vadd.f32 %v2717_v55, %v7982_v5  ;;  %v2871_v0 = vadd.f32 %v2870_v58, %v8094_v43  ;;  %v2719_v1 = vpop.f32.mrb[26].mxu0  ;;  %v2872_v2 = vpop.f32.mrb[26].mxu1  ;;  %v3376_v7 = vpack.c.bf16 %v3204_v48, %v3200_v44  ;;  %3963 = vmatpush1.bf16.msra.mxu0 %v6569_v35  ;;  %v8145_v9 = vpack.c.bf16 %v3174_v32, %v3170_v47 }
 0x218   : > { %v3079_v11 = vadd.f32 %v7973_v3, %v2716_v57  ;;  %v3049_v12 = vadd.f32 %v7064_v60, %v2869_v61  ;;  %v2720_v13 = vadd.f32 %v2719_v1, %v7976_v53  ;;  %v2873_v14 = vadd.f32 %v2872_v2, %v8090_v40  ;;  %v2721_v15 = vpop.f32.mrb[27].mxu0  ;;  %v2874_v16 = vpop.f32.mrb[27].mxu1  ;;  %3964 = vmatprep.subr.bf16.mxu0 %v6574_v42 }
 0x219   : > { %v3080_v19 = vadd.f32 %v7979_v4, %v2718_v63  ;;  %v3050_v21 = vadd.f32 %v7060_v59, %v2871_v0  ;;  %v2722_v22 = vadd.f32 %v2721_v15, %v7982_v5  ;;  %v2875_v23 = vadd.f32 %v2874_v16, %v8094_v43  ;;  %3827 = vmatprep.mubr.bf16.mxu0 %v3376_v7  ;;  %v6578_v63 = vld [vmem:[%s8979_s5 + $0x1a0] ss:$8 sps:$4 sm:$0xff]  }
 0x21a   : > { %v3083_v24 = vadd.f32 %v7973_v3, %v2720_v13  ;;  %v3053_v25 = vadd.f32 %v7064_v60, %v2873_v14  ;;  %3828 = vmatmul.mubr.bf16.gmra.mrb[68].mxu0 %v3375_v62  ;;  %v3207_v29 = vmax.f32 %v3079_v11, 0.0  ;;  %v3177_v30 = vmax.f32 %v3049_v12, 0.0  ;;  %v6583_v13 = vld [vmem:[%s8979_s5 + $0x1b4] ss:$8 sps:$4 sm:$0xff]  }
 0x21b   : > { %v3084_v26 = vadd.f32 %v7979_v4, %v2722_v22  ;;  %v3054_v56 = vadd.f32 %v7060_v59, %v2875_v23  ;;  %3965 = vmatpush1.bf16.msra.mxu0 %v6572_v8  ;;  %v3208_v35 = vmax.f32 %v3080_v19, 0.0  ;;  %v3178_v36 = vmax.f32 %v3050_v21, 0.0 }
 0x21c   : > { %v3211_v31 = vmax.f32 %v3083_v24, 0.0  ;;  %v3181_v33 = vmax.f32 %v3053_v25, 0.0  ;;  %3966 = vmatprep.subr.bf16.mxu0 %v6577_v18  ;;  %v6581_v24 = vld [vmem:[%s8979_s5 + $0x1b0] ss:$8 sps:$4 sm:$0xff]  }
 0x21d   : > { %v3212_v37 = vmax.f32 %v3084_v26, 0.0  ;;  %v3182_v39 = vmax.f32 %v3054_v56, 0.0  ;;  %v2725_v41 = vpop.f32.mrb[28].mxu0  ;;  %v2878_v42 = vpop.f32.mrb[28].mxu1 }
 0x21e   : > { %v2726_v44 = vadd.f32 %v2725_v41, %v7976_v53  ;;  %v2879_v47 = vadd.f32 %v2878_v42, %v8090_v40  ;;  %v2727_v48 = vpop.f32.mrb[29].mxu0  ;;  %v2880_v32 = vpop.f32.mrb[29].mxu1  ;;  %v3379_v50 = vpack.c.bf16 %v3211_v31, %v3207_v29  ;;  %v8170_v51 = vpack.c.bf16 %v3181_v33, %v3177_v30  ;;  %v6586_v29 = vld [vmem:[%s8979_s5 + $0x1c4] ss:$8 sps:$4 sm:$0xff]  }
 0x21f   : > { %v2728_v57 = vadd.f32 %v2727_v48, %v7982_v5  ;;  %v2881_v61 = vadd.f32 %v2880_v32, %v8094_v43  ;;  %v2729_v55 = vpop.f32.mrb[30].mxu0  ;;  %v2882_v58 = vpop.f32.mrb[30].mxu1  ;;  %v3380_v62 = vpack.c.bf16 %v3212_v37, %v3208_v35  ;;  %3967 = vmatpush1.bf16.msra.mxu0 %v6575_v28  ;;  %v8177_v0 = vpack.c.bf16 %v3182_v39, %v3178_v36 }
 0x220   : > { %v3087_v1 = vadd.f32 %v7973_v3, %v2726_v44  ;;  %v3057_v2 = vadd.f32 %v7064_v60, %v2879_v47  ;;  %v2730_v7 = vadd.f32 %v2729_v55, %v7976_v53  ;;  %v2883_v8 = vadd.f32 %v2882_v58, %v8090_v40  ;;  %v2731_v11 = vpop.f32.mrb[31].mxu0  ;;  %v2884_v12 = vpop.f32.mrb[31].mxu1  ;;  %3968 = vmatprep.subr.bf16.mxu0 %v6580_v34  ;;  %v6584_v55 = vld [vmem:[%s8979_s5 + $0x1c0] ss:$8 sps:$4 sm:$0xff]  }
 0x221   : > { %v3088_v14 = vadd.f32 %v7979_v4, %v2728_v57  ;;  %v3058_v15 = vadd.f32 %v7060_v59, %v2881_v61  ;;  %v2732_v16 = vadd.f32 %v2731_v11, %v7982_v5  ;;  %v2885_v18 = vadd.f32 %v2884_v12, %v8094_v43  ;;  %3837 = vmatprep.mubr.bf16.mxu0 %v3380_v62  ;;  %v6589_v11 = vld [vmem:[%s8979_s5 + $0x1d4] ss:$8 sps:$4 sm:$0xff]  }
 0x222   : > { %v3091_v19 = vadd.f32 %v7973_v3, %v2730_v7  ;;  %v3061_v21 = vadd.f32 %v7064_v60, %v2883_v8  ;;  %3838 = vmatmul.mubr.bf16.gmra.mrb[72].mxu0 %v3379_v50  ;;  %v3215_v25 = vmax.f32 %v3087_v1, 0.0  ;;  %v3185_v26 = vmax.f32 %v3057_v2, 0.0 }
 0x223   : > { %v3092_v22 = vadd.f32 %v7979_v4, %v2732_v16  ;;  %v3062_v23 = vadd.f32 %v7060_v59, %v2885_v18  ;;  %3969 = vmatpush1.bf16.msra.mxu0 %v6578_v63  ;;  %v3216_v30 = vmax.f32 %v3088_v14, 0.0  ;;  %v3186_v31 = vmax.f32 %v3058_v15, 0.0 }
 0x224   : > { %v3219_v56 = vmax.f32 %v3091_v19, 0.0  ;;  %v3189_v28 = vmax.f32 %v3061_v21, 0.0  ;;  %3970 = vmatprep.subr.bf16.mxu0 %v6583_v13 }
 0x225   : > { %v3220_v33 = vmax.f32 %v3092_v22, 0.0  ;;  %v3190_v34 = vmax.f32 %v3062_v23, 0.0  ;;  %v2735_v35 = vpop.f32.mrb[32].mxu0  ;;  %v2888_v36 = vpop.f32.mrb[32].mxu1  ;;  %v6587_v22 = vld [vmem:[%s8979_s5 + $0x1d0] ss:$8 sps:$4 sm:$0xff]  }
 0x226   : > { %v2736_v37 = vadd.f32 %v2735_v35, %v7976_v53  ;;  %v2889_v39 = vadd.f32 %v2888_v36, %v8090_v40  ;;  %v2737_v41 = vpop.f32.mrb[33].mxu0  ;;  %v2890_v42 = vpop.f32.mrb[33].mxu1  ;;  %v3383_v44 = vpack.c.bf16 %v3219_v56, %v3215_v25  ;;  %v8202_v47 = vpack.c.bf16 %v3189_v28, %v3185_v26  ;;  %v6592_v56 = vld [vmem:[%s8979_s5 + $0x1e4] ss:$8 sps:$4 sm:$0xff]  }
 0x227   : > { %v2738_v48 = vadd.f32 %v2737_v41, %v7982_v5  ;;  %v2891_v32 = vadd.f32 %v2890_v42, %v8094_v43  ;;  %v2739_v50 = vpop.f32.mrb[34].mxu0  ;;  %v2892_v57 = vpop.f32.mrb[34].mxu1  ;;  %v3384_v61 = vpack.c.bf16 %v3220_v33, %v3216_v30  ;;  %3971 = vmatpush1.bf16.msra.mxu0 %v6581_v24  ;;  %v8209_v58 = vpack.c.bf16 %v3190_v34, %v3186_v31 }
 0x228   : > { %v3095_v62 = vadd.f32 %v7973_v3, %v2736_v37  ;;  %v3065_v63 = vadd.f32 %v7064_v60, %v2889_v39  ;;  %v2740_v1 = vadd.f32 %v2739_v50, %v7976_v53  ;;  %v2893_v2 = vadd.f32 %v2892_v57, %v8090_v40  ;;  %v2741_v7 = vpop.f32.mrb[35].mxu0  ;;  %v2894_v8 = vpop.f32.mrb[35].mxu1  ;;  %3972 = vmatprep.subr.bf16.mxu0 %v6586_v29 }
 0x229   : > { %v3096_v12 = vadd.f32 %v7979_v4, %v2738_v48  ;;  %v3066_v13 = vadd.f32 %v7060_v59, %v2891_v32  ;;  %v2742_v14 = vadd.f32 %v2741_v7, %v7982_v5  ;;  %v2895_v15 = vadd.f32 %v2894_v8, %v8094_v43  ;;  %3847 = vmatprep.mubr.bf16.mxu0 %v3384_v61  ;;  %v6590_v61 = vld [vmem:[%s8979_s5 + $0x1e0] ss:$8 sps:$4 sm:$0xff]  }
 0x22a   : > { %v3099_v16 = vadd.f32 %v7973_v3, %v2740_v1  ;;  %v3069_v18 = vadd.f32 %v7064_v60, %v2893_v2  ;;  %3848 = vmatmul.mubr.bf16.gmra.mrb[76].mxu0 %v3383_v44  ;;  %v3223_v23 = vmax.f32 %v3095_v62, 0.0  ;;  %v3193_v24 = vmax.f32 %v3065_v63, 0.0 }
 0x22b   : > { %v3100_v19 = vadd.f32 %v7979_v4, %v2742_v14  ;;  %v3070_v21 = vadd.f32 %v7060_v59, %v2895_v15  ;;  %3973 = vmatpush1.bf16.msra.mxu0 %v6584_v55  ;;  %v3224_v28 = vmax.f32 %v3096_v12, 0.0  ;;  %v3194_v29 = vmax.f32 %v3066_v13, 0.0 }
 0x22c   : > { %v3227_v25 = vmax.f32 %v3099_v16, 0.0  ;;  %v3197_v26 = vmax.f32 %v3069_v18, 0.0  ;;  %3974 = vmatprep.subr.bf16.mxu0 %v6589_v11  ;;  %v6595_v11 = vld [vmem:[%s8979_s5 + $0x1f4] ss:$8 sps:$4 sm:$0xff]  }
 0x22d   : > { %v3228_v30 = vmax.f32 %v3100_v19, 0.0  ;;  %v3198_v31 = vmax.f32 %v3070_v21, 0.0  ;;  %v2745_v33 = vpop.f32.mrb[36].mxu0  ;;  %v2898_v34 = vpop.f32.mrb[36].mxu1 }
 0x22e   : > { %v2746_v35 = vadd.f32 %v2745_v33, %v7976_v53  ;;  %v2899_v36 = vadd.f32 %v2898_v34, %v8090_v40  ;;  %v2747_v37 = vpop.f32.mrb[37].mxu0  ;;  %v2900_v39 = vpop.f32.mrb[37].mxu1  ;;  %v3387_v41 = vpack.c.bf16 %v3227_v25, %v3223_v23  ;;  %v8234_v42 = vpack.c.bf16 %v3197_v26, %v3193_v24 }
 0x22f   : > { %v2748_v44 = vadd.f32 %v2747_v37, %v7982_v5  ;;  %v2901_v48 = vadd.f32 %v2900_v39, %v8094_v43  ;;  %v2749_v32 = vpop.f32.mrb[38].mxu0  ;;  %v2902_v50 = vpop.f32.mrb[38].mxu1  ;;  %v3388_v57 = vpack.c.bf16 %v3228_v30, %v3224_v28  ;;  %3975 = vmatpush1.bf16.msra.mxu0 %v6587_v22  ;;  %v8241_v55 = vpack.c.bf16 %v3198_v31, %v3194_v29  ;;  %v6593_v22 = vld [vmem:[%s8979_s5 + $0x1f0] ss:$8 sps:$4 sm:$0xff]  }
 0x230   : > { %v3103_v62 = vadd.f32 %v7973_v3, %v2746_v35  ;;  %v3073_v63 = vadd.f32 %v7064_v60, %v2899_v36  ;;  %v2750_v1 = vadd.f32 %v2749_v32, %v7976_v53  ;;  %v2903_v2 = vadd.f32 %v2902_v50, %v8090_v40  ;;  %v2751_v7 = vpop.f32.mrb[39].mxu0  ;;  %v2904_v8 = vpop.f32.mrb[39].mxu1  ;;  %3976 = vmatprep.subr.bf16.mxu0 %v6592_v56 }
 0x231   : > { %v3104_v12 = vadd.f32 %v7979_v4, %v2748_v44  ;;  %v3074_v13 = vadd.f32 %v7060_v59, %v2901_v48  ;;  %v2752_v14 = vadd.f32 %v2751_v7, %v7982_v5  ;;  %v2905_v15 = vadd.f32 %v2904_v8, %v8094_v43  ;;  %3857 = vmatprep.mubr.bf16.mxu0 %v3388_v57 }
 0x232   : > { %v3107_v16 = vadd.f32 %v7973_v3, %v2750_v1  ;;  %v3077_v18 = vadd.f32 %v7064_v60, %v2903_v2  ;;  %3858 = vmatmul.mubr.bf16.gmra.mrb[80].mxu0 %v3387_v41  ;;  %v3231_v23 = vmax.f32 %v3103_v62, 0.0  ;;  %v3201_v24 = vmax.f32 %v3073_v63, 0.0 }
 0x233   : > { %v3108_v19 = vadd.f32 %v7979_v4, %v2752_v14  ;;  %v3078_v21 = vadd.f32 %v7060_v59, %v2905_v15  ;;  %3977 = vmatpush1.bf16.msra.mxu0 %v6590_v61  ;;  %v3232_v56 = vmax.f32 %v3104_v12, 0.0  ;;  %v3202_v28 = vmax.f32 %v3074_v13, 0.0 }
 0x234   : > { %v3235_v25 = vmax.f32 %v3107_v16, 0.0  ;;  %v3205_v26 = vmax.f32 %v3077_v18, 0.0  ;;  %3978 = vmatprep.subr.bf16.mxu0 %v6595_v11 }
 0x235   : > { %v3236_v29 = vmax.f32 %v3108_v19, 0.0  ;;  %v3206_v30 = vmax.f32 %v3078_v21, 0.0  ;;  %v2755_v31 = vpop.f32.mrb[40].mxu0  ;;  %v2908_v33 = vpop.f32.mrb[40].mxu1 }
 0x236   : > { %v2756_v34 = vadd.f32 %v2755_v31, %v7976_v53  ;;  %v2909_v35 = vadd.f32 %v2908_v33, %v8090_v40  ;;  %v2757_v36 = vpop.f32.mrb[41].mxu0  ;;  %v2910_v37 = vpop.f32.mrb[41].mxu1  ;;  %v3391_v39 = vpack.c.bf16 %v3235_v25, %v3231_v23  ;;  %v8263_v41 = vpack.c.bf16 %v3205_v26, %v3201_v24 }
 0x237   : > { %v2758_v44 = vadd.f32 %v2757_v36, %v7982_v5  ;;  %v2911_v48 = vadd.f32 %v2910_v37, %v8094_v43  ;;  %v2759_v32 = vpop.f32.mrb[42].mxu0  ;;  %v2912_v50 = vpop.f32.mrb[42].mxu1  ;;  %v3392_v57 = vpack.c.bf16 %v3236_v29, %v3232_v56  ;;  %3979 = vmatpush1.bf16.msra.mxu0 %v6593_v22  ;;  %v8267_v61 = vpack.c.bf16 %v3206_v30, %v3202_v28 }
 0x238   : > { %v3111_v62 = vadd.f32 %v7973_v3, %v2756_v34  ;;  %v3081_v63 = vadd.f32 %v7064_v60, %v2909_v35  ;;  %v2760_v1 = vadd.f32 %v2759_v32, %v7976_v53  ;;  %v2913_v2 = vadd.f32 %v2912_v50, %v8090_v40  ;;  %v2761_v7 = vpop.f32.mrb[43].mxu0  ;;  %v2914_v8 = vpop.f32.mrb[43].mxu1 }
 0x239   : > { %v3112_v11 = vadd.f32 %v7979_v4, %v2758_v44  ;;  %v3082_v12 = vadd.f32 %v7060_v59, %v2911_v48  ;;  %v2762_v13 = vadd.f32 %v2761_v7, %v7982_v5  ;;  %v2915_v14 = vadd.f32 %v2914_v8, %v8094_v43  ;;  %3867 = vmatprep.mubr.bf16.mxu0 %v3392_v57 }
 0x23a   : > { %v3115_v15 = vadd.f32 %v7973_v3, %v2760_v1  ;;  %v3085_v16 = vadd.f32 %v7064_v60, %v2913_v2  ;;  %3868 = vmatmul.mubr.bf16.gmra.mrb[84].mxu0 %v3391_v39  ;;  %v3239_v21 = vmax.f32 %v3111_v62, 0.0  ;;  %v3209_v22 = vmax.f32 %v3081_v63, 0.0 }
 0x23b   : > { %v3116_v18 = vadd.f32 %v7979_v4, %v2762_v13  ;;  %v3086_v19 = vadd.f32 %v7060_v59, %v2915_v14  ;;  %v3240_v25 = vmax.f32 %v3112_v11, 0.0  ;;  %v3210_v26 = vmax.f32 %v3082_v12, 0.0 }
 0x23c   : > { %v3243_v23 = vmax.f32 %v3115_v15, 0.0  ;;  %v3213_v24 = vmax.f32 %v3085_v16, 0.0 }
 0x23d   : > { %v3244_v56 = vmax.f32 %v3116_v18, 0.0  ;;  %v3214_v28 = vmax.f32 %v3086_v19, 0.0  ;;  %v2765_v29 = vpop.f32.mrb[44].mxu0  ;;  %v2918_v30 = vpop.f32.mrb[44].mxu1 }
 0x23e   : > { %v2766_v31 = vadd.f32 %v2765_v29, %v7976_v53  ;;  %v2919_v33 = vadd.f32 %v2918_v30, %v8090_v40  ;;  %v2767_v34 = vpop.f32.mrb[45].mxu0  ;;  %v2920_v35 = vpop.f32.mrb[45].mxu1  ;;  %v3395_v36 = vpack.c.bf16 %v3243_v23, %v3239_v21  ;;  %v8283_v37 = vpack.c.bf16 %v3213_v24, %v3209_v22 }
 0x23f   : > { %v2768_v39 = vadd.f32 %v2767_v34, %v7982_v5  ;;  %v2921_v44 = vadd.f32 %v2920_v35, %v8094_v43  ;;  %v2769_v48 = vpop.f32.mrb[46].mxu0  ;;  %v2922_v32 = vpop.f32.mrb[46].mxu1  ;;  %v3396_v50 = vpack.c.bf16 %v3244_v56, %v3240_v25  ;;  %v8287_v57 = vpack.c.bf16 %v3214_v28, %v3210_v26 }
 0x240   : > { %v3119_v62 = vadd.f32 %v7973_v3, %v2766_v31  ;;  %v3089_v63 = vadd.f32 %v7064_v60, %v2919_v33  ;;  %v2770_v1 = vadd.f32 %v2769_v48, %v7976_v53  ;;  %v2923_v2 = vadd.f32 %v2922_v32, %v8090_v40  ;;  %v2771_v7 = vpop.f32.mrb[47].mxu0  ;;  %v2924_v8 = vpop.f32.mrb[47].mxu1 }
 0x241   : > { %v3120_v11 = vadd.f32 %v7979_v4, %v2768_v39  ;;  %v3090_v12 = vadd.f32 %v7060_v59, %v2921_v44  ;;  %v2772_v13 = vadd.f32 %v2771_v7, %v7982_v5  ;;  %v2925_v14 = vadd.f32 %v2924_v8, %v8094_v43  ;;  %3877 = vmatprep.mubr.bf16.mxu0 %v3396_v50 }
 0x242   : > { %v3123_v15 = vadd.f32 %v7973_v3, %v2770_v1  ;;  %v3093_v16 = vadd.f32 %v7064_v60, %v2923_v2  ;;  %3878 = vmatmul.mubr.bf16.gmra.mrb[88].mxu0 %v3395_v36  ;;  %v3247_v21 = vmax.f32 %v3119_v62, 0.0  ;;  %v3217_v22 = vmax.f32 %v3089_v63, 0.0 }
 0x243   : > { %v3124_v18 = vadd.f32 %v7979_v4, %v2772_v13  ;;  %v3094_v19 = vadd.f32 %v7060_v59, %v2925_v14  ;;  %v3248_v25 = vmax.f32 %v3120_v11, 0.0  ;;  %v3218_v26 = vmax.f32 %v3090_v12, 0.0 }
 0x244   : > { %v3251_v23 = vmax.f32 %v3123_v15, 0.0  ;;  %v3221_v24 = vmax.f32 %v3093_v16, 0.0 }
 0x245   : > { %v3252_v56 = vmax.f32 %v3124_v18, 0.0  ;;  %v3222_v28 = vmax.f32 %v3094_v19, 0.0  ;;  %v2775_v29 = vpop.f32.mrb[48].mxu0  ;;  %v2928_v30 = vpop.f32.mrb[48].mxu1 }
 0x246   : > { %v2776_v31 = vadd.f32 %v2775_v29, %v7976_v53  ;;  %v2929_v33 = vadd.f32 %v2928_v30, %v8090_v40  ;;  %v2777_v34 = vpop.f32.mrb[49].mxu0  ;;  %v2930_v35 = vpop.f32.mrb[49].mxu1  ;;  %v3399_v36 = vpack.c.bf16 %v3251_v23, %v3247_v21  ;;  %v8303_v39 = vpack.c.bf16 %v3221_v24, %v3217_v22 }
 0x247   : > { %v2778_v44 = vadd.f32 %v2777_v34, %v7982_v5  ;;  %v2931_v48 = vadd.f32 %v2930_v35, %v8094_v43  ;;  %v2779_v32 = vpop.f32.mrb[50].mxu0  ;;  %v2932_v50 = vpop.f32.mrb[50].mxu1  ;;  %v3400_v62 = vpack.c.bf16 %v3252_v56, %v3248_v25  ;;  %v8307_v63 = vpack.c.bf16 %v3222_v28, %v3218_v26 }
 0x248   : > { %v3127_v1 = vadd.f32 %v7973_v3, %v2776_v31  ;;  %v3097_v2 = vadd.f32 %v7064_v60, %v2929_v33  ;;  %v2780_v7 = vadd.f32 %v2779_v32, %v7976_v53  ;;  %v2933_v8 = vadd.f32 %v2932_v50, %v8090_v40  ;;  %v2781_v11 = vpop.f32.mrb[51].mxu0  ;;  %v2934_v12 = vpop.f32.mrb[51].mxu1 }
 0x249   : > { %v3128_v13 = vadd.f32 %v7979_v4, %v2778_v44  ;;  %v3098_v14 = vadd.f32 %v7060_v59, %v2931_v48  ;;  %v2782_v15 = vadd.f32 %v2781_v11, %v7982_v5  ;;  %v2935_v16 = vadd.f32 %v2934_v12, %v8094_v43  ;;  %3887 = vmatprep.mubr.bf16.mxu0 %v3400_v62 }
 0x24a   : > { %v3131_v18 = vadd.f32 %v7973_v3, %v2780_v7  ;;  %v3101_v19 = vadd.f32 %v7064_v60, %v2933_v8  ;;  %3888 = vmatmul.mubr.bf16.gmra.mrb[92].mxu0 %v3399_v36  ;;  %v3255_v22 = vmax.f32 %v3127_v1, 0.0  ;;  %v3225_v23 = vmax.f32 %v3097_v2, 0.0  ;;  %v6596_v7 = vld [vmem:[%s8981_s7 + $0x40] sm:$0xff]  }
 0x24b   : > { %v3132_v53 = vadd.f32 %v7979_v4, %v2782_v15  ;;  %v3102_v21 = vadd.f32 %v7060_v59, %v2935_v16  ;;  %v3256_v26 = vmax.f32 %v3128_v13, 0.0  ;;  %v3226_v56 = vmax.f32 %v3098_v14, 0.0  ;;  %v6597_v8 = vld [vmem:[%s8981_s7] sm:$0xff]   ;;  %5691 = vmatprep.subr.bf16.mxu1 %v6596_v7 }
 0x24c   : > { %v3259_v24 = vmax.f32 %v3131_v18, 0.0  ;;  %v3229_v25 = vmax.f32 %v3101_v19, 0.0  ;;  %5692 = vmatpush3.bf16.msra.mxu1 %v6597_v8  ;;  %v6598_v8 = vld [vmem:[%s8981_s7 + $0x48] sm:$0xff]  }
 0x24d   : > { %v3260_v28 = vmax.f32 %v3132_v53, 0.0  ;;  %v3230_v5 = vmax.f32 %v3102_v21, 0.0  ;;  %v2938_v29 = vpop.f32.mrb[52].mxu1  ;;  %5693 = vmatprep.subr.bf16.mxu1 %v6598_v8  ;;  %v6600_v8 = vld [vmem:[%s8981_s7 + $0x50] sm:$0xff]  }
 0x24e   : > { %v2939_v30 = vadd.f32 %v2938_v29, %v8090_v40  ;;  %v2940_v31 = vpop.f32.mrb[53].mxu1  ;;  %v3403_v3 = vpack.c.bf16 %v3259_v24, %v3255_v22  ;;  %v8322_v33 = vpack.c.bf16 %v3229_v25, %v3225_v23 }
 0x24f   : > { %v2941_v34 = vadd.f32 %v2940_v31, %v8094_v43  ;;  %v2942_v4 = vpop.f32.mrb[54].mxu1  ;;  %v3404_v35 = vpack.c.bf16 %v3260_v28, %v3256_v26  ;;  %v8325_v36 = vpack.c.bf16 %v3230_v5, %v3226_v56 }
 0x250   : > { %v3105_v44 = vadd.f32 %v7064_v60, %v2939_v30  ;;  %v2943_v48 = vadd.f32 %v2942_v4, %v8090_v40  ;;  %v2944_v32 = vpop.f32.mrb[55].mxu1 }
 0x251   : > { %v3106_v50 = vadd.f32 %v7060_v59, %v2941_v34  ;;  %v2945_v62 = vadd.f32 %v2944_v32, %v8094_v43  ;;  %3897 = vmatprep.mubr.bf16.mxu0 %v3404_v35 }
 0x252   : > { %v3109_v1 = vadd.f32 %v7064_v60, %v2943_v48  ;;  %3898 = vmatmul.mubr.bf16.gmra.mrb[96].mxu0 %v3403_v3  ;;  %v3233_v11 = vmax.f32 %v3105_v44, 0.0 }
 0x253   : > { %v3110_v2 = vadd.f32 %v7060_v59, %v2945_v62  ;;  %3907 = vmatprep.mubr.bf16.mxu0 %v8009_v54  ;;  %v3234_v13 = vmax.f32 %v3106_v50, 0.0 }
 0x254   : > { %v3237_v12 = vmax.f32 %v3109_v1, 0.0 }
 0x255   : > { %v3238_v14 = vmax.f32 %v3110_v2, 0.0  ;;  %v2948_v15 = vpop.f32.mrb[56].mxu1 }
 0x256   : > { %v2949_v16 = vadd.f32 %v2948_v15, %v8090_v40  ;;  %v2950_v18 = vpop.f32.mrb[57].mxu1  ;;  %v8341_v19 = vpack.c.bf16 %v3237_v12, %v3233_v11  ;;  %v6599_v11 = vld [vmem:[%s8981_s7 + $0x8] sm:$0xff]  }
 0x257   : > { %v2951_v54 = vadd.f32 %v2950_v18, %v8094_v43  ;;  %v2952_v53 = vpop.f32.mrb[58].mxu1  ;;  %v8344_v21 = vpack.c.bf16 %v3238_v14, %v3234_v13  ;;  %5694 = vmatpush3.bf16.msra.mxu1 %v6599_v11  ;;  %v6601_v11 = vld [vmem:[%s8981_s7 + $0x10] sm:$0xff]  }
 0x258   : > { %v3113_v22 = vadd.f32 %v7064_v60, %v2949_v16  ;;  %v2953_v23 = vadd.f32 %v2952_v53, %v8090_v40  ;;  %v2954_v24 = vpop.f32.mrb[59].mxu1  ;;  %5695 = vmatprep.subr.bf16.mxu1 %v6600_v8 }
 0x259   : > { %v3114_v25 = vadd.f32 %v7060_v59, %v2951_v54  ;;  %v2955_v26 = vadd.f32 %v2954_v24, %v8094_v43 }
 0x25a   : > { %v3117_v56 = vadd.f32 %v7064_v60, %v2953_v23  ;;  %3908 = vmatmul.mubr.bf16.gmra.mrb[100].mxu0 %v8002_v45  ;;  %v3241_v5 = vmax.f32 %v3113_v22, 0.0 }
 0x25b   : > { %v3118_v28 = vadd.f32 %v7060_v59, %v2955_v26  ;;  %3917 = vmatprep.mubr.bf16.mxu0 %v8041_v38  ;;  %v3242_v30 = vmax.f32 %v3114_v25, 0.0  ;;  %5696 = vmatpush3.bf16.msra.mxu1 %v6601_v11 }
 0x25c   : > { %v3245_v29 = vmax.f32 %v3117_v56, 0.0 }
 0x25d   : > { %v3246_v31 = vmax.f32 %v3118_v28, 0.0  ;;  %v2958_v3 = vpop.f32.mrb[60].mxu1 }
 0x25e   : > { %v2959_v34 = vadd.f32 %v2958_v3, %v8090_v40  ;;  %v2960_v4 = vpop.f32.mrb[61].mxu1  ;;  %v8355_v35 = vpack.c.bf16 %v3245_v29, %v3241_v5 }
 0x25f   : > { %v2961_v44 = vadd.f32 %v2960_v4, %v8094_v43  ;;  %v2962_v48 = vpop.f32.mrb[62].mxu1  ;;  %v8358_v32 = vpack.c.bf16 %v3246_v31, %v3242_v30 }
 0x260   : > { %v3121_v45 = vadd.f32 %v7064_v60, %v2959_v34  ;;  %v2963_v50 = vadd.f32 %v2962_v48, %v8090_v40  ;;  %v2964_v38 = vpop.f32.mrb[63].mxu1 }
 0x261   : > { %v3122_v62 = vadd.f32 %v7060_v59, %v2961_v44  ;;  %v2965_v1 = vadd.f32 %v2964_v38, %v8094_v43 }
 0x262   : > { %v3125_v2 = vadd.f32 %v7064_v60, %v2963_v50  ;;  %3918 = vmatmul.mubr.bf16.gmra.mrb[104].mxu0 %v8034_v49  ;;  %v3249_v12 = vmax.f32 %v3121_v45, 0.0 }
 0x263   : > { %v3126_v7 = vadd.f32 %v7060_v59, %v2965_v1  ;;  %3927 = vmatprep.mubr.bf16.mxu0 %v8073_v27  ;;  %v3250_v14 = vmax.f32 %v3122_v62, 0.0 }
 0x264   : > { %v3253_v13 = vmax.f32 %v3125_v2, 0.0 }
 0x265   : > { %v3254_v15 = vmax.f32 %v3126_v7, 0.0  ;;  %v2968_v16 = vpop.f32.mrb[64].mxu1 }
 0x266   : > { %v2969_v49 = vadd.f32 %v2968_v16, %v8090_v40  ;;  %v2970_v18 = vpop.f32.mrb[65].mxu1  ;;  %v8375_v54 = vpack.c.bf16 %v3253_v13, %v3249_v12  ;;  %v6602_v12 = vld [vmem:[%s8981_s7 + $0x58] sm:$0xff]  }
 0x267   : > { %v2971_v27 = vadd.f32 %v2970_v18, %v8094_v43  ;;  %v2972_v53 = vpop.f32.mrb[66].mxu1  ;;  %v8378_v22 = vpack.c.bf16 %v3254_v15, %v3250_v14  ;;  %v6603_v18 = vld [vmem:[%s8981_s7 + $0x18] sm:$0xff]   ;;  %5697 = vmatprep.subr.bf16.mxu1 %v6602_v12 }
 0x268   : > { %v3129_v23 = vadd.f32 %v7064_v60, %v2969_v49  ;;  %v2973_v24 = vadd.f32 %v2972_v53, %v8090_v40  ;;  %v2974_v25 = vpop.f32.mrb[67].mxu1  ;;  %5698 = vmatpush3.bf16.msra.mxu1 %v6603_v18  ;;  %v6610_v18 = vld [vmem:[%s8981_s7 + $0x78] sm:$0xff]  }
 0x269   : > { %v3130_v26 = vadd.f32 %v7060_v59, %v2971_v27  ;;  %v2975_v56 = vadd.f32 %v2974_v25, %v8094_v43 }
 0x26a   : > { %v3133_v28 = vadd.f32 %v7064_v60, %v2973_v24  ;;  %3928 = vmatmul.mubr.bf16.gmra.mrb[108].mxu0 %v8066_v20  ;;  %v3257_v29 = vmax.f32 %v3129_v23, 0.0 }
 0x26b   : > { %v3134_v5 = vadd.f32 %v7060_v59, %v2975_v56  ;;  %3937 = vmatprep.mubr.bf16.mxu0 %v8113_v17  ;;  %v3258_v31 = vmax.f32 %v3130_v26, 0.0 }
 0x26c   : > { %v3261_v30 = vmax.f32 %v3133_v28, 0.0 }
 0x26d   : > { %v3262_v3 = vmax.f32 %v3134_v5, 0.0  ;;  %v2978_v34 = vpop.f32.mrb[68].mxu1 }
 0x26e   : > { %v2979_v4 = vadd.f32 %v2978_v34, %v8090_v40  ;;  %v2980_v44 = vpop.f32.mrb[69].mxu1  ;;  %v8389_v48 = vpack.c.bf16 %v3261_v30, %v3257_v29  ;;  %v6606_v34 = vld [vmem:[%s8981_s7 + $0x68] sm:$0xff]  }
 0x26f   : > { %v2981_v45 = vadd.f32 %v2980_v44, %v8094_v43  ;;  %v2982_v50 = vpop.f32.mrb[70].mxu1  ;;  %v8392_v38 = vpack.c.bf16 %v3262_v3, %v3258_v31  ;;  %v6605_v31 = vld [vmem:[%s8981_s7 + $0x20] sm:$0xff]  }
 0x270   : > { %v3137_v20 = vadd.f32 %v7064_v60, %v2979_v4  ;;  %v2983_v62 = vadd.f32 %v2982_v50, %v8090_v40  ;;  %v2984_v17 = vpop.f32.mrb[71].mxu1 }
 0x271   : > { %v3138_v1 = vadd.f32 %v7060_v59, %v2981_v45  ;;  %v2985_v2 = vadd.f32 %v2984_v17, %v8094_v43  ;;  %v6607_v17 = vld [vmem:[%s8981_s7 + $0x28] sm:$0xff]  }
 0x272   : > { %v3141_v7 = vadd.f32 %v7064_v60, %v2983_v62  ;;  %3938 = vmatmul.mubr.bf16.gmra.mrb[112].mxu0 %v8106_v10  ;;  %v3265_v14 = vmax.f32 %v3137_v20, 0.0 }
 0x273   : > { %v3142_v13 = vadd.f32 %v7060_v59, %v2985_v2  ;;  %3980 = vmatprep.mubr.bf16.mxu0 %v8145_v9  ;;  %v3266_v10 = vmax.f32 %v3138_v1, 0.0  ;;  %v6604_v9 = vld [vmem:[%s8981_s7 + $0x60] sm:$0xff]  }
 0x274   : > { %v3269_v15 = vmax.f32 %v3141_v7, 0.0  ;;  %5699 = vmatprep.subr.bf16.mxu1 %v6604_v9 }
 0x275   : > { %v3270_v16 = vmax.f32 %v3142_v13, 0.0  ;;  %v2988_v49 = vpop.f32.mrb[72].mxu1  ;;  %5700 = vmatpush3.bf16.msra.mxu1 %v6605_v31 }
 0x276   : > { %v2989_v27 = vadd.f32 %v2988_v49, %v8090_v40  ;;  %v2990_v53 = vpop.f32.mrb[73].mxu1  ;;  %v8415_v23 = vpack.c.bf16 %v3269_v15, %v3265_v14  ;;  %5701 = vmatprep.subr.bf16.mxu1 %v6606_v34 }
 0x277   : > { %v2991_v24 = vadd.f32 %v2990_v53, %v8094_v43  ;;  %v2992_v25 = vpop.f32.mrb[74].mxu1  ;;  %v8421_v26 = vpack.c.bf16 %v3270_v16, %v3266_v10  ;;  %v6609_v16 = vld [vmem:[%s8981_s7 + $0x30] sm:$0xff]  }
 0x278   : > { %v3145_v56 = vadd.f32 %v7064_v60, %v2989_v27  ;;  %v2993_v28 = vadd.f32 %v2992_v25, %v8090_v40  ;;  %v2994_v5 = vpop.f32.mrb[75].mxu1 }
 0x279   : > { %v3146_v29 = vadd.f32 %v7060_v59, %v2991_v24  ;;  %v2995_v30 = vadd.f32 %v2994_v5, %v8094_v43  ;;  %5702 = vmatpush3.bf16.msra.mxu1 %v6607_v17 }
 0x27a   : > { %v3149_v3 = vadd.f32 %v7064_v60, %v2993_v28  ;;  %3981 = vmatmul.mubr.bf16.vlgmr.msra.gmra.mrb[52].mxu0 %v8136_v52  ;;  %v3273_v44 = vmax.f32 %v3145_v56, 0.0  ;;  %v6611_v28 = vld [vmem:[%s8981_s7 + $0x38] sm:$0xff]  }
 0x27b   : > { %v3150_v4 = vadd.f32 %v7060_v59, %v2995_v30  ;;  %3990 = vmatprep.mubr.bf16.mxu0 %v8177_v0  ;;  %v3274_v50 = vmax.f32 %v3146_v29, 0.0  ;;  %v6608_v0 = vld [vmem:[%s8981_s7 + $0x70] sm:$0xff]  }
 0x27c   : > { %v3277_v45 = vmax.f32 %v3149_v3, 0.0  ;;  %5703 = vmatprep.subr.bf16.mxu1 %v6608_v0 }
 0x27d   : > { %v3278_v20 = vmax.f32 %v3150_v4, 0.0  ;;  %v2998_v62 = vpop.f32.mrb[76].mxu1  ;;  %5704 = vmatpush3.bf16.msra.mxu1 %v6609_v16 }
 0x27e   : > { %v2999_v52 = vadd.f32 %v2998_v62, %v8090_v40  ;;  %v3000_v1 = vpop.f32.mrb[77].mxu1  ;;  %v8441_v2 = vpack.c.bf16 %v3277_v45, %v3273_v44  ;;  %5705 = vmatprep.subr.bf16.mxu1 %v6610_v18  ;;  %v6615_v18 = vld [vmem:[%s8983_s9 + $0x18] sm:$0xff]  }
 0x27f   : > { %v3001_v7 = vadd.f32 %v3000_v1, %v8094_v43  ;;  %v3002_v8 = vpop.f32.mrb[78].mxu1  ;;  %v3414_v11 = vpack.c.bf16 %v3278_v20, %v3274_v50 }
 0x280   : > { %v3153_v12 = vadd.f32 %v7064_v60, %v2999_v52  ;;  %v3003_v13 = vadd.f32 %v3002_v8, %v8090_v40  ;;  %v3004_v14 = vpop.f32.mrb[79].mxu1 }
 0x281   : > { %v3154_v15 = vadd.f32 %v7060_v59, %v3001_v7  ;;  %v3005_v10 = vadd.f32 %v3004_v14, %v8094_v43  ;;  %5706 = vmatpush3.bf16.msra.mxu1 %v6611_v28 }
 0x282   : > { %v3157_v49 = vadd.f32 %v7064_v60, %v3003_v13  ;;  %3991 = vmatmul.mubr.bf16.gmra.mrb[56].mxu0 %v8170_v51  ;;  %v3281_v53 = vmax.f32 %v3153_v12, 0.0 }
 0x283   : > { %v3158_v27 = vadd.f32 %v7060_v59, %v3005_v10  ;;  %4000 = vmatprep.mubr.bf16.mxu0 %v8209_v58  ;;  %v3282_v24 = vmax.f32 %v3154_v15, 0.0 }
 0x284   : > { %v3285_v9 = vmax.f32 %v3157_v49, 0.0 }
 0x285   : > { %v3286_v25 = vmax.f32 %v3158_v27, 0.0  ;;  %v3008_v56 = vpop.f32.mrb[80].mxu1 }
 0x286   : > { %v3009_v51 = vadd.f32 %v3008_v56, %v8090_v40  ;;  %v3010_v5 = vpop.f32.mrb[81].mxu1  ;;  %v3417_v29 = vpack.c.bf16 %v3285_v9, %v3281_v53 }
 0x287   : > { %v3011_v30 = vadd.f32 %v3010_v5, %v8094_v43  ;;  %v3012_v31 = vpop.f32.mrb[82].mxu1  ;;  %v3418_v3 = vpack.c.bf16 %v3286_v25, %v3282_v24 }
 0x288   : > { %v3161_v58 = vadd.f32 %v7064_v60, %v3009_v51  ;;  %v3013_v34 = vadd.f32 %v3012_v31, %v8090_v40  ;;  %v3014_v4 = vpop.f32.mrb[83].mxu1 }
 0x289   : > { %v3162_v44 = vadd.f32 %v7060_v59, %v3011_v30  ;;  %v3015_v45 = vadd.f32 %v3014_v4, %v8094_v43 }
 0x28a   : > { %v3165_v50 = vadd.f32 %v7064_v60, %v3013_v34  ;;  %4001 = vmatmul.mubr.bf16.gmra.mrb[60].mxu0 %v8202_v47  ;;  %v3289_v62 = vmax.f32 %v3161_v58, 0.0 }
 0x28b   : > { %v3166_v20 = vadd.f32 %v7060_v59, %v3015_v45  ;;  %4010 = vmatprep.mubr.bf16.mxu0 %v8241_v55  ;;  %v3290_v52 = vmax.f32 %v3162_v44, 0.0  ;;  %v3423_v59 = vld [vmem:[%s8980_s6] sm:$0x3] }
 0x28c   : > { %v3293_v17 = vmax.f32 %v3165_v50, 0.0  ;;  %v8498_v60 = vrot.slane %v3423_v59, %v7094_v6  ;;  %v8501_v43 = vrot.slane %v3423_v59, %v7030_v46 }
 0x28d   : > { %v3294_v1 = vmax.f32 %v3166_v20, 0.0 }
 0x28e   : > { %v3421_v0 = vpack.c.bf16 %v3293_v17, %v3289_v62 }
 0x28f   : > { %v3422_v40 = vpack.c.bf16 %v3294_v1, %v3290_v52 }
 0x292   : > { %4011 = vmatmul.mubr.bf16.gmra.mrb[64].mxu0 %v8234_v42 }
 0x293   : > { %4020 = vmatprep.mubr.bf16.mxu0 %v8267_v61 }
 0x29a   : > { %4021 = vmatmul.mubr.bf16.gmra.mrb[68].mxu0 %v8263_v41 }
 0x29b   : > { %4030 = vmatprep.mubr.bf16.mxu0 %v8287_v57 }
 0x2a2   : > { %4031 = vmatmul.mubr.bf16.gmra.mrb[72].mxu0 %v8283_v37 }
 0x2a3   : > { %4040 = vmatprep.mubr.bf16.mxu0 %v8307_v63 }
 0x2aa   : > { %4041 = vmatmul.mubr.bf16.gmra.mrb[76].mxu0 %v8303_v39  ;;  %v6612_v39 = vld [vmem:[%s8983_s9] sm:$0xff]  }
 0x2ab   : > { %4050 = vmatprep.mubr.bf16.mxu0 %v8325_v36  ;;  %5827 = vmatprep.subr.bf16.mxu1 %v6612_v39 }
 0x2b2   : > { %4051 = vmatmul.mubr.bf16.gmra.mrb[80].mxu0 %v8322_v33 }
 0x2b3   : > { %4060 = vmatprep.mubr.bf16.mxu0 %v8344_v21 }
 0x2ba   : > { %4061 = vmatmul.mubr.bf16.gmra.mrb[84].mxu0 %v8341_v19 }
 0x2bb   : > { %4070 = vmatprep.mubr.bf16.mxu0 %v8358_v32 }
 0x2c2   : > { %4071 = vmatmul.mubr.bf16.gmra.mrb[88].mxu0 %v8355_v35 }
 0x2c3   : > { %4080 = vmatprep.mubr.bf16.mxu0 %v8378_v22  ;;  %v6613_v22 = vld [vmem:[%s8983_s9 + $0x8] sm:$0xff]  }
 0x2ca   : > { %4081 = vmatmul.mubr.bf16.gmra.mrb[92].mxu0 %v8375_v54 }
 0x2cb   : > { %4090 = vmatprep.mubr.bf16.mxu0 %v8392_v38 }
 0x2d2   : > { %4091 = vmatmul.mubr.bf16.gmra.mrb[96].mxu0 %v8389_v48 }
 0x2d3   : > { %4100 = vmatprep.mubr.bf16.mxu0 %v8421_v26 }
 0x2da   : > { %4101 = vmatmul.mubr.bf16.gmra.mrb[100].mxu0 %v8415_v23 }
 0x2db   : > { %4110 = vmatprep.mubr.bf16.mxu0 %v3414_v11  ;;  %v6614_v11 = vld [vmem:[%s8983_s9 + $0x10] sm:$0xff]  }
 0x2e2   : > { %4111 = vmatmul.mubr.bf16.gmra.mrb[104].mxu0 %v8441_v2 }
 0x2e3   : > { %4120 = vmatprep.mubr.bf16.mxu0 %v3418_v3 }
 0x2ea   : > { %4121 = vmatmul.mubr.bf16.gmra.mrb[108].mxu0 %v3417_v29 }
 0x2eb   : > { %4130 = vmatprep.mubr.bf16.mxu0 %v3422_v40 }
 0x2f2   : > { %4131 = vmatmul.mubr.bf16.gmra.mrb[112].mxu0 %v3421_v0 }
 0x34d   : > { %v3982_v47 = vpop.f32.mrb[52].mxu0 }
 0x34e   : > { %v5883_v42 = vadd.f32 %v3982_v47, %v8498_v60  ;;  %v3984_v55 = vpop.f32.mrb[53].mxu0 }
 0x34f   : > { %v5884_v41 = vadd.f32 %v3984_v55, %v8501_v43  ;;  %v3986_v61 = vpop.f32.mrb[54].mxu0 }
 0x350   : > { %v5885_v37 = vadd.f32 %v3986_v61, %v8498_v60  ;;  %v3988_v57 = vpop.f32.mrb[55].mxu0  ;;  %v4141_v63 = vmax.f32 %v5883_v42, 0.0 }
 0x351   : > { %v5886_v6 = vadd.f32 %v3988_v57, %v8501_v43  ;;  %v4142_v46 = vmax.f32 %v5884_v41, 0.0 }
 0x352   : > { %v4143_v33 = vmax.f32 %v5885_v37, 0.0 }
 0x353   : > { %v4144_v36 = vmax.f32 %v5886_v6, 0.0 }
 0x354   : > { %v4237_v19 = vpack.c.bf16 %v4143_v33, %v4141_v63 }
 0x355   : > { %v4238_v21 = vpack.c.bf16 %v4144_v36, %v4142_v46  ;;  %v3992_v35 = vpop.f32.mrb[56].mxu0 }
 0x356   : > { %v5887_v32 = vadd.f32 %v3992_v35, %v8498_v60  ;;  %v3994_v54 = vpop.f32.mrb[57].mxu0 }
 0x357   : > { %v5888_v48 = vadd.f32 %v3994_v54, %v8501_v43  ;;  %v3996_v38 = vpop.f32.mrb[58].mxu0  ;;  %4404 = vmatprep.mubr.bf16.mxu1 %v4238_v21 }
 0x358   : > { %v5889_v23 = vadd.f32 %v3996_v38, %v8498_v60  ;;  %v3998_v26 = vpop.f32.mrb[59].mxu0  ;;  %4405 = vmatmul.mubr.bf16.vlgmr.msra.gmra.mrb[84].mxu1 %v4237_v19  ;;  %v4145_v7 = vmax.f32 %v5887_v32, 0.0 }
 0x359   : > { %v5890_v2 = vadd.f32 %v3998_v26, %v8501_v43  ;;  %5828 = vmatpush3.bf16.msra.mxu1 %v6612_v39  ;;  %v4146_v12 = vmax.f32 %v5888_v48, 0.0 }
 0x35a   : > { %v4147_v8 = vmax.f32 %v5889_v23, 0.0  ;;  %5829 = vmatprep.subr.bf16.mxu1 %v6613_v22 }
 0x35b   : > { %v4148_v13 = vmax.f32 %v5890_v2, 0.0 }
 0x35c   : > { %v4239_v14 = vpack.c.bf16 %v4147_v8, %v4145_v7 }
 0x35d   : > { %v4240_v15 = vpack.c.bf16 %v4148_v13, %v4146_v12  ;;  %v4002_v10 = vpop.f32.mrb[60].mxu0  ;;  %5830 = vmatpush3.bf16.msra.mxu1 %v6613_v22 }
 0x35e   : > { %v5891_v16 = vadd.f32 %v4002_v10, %v8498_v60  ;;  %v4004_v49 = vpop.f32.mrb[61].mxu0  ;;  %5831 = vmatprep.subr.bf16.mxu1 %v6614_v11 }
 0x35f   : > { %v5892_v27 = vadd.f32 %v4004_v49, %v8501_v43  ;;  %v4006_v53 = vpop.f32.mrb[62].mxu0  ;;  %4412 = vmatprep.mubr.bf16.mxu1 %v4240_v15 }
 0x360   : > { %v5893_v9 = vadd.f32 %v4006_v53, %v8498_v60  ;;  %v4008_v24 = vpop.f32.mrb[63].mxu0  ;;  %4413 = vmatmul.mubr.bf16.gmra.mrb[88].mxu1 %v4239_v14  ;;  %v4149_v56 = vmax.f32 %v5891_v16, 0.0 }
 0x361   : > { %v5894_v25 = vadd.f32 %v4008_v24, %v8501_v43  ;;  %5832 = vmatpush3.bf16.msra.mxu1 %v6614_v11  ;;  %v4150_v51 = vmax.f32 %v5892_v27, 0.0 }
 0x362   : > { %v4151_v28 = vmax.f32 %v5893_v9, 0.0  ;;  %5833 = vmatprep.subr.bf16.mxu1 %v6615_v18 }
 0x363   : > { %v4152_v5 = vmax.f32 %v5894_v25, 0.0 }
 0x364   : > { %v4241_v29 = vpack.c.bf16 %v4151_v28, %v4149_v56 }
 0x365   : > { %v4242_v30 = vpack.c.bf16 %v4152_v5, %v4150_v51  ;;  %v4012_v31 = vpop.f32.mrb[64].mxu0  ;;  %5834 = vmatpush3.bf16.msra.mxu1 %v6615_v18 }
 0x366   : > { %v5895_v3 = vadd.f32 %v4012_v31, %v8498_v60  ;;  %v4014_v58 = vpop.f32.mrb[65].mxu0 }
 0x367   : > { %v5896_v34 = vadd.f32 %v4014_v58, %v8501_v43  ;;  %v4016_v4 = vpop.f32.mrb[66].mxu0  ;;  %4420 = vmatprep.mubr.bf16.mxu1 %v4242_v30 }
 0x368   : > { %v5897_v44 = vadd.f32 %v4016_v4, %v8498_v60  ;;  %v4018_v45 = vpop.f32.mrb[67].mxu0  ;;  %4421 = vmatmul.mubr.bf16.gmra.mrb[92].mxu1 %v4241_v29  ;;  %v4153_v20 = vmax.f32 %v5895_v3, 0.0 }
 0x369   : > { %v5898_v50 = vadd.f32 %v4018_v45, %v8501_v43  ;;  %v4154_v17 = vmax.f32 %v5896_v34, 0.0 }
 0x36a   : > { %v4155_v62 = vmax.f32 %v5897_v44, 0.0 }
 0x36b   : > { %v4156_v52 = vmax.f32 %v5898_v50, 0.0 }
 0x36c   : > { %v4243_v1 = vpack.c.bf16 %v4155_v62, %v4153_v20 }
 0x36d   : > { %v4244_v0 = vpack.c.bf16 %v4156_v52, %v4154_v17  ;;  %v4022_v40 = vpop.f32.mrb[68].mxu0 }
 0x36e   : > { %v5899_v59 = vadd.f32 %v4022_v40, %v8498_v60  ;;  %v4024_v47 = vpop.f32.mrb[69].mxu0 }
 0x36f   : > { %v5900_v42 = vadd.f32 %v4024_v47, %v8501_v43  ;;  %v4026_v55 = vpop.f32.mrb[70].mxu0  ;;  %4428 = vmatprep.mubr.bf16.mxu1 %v4244_v0 }
 0x370   : > { %v5901_v41 = vadd.f32 %v4026_v55, %v8498_v60  ;;  %v4028_v61 = vpop.f32.mrb[71].mxu0  ;;  %4429 = vmatmul.mubr.bf16.gmra.mrb[96].mxu1 %v4243_v1  ;;  %v4157_v57 = vmax.f32 %v5899_v59, 0.0 }
 0x371   : > { %v5902_v37 = vadd.f32 %v4028_v61, %v8501_v43  ;;  %v4158_v6 = vmax.f32 %v5900_v42, 0.0 }
 0x372   : > { %v4159_v39 = vmax.f32 %v5901_v41, 0.0 }
 0x373   : > { %v4160_v63 = vmax.f32 %v5902_v37, 0.0 }
 0x374   : > { %v4245_v33 = vpack.c.bf16 %v4159_v39, %v4157_v57 }
 0x375   : > { %v4246_v46 = vpack.c.bf16 %v4160_v63, %v4158_v6  ;;  %v4032_v36 = vpop.f32.mrb[72].mxu0 }
 0x376   : > { %v5903_v19 = vadd.f32 %v4032_v36, %v8498_v60  ;;  %v4034_v21 = vpop.f32.mrb[73].mxu0 }
 0x377   : > { %v5904_v35 = vadd.f32 %v4034_v21, %v8501_v43  ;;  %v4036_v32 = vpop.f32.mrb[74].mxu0  ;;  %4436 = vmatprep.mubr.bf16.mxu1 %v4246_v46 }
 0x378   : > { %v5905_v54 = vadd.f32 %v4036_v32, %v8498_v60  ;;  %v4038_v22 = vpop.f32.mrb[75].mxu0  ;;  %4437 = vmatmul.mubr.bf16.gmra.mrb[100].mxu1 %v4245_v33  ;;  %v4161_v38 = vmax.f32 %v5903_v19, 0.0 }
 0x379   : > { %v5906_v48 = vadd.f32 %v4038_v22, %v8501_v43  ;;  %v4162_v26 = vmax.f32 %v5904_v35, 0.0 }
 0x37a   : > { %v4163_v23 = vmax.f32 %v5905_v54, 0.0 }
 0x37b   : > { %v4164_v2 = vmax.f32 %v5906_v48, 0.0 }
 0x37c   : > { %v4247_v7 = vpack.c.bf16 %v4163_v23, %v4161_v38 }
 0x37d   : > { %v4248_v8 = vpack.c.bf16 %v4164_v2, %v4162_v26  ;;  %v4042_v11 = vpop.f32.mrb[76].mxu0 }
 0x37e   : > { %v5907_v12 = vadd.f32 %v4042_v11, %v8498_v60  ;;  %v4044_v13 = vpop.f32.mrb[77].mxu0 }
 0x37f   : > { %v5908_v14 = vadd.f32 %v4044_v13, %v8501_v43  ;;  %v4046_v15 = vpop.f32.mrb[78].mxu0  ;;  %4444 = vmatprep.mubr.bf16.mxu1 %v4248_v8 }
 0x380   : > { %v5909_v10 = vadd.f32 %v4046_v15, %v8498_v60  ;;  %v4048_v16 = vpop.f32.mrb[79].mxu0  ;;  %4445 = vmatmul.mubr.bf16.gmra.mrb[104].mxu1 %v4247_v7  ;;  %v4165_v18 = vmax.f32 %v5907_v12, 0.0 }
 0x381   : > { %v5910_v49 = vadd.f32 %v4048_v16, %v8501_v43  ;;  %v4166_v53 = vmax.f32 %v5908_v14, 0.0 }
 0x382   : > { %v4167_v27 = vmax.f32 %v5909_v10, 0.0 }
 0x383   : > { %v4168_v9 = vmax.f32 %v5910_v49, 0.0 }
 0x384   : > { %v4249_v24 = vpack.c.bf16 %v4167_v27, %v4165_v18 }
 0x385   : > { %v4250_v25 = vpack.c.bf16 %v4168_v9, %v4166_v53  ;;  %v4052_v56 = vpop.f32.mrb[80].mxu0 }
 0x386   : > { %v5911_v28 = vadd.f32 %v4052_v56, %v8498_v60  ;;  %v4054_v51 = vpop.f32.mrb[81].mxu0 }
 0x387   : > { %v5912_v5 = vadd.f32 %v4054_v51, %v8501_v43  ;;  %v4056_v29 = vpop.f32.mrb[82].mxu0  ;;  %4452 = vmatprep.mubr.bf16.mxu1 %v4250_v25 }
 0x388   : > { %v5913_v30 = vadd.f32 %v4056_v29, %v8498_v60  ;;  %v4058_v31 = vpop.f32.mrb[83].mxu0  ;;  %4453 = vmatmul.mubr.bf16.gmra.mrb[108].mxu1 %v4249_v24  ;;  %v4169_v58 = vmax.f32 %v5911_v28, 0.0 }
 0x389   : > { %v5914_v3 = vadd.f32 %v4058_v31, %v8501_v43  ;;  %v4170_v4 = vmax.f32 %v5912_v5, 0.0 }
 0x38a   : > { %v4171_v34 = vmax.f32 %v5913_v30, 0.0 }
 0x38b   : > { %v4172_v44 = vmax.f32 %v5914_v3, 0.0 }
 0x38c   : > { %v4251_v45 = vpack.c.bf16 %v4171_v34, %v4169_v58  ;;  %v6616_v34 = vld [vmem:[%s8983_s9 + $0x20] sm:$0xff]  }
 0x38d   : > { %v4252_v50 = vpack.c.bf16 %v4172_v44, %v4170_v4  ;;  %v4062_v20 = vpop.f32.mrb[84].mxu0  ;;  %5835 = vmatprep.subr.bf16.mxu1 %v6616_v34 }
 0x38e   : > { %v5915_v62 = vadd.f32 %v4062_v20, %v8498_v60  ;;  %v4064_v17 = vpop.f32.mrb[85].mxu0  ;;  %5836 = vmatpush3.bf16.msra.mxu1 %v6616_v34 }
 0x38f   : > { %v5916_v52 = vadd.f32 %v4064_v17, %v8501_v43  ;;  %v4066_v1 = vpop.f32.mrb[86].mxu0  ;;  %4460 = vmatprep.mubr.bf16.mxu1 %v4252_v50 }
 0x390   : > { %v5917_v0 = vadd.f32 %v4066_v1, %v8498_v60  ;;  %v4068_v40 = vpop.f32.mrb[87].mxu0  ;;  %4461 = vmatmul.mubr.bf16.gmra.mrb[112].mxu1 %v4251_v45  ;;  %v4173_v47 = vmax.f32 %v5915_v62, 0.0 }
 0x391   : > { %v5918_v59 = vadd.f32 %v4068_v40, %v8501_v43  ;;  %v4174_v55 = vmax.f32 %v5916_v52, 0.0  ;;  %v6617_v52 = vld [vmem:[%s8983_s9 + $0x28] sm:$0xff]  }
 0x392   : > { %v4175_v42 = vmax.f32 %v5917_v0, 0.0  ;;  %5837 = vmatprep.subr.bf16.mxu1 %v6617_v52 }
 0x393   : > { %v4176_v41 = vmax.f32 %v5918_v59, 0.0  ;;  %5838 = vmatpush3.bf16.msra.mxu1 %v6617_v52 }
 0x394   : > { %v4253_v61 = vpack.c.bf16 %v4175_v42, %v4173_v47 }
 0x395   : > { %v4254_v37 = vpack.c.bf16 %v4176_v41, %v4174_v55  ;;  %v4072_v57 = vpop.f32.mrb[88].mxu0  ;;  %v6618_v41 = vld [vmem:[%s8983_s9 + $0x30] sm:$0xff]  }
 0x396   : > { %v5919_v39 = vadd.f32 %v4072_v57, %v8498_v60  ;;  %v4074_v6 = vpop.f32.mrb[89].mxu0  ;;  %5839 = vmatprep.subr.bf16.mxu1 %v6618_v41 }
 0x397   : > { %v5920_v63 = vadd.f32 %v4074_v6, %v8501_v43  ;;  %v4076_v33 = vpop.f32.mrb[90].mxu0  ;;  %4468 = vmatprep.mubr.bf16.mxu1 %v4254_v37  ;;  %5840 = vmatpush3.bf16.msra.mxu1 %v6618_v41 }
 0x398   : > { %v5921_v46 = vadd.f32 %v4076_v33, %v8498_v60  ;;  %v4078_v36 = vpop.f32.mrb[91].mxu0  ;;  %4469 = vmatmul.mubr.bf16.gmra.mrb[116].mxu1 %v4253_v61  ;;  %v4177_v21 = vmax.f32 %v5919_v39, 0.0 }
 0x399   : > { %v5922_v19 = vadd.f32 %v4078_v36, %v8501_v43  ;;  %v4178_v32 = vmax.f32 %v5920_v63, 0.0 }
 0x39a   : > { %v4179_v35 = vmax.f32 %v5921_v46, 0.0  ;;  %v6619_v46 = vld [vmem:[%s8983_s9 + $0x38] sm:$0xff]  }
 0x39b   : > { %v4180_v54 = vmax.f32 %v5922_v19, 0.0  ;;  %5841 = vmatprep.subr.bf16.mxu1 %v6619_v46 }
 0x39c   : > { %v4255_v22 = vpack.c.bf16 %v4179_v35, %v4177_v21  ;;  %5842 = vmatpush3.bf16.msra.mxu1 %v6619_v46 }
 0x39d   : > { %v4256_v48 = vpack.c.bf16 %v4180_v54, %v4178_v32  ;;  %v4082_v38 = vpop.f32.mrb[92].mxu0 }
 0x39e   : > { %v5923_v23 = vadd.f32 %v4082_v38, %v8498_v60  ;;  %v4084_v26 = vpop.f32.mrb[93].mxu0 }
 0x39f   : > { %v5924_v2 = vadd.f32 %v4084_v26, %v8501_v43  ;;  %v4086_v7 = vpop.f32.mrb[94].mxu0  ;;  %4476 = vmatprep.mubr.bf16.mxu1 %v4256_v48 }
 0x3a0   : > { %v5925_v8 = vadd.f32 %v4086_v7, %v8498_v60  ;;  %v4088_v11 = vpop.f32.mrb[95].mxu0  ;;  %4477 = vmatmul.mubr.bf16.gmra.mrb[120].mxu1 %v4255_v22  ;;  %v4181_v13 = vmax.f32 %v5923_v23, 0.0 }
 0x3a1   : > { %v5926_v12 = vadd.f32 %v4088_v11, %v8501_v43  ;;  %v4182_v15 = vmax.f32 %v5924_v2, 0.0 }
 0x3a2   : > { %v4183_v14 = vmax.f32 %v5925_v8, 0.0 }
 0x3a3   : > { %v4184_v10 = vmax.f32 %v5926_v12, 0.0 }
 0x3a4   : > { %v4257_v16 = vpack.c.bf16 %v4183_v14, %v4181_v13 }
 0x3a5   : > { %v4258_v49 = vpack.c.bf16 %v4184_v10, %v4182_v15  ;;  %v4092_v18 = vpop.f32.mrb[96].mxu0 }
 0x3a6   : > { %v5927_v27 = vadd.f32 %v4092_v18, %v8498_v60  ;;  %v4094_v53 = vpop.f32.mrb[97].mxu0 }
 0x3a7   : > { %v5928_v9 = vadd.f32 %v4094_v53, %v8501_v43  ;;  %v4096_v24 = vpop.f32.mrb[98].mxu0  ;;  %4484 = vmatprep.mubr.bf16.mxu1 %v4258_v49 }
 0x3a8   : > { %v5929_v25 = vadd.f32 %v4096_v24, %v8498_v60  ;;  %v4098_v56 = vpop.f32.mrb[99].mxu0  ;;  %4485 = vmatmul.mubr.bf16.gmra.mrb[124].mxu1 %v4257_v16  ;;  %v4185_v51 = vmax.f32 %v5927_v27, 0.0 }
 0x3a9   : > { %v5930_v28 = vadd.f32 %v4098_v56, %v8501_v43  ;;  %v4186_v29 = vmax.f32 %v5928_v9, 0.0 }
 0x3aa   : > { %v4187_v5 = vmax.f32 %v5929_v25, 0.0 }
 0x3ab   : > { %v4188_v30 = vmax.f32 %v5930_v28, 0.0 }
 0x3ac   : > { %v4259_v31 = vpack.c.bf16 %v4187_v5, %v4185_v51 }
 0x3ad   : > { %v4260_v3 = vpack.c.bf16 %v4188_v30, %v4186_v29  ;;  %v4102_v58 = vpop.f32.mrb[100].mxu0 }
 0x3ae   : > { %v5931_v4 = vadd.f32 %v4102_v58, %v8498_v60  ;;  %v4104_v44 = vpop.f32.mrb[101].mxu0 }
 0x3af   : > { %v5932_v45 = vadd.f32 %v4104_v44, %v8501_v43  ;;  %v4106_v50 = vpop.f32.mrb[102].mxu0  ;;  %4492 = vmatprep.mubr.bf16.mxu1 %v4260_v3  ;;  %v8594_v3 = vld [vmem:[%s8982_s8] ss:$0 sm:$0xff] }
 0x3b0   : > { %v5933_v20 = vadd.f32 %v4106_v50, %v8498_v60  ;;  %v4108_v62 = vpop.f32.mrb[103].mxu0  ;;  %4493 = vmatmul.mubr.bf16.gmra.mrb[128].mxu1 %v4259_v31  ;;  %v4189_v1 = vmax.f32 %v5931_v4, 0.0 }
 0x3b1   : > { %v5934_v17 = vadd.f32 %v4108_v62, %v8501_v43  ;;  %v4190_v40 = vmax.f32 %v5932_v45, 0.0 }
 0x3b2   : > { %v4191_v0 = vmax.f32 %v5933_v20, 0.0 }
 0x3b3   : > { %v4192_v59 = vmax.f32 %v5934_v17, 0.0 }
 0x3b4   : > { %v4261_v47 = vpack.c.bf16 %v4191_v0, %v4189_v1 }
 0x3b5   : > { %v4262_v42 = vpack.c.bf16 %v4192_v59, %v4190_v40  ;;  %v4112_v55 = vpop.f32.mrb[104].mxu0 }
 0x3b6   : > { %v5935_v61 = vadd.f32 %v4112_v55, %v8498_v60  ;;  %v4114_v37 = vpop.f32.mrb[105].mxu0 }
 0x3b7   : > { %v5936_v57 = vadd.f32 %v4114_v37, %v8501_v43  ;;  %v4116_v39 = vpop.f32.mrb[106].mxu0  ;;  %4500 = vmatprep.mubr.bf16.mxu1 %v4262_v42 }
 0x3b8   : > { %v5937_v6 = vadd.f32 %v4116_v39, %v8498_v60  ;;  %v4118_v63 = vpop.f32.mrb[107].mxu0  ;;  %4501 = vmatmul.mubr.bf16.gmra.mrb[132].mxu1 %v4261_v47  ;;  %v4193_v36 = vmax.f32 %v5935_v61, 0.0 }
 0x3b9   : > { %v5938_v33 = vadd.f32 %v4118_v63, %v8501_v43  ;;  %v4194_v21 = vmax.f32 %v5936_v57, 0.0 }
 0x3ba   : > { %v4195_v19 = vmax.f32 %v5937_v6, 0.0 }
 0x3bb   : > { %v4196_v35 = vmax.f32 %v5938_v33, 0.0 }
 0x3bc   : > { %v4263_v32 = vpack.c.bf16 %v4195_v19, %v4193_v36 }
 0x3bd   : > { %v4264_v54 = vpack.c.bf16 %v4196_v35, %v4194_v21  ;;  %v4122_v22 = vpop.f32.mrb[108].mxu0 }
 0x3be   : > { %v5939_v48 = vadd.f32 %v4122_v22, %v8498_v60  ;;  %v4124_v38 = vpop.f32.mrb[109].mxu0 }
 0x3bf   : > { %v5940_v23 = vadd.f32 %v4124_v38, %v8501_v43  ;;  %v4126_v26 = vpop.f32.mrb[110].mxu0  ;;  %4508 = vmatprep.mubr.bf16.mxu1 %v4264_v54 }
 0x3c0   : > { %v5941_v2 = vadd.f32 %v4126_v26, %v8498_v60  ;;  %v4128_v7 = vpop.f32.mrb[111].mxu0  ;;  %4509 = vmatmul.mubr.bf16.gmra.mrb[136].mxu1 %v4263_v32  ;;  %v4197_v11 = vmax.f32 %v5939_v48, 0.0 }
 0x3c1   : > { %v5942_v8 = vadd.f32 %v4128_v7, %v8501_v43  ;;  %v4198_v13 = vmax.f32 %v5940_v23, 0.0 }
 0x3c2   : > { %v4199_v12 = vmax.f32 %v5941_v2, 0.0 }
 0x3c3   : > { %v4200_v14 = vmax.f32 %v5942_v8, 0.0 }
 0x3c4   : > { %v4265_v15 = vpack.c.bf16 %v4199_v12, %v4197_v11 }
 0x3c5   : > { %v4266_v10 = vpack.c.bf16 %v4200_v14, %v4198_v13  ;;  %v4132_v16 = vpop.f32.mrb[112].mxu0 }
 0x3c6   : > { %v5943_v49 = vadd.f32 %v4132_v16, %v8498_v60  ;;  %v4134_v18 = vpop.f32.mrb[113].mxu0 }
 0x3c7   : > { %v5944_v27 = vadd.f32 %v4134_v18, %v8501_v43  ;;  %v4136_v53 = vpop.f32.mrb[114].mxu0  ;;  %4516 = vmatprep.mubr.bf16.mxu1 %v4266_v10 }
 0x3c8   : > { %v5945_v9 = vadd.f32 %v4136_v53, %v8498_v60  ;;  %v4138_v24 = vpop.f32.mrb[115].mxu0  ;;  %4517 = vmatmul.mubr.bf16.gmra.mrb[140].mxu1 %v4265_v15  ;;  %v4201_v56 = vmax.f32 %v5943_v49, 0.0 }
 0x3c9   : > { %v5946_v25 = vadd.f32 %v4138_v24, %v8501_v43  ;;  %v4202_v51 = vmax.f32 %v5944_v27, 0.0 }
 0x3ca   : > { %v4203_v28 = vmax.f32 %v5945_v9, 0.0 }
 0x3cb   : > { %v4204_v5 = vmax.f32 %v5946_v25, 0.0 }
 0x3cc   : > { %v4267_v29 = vpack.c.bf16 %v4203_v28, %v4201_v56 }
 0x3cd   : > { %v4268_v30 = vpack.c.bf16 %v4204_v5, %v4202_v51 }
 0x3cf   : > { %4524 = vmatprep.mubr.bf16.mxu1 %v4268_v30 }
 0x3d0   : > { %4525 = vmatmul.mubr.bf16.gmra.mrb[144].mxu1 %v4267_v29 }
 0x42b   : > { %v5707_v31 = vpop.f32.mrb[84].mxu1 }
 0x42c   : > { %v5708_v58 = vpop.f32.mrb[85].mxu1 }
 0x42d   : > { %v5709_v60 = vadd.f32 %v5708_v58, %v5707_v31  ;;  %v5710_v34 = vpop.f32.mrb[86].mxu1 }
 0x42e   : > { %v5711_v4 = vpop.f32.mrb[87].mxu1 }
 0x42f   : > { %v4407_v43 = vadd.f32 %v5709_v60, %v8594_v3  ;;  %v5712_v44 = vadd.f32 %v5711_v4, %v5710_v34 }
 0x431   : > { %v4410_v45 = vadd.f32 %v5712_v44, %v8594_v3  ;;  %v4533_v50 = vmax.f32 %v4407_v43, 0.0 }
 0x433   : > { %v4534_v20 = vmax.f32 %v4410_v45, 0.0  ;;  %v5713_v62 = vpop.f32.mrb[88].mxu1 }
 0x434   : > { %v5714_v17 = vpop.f32.mrb[89].mxu1 }
 0x435   : > { %v5715_v52 = vadd.f32 %v5714_v17, %v5713_v62  ;;  %v5716_v1 = vpop.f32.mrb[90].mxu1  ;;  %v4581_v0 = vpack.c.bf16 %v4534_v20, %v4533_v50 }
 0x436   : > { %v5717_v40 = vpop.f32.mrb[91].mxu1 }
 0x437   : > { %v4415_v59 = vadd.f32 %v5715_v52, %v8594_v3  ;;  %v5718_v47 = vadd.f32 %v5717_v40, %v5716_v1  ;;  %5843 = vmatprep.mubr.bf16.mxu1 %v4581_v0 }
 0x439   : > { %v4418_v42 = vadd.f32 %v5718_v47, %v8594_v3  ;;  %v4535_v55 = vmax.f32 %v4415_v59, 0.0 }
 0x43b   : > { %v4536_v41 = vmax.f32 %v4418_v42, 0.0  ;;  %v5719_v61 = vpop.f32.mrb[92].mxu1 }
 0x43c   : > { %v5720_v37 = vpop.f32.mrb[93].mxu1 }
 0x43d   : > { %v4582_v57 = vpack.c.bf16 %v4536_v41, %v4535_v55  ;;  %v5721_v39 = vadd.f32 %v5720_v37, %v5719_v61  ;;  %v5722_v6 = vpop.f32.mrb[94].mxu1 }
 0x43e   : > { %v5723_v63 = vpop.f32.mrb[95].mxu1 }
 0x43f   : > { %v4423_v33 = vadd.f32 %v5721_v39, %v8594_v3  ;;  %v5724_v46 = vadd.f32 %v5723_v63, %v5722_v6  ;;  %5844 = vmatmul.mubr.bf16.vlgmr.msra.gmra.mrb[148].mxu1 %v4582_v57 }
 0x441   : > { %v4426_v36 = vadd.f32 %v5724_v46, %v8594_v3  ;;  %v4537_v19 = vmax.f32 %v4423_v33, 0.0 }
 0x443   : > { %v4538_v21 = vmax.f32 %v4426_v36, 0.0  ;;  %v5725_v35 = vpop.f32.mrb[96].mxu1 }
 0x444   : > { %v5726_v32 = vpop.f32.mrb[97].mxu1 }
 0x445   : > { %v5727_v54 = vadd.f32 %v5726_v32, %v5725_v35  ;;  %v5728_v22 = vpop.f32.mrb[98].mxu1  ;;  %v4583_v48 = vpack.c.bf16 %v4538_v21, %v4537_v19 }
 0x446   : > { %v5729_v38 = vpop.f32.mrb[99].mxu1 }
 0x447   : > { %v4431_v23 = vadd.f32 %v5727_v54, %v8594_v3  ;;  %v5730_v26 = vadd.f32 %v5729_v38, %v5728_v22  ;;  %5847 = vmatprep.mubr.bf16.mxu1 %v4583_v48 }
 0x449   : > { %v4434_v2 = vadd.f32 %v5730_v26, %v8594_v3  ;;  %v4539_v7 = vmax.f32 %v4431_v23, 0.0 }
 0x44b   : > { %v4540_v8 = vmax.f32 %v4434_v2, 0.0  ;;  %v5731_v11 = vpop.f32.mrb[100].mxu1 }
 0x44c   : > { %v5732_v12 = vpop.f32.mrb[101].mxu1 }
 0x44d   : > { %v5733_v13 = vadd.f32 %v5732_v12, %v5731_v11  ;;  %v5734_v14 = vpop.f32.mrb[102].mxu1  ;;  %v4584_v15 = vpack.c.bf16 %v4540_v8, %v4539_v7 }
 0x44e   : > { %v5735_v10 = vpop.f32.mrb[103].mxu1 }
 0x44f   : > { %v4439_v16 = vadd.f32 %v5733_v13, %v8594_v3  ;;  %v5736_v49 = vadd.f32 %v5735_v10, %v5734_v14  ;;  %5848 = vmatmul.mubr.bf16.gmra.mrb[152].mxu1 %v4584_v15 }
 0x451   : > { %v4442_v18 = vadd.f32 %v5736_v49, %v8594_v3  ;;  %v4541_v27 = vmax.f32 %v4439_v16, 0.0 }
 0x453   : > { %v4542_v53 = vmax.f32 %v4442_v18, 0.0  ;;  %v5737_v9 = vpop.f32.mrb[104].mxu1 }
 0x454   : > { %v5738_v24 = vpop.f32.mrb[105].mxu1 }
 0x455   : > { %v5739_v25 = vadd.f32 %v5738_v24, %v5737_v9  ;;  %v5740_v56 = vpop.f32.mrb[106].mxu1  ;;  %v4585_v28 = vpack.c.bf16 %v4542_v53, %v4541_v27 }
 0x456   : > { %v5741_v51 = vpop.f32.mrb[107].mxu1 }
 0x457   : > { %v4447_v5 = vadd.f32 %v5739_v25, %v8594_v3  ;;  %v5742_v29 = vadd.f32 %v5741_v51, %v5740_v56  ;;  %5851 = vmatprep.mubr.bf16.mxu1 %v4585_v28 }
 0x459   : > { %v4450_v30 = vadd.f32 %v5742_v29, %v8594_v3  ;;  %v4543_v31 = vmax.f32 %v4447_v5, 0.0 }
 0x45b   : > { %v4544_v58 = vmax.f32 %v4450_v30, 0.0  ;;  %v5743_v60 = vpop.f32.mrb[108].mxu1 }
 0x45c   : > { %v5744_v34 = vpop.f32.mrb[109].mxu1 }
 0x45d   : > { %v5745_v4 = vadd.f32 %v5744_v34, %v5743_v60  ;;  %v5746_v43 = vpop.f32.mrb[110].mxu1  ;;  %v4586_v44 = vpack.c.bf16 %v4544_v58, %v4543_v31 }
 0x45e   : > { %v5747_v45 = vpop.f32.mrb[111].mxu1 }
 0x45f   : > { %v4455_v50 = vadd.f32 %v5745_v4, %v8594_v3  ;;  %v5748_v20 = vadd.f32 %v5747_v45, %v5746_v43  ;;  %5852 = vmatmul.mubr.bf16.gmra.mrb[156].mxu1 %v4586_v44 }
 0x461   : > { %v4458_v62 = vadd.f32 %v5748_v20, %v8594_v3  ;;  %v4545_v17 = vmax.f32 %v4455_v50, 0.0 }
 0x463   : > { %v4546_v52 = vmax.f32 %v4458_v62, 0.0  ;;  %v5749_v1 = vpop.f32.mrb[112].mxu1 }
 0x464   : > { %v5750_v0 = vpop.f32.mrb[113].mxu1 }
 0x465   : > { %v5751_v40 = vadd.f32 %v5750_v0, %v5749_v1  ;;  %v5752_v59 = vpop.f32.mrb[114].mxu1  ;;  %v4587_v47 = vpack.c.bf16 %v4546_v52, %v4545_v17 }
 0x466   : > { %v5753_v42 = vpop.f32.mrb[115].mxu1 }
 0x467   : > { %v4463_v55 = vadd.f32 %v5751_v40, %v8594_v3  ;;  %v5754_v41 = vadd.f32 %v5753_v42, %v5752_v59  ;;  %5855 = vmatprep.mubr.bf16.mxu1 %v4587_v47 }
 0x469   : > { %v4466_v61 = vadd.f32 %v5754_v41, %v8594_v3  ;;  %v4547_v37 = vmax.f32 %v4463_v55, 0.0 }
 0x46b   : > { %v4548_v57 = vmax.f32 %v4466_v61, 0.0  ;;  %v5755_v39 = vpop.f32.mrb[116].mxu1 }
 0x46c   : > { %v5756_v6 = vpop.f32.mrb[117].mxu1 }
 0x46d   : > { %v5757_v63 = vadd.f32 %v5756_v6, %v5755_v39  ;;  %v5758_v33 = vpop.f32.mrb[118].mxu1  ;;  %v4588_v46 = vpack.c.bf16 %v4548_v57, %v4547_v37 }
 0x46e   : > { %v5759_v36 = vpop.f32.mrb[119].mxu1 }
 0x46f   : > { %v4471_v19 = vadd.f32 %v5757_v63, %v8594_v3  ;;  %v5760_v21 = vadd.f32 %v5759_v36, %v5758_v33  ;;  %5856 = vmatmul.mubr.bf16.gmra.mrb[160].mxu1 %v4588_v46 }
 0x471   : > { %v4474_v35 = vadd.f32 %v5760_v21, %v8594_v3  ;;  %v4549_v32 = vmax.f32 %v4471_v19, 0.0 }
 0x473   : > { %v4550_v54 = vmax.f32 %v4474_v35, 0.0  ;;  %v5761_v22 = vpop.f32.mrb[120].mxu1 }
 0x474   : > { %v5762_v48 = vpop.f32.mrb[121].mxu1 }
 0x475   : > { %v5763_v38 = vadd.f32 %v5762_v48, %v5761_v22  ;;  %v5764_v23 = vpop.f32.mrb[122].mxu1  ;;  %v4589_v26 = vpack.c.bf16 %v4550_v54, %v4549_v32 }
 0x476   : > { %v5765_v2 = vpop.f32.mrb[123].mxu1 }
 0x477   : > { %v4479_v7 = vadd.f32 %v5763_v38, %v8594_v3  ;;  %v5766_v8 = vadd.f32 %v5765_v2, %v5764_v23  ;;  %5859 = vmatprep.mubr.bf16.mxu1 %v4589_v26 }
 0x479   : > { %v4482_v11 = vadd.f32 %v5766_v8, %v8594_v3  ;;  %v4551_v12 = vmax.f32 %v4479_v7, 0.0 }
 0x47b   : > { %v4552_v13 = vmax.f32 %v4482_v11, 0.0  ;;  %v5767_v14 = vpop.f32.mrb[124].mxu1 }
 0x47c   : > { %v5768_v15 = vpop.f32.mrb[125].mxu1 }
 0x47d   : > { %v5769_v10 = vadd.f32 %v5768_v15, %v5767_v14  ;;  %v5770_v16 = vpop.f32.mrb[126].mxu1  ;;  %v4590_v49 = vpack.c.bf16 %v4552_v13, %v4551_v12 }
 0x47e   : > { %v5771_v18 = vpop.f32.mrb[127].mxu1 }
 0x47f   : > { %v4487_v27 = vadd.f32 %v5769_v10, %v8594_v3  ;;  %v5772_v53 = vadd.f32 %v5771_v18, %v5770_v16  ;;  %5860 = vmatmul.mubr.bf16.gmra.mrb[164].mxu1 %v4590_v49  ;;  %v8631_v49 = vld [vmem:[%s8984_s10] ss:$0 sm:$0xff] }
 0x481   : > { %v4490_v9 = vadd.f32 %v5772_v53, %v8594_v3  ;;  %v4553_v24 = vmax.f32 %v4487_v27, 0.0 }
 0x483   : > { %v4554_v25 = vmax.f32 %v4490_v9, 0.0  ;;  %v5773_v56 = vpop.f32.mrb[128].mxu1 }
 0x484   : > { %v5774_v28 = vpop.f32.mrb[129].mxu1 }
 0x485   : > { %v5775_v51 = vadd.f32 %v5774_v28, %v5773_v56  ;;  %v5776_v5 = vpop.f32.mrb[130].mxu1  ;;  %v4591_v29 = vpack.c.bf16 %v4554_v25, %v4553_v24 }
 0x486   : > { %v5777_v30 = vpop.f32.mrb[131].mxu1 }
 0x487   : > { %v4495_v31 = vadd.f32 %v5775_v51, %v8594_v3  ;;  %v5778_v58 = vadd.f32 %v5777_v30, %v5776_v5  ;;  %5863 = vmatprep.mubr.bf16.mxu1 %v4591_v29 }
 0x489   : > { %v4498_v60 = vadd.f32 %v5778_v58, %v8594_v3  ;;  %v4555_v34 = vmax.f32 %v4495_v31, 0.0 }
 0x48b   : > { %v4556_v4 = vmax.f32 %v4498_v60, 0.0  ;;  %v5779_v43 = vpop.f32.mrb[132].mxu1 }
 0x48c   : > { %v5780_v44 = vpop.f32.mrb[133].mxu1 }
 0x48d   : > { %v5781_v45 = vadd.f32 %v5780_v44, %v5779_v43  ;;  %v5782_v50 = vpop.f32.mrb[134].mxu1  ;;  %v4592_v20 = vpack.c.bf16 %v4556_v4, %v4555_v34 }
 0x48e   : > { %v5783_v62 = vpop.f32.mrb[135].mxu1 }
 0x48f   : > { %v4503_v17 = vadd.f32 %v5781_v45, %v8594_v3  ;;  %v5784_v52 = vadd.f32 %v5783_v62, %v5782_v50  ;;  %5864 = vmatmul.mubr.bf16.gmra.mrb[168].mxu1 %v4592_v20 }
 0x491   : > { %v4506_v1 = vadd.f32 %v5784_v52, %v8594_v3  ;;  %v4557_v0 = vmax.f32 %v4503_v17, 0.0 }
 0x493   : > { %v4558_v40 = vmax.f32 %v4506_v1, 0.0  ;;  %v5785_v59 = vpop.f32.mrb[136].mxu1 }
 0x494   : > { %v5786_v47 = vpop.f32.mrb[137].mxu1 }
 0x495   : > { %v5787_v42 = vadd.f32 %v5786_v47, %v5785_v59  ;;  %v5788_v55 = vpop.f32.mrb[138].mxu1  ;;  %v4593_v41 = vpack.c.bf16 %v4558_v40, %v4557_v0 }
 0x496   : > { %v5789_v61 = vpop.f32.mrb[139].mxu1 }
 0x497   : > { %v4511_v37 = vadd.f32 %v5787_v42, %v8594_v3  ;;  %v5790_v57 = vadd.f32 %v5789_v61, %v5788_v55  ;;  %5867 = vmatprep.mubr.bf16.mxu1 %v4593_v41 }
 0x499   : > { %v4514_v39 = vadd.f32 %v5790_v57, %v8594_v3  ;;  %v4559_v6 = vmax.f32 %v4511_v37, 0.0 }
 0x49b   : > { %v4560_v63 = vmax.f32 %v4514_v39, 0.0  ;;  %v5791_v33 = vpop.f32.mrb[140].mxu1 }
 0x49c   : > { %v5792_v46 = vpop.f32.mrb[141].mxu1 }
 0x49d   : > { %v5793_v36 = vadd.f32 %v5792_v46, %v5791_v33  ;;  %v5794_v19 = vpop.f32.mrb[142].mxu1  ;;  %v4594_v21 = vpack.c.bf16 %v4560_v63, %v4559_v6 }
 0x49e   : > { %v5795_v35 = vpop.f32.mrb[143].mxu1 }
 0x49f   : > { %v4519_v32 = vadd.f32 %v5793_v36, %v8594_v3  ;;  %v5796_v54 = vadd.f32 %v5795_v35, %v5794_v19  ;;  %5868 = vmatmul.mubr.bf16.gmra.mrb[172].mxu1 %v4594_v21 }
 0x4a1   : > { %v4522_v22 = vadd.f32 %v5796_v54, %v8594_v3  ;;  %v4561_v48 = vmax.f32 %v4519_v32, 0.0 }
 0x4a3   : > { %v4562_v38 = vmax.f32 %v4522_v22, 0.0  ;;  %v5797_v23 = vpop.f32.mrb[144].mxu1 }
 0x4a4   : > { %v5798_v26 = vpop.f32.mrb[145].mxu1 }
 0x4a5   : > { %v5799_v2 = vadd.f32 %v5798_v26, %v5797_v23  ;;  %v5800_v7 = vpop.f32.mrb[146].mxu1  ;;  %v4595_v8 = vpack.c.bf16 %v4562_v38, %v4561_v48 }
 0x4a6   : > { %v5801_v11 = vpop.f32.mrb[147].mxu1 }
 0x4a7   : > { %v4527_v12 = vadd.f32 %v5799_v2, %v8594_v3  ;;  %v5802_v13 = vadd.f32 %v5801_v11, %v5800_v7  ;;  %5871 = vmatprep.mubr.bf16.mxu1 %v4595_v8 }
 0x4a9   : > { %v4530_v14 = vadd.f32 %v5802_v13, %v8594_v3  ;;  %v4563_v15 = vmax.f32 %v4527_v12, 0.0 }
 0x4ab   : > { %v4564_v10 = vmax.f32 %v4530_v14, 0.0 }
 0x4ad   : > { %v4596_v16 = vpack.c.bf16 %v4564_v10, %v4563_v15 }
 0x4af   : > { %5872 = vmatmul.mubr.bf16.gmra.mrb[176].mxu1 %v4596_v16 }
 0x512   : > { %v5845_v18 = vpop.f32.mrb[148].mxu1 }
 0x513   : > { %v8634_v27 = vadd.f32 %v5845_v18, %v8631_v49  ;;  %v4686_v53 = vpop.f32.mrb[149].mxu1 }
 0x514   : > { %v8637_v9 = vadd.f32 %v8631_v49, %v4686_v53  ;;  %v5846_v24 = vpop.f32.mrb[150].mxu1 }
 0x515   : > { %4817 = vmax.xlane.f32.xlu1 %v8634_v27  ;;  %v4689_v3 = vpop.f32.mrb[151].mxu1  ;;  %v8642_v25 = vadd.f32 %v5846_v24, %v8631_v49 }
 0x516   : > { %4813 = vmax.xlane.f32.xlu0 %v8637_v9  ;;  %v8645_v56 = vadd.f32 %v8631_v49, %v4689_v3 }
 0x519   : > { %4819 = vmax.xlane.f32.xlu1 %v8642_v25 }
 0x51a   : > { %4815 = vmax.xlane.f32.xlu0 %v8645_v56 }
 0x522   : > { %v5849_v28 = vpop.f32.mrb[152].mxu1 }
 0x523   : > { %v8650_v51 = vadd.f32 %v5849_v28, %v8631_v49  ;;  %v4702_v5 = vpop.f32.mrb[153].mxu1 }
 0x524   : > { %v5850_v29 = vpop.f32.mrb[154].mxu1  ;;  %v8657_v58 = vadd.f32 %v8631_v49, %v4702_v5 }
 0x525   : > { %v8653_v30 = vadd.f32 %v5850_v29, %v8631_v49  ;;  %v4705_v31 = vpop.f32.mrb[155].mxu1  ;;  %4825 = vmax.xlane.f32.xlu0 %v8650_v51 }
 0x526   : > { %v8661_v60 = vadd.f32 %v8631_v49, %v4705_v31 }
 0x527   : > { %4827 = vmax.xlane.f32.xlu1 %v8653_v30 }
 0x529   : > { %4821 = vmax.xlane.f32.xlu0 %v8657_v58 }
 0x52b   : > { %4823 = vmax.xlane.f32.xlu1 %v8661_v60 }
 0x532   : > { %v5853_v34 = vpop.f32.mrb[156].mxu1 }
 0x533   : > { %v8666_v4 = vadd.f32 %v5853_v34, %v8631_v49  ;;  %v4718_v43 = vpop.f32.mrb[157].mxu1 }
 0x534   : > { %v5854_v44 = vpop.f32.mrb[158].mxu1  ;;  %v8673_v20 = vadd.f32 %v8631_v49, %v4718_v43 }
 0x535   : > { %v8669_v45 = vadd.f32 %v5854_v44, %v8631_v49  ;;  %v4721_v50 = vpop.f32.mrb[159].mxu1  ;;  %4833 = vmax.xlane.f32.xlu0 %v8666_v4 }
 0x536   : > { %v8677_v62 = vadd.f32 %v8631_v49, %v4721_v50 }
 0x537   : > { %4835 = vmax.xlane.f32.xlu1 %v8669_v45 }
 0x539   : > { %4829 = vmax.xlane.f32.xlu0 %v8673_v20 }
 0x53b   : > { %4831 = vmax.xlane.f32.xlu1 %v8677_v62 }
 0x542   : > { %v5857_v17 = vpop.f32.mrb[160].mxu1 }
 0x543   : > { %v8682_v52 = vadd.f32 %v5857_v17, %v8631_v49  ;;  %v4734_v1 = vpop.f32.mrb[161].mxu1 }
 0x544   : > { %v5858_v0 = vpop.f32.mrb[162].mxu1  ;;  %v8689_v47 = vadd.f32 %v8631_v49, %v4734_v1 }
 0x545   : > { %v8685_v40 = vadd.f32 %v5858_v0, %v8631_v49  ;;  %v4737_v59 = vpop.f32.mrb[163].mxu1  ;;  %4841 = vmax.xlane.f32.xlu0 %v8682_v52 }
 0x546   : > { %v8693_v42 = vadd.f32 %v8631_v49, %v4737_v59 }
 0x547   : > { %4843 = vmax.xlane.f32.xlu1 %v8685_v40 }
 0x549   : > { %4837 = vmax.xlane.f32.xlu0 %v8689_v47 }
 0x54b   : > { %4839 = vmax.xlane.f32.xlu1 %v8693_v42 }
 0x552   : > { %v5861_v55 = vpop.f32.mrb[164].mxu1 }
 0x553   : > { %v8698_v41 = vadd.f32 %v5861_v55, %v8631_v49  ;;  %v4750_v61 = vpop.f32.mrb[165].mxu1 }
 0x554   : > { %v5862_v37 = vpop.f32.mrb[166].mxu1  ;;  %v8705_v6 = vadd.f32 %v8631_v49, %v4750_v61 }
 0x555   : > { %v8701_v57 = vadd.f32 %v5862_v37, %v8631_v49  ;;  %v4753_v39 = vpop.f32.mrb[167].mxu1  ;;  %4849 = vmax.xlane.f32.xlu0 %v8698_v41 }
 0x556   : > { %v8709_v63 = vadd.f32 %v8631_v49, %v4753_v39 }
 0x557   : > { %4851 = vmax.xlane.f32.xlu1 %v8701_v57 }
 0x559   : > { %4845 = vmax.xlane.f32.xlu0 %v8705_v6 }
 0x55b   : > { %4847 = vmax.xlane.f32.xlu1 %v8709_v63 }
 0x562   : > { %v5865_v33 = vpop.f32.mrb[168].mxu1 }
 0x563   : > { %v8714_v46 = vadd.f32 %v5865_v33, %v8631_v49  ;;  %v4766_v36 = vpop.f32.mrb[169].mxu1 }
 0x564   : > { %v5866_v19 = vpop.f32.mrb[170].mxu1  ;;  %v8721_v32 = vadd.f32 %v8631_v49, %v4766_v36 }
 0x565   : > { %v8717_v21 = vadd.f32 %v5866_v19, %v8631_v49  ;;  %v4769_v35 = vpop.f32.mrb[171].mxu1  ;;  %4857 = vmax.xlane.f32.xlu0 %v8714_v46 }
 0x566   : > { %v8725_v54 = vadd.f32 %v8631_v49, %v4769_v35 }
 0x567   : > { %4859 = vmax.xlane.f32.xlu1 %v8717_v21 }
 0x569   : > { %4853 = vmax.xlane.f32.xlu0 %v8721_v32 }
 0x56b   : > { %4855 = vmax.xlane.f32.xlu1 %v8725_v54 }
 0x572   : > { %v5869_v22 = vpop.f32.mrb[172].mxu1 }
 0x573   : > { %v8730_v48 = vadd.f32 %v5869_v22, %v8631_v49  ;;  %v4782_v38 = vpop.f32.mrb[173].mxu1 }
 0x574   : > { %v5870_v23 = vpop.f32.mrb[174].mxu1  ;;  %v8737_v7 = vadd.f32 %v8631_v49, %v4782_v38 }
 0x575   : > { %v8733_v26 = vadd.f32 %v5870_v23, %v8631_v49  ;;  %v4785_v2 = vpop.f32.mrb[175].mxu1  ;;  %4865 = vmax.xlane.f32.xlu0 %v8730_v48 }
 0x576   : > { %v8741_v8 = vadd.f32 %v8631_v49, %v4785_v2 }
 0x577   : > { %4867 = vmax.xlane.f32.xlu1 %v8733_v26 }
 0x579   : > { %4861 = vmax.xlane.f32.xlu0 %v8737_v7 }
 0x57b   : > { %4863 = vmax.xlane.f32.xlu1 %v8741_v8 }
 0x582   : > { %v5873_v11 = vpop.f32.mrb[176].mxu1 }
 0x583   : > { %v4798_v12 = vpop.f32.mrb[177].mxu1  ;;  %v8753_v16 = vadd.f32 %v5873_v11, %v8631_v49 }
 0x584   : > { %v8746_v13 = vadd.f32 %v8631_v49, %v4798_v12  ;;  %v5874_v14 = vpop.f32.mrb[178].mxu1 }
 0x585   : > { %v4801_v15 = vpop.f32.mrb[179].mxu1  ;;  %v8757_v18 = vadd.f32 %v5874_v14, %v8631_v49 }
 0x586   : > { %v8749_v10 = vadd.f32 %v8631_v49, %v4801_v15  ;;  %4869 = vmax.xlane.f32.xlu0 %v8746_v13 }
 0x588   : > { %4871 = vmax.xlane.f32.xlu1 %v8749_v10 }
 0x58a   : > { %4873 = vmax.xlane.f32.xlu0 %v8753_v16 }
 0x58c   : > { %4875 = vmax.xlane.f32.xlu1 %v8757_v18 }
 0x5a2   : > { %v4818_v53 = vpop.xlane.xlu1 %4817 }
 0x5a3   : > { %v8762_v24 = vsub.f32 %v8634_v27, %v4818_v53  ;;  %v4814_v3 = vpop.xlane.xlu0 %4813 }
 0x5a4   : > { %v8765_v28 = vsub.f32 %v8637_v9, %v4814_v3 }
 0x5a5   : > { %v4913_v5 = vmul.f32 1.442695, %v8762_v24 }
 0x5a6   : > { %v4909_v29 = vmul.f32 1.442695, %v8765_v28  ;;  %v4820_v31 = vpop.xlane.xlu1 %4819 }
 0x5a7   : > { %6620 = vpow2.f32 %v4913_v5  ;;  %v8770_v49 = vsub.f32 %v8642_v25, %v4820_v31  ;;  %v4816_v34 = vpop.xlane.xlu0 %4815 }
 0x5a8   : > { %v8773_v43 = vsub.f32 %v8645_v56, %v4816_v34  ;;  %6622 = vpow2.f32 %v4909_v29 }
 0x5a9   : > { %v4915_v27 = vmul.f32 1.442695, %v8770_v49 }
 0x5aa   : > { %v4911_v9 = vmul.f32 1.442695, %v8773_v43 }
 0x5ab   : > { %6624 = vpow2.f32 %v4915_v27 }
 0x5ac   : > { %6626 = vpow2.f32 %v4911_v9 }
 0x5b1   : > { %v6621_v44 = vpop.eup %6620 }
 0x5b2   : > { %4977 = vadd.xlane.f32.xlu0 %v6621_v44  ;;  %v4826_v50 = vpop.xlane.xlu0 %4825  ;;  %v6623_v1 = vpop.eup %6622 }
 0x5b3   : > { %v8778_v17 = vsub.f32 %v8650_v51, %v4826_v50 }
 0x5b4   : > { %v4828_v25 = vpop.xlane.xlu1 %4827 }
 0x5b5   : > { %v6625_v0 = vpop.eup %6624  ;;  %v4921_v59 = vmul.f32 1.442695, %v8778_v17  ;;  %v8782_v56 = vsub.f32 %v8653_v30, %v4828_v25 }
 0x5b6   : > { %4979 = vadd.xlane.f32.xlu1 %v6625_v0  ;;  %4973 = vadd.xlane.f32.xlu0 %v6623_v1  ;;  %v4822_v55 = vpop.xlane.xlu0 %4821  ;;  %v6627_v51 = vpop.eup %6626 }
 0x5b7   : > { %6628 = vpow2.f32 %v4921_v59  ;;  %v4923_v61 = vmul.f32 1.442695, %v8782_v56  ;;  %v8786_v37 = vsub.f32 %v8657_v58, %v4822_v55 }
 0x5b8   : > { %v4824_v39 = vpop.xlane.xlu1 %4823 }
 0x5b9   : > { %6630 = vpow2.f32 %v4923_v61  ;;  %v4917_v33 = vmul.f32 1.442695, %v8786_v37  ;;  %v8790_v36 = vsub.f32 %v8661_v60, %v4824_v39 }
 0x5ba   : > { %4975 = vadd.xlane.f32.xlu1 %v6627_v51 }
 0x5bb   : > { %6632 = vpow2.f32 %v4917_v33  ;;  %v4919_v30 = vmul.f32 1.442695, %v8790_v36 }
 0x5bd   : > { %6634 = vpow2.f32 %v4919_v30 }
 0x5c1   : > { %v6629_v19 = vpop.eup %6628 }
 0x5c2   : > { %4985 = vadd.xlane.f32.xlu0 %v6629_v19  ;;  %v4834_v35 = vpop.xlane.xlu0 %4833 }
 0x5c3   : > { %v6631_v22 = vpop.eup %6630  ;;  %v8794_v58 = vsub.f32 %v8666_v4, %v4834_v35 }
 0x5c4   : > { %v4836_v38 = vpop.xlane.xlu1 %4835  ;;  %4987 = vadd.xlane.f32.xlu1 %v6631_v22 }
 0x5c5   : > { %v6633_v23 = vpop.eup %6632  ;;  %v4929_v2 = vmul.f32 1.442695, %v8794_v58  ;;  %v8798_v60 = vsub.f32 %v8669_v45, %v4836_v38 }
 0x5c6   : > { %4981 = vadd.xlane.f32.xlu0 %v6633_v23  ;;  %v4830_v11 = vpop.xlane.xlu0 %4829 }
 0x5c7   : > { %v6635_v12 = vpop.eup %6634  ;;  %6636 = vpow2.f32 %v4929_v2  ;;  %v4931_v14 = vmul.f32 1.442695, %v8798_v60  ;;  %v8802_v15 = vsub.f32 %v8673_v20, %v4830_v11 }
 0x5c8   : > { %v4832_v53 = vpop.xlane.xlu1 %4831  ;;  %4983 = vadd.xlane.f32.xlu1 %v6635_v12 }
 0x5c9   : > { %6638 = vpow2.f32 %v4931_v14  ;;  %v4925_v4 = vmul.f32 1.442695, %v8802_v15  ;;  %v8806_v3 = vsub.f32 %v8677_v62, %v4832_v53 }
 0x5cb   : > { %6640 = vpow2.f32 %v4925_v4  ;;  %v4927_v45 = vmul.f32 1.442695, %v8806_v3 }
 0x5cd   : > { %6642 = vpow2.f32 %v4927_v45 }
 0x5d1   : > { %v6637_v5 = vpop.eup %6636 }
 0x5d2   : > { %4993 = vadd.xlane.f32.xlu0 %v6637_v5  ;;  %v4842_v29 = vpop.xlane.xlu0 %4841 }
 0x5d3   : > { %v6639_v31 = vpop.eup %6638  ;;  %v8810_v34 = vsub.f32 %v8682_v52, %v4842_v29 }
 0x5d4   : > { %v4844_v20 = vpop.xlane.xlu1 %4843  ;;  %4995 = vadd.xlane.f32.xlu1 %v6639_v31 }
 0x5d5   : > { %v6641_v27 = vpop.eup %6640  ;;  %v4937_v9 = vmul.f32 1.442695, %v8810_v34  ;;  %v8814_v44 = vsub.f32 %v8685_v40, %v4844_v20 }
 0x5d6   : > { %4989 = vadd.xlane.f32.xlu0 %v6641_v27  ;;  %v4838_v62 = vpop.xlane.xlu0 %4837 }
 0x5d7   : > { %v6643_v50 = vpop.eup %6642  ;;  %6644 = vpow2.f32 %v4937_v9  ;;  %v4939_v1 = vmul.f32 1.442695, %v8814_v44  ;;  %v8818_v25 = vsub.f32 %v8689_v47, %v4838_v62 }
 0x5d8   : > { %v4840_v0 = vpop.xlane.xlu1 %4839  ;;  %4991 = vadd.xlane.f32.xlu1 %v6643_v50 }
 0x5d9   : > { %6646 = vpow2.f32 %v4939_v1  ;;  %v4933_v52 = vmul.f32 1.442695, %v8818_v25  ;;  %v8822_v59 = vsub.f32 %v8693_v42, %v4840_v0 }
 0x5db   : > { %6648 = vpow2.f32 %v4933_v52  ;;  %v4935_v40 = vmul.f32 1.442695, %v8822_v59 }
 0x5dd   : > { %6650 = vpow2.f32 %v4935_v40 }
 0x5e1   : > { %v6645_v55 = vpop.eup %6644 }
 0x5e2   : > { %5001 = vadd.xlane.f32.xlu0 %v6645_v55  ;;  %v4850_v61 = vpop.xlane.xlu0 %4849 }
 0x5e3   : > { %v6647_v39 = vpop.eup %6646  ;;  %v8826_v51 = vsub.f32 %v8698_v41, %v4850_v61 }
 0x5e4   : > { %v4852_v47 = vpop.xlane.xlu1 %4851  ;;  %5003 = vadd.xlane.f32.xlu1 %v6647_v39 }
 0x5e5   : > { %v6649_v33 = vpop.eup %6648  ;;  %v4945_v30 = vmul.f32 1.442695, %v8826_v51  ;;  %v8830_v19 = vsub.f32 %v8701_v57, %v4852_v47 }
 0x5e6   : > { %4997 = vadd.xlane.f32.xlu0 %v6649_v33  ;;  %v4846_v42 = vpop.xlane.xlu0 %4845 }
 0x5e7   : > { %v6651_v35 = vpop.eup %6650  ;;  %6652 = vpow2.f32 %v4945_v30  ;;  %v4947_v22 = vmul.f32 1.442695, %v8830_v19  ;;  %v8834_v38 = vsub.f32 %v8705_v6, %v4846_v42 }
 0x5e8   : > { %v4848_v23 = vpop.xlane.xlu1 %4847  ;;  %4999 = vadd.xlane.f32.xlu1 %v6651_v35 }
 0x5e9   : > { %6654 = vpow2.f32 %v4947_v22  ;;  %v4941_v41 = vmul.f32 1.442695, %v8834_v38  ;;  %v8838_v2 = vsub.f32 %v8709_v63, %v4848_v23 }
 0x5eb   : > { %6656 = vpow2.f32 %v4941_v41  ;;  %v4943_v57 = vmul.f32 1.442695, %v8838_v2 }
 0x5ed   : > { %6658 = vpow2.f32 %v4943_v57 }
 0x5f1   : > { %v6653_v11 = vpop.eup %6652 }
 0x5f2   : > { %5009 = vadd.xlane.f32.xlu0 %v6653_v11  ;;  %v4858_v12 = vpop.xlane.xlu0 %4857 }
 0x5f3   : > { %v6655_v14 = vpop.eup %6654  ;;  %v8842_v53 = vsub.f32 %v8714_v46, %v4858_v12 }
 0x5f4   : > { %v4860_v6 = vpop.xlane.xlu1 %4859  ;;  %5011 = vadd.xlane.f32.xlu1 %v6655_v14 }
 0x5f5   : > { %v6657_v4 = vpop.eup %6656  ;;  %v4953_v45 = vmul.f32 1.442695, %v8842_v53  ;;  %v8846_v5 = vsub.f32 %v8717_v21, %v4860_v6 }
 0x5f6   : > { %5005 = vadd.xlane.f32.xlu0 %v6657_v4  ;;  %v4854_v63 = vpop.xlane.xlu0 %4853 }
 0x5f7   : > { %v6659_v29 = vpop.eup %6658  ;;  %6660 = vpow2.f32 %v4953_v45  ;;  %v4955_v31 = vmul.f32 1.442695, %v8846_v5  ;;  %v8850_v20 = vsub.f32 %v8721_v32, %v4854_v63 }
 0x5f8   : > { %v4856_v27 = vpop.xlane.xlu1 %4855  ;;  %5007 = vadd.xlane.f32.xlu1 %v6659_v29 }
 0x5f9   : > { %6662 = vpow2.f32 %v4955_v31  ;;  %v4949_v46 = vmul.f32 1.442695, %v8850_v20  ;;  %v8854_v9 = vsub.f32 %v8725_v54, %v4856_v27 }
 0x5fb   : > { %6664 = vpow2.f32 %v4949_v46  ;;  %v4951_v21 = vmul.f32 1.442695, %v8854_v9 }
 0x5fd   : > { %6666 = vpow2.f32 %v4951_v21 }
 0x601   : > { %v6661_v62 = vpop.eup %6660 }
 0x602   : > { %5017 = vadd.xlane.f32.xlu0 %v6661_v62  ;;  %v4866_v50 = vpop.xlane.xlu0 %4865 }
 0x603   : > { %v6663_v1 = vpop.eup %6662  ;;  %v8858_v0 = vsub.f32 %v8730_v48, %v4866_v50 }
 0x604   : > { %v4868_v32 = vpop.xlane.xlu1 %4867  ;;  %5019 = vadd.xlane.f32.xlu1 %v6663_v1 }
 0x605   : > { %v6665_v52 = vpop.eup %6664  ;;  %v4961_v40 = vmul.f32 1.442695, %v8858_v0  ;;  %v8862_v55 = vsub.f32 %v8733_v26, %v4868_v32 }
 0x606   : > { %5013 = vadd.xlane.f32.xlu0 %v6665_v52  ;;  %v4862_v54 = vpop.xlane.xlu0 %4861 }
 0x607   : > { %v6667_v61 = vpop.eup %6666  ;;  %6668 = vpow2.f32 %v4961_v40  ;;  %v4963_v39 = vmul.f32 1.442695, %v8862_v55  ;;  %v8866_v47 = vsub.f32 %v8737_v7, %v4862_v54 }
 0x608   : > { %v4864_v33 = vpop.xlane.xlu1 %4863  ;;  %5015 = vadd.xlane.f32.xlu1 %v6667_v61 }
 0x609   : > { %6670 = vpow2.f32 %v4963_v39  ;;  %v4957_v48 = vmul.f32 1.442695, %v8866_v47  ;;  %v8870_v30 = vsub.f32 %v8741_v8, %v4864_v33 }
 0x60b   : > { %6672 = vpow2.f32 %v4957_v48  ;;  %v4959_v26 = vmul.f32 1.442695, %v8870_v30 }
 0x60d   : > { %6674 = vpow2.f32 %v4959_v26 }
 0x611   : > { %v6669_v42 = vpop.eup %6668 }
 0x612   : > { %5025 = vadd.xlane.f32.xlu0 %v6669_v42 }
 0x613   : > { %v6671_v35 = vpop.eup %6670  ;;  %v4870_v22 = vpop.xlane.xlu0 %4869 }
 0x614   : > { %v8874_v23 = vsub.f32 %v8746_v13, %v4870_v22  ;;  %5027 = vadd.xlane.f32.xlu1 %v6671_v35 }
 0x615   : > { %v6673_v7 = vpop.eup %6672  ;;  %v4872_v41 = vpop.xlane.xlu1 %4871 }
 0x616   : > { %v4965_v57 = vmul.f32 1.442695, %v8874_v23  ;;  %v8878_v11 = vsub.f32 %v8749_v10, %v4872_v41  ;;  %5021 = vadd.xlane.f32.xlu0 %v6673_v7 }
 0x617   : > { %v6675_v8 = vpop.eup %6674  ;;  %v4874_v12 = vpop.xlane.xlu0 %4873 }
 0x618   : > { %6676 = vpow2.f32 %v4965_v57  ;;  %v4967_v14 = vmul.f32 1.442695, %v8878_v11  ;;  %v8882_v6 = vsub.f32 %v8753_v16, %v4874_v12  ;;  %5023 = vadd.xlane.f32.xlu1 %v6675_v8 }
 0x619   : > { %v4876_v13 = vpop.xlane.xlu1 %4875 }
 0x61a   : > { %6678 = vpow2.f32 %v4967_v14  ;;  %v4969_v4 = vmul.f32 1.442695, %v8882_v6  ;;  %v8886_v45 = vsub.f32 %v8757_v18, %v4876_v13 }
 0x61c   : > { %6680 = vpow2.f32 %v4969_v4  ;;  %v4971_v10 = vmul.f32 1.442695, %v8886_v45 }
 0x61e   : > { %6682 = vpow2.f32 %v4971_v10 }
 0x622   : > { %v6677_v63 = vpop.eup %6676 }
 0x623   : > { %5029 = vadd.xlane.f32.xlu0 %v6677_v63 }
 0x624   : > { %v6679_v29 = vpop.eup %6678 }
 0x625   : > { %5031 = vadd.xlane.f32.xlu1 %v6679_v29 }
 0x626   : > { %v6681_v31 = vpop.eup %6680 }
 0x627   : > { %5033 = vadd.xlane.f32.xlu0 %v6681_v31 }
 0x628   : > { %v6683_v16 = vpop.eup %6682 }
 0x629   : > { %5035 = vadd.xlane.f32.xlu1 %v6683_v16 }
 0x63f   : > { %v4978_v27 = vpop.xlane.xlu0 %4977 }
 0x640   : > { %6684 = vlog2.f32 %v4978_v27 }
 0x643   : > { %v4980_v46 = vpop.xlane.xlu1 %4979  ;;  %v4974_v21 = vpop.xlane.xlu0 %4973 }
 0x644   : > { %6686 = vlog2.f32 %v4980_v46 }
 0x645   : > { %6688 = vlog2.f32 %v4974_v21 }
 0x647   : > { %v4976_v18 = vpop.xlane.xlu1 %4975 }
 0x648   : > { %6690 = vlog2.f32 %v4976_v18 }
 0x64a   : > { %v6685_v62 = vpop.eup %6684 }
 0x64b   : > { %v5042_v50 = vmul.f32 0.6931472, %v6685_v62 }
 0x64d   : > { %v5103_v1 = vsub.f32 %v8762_v24, %v5042_v50 }
 0x64e   : > { %v6687_v32 = vpop.eup %6686 }
 0x64f   : > { %v6689_v52 = vpop.eup %6688  ;;  %5135 = vst [vmem:[%s8893_s16 + $0x10] sm:$0xff] %v5103_v1  ;;  %v5044_v40 = vmul.f32 0.6931472, %v6687_v32  ;;  %v4986_v54 = vpop.xlane.xlu0 %4985 }
 0x650   : > { %v5038_v61 = vmul.f32 0.6931472, %v6689_v52  ;;  %6692 = vlog2.f32 %v4986_v54 }
 0x651   : > { %v5104_v39 = vsub.f32 %v8770_v49, %v5044_v40  ;;  %v4988_v33 = vpop.xlane.xlu1 %4987 }
 0x652   : > { %v6691_v48 = vpop.eup %6690  ;;  %v5101_v26 = vsub.f32 %v8765_v28, %v5038_v61  ;;  %6694 = vlog2.f32 %v4988_v33 }
 0x653   : > { %5136 = vst [vmem:[%s8893_s16 + $0x18] sm:$0xff] %v5104_v39  ;;  %v5040_v42 = vmul.f32 0.6931472, %v6691_v48  ;;  %v4982_v24 = vpop.xlane.xlu0 %4981 }
 0x654   : > { %5133 = vst [vmem:[%s8893_s16] sm:$0xff] %v5101_v26  ;;  %6696 = vlog2.f32 %v4982_v24 }
 0x655   : > { %v5102_v35 = vsub.f32 %v8773_v43, %v5040_v42  ;;  %v4984_v22 = vpop.xlane.xlu1 %4983 }
 0x656   : > { %6698 = vlog2.f32 %v4984_v22 }
 0x657   : > { %5134 = vst [vmem:[%s8893_s16 + $0x8] sm:$0xff] %v5102_v35 }
 0x65a   : > { %v6693_v7 = vpop.eup %6692 }
 0x65b   : > { %v5050_v41 = vmul.f32 0.6931472, %v6693_v7 }
 0x65c   : > { %v6695_v49 = vpop.eup %6694 }
 0x65d   : > { %v5107_v57 = vsub.f32 %v8778_v17, %v5050_v41  ;;  %v5052_v28 = vmul.f32 0.6931472, %v6695_v49 }
 0x65e   : > { %v6697_v8 = vpop.eup %6696 }
 0x65f   : > { %5139 = vst [vmem:[%s8893_s16 + $0x30] sm:$0xff] %v5107_v57  ;;  %v5108_v12 = vsub.f32 %v8782_v56, %v5052_v28  ;;  %v5046_v14 = vmul.f32 0.6931472, %v6697_v8  ;;  %v4994_v13 = vpop.xlane.xlu0 %4993 }
 0x660   : > { %v6699_v4 = vpop.eup %6698  ;;  %6700 = vlog2.f32 %v4994_v13 }
 0x661   : > { %5140 = vst [vmem:[%s8893_s16 + $0x38] sm:$0xff] %v5108_v12  ;;  %v5105_v43 = vsub.f32 %v8786_v37, %v5046_v14  ;;  %v5048_v10 = vmul.f32 0.6931472, %v6699_v4  ;;  %v4996_v63 = vpop.xlane.xlu1 %4995 }
 0x662   : > { %6702 = vlog2.f32 %v4996_v63 }
 0x663   : > { %5137 = vst [vmem:[%s8893_s16 + $0x20] sm:$0xff] %v5105_v43  ;;  %v5106_v17 = vsub.f32 %v8790_v36, %v5048_v10  ;;  %v4990_v29 = vpop.xlane.xlu0 %4989 }
 0x664   : > { %6704 = vlog2.f32 %v4990_v29 }
 0x665   : > { %5138 = vst [vmem:[%s8893_s16 + $0x28] sm:$0xff] %v5106_v17  ;;  %v4992_v31 = vpop.xlane.xlu1 %4991 }
 0x666   : > { %6706 = vlog2.f32 %v4992_v31 }
 0x66a   : > { %v6701_v56 = vpop.eup %6700 }
 0x66b   : > { %v5058_v16 = vmul.f32 0.6931472, %v6701_v56 }
 0x66c   : > { %v6703_v27 = vpop.eup %6702 }
 0x66d   : > { %v5111_v46 = vsub.f32 %v8794_v58, %v5058_v16  ;;  %v5060_v37 = vmul.f32 0.6931472, %v6703_v27 }
 0x66e   : > { %v6705_v21 = vpop.eup %6704 }
 0x66f   : > { %5143 = vst [vmem:[%s8893_s16 + $0x50] sm:$0xff] %v5111_v46  ;;  %v5112_v18 = vsub.f32 %v8798_v60, %v5060_v37  ;;  %v5054_v62 = vmul.f32 0.6931472, %v6705_v21  ;;  %v5002_v36 = vpop.xlane.xlu0 %5001 }
 0x670   : > { %v6707_v50 = vpop.eup %6706  ;;  %6708 = vlog2.f32 %v5002_v36 }
 0x671   : > { %5144 = vst [vmem:[%s8893_s16 + $0x58] sm:$0xff] %v5112_v18  ;;  %v5109_v1 = vsub.f32 %v8802_v15, %v5054_v62  ;;  %v5056_v32 = vmul.f32 0.6931472, %v6707_v50  ;;  %v5004_v52 = vpop.xlane.xlu1 %5003 }
 0x672   : > { %6710 = vlog2.f32 %v5004_v52 }
 0x673   : > { %5141 = vst [vmem:[%s8893_s16 + $0x40] sm:$0xff] %v5109_v1  ;;  %v5110_v58 = vsub.f32 %v8806_v3, %v5056_v32  ;;  %v4998_v40 = vpop.xlane.xlu0 %4997 }
 0x674   : > { %6712 = vlog2.f32 %v4998_v40 }
 0x675   : > { %5142 = vst [vmem:[%s8893_s16 + $0x48] sm:$0xff] %v5110_v58  ;;  %v5000_v54 = vpop.xlane.xlu1 %4999 }
 0x676   : > { %6714 = vlog2.f32 %v5000_v54 }
 0x67a   : > { %v6709_v60 = vpop.eup %6708 }
 0x67b   : > { %v5066_v61 = vmul.f32 0.6931472, %v6709_v60 }
 0x67c   : > { %v6711_v39 = vpop.eup %6710 }
 0x67d   : > { %v5115_v33 = vsub.f32 %v8810_v34, %v5066_v61  ;;  %v5068_v15 = vmul.f32 0.6931472, %v6711_v39 }
 0x67e   : > { %v6713_v48 = vpop.eup %6712 }
 0x67f   : > { %5147 = vst [vmem:[%s8893_s16 + $0x70] sm:$0xff] %v5115_v33  ;;  %v5116_v26 = vsub.f32 %v8814_v44, %v5068_v15  ;;  %v5062_v42 = vmul.f32 0.6931472, %v6713_v48  ;;  %v5010_v3 = vpop.xlane.xlu0 %5009 }
 0x680   : > { %v6715_v24 = vpop.eup %6714  ;;  %6716 = vlog2.f32 %v5010_v3 }
 0x681   : > { %5148 = vst [vmem:[%s8893_s16 + $0x78] sm:$0xff] %v5116_v26  ;;  %v5113_v35 = vsub.f32 %v8818_v25, %v5062_v42  ;;  %v5064_v22 = vmul.f32 0.6931472, %v6715_v24  ;;  %v5012_v7 = vpop.xlane.xlu1 %5011 }
 0x682   : > { %6718 = vlog2.f32 %v5012_v7 }
 0x683   : > { %5145 = vst [vmem:[%s8893_s16 + $0x60] sm:$0xff] %v5113_v35  ;;  %v5114_v34 = vsub.f32 %v8822_v59, %v5064_v22  ;;  %v5006_v41 = vpop.xlane.xlu0 %5005 }
 0x684   : > { %6720 = vlog2.f32 %v5006_v41 }
 0x685   : > { %5146 = vst [vmem:[%s8893_s16 + $0x68] sm:$0xff] %v5114_v34  ;;  %v5008_v49 = vpop.xlane.xlu1 %5007 }
 0x686   : > { %6722 = vlog2.f32 %v5008_v49 }
 0x68a   : > { %v6717_v44 = vpop.eup %6716 }
 0x68b   : > { %v5074_v57 = vmul.f32 0.6931472, %v6717_v44 }
 0x68c   : > { %v6719_v28 = vpop.eup %6718 }
 0x68d   : > { %v5119_v8 = vsub.f32 %v8826_v51, %v5074_v57  ;;  %v5076_v25 = vmul.f32 0.6931472, %v6719_v28 }
 0x68e   : > { %v6721_v12 = vpop.eup %6720 }
 0x68f   : > { %5151 = vst [vmem:[%s8893_s16 + $0x90] sm:$0xff] %v5119_v8  ;;  %v5120_v14 = vsub.f32 %v8830_v19, %v5076_v25  ;;  %v5070_v13 = vmul.f32 0.6931472, %v6721_v12  ;;  %v5018_v59 = vpop.xlane.xlu0 %5017 }
 0x690   : > { %v6723_v4 = vpop.eup %6722  ;;  %6724 = vlog2.f32 %v5018_v59 }
 0x691   : > { %5152 = vst [vmem:[%s8893_s16 + $0x98] sm:$0xff] %v5120_v14  ;;  %v5117_v43 = vsub.f32 %v8834_v38, %v5070_v13  ;;  %v5072_v10 = vmul.f32 0.6931472, %v6723_v4  ;;  %v5020_v63 = vpop.xlane.xlu1 %5019 }
 0x692   : > { %6726 = vlog2.f32 %v5020_v63 }
 0x693   : > { %5149 = vst [vmem:[%s8893_s16 + $0x80] sm:$0xff] %v5117_v43  ;;  %v5118_v51 = vsub.f32 %v8838_v2, %v5072_v10  ;;  %v5014_v17 = vpop.xlane.xlu0 %5013 }
 0x694   : > { %6728 = vlog2.f32 %v5014_v17 }
 0x695   : > { %5150 = vst [vmem:[%s8893_s16 + $0x88] sm:$0xff] %v5118_v51  ;;  %v5016_v29 = vpop.xlane.xlu1 %5015 }
 0x696   : > { %6730 = vlog2.f32 %v5016_v29 }
 0x69a   : > { %v6725_v19 = vpop.eup %6724 }
 0x69b   : > { %v5082_v31 = vmul.f32 0.6931472, %v6725_v19 }
 0x69c   : > { %v6727_v56 = vpop.eup %6726 }
 0x69d   : > { %v5123_v16 = vsub.f32 %v8842_v53, %v5082_v31  ;;  %v5084_v38 = vmul.f32 0.6931472, %v6727_v56 }
 0x69e   : > { %v6729_v27 = vpop.eup %6728 }
 0x69f   : > { %5155 = vst [vmem:[%s8893_s16 + $0xb0] sm:$0xff] %v5123_v16  ;;  %v5124_v46 = vsub.f32 %v8846_v5, %v5084_v38  ;;  %v5078_v37 = vmul.f32 0.6931472, %v6729_v27  ;;  %v5026_v2 = vpop.xlane.xlu0 %5025 }
 0x6a0   : > { %v6731_v21 = vpop.eup %6730  ;;  %6732 = vlog2.f32 %v5026_v2 }
 0x6a1   : > { %5156 = vst [vmem:[%s8893_s16 + $0xb8] sm:$0xff] %v5124_v46  ;;  %v5121_v18 = vsub.f32 %v8850_v20, %v5078_v37  ;;  %v5080_v62 = vmul.f32 0.6931472, %v6731_v21  ;;  %v5028_v36 = vpop.xlane.xlu1 %5027 }
 0x6a2   : > { %6734 = vlog2.f32 %v5028_v36 }
 0x6a3   : > { %5153 = vst [vmem:[%s8893_s16 + $0xa0] sm:$0xff] %v5121_v18  ;;  %v5122_v53 = vsub.f32 %v8854_v9, %v5080_v62  ;;  %v5022_v50 = vpop.xlane.xlu0 %5021 }
 0x6a4   : > { %6736 = vlog2.f32 %v5022_v50 }
 0x6a5   : > { %5154 = vst [vmem:[%s8893_s16 + $0xa8] sm:$0xff] %v5122_v53  ;;  %v5024_v1 = vpop.xlane.xlu1 %5023 }
 0x6a6   : > { %6738 = vlog2.f32 %v5024_v1 }
 0x6aa   : > { %v6733_v5 = vpop.eup %6732 }
 0x6ab   : > { %v5090_v32 = vmul.f32 0.6931472, %v6733_v5 }
 0x6ac   : > { %v6735_v52 = vpop.eup %6734 }
 0x6ad   : > { %v5127_v58 = vsub.f32 %v8858_v0, %v5090_v32  ;;  %v5092_v20 = vmul.f32 0.6931472, %v6735_v52 }
 0x6ae   : > { %v6737_v40 = vpop.eup %6736 }
 0x6af   : > { %5159 = vst [vmem:[%s8893_s16 + $0xd0] sm:$0xff] %v5127_v58  ;;  %v5128_v54 = vsub.f32 %v8862_v55, %v5092_v20  ;;  %v5086_v60 = vmul.f32 0.6931472, %v6737_v40 }
 0x6b0   : > { %v6739_v9 = vpop.eup %6738  ;;  %v5030_v61 = vpop.xlane.xlu0 %5029 }
 0x6b1   : > { %5160 = vst [vmem:[%s8893_s16 + $0xd8] sm:$0xff] %v5128_v54  ;;  %v5125_v39 = vsub.f32 %v8866_v47, %v5086_v60  ;;  %v5088_v33 = vmul.f32 0.6931472, %v6739_v9  ;;  %6740 = vlog2.f32 %v5030_v61 }
 0x6b2   : > { %v5032_v15 = vpop.xlane.xlu1 %5031 }
 0x6b3   : > { %5157 = vst [vmem:[%s8893_s16 + $0xc0] sm:$0xff] %v5125_v39  ;;  %v5126_v48 = vsub.f32 %v8870_v30, %v5088_v33  ;;  %6742 = vlog2.f32 %v5032_v15 }
 0x6b4   : > { %v5034_v0 = vpop.xlane.xlu0 %5033 }
 0x6b5   : > { %5158 = vst [vmem:[%s8893_s16 + $0xc8] sm:$0xff] %v5126_v48  ;;  %6744 = vlog2.f32 %v5034_v0 }
 0x6b6   : > { %v5036_v55 = vpop.xlane.xlu1 %5035 }
 0x6b7   : > { %6746 = vlog2.f32 %v5036_v55 }
 0x6bb   : > { %v6741_v26 = vpop.eup %6740 }
 0x6bc   : > { %v5094_v42 = vmul.f32 0.6931472, %v6741_v26 }
 0x6bd   : > { %v6743_v3 = vpop.eup %6742 }
 0x6be   : > { %v5129_v47 = vsub.f32 %v8874_v23, %v5094_v42  ;;  %v5096_v24 = vmul.f32 0.6931472, %v6743_v3 }
 0x6bf   : > { %v6745_v35 = vpop.eup %6744 }
 0x6c0   : > { %5161 = vst [vmem:[%s8893_s16 + $0xe0] sm:$0xff] %v5129_v47  ;;  %v5130_v22 = vsub.f32 %v8878_v11, %v5096_v24  ;;  %v5098_v30 = vmul.f32 0.6931472, %v6745_v35 }
 0x6c1   : > { %v6747_v7 = vpop.eup %6746 }
 0x6c2   : > { %5162 = vst [vmem:[%s8893_s16 + $0xe8] sm:$0xff] %v5130_v22  ;;  %v5131_v34 = vsub.f32 %v8882_v6, %v5098_v30  ;;  %v5100_v41 = vmul.f32 0.6931472, %v6747_v7 }
 0x6c4   : > { %5163 = vst [vmem:[%s8893_s16 + $0xf0] sm:$0xff] %v5131_v34  ;;  %v5132_v49 = vsub.f32 %v8886_v45, %v5100_v41 }
 0x6c6   : > { %5164 = vst [vmem:[%s8893_s16 + $0xf8] sm:$0xff] %v5132_v49 }
 0x6c7 PF: > { %s21_s21 = sadd.s32 1, %s6788_s21   ;;  %s8986_s17 = smov %s6780_s19 }
 0x6c8   : > { %p18_p7 = scmp.ge.s32.totalorder %s21_s21, 6   ;;  %s8987_s18 = smov %s6784_s20 }
 0x6c9   : > { %s8988_s19 = smov %s8991_s22  ;;  %s8989_s20 = smov %s8995_s23 }
 0x6ca   :  { %20 = sbr.rel (!%p18_p7) target bundleno = 3 (0x3), region = 97 }

</bundles_post_ra>
